<compile_context>
chip_gen: v6e
topology: v6e:2x2x1
jax: 0.10.0
libtpu: 0.0.40
codegen_flags: <defaults>
</compile_context>

<pallas_src>
import jax
import jax.numpy as jnp
from jax.experimental import pallas as pl
from jax.experimental.pallas import tpu as pltpu


# ----------------------------- model constants ------------------------------

INPUT_CHANNELS = 4
IMG_SIZE       = 16
TIME_INPUT_DIM = 8
SEQ_LEN        = 8
CNN_OUT_DIM    = 32
LSTM_HIDDEN    = 32
LSTM_LAYERS    = 2
OUTPUT_DIM     = 16
LSTM_OUT_DIM   = OUTPUT_DIM * 2          # lstm_output_dim = output_dim * 2
CONV1_CH       = 16
CONV2_CH       = 32

PAD_ROWS       = 24                       # >= IMG_SIZE + 1 and a multiple of 8

assert IMG_SIZE & (IMG_SIZE - 1) == 0, "conv mask trick assumes power-of-two W/H"
assert PAD_ROWS % 8 == 0 and PAD_ROWS >= IMG_SIZE + 1

_VMEM_SPEC = pl.BlockSpec(memory_space=pltpu.MemorySpace.VMEM)


# ----------------------------- LSTM recurrence (in-kernel helper) -----------

def _bilstm_scan(gates_pre, whh_comb, t_len, batch, h_dim, need_seq):
    """Bidirectional LSTM layer with hoisted input gates.

    gates_pre : (T*B, 8H) time-major; columns [0:4H] forward (x@wih_f + b_f),
                columns [4H:8H] backward.  T-step unrolled loop; ONE recurrent
                MXU issue per step: [h_f; h_b](2B,H) @ [whh_f|whh_b](H,8H).
    Returns (per-time forward outs, per-time backward outs, final combined h).
    """
    h4 = 4 * h_dim
    outs_f = [None] * t_len
    outs_b = [None] * t_len
    h_comb = None
    c_comb = None
    for s in range(t_len):                       # T is small & static -> unroll
        tf, tb = s, t_len - 1 - s                # in-kernel time reversal
        g_f = gates_pre[tf * batch:(tf + 1) * batch, 0:h4]
        g_b = gates_pre[tb * batch:(tb + 1) * batch, h4:2 * h4]
        if h_comb is not None:                   # h == 0 at s == 0 -> skip matmul
            rec = jnp.dot(h_comb, whh_comb, preferred_element_type=jnp.float32)
            g_f = g_f + rec[0:batch, 0:h4]
            g_b = g_b + rec[batch:2 * batch, h4:2 * h4]
        g = jnp.concatenate([g_f, g_b], axis=0)  # (2B, 4H), rows = [fwd; bwd]
        # PyTorch gate order [i, f, g, o]; slice BEFORE the transcendentals.
        i_g = jax.nn.sigmoid(g[:, 0:h_dim])
        f_g = jax.nn.sigmoid(g[:, h_dim:2 * h_dim])
        g_g = jnp.tanh(g[:, 2 * h_dim:3 * h_dim])
        o_g = jax.nn.sigmoid(g[:, 3 * h_dim:4 * h_dim])
        c_comb = i_g * g_g if c_comb is None else f_g * c_comb + i_g * g_g
        h_comb = o_g * jnp.tanh(c_comb)
        if need_seq:
            outs_f[tf] = h_comb[0:batch, :]
            outs_b[tb] = h_comb[batch:2 * batch, :]
    return outs_f, outs_b, h_comb


# ----------------------------- the fused kernel -----------------------------

def _cnn_lstm_kernel(patches1_ref, pool_ref, ts_ref,
                     conv1_w_ref, conv1_b_ref, conv2_w_ref, conv2_b_ref,
                     cnn_fc_w_ref, cnn_fc_b_ref,
                     lstm0_wih_ref, lstm0_whh_ref, lstm0_b_ref,
                     lstm1_wih_ref, lstm1_whh_ref, lstm1_b_ref,
                     lstm_fc_w_ref, lstm_fc_b_ref,
                     fuse_w_ref, fuse_b_ref, head_w_ref, head_b_ref,
                     out_ref, y1pad_ref):
    batch = pool_ref.shape[0]
    n_pix = patches1_ref.shape[0]              # B * H * W
    c1 = conv1_w_ref.shape[1]
    h_dim = lstm0_whh_ref.shape[0]
    t_len = ts_ref.shape[0] // batch
    img_w = IMG_SIZE
    hw = IMG_SIZE * IMG_SIZE

    # ---------------- conv1: one flat matmul + ReLU --------------------------
    y1 = jnp.maximum(
        jnp.dot(patches1_ref[...], conv1_w_ref[...],
                preferred_element_type=jnp.float32) + conv1_b_ref[...], 0.0)

    # Stage y1 into a zero-padded VMEM scratch so every conv2 tap is a plain
    # statically-offset row-shifted read (keeps everything in VMEM).
    y1pad_ref[0:PAD_ROWS, :] = jnp.zeros((PAD_ROWS, c1), jnp.float32)
    y1pad_ref[PAD_ROWS + n_pix:PAD_ROWS + n_pix + PAD_ROWS, :] = (
        jnp.zeros((PAD_ROWS, c1), jnp.float32))
    y1pad_ref[PAD_ROWS:PAD_ROWS + n_pix, :] = y1

    # ---------------- conv2: 9 shifted, masked, accumulating matmuls ---------
    # Edge masks (same-padding + no cross-image leakage).  Power-of-two W/H ->
    # bitwise ops only (no vector integer division on the VPU).
    row_id = jax.lax.broadcasted_iota(jnp.int32, (n_pix, c1), 0)
    pix_in_img = jnp.bitwise_and(row_id, hw - 1)        # h*W + w within image
    w_in_img = jnp.bitwise_and(row_id, img_w - 1)       # w within row
    h_ok_m1 = pix_in_img >= img_w                       # h - 1 >= 0
    h_ok_p1 = pix_in_img < hw - img_w                   # h + 1 <  H
    w_ok_m1 = w_in_img >= 1                             # w - 1 >= 0
    w_ok_p1 = w_in_img < img_w - 1                      # w + 1 <  W

    acc = None
    tap = 0
    for di in (-1, 0, 1):                 # tap order matches im2col / conv2_w
        for dj in (-1, 0, 1):
            start = PAD_ROWS + di * img_w + dj
            shifted = y1pad_ref[start:start + n_pix, :]          # (n_pix, C1)
            conds = []
            if di == -1:
                conds.append(h_ok_m1)
            if di == 1:
                conds.append(h_ok_p1)
            if dj == -1:
                conds.append(w_ok_m1)
            if dj == 1:
                conds.append(w_ok_p1)
            if conds:
                valid = conds[0]
                for extra in conds[1:]:
                    valid = jnp.logical_and(valid, extra)
                shifted = jnp.where(valid, shifted, 0.0)
            contrib = jnp.dot(shifted, conv2_w_ref[tap],
                              preferred_element_type=jnp.float32)
            acc = contrib if acc is None else acc + contrib
            tap += 1
    y2 = jnp.maximum(acc + conv2_b_ref[...], 0.0)                # (n_pix, C2)

    # ---------------- GAP (precomputed pooling matmul) + cnn_fc --------------
    gap = jnp.dot(pool_ref[...], y2, preferred_element_type=jnp.float32)  # (B, C2)
    cnn_feat = jnp.maximum(
        jnp.dot(gap, cnn_fc_w_ref[...], preferred_element_type=jnp.float32)
        + cnn_fc_b_ref[...], 0.0)                                # (B, 32)

    # ---------------- 2-layer bidirectional LSTM -----------------------------
    # Layer 0: input gates for BOTH directions in one hoisted matmul.
    gates0 = (jnp.dot(ts_ref[...], lstm0_wih_ref[...],
                      preferred_element_type=jnp.float32)
              + lstm0_b_ref[...])                                # (T*B, 8H)
    f_seq, b_seq, _ = _bilstm_scan(gates0, lstm0_whh_ref[...],
                                   t_len, batch, h_dim, need_seq=True)

    # Layer 1: input gates from the stacked fwd / bwd sequences (no per-step
    # lane concats of [h_f | h_b]).
    hf_stack = jnp.concatenate(f_seq, axis=0)                    # (T*B, H)
    hb_stack = jnp.concatenate(b_seq, axis=0)                    # (T*B, H)
    wih1 = lstm1_wih_ref[...]                                    # (2H, 8H)
    gates1 = (jnp.dot(hf_stack, wih1[0:h_dim, :],
                      preferred_element_type=jnp.float32)
              + jnp.dot(hb_stack, wih1[h_dim:2 * h_dim, :],
                        preferred_element_type=jnp.float32)
              + lstm1_b_ref[...])                                # (T*B, 8H)
    _, _, h_fin = _bilstm_scan(gates1, lstm1_whh_ref[...],
                               t_len, batch, h_dim, need_seq=False)

    lstm_fc_w = lstm_fc_w_ref[...]                               # (2H, OUT)
    lstm_feat = jnp.maximum(
        jnp.dot(h_fin[0:batch, :], lstm_fc_w[0:h_dim, :],
                preferred_element_type=jnp.float32)
        + jnp.dot(h_fin[batch:2 * batch, :], lstm_fc_w[h_dim:2 * h_dim, :],
                  preferred_element_type=jnp.float32)
        + lstm_fc_b_ref[...], 0.0)                               # (B, 32)

    # ---------------- fusion head (dropout = identity in eval) ---------------
    fuse_w = fuse_w_ref[...]                                     # (64, 16)
    hid = jnp.maximum(
        jnp.dot(cnn_feat, fuse_w[0:CNN_OUT_DIM, :],
                preferred_element_type=jnp.float32)
        + jnp.dot(lstm_feat, fuse_w[CNN_OUT_DIM:CNN_OUT_DIM + LSTM_OUT_DIM, :],
                  preferred_element_type=jnp.float32)
        + fuse_b_ref[...], 0.0)
    out_ref[...] = (jnp.dot(hid, head_w_ref[...],
                            preferred_element_type=jnp.float32)
                    + head_b_ref[...])


# ----------------------------- Pallas wrapper -------------------------------

def _pallas_cnn_lstm(patches1, pool, ts_flat, params):
    batch = pool.shape[0]
    n_pix = patches1.shape[0]
    args = (patches1, pool, ts_flat,
            params["conv1_w"], params["conv1_b"],
            params["conv2_w"], params["conv2_b"],
            params["cnn_fc_w"], params["cnn_fc_b"],
            params["lstm0_wih"], params["lstm0_whh"], params["lstm0_b"],
            params["lstm1_wih"], params["lstm1_whh"], params["lstm1_b"],
            params["lstm_fc_w"], params["lstm_fc_b"],
            params["fuse_w"], params["fuse_b"],
            params["head_w"], params["head_b"])
    return pl.pallas_call(
        _cnn_lstm_kernel,
        out_shape=jax.ShapeDtypeStruct((batch, OUTPUT_DIM), jnp.float32),
        in_specs=[_VMEM_SPEC] * len(args),
        out_specs=_VMEM_SPEC,
        scratch_shapes=[pltpu.VMEM((2 * PAD_ROWS + n_pix, CONV1_CH), jnp.float32)],
    )(*args)


# ----------------------------- JAX glue (wrapper-side, tiny) ----------------

def im2col_nhwc(x, k=3, pad=1):
    """(B, H, W, C) -> (B*H*W, k*k*C) patches, stride 1, zero 'same' padding.

    Patch layout is tap-major / channel-minor; to import PyTorch conv weights
    (Cout, Cin, kh, kw), permute to (kh, kw, Cin, Cout) and reshape to
    (k*k*Cin, Cout).
    """
    b, h, w, c = x.shape
    xp = jnp.pad(x, ((0, 0), (pad, pad), (pad, pad), (0, 0)))
    cols = [xp[:, di:di + h, dj:dj + w, :] for di in range(k) for dj in range(k)]
    patches = jnp.concatenate(cols, axis=-1)          # (B, H, W, k*k*C)
    return patches.reshape(b * h * w, k * k * c)


def _pool_matrix(batch, hw):
    """(B, B*H*W) global-average-pool matrix (constant-folded under jit)."""
    n = batch * hw
    bi = jnp.arange(batch, dtype=jnp.int32)[:, None]
    pi = jnp.arange(n, dtype=jnp.int32)[None, :]
    inside = (pi >= bi * hw) & (pi < (bi + 1) * hw)
    return jnp.where(inside, jnp.float32(1.0 / hw), jnp.float32(0.0))


# ----------------------------- parameters -----------------------------------

def init_params(key):
    def nrm(k, shape, scale=0.05):
        return scale * jax.random.normal(k, shape, dtype=jnp.float32)

    keys = iter(jax.random.split(key, 32))
    p = {}
    # CNN branch.  conv2_w is stored tap-major (9, C1, C2) so the kernel can
    # index one tap at a time; reshape(9*C1, C2) gives the im2col layout.
    p["conv1_w"] = nrm(next(keys), (9 * INPUT_CHANNELS, CONV1_CH))
    p["conv1_b"] = nrm(next(keys), (1, CONV1_CH))
    p["conv2_w"] = nrm(next(keys), (9, CONV1_CH, CONV2_CH))
    p["conv2_b"] = nrm(next(keys), (1, CONV2_CH))
    p["cnn_fc_w"] = nrm(next(keys), (CONV2_CH, CNN_OUT_DIM))
    p["cnn_fc_b"] = nrm(next(keys), (1, CNN_OUT_DIM))
    # LSTM branch: PyTorch gate order [i, f, g, o].  Per layer, weights for the
    # two directions are stacked along the LAST axis: columns [0:4H] = forward,
    # [4H:8H] = backward (matmul-ready, (Din, 8H)).  Single merged bias per
    # direction (= b_ih + b_hh when converting PyTorch weights).
    for layer in range(LSTM_LAYERS):
        d_in = TIME_INPUT_DIM if layer == 0 else 2 * LSTM_HIDDEN
        p[f"lstm{layer}_wih"] = nrm(next(keys), (d_in, 8 * LSTM_HIDDEN))
        p[f"lstm{layer}_whh"] = nrm(next(keys), (LSTM_HIDDEN, 8 * LSTM_HIDDEN))
        p[f"lstm{layer}_b"]   = nrm(next(keys), (1, 8 * LSTM_HIDDEN))
    p["lstm_fc_w"] = nrm(next(keys), (2 * LSTM_HIDDEN, LSTM_OUT_DIM))
    p["lstm_fc_b"] = nrm(next(keys), (1, LSTM_OUT_DIM))
    # Fusion head
    p["fuse_w"] = nrm(next(keys), (CNN_OUT_DIM + LSTM_OUT_DIM, OUTPUT_DIM))
    p["fuse_b"] = nrm(next(keys), (1, OUTPUT_DIM))
    p["head_w"] = nrm(next(keys), (OUTPUT_DIM, OUTPUT_DIM))
    p["head_b"] = nrm(next(keys), (1, OUTPUT_DIM))
    return p


# ----------------------------- forward ---------------------------------------

@jax.jit
def cnn_lstm_forward(params, images, time_series):
    """images: (B, C, H, W) NCHW; time_series: (B, T, D).  Returns (B, OUTPUT_DIM)."""
    b, _, h, w = images.shape
    x_nhwc = jnp.transpose(images, (0, 2, 3, 1))                  # (B, H, W, C)
    patches1 = im2col_nhwc(x_nhwc)                                # (B*H*W, 9C)
    ts_flat = jnp.transpose(time_series, (1, 0, 2)).reshape(
        time_series.shape[1] * b, time_series.shape[2])           # (T*B, D) time-major
    pool = _pool_matrix(b, h * w)                                 # (B, B*H*W)
    return _pallas_cnn_lstm(patches1, pool, ts_flat, params)


# ----------------------------- pure-JAX reference ----------------------------

@jax.jit
def reference_forward(params, images, time_series):
    b, _, h, w = images.shape
    x_nhwc = jnp.transpose(images, (0, 2, 3, 1))
    p1 = im2col_nhwc(x_nhwc)
    y1 = jax.nn.relu(p1 @ params["conv1_w"] + params["conv1_b"])
    p2 = im2col_nhwc(y1.reshape(b, h, w, CONV1_CH))
    conv2_w_flat = params["conv2_w"].reshape(9 * CONV1_CH, CONV2_CH)
    y2 = jax.nn.relu(p2 @ conv2_w_flat + params["conv2_b"])
    gap = jnp.mean(y2.reshape(b, h * w, CONV2_CH), axis=1)
    cnn_feat = jax.nn.relu(gap @ params["cnn_fc_w"] + params["cnn_fc_b"])

    xs = jnp.transpose(time_series, (1, 0, 2))                    # (T, B, D)
    t_len = xs.shape[0]
    h4 = 4 * LSTM_HIDDEN
    layer_in = xs
    finals = []
    for layer in range(LSTM_LAYERS):
        wih = params[f"lstm{layer}_wih"]
        whh = params[f"lstm{layer}_whh"]
        bb = params[f"lstm{layer}_b"]
        outs = []
        finals = []
        for d, order in enumerate((range(t_len), range(t_len - 1, -1, -1))):
            wih_d = wih[:, d * h4:(d + 1) * h4]
            whh_d = whh[:, d * h4:(d + 1) * h4]
            b_d = bb[:, d * h4:(d + 1) * h4]
            hh = jnp.zeros((b, LSTM_HIDDEN), jnp.float32)
            cc = jnp.zeros((b, LSTM_HIDDEN), jnp.float32)
            seq = [None] * t_len
            for t in order:
                g = layer_in[t] @ wih_d + hh @ whh_d + b_d
                i = jax.nn.sigmoid(g[:, :LSTM_HIDDEN])
                f = jax.nn.sigmoid(g[:, LSTM_HIDDEN:2 * LSTM_HIDDEN])
                gg = jnp.tanh(g[:, 2 * LSTM_HIDDEN:3 * LSTM_HIDDEN])
                o = jax.nn.sigmoid(g[:, 3 * LSTM_HIDDEN:])
                cc = f * cc + i * gg
                hh = o * jnp.tanh(cc)
                seq[t] = hh
            outs.append(seq)
            finals.append(hh)
        layer_in = jnp.stack(
            [jnp.concatenate([outs[0][t], outs[1][t]], axis=1) for t in range(t_len)],
            axis=0)
    lstm_hidden = jnp.concatenate(finals, axis=1)
    lstm_feat = jax.nn.relu(lstm_hidden @ params["lstm_fc_w"] + params["lstm_fc_b"])
    fused = jnp.concatenate([cnn_feat, lstm_feat], axis=1)
    hid = jax.nn.relu(fused @ params["fuse_w"] + params["fuse_b"])
    return hid @ params["head_w"] + params["head_b"]


# ----------------------------- main -----------------------------------------

if __name__ == "__main__":
    key = jax.random.PRNGKey(0)
    k_params, k_img, k_ts = jax.random.split(key, 3)

    params = init_params(k_params)
    images = jax.random.normal(k_img, (2, INPUT_CHANNELS, IMG_SIZE, IMG_SIZE),
                               dtype=jnp.float32)
    time_series = jax.random.normal(k_ts, (2, SEQ_LEN, TIME_INPUT_DIM),
                                    dtype=jnp.float32)

    logits = cnn_lstm_forward(params, images, time_series)
    logits = jax.block_until_ready(logits)

    assert logits.shape == (2, OUTPUT_DIM), logits.shape
    assert bool(jnp.all(jnp.isfinite(logits)))

    ref = jax.block_until_ready(reference_forward(params, images, time_series))
    assert bool(jnp.allclose(logits, ref, atol=2e-3, rtol=2e-3)), (
        "Pallas output does not match pure-JAX reference")

    print("KERNEL_OK")
</pallas_src>

<mosaic_0001>
module attributes {stable_mosaic.version = 11 : i64} {
  func.func @_cnn_lstm_kernel(%arg0: memref<512x36xf32, #tpu.memory_space<vmem>>, %arg1: memref<2x512xf32, #tpu.memory_space<vmem>>, %arg2: memref<16x8xf32, #tpu.memory_space<vmem>>, %arg3: memref<36x16xf32, #tpu.memory_space<vmem>>, %arg4: memref<1x16xf32, #tpu.memory_space<vmem>>, %arg5: memref<9x16x32xf32, #tpu.memory_space<vmem>>, %arg6: memref<1x32xf32, #tpu.memory_space<vmem>>, %arg7: memref<32x32xf32, #tpu.memory_space<vmem>>, %arg8: memref<1x32xf32, #tpu.memory_space<vmem>>, %arg9: memref<8x256xf32, #tpu.memory_space<vmem>>, %arg10: memref<32x256xf32, #tpu.memory_space<vmem>>, %arg11: memref<1x256xf32, #tpu.memory_space<vmem>>, %arg12: memref<64x256xf32, #tpu.memory_space<vmem>>, %arg13: memref<32x256xf32, #tpu.memory_space<vmem>>, %arg14: memref<1x256xf32, #tpu.memory_space<vmem>>, %arg15: memref<64x32xf32, #tpu.memory_space<vmem>>, %arg16: memref<1x32xf32, #tpu.memory_space<vmem>>, %arg17: memref<64x16xf32, #tpu.memory_space<vmem>>, %arg18: memref<1x16xf32, #tpu.memory_space<vmem>>, %arg19: memref<16x16xf32, #tpu.memory_space<vmem>>, %arg20: memref<1x16xf32, #tpu.memory_space<vmem>>, %arg21: memref<2x16xf32, #tpu.memory_space<vmem>>, %arg22: memref<560x16xf32, #tpu.memory_space<vmem>>) attributes {dimension_semantics = [], scalar_prefetch = 0 : i64, scratch_operands = 1 : i64, tpu.core_type = #tpu.core_type<tc>} {
    %c0 = arith.constant 0 : index
    %c0_0 = arith.constant 0 : index
    %0 = vector.load %arg0[%c0, %c0_0] : memref<512x36xf32, #tpu.memory_space<vmem>>, vector<512x36xf32>
    %c0_1 = arith.constant 0 : index
    %c0_2 = arith.constant 0 : index
    %1 = vector.load %arg3[%c0_1, %c0_2] : memref<36x16xf32, #tpu.memory_space<vmem>>, vector<36x16xf32>
    %cst = arith.constant dense<0.000000e+00> : vector<512x16xf32>
    %2 = tpu.matmul %0, %1, %cst {dimension_numbers = #tpu.dot_dimension_numbers<[1], [0], [0], [1], [0, 0, 1, 1], [], []>} : vector<512x36xf32>, vector<36x16xf32>, vector<512x16xf32> -> vector<512x16xf32>
    %c0_3 = arith.constant 0 : index
    %c0_4 = arith.constant 0 : index
    %3 = vector.load %arg4[%c0_3, %c0_4] : memref<1x16xf32, #tpu.memory_space<vmem>>, vector<1x16xf32>
    %4 = vector.broadcast %3 : vector<1x16xf32> to vector<512x16xf32>
    %5 = arith.addf %2, %4 : vector<512x16xf32>
    %cst_5 = arith.constant 0.000000e+00 : f32
    %6 = vector.broadcast %cst_5 : f32 to vector<512x16xf32>
    %7 = arith.maximumf %5, %6 : vector<512x16xf32>
    %cst_6 = arith.constant 0.000000e+00 : f32
    %8 = vector.broadcast %cst_6 : f32 to vector<24x16xf32>
    %c0_7 = arith.constant 0 : index
    %c0_8 = arith.constant 0 : index
    %9 = vector.load %arg22[%c0_7, %c0_8] : memref<560x16xf32, #tpu.memory_space<vmem>>, vector<24x16xf32>
    tpu.vector_store %arg22[%c0_7, %c0_8], %8 {strides = array<i32>} : memref<560x16xf32, #tpu.memory_space<vmem>>, vector<24x16xf32>,
    %cst_9 = arith.constant 0.000000e+00 : f32
    %10 = vector.broadcast %cst_9 : f32 to vector<24x16xf32>
    %c536 = arith.constant 536 : index
    %c0_10 = arith.constant 0 : index
    %11 = vector.load %arg22[%c536, %c0_10] : memref<560x16xf32, #tpu.memory_space<vmem>>, vector<24x16xf32>
    tpu.vector_store %arg22[%c536, %c0_10], %10 {strides = array<i32>} : memref<560x16xf32, #tpu.memory_space<vmem>>, vector<24x16xf32>,
    %c24 = arith.constant 24 : index
    %c0_11 = arith.constant 0 : index
    %12 = vector.load %arg22[%c24, %c0_11] : memref<560x16xf32, #tpu.memory_space<vmem>>, vector<512x16xf32>
    tpu.vector_store %arg22[%c24, %c0_11], %7 {strides = array<i32>} : memref<560x16xf32, #tpu.memory_space<vmem>>, vector<512x16xf32>,
    %13 = tpu.iota {dimensions = array<i32: 0>} : vector<512x16xi32>
    %c255_i32 = arith.constant 255 : i32
    %14 = vector.broadcast %c255_i32 : i32 to vector<512x16xi32>
    %15 = arith.andi %13, %14 : vector<512x16xi32>
    %c15_i32 = arith.constant 15 : i32
    %16 = vector.broadcast %c15_i32 : i32 to vector<512x16xi32>
    %17 = arith.andi %13, %16 : vector<512x16xi32>
    %c16_i32 = arith.constant 16 : i32
    %18 = vector.broadcast %c16_i32 : i32 to vector<512x16xi32>
    %19 = arith.cmpi sge, %15, %18 : vector<512x16xi32>
    %c240_i32 = arith.constant 240 : i32
    %20 = vector.broadcast %c240_i32 : i32 to vector<512x16xi32>
    %21 = arith.cmpi slt, %15, %20 : vector<512x16xi32>
    %c1_i32 = arith.constant 1 : i32
    %22 = vector.broadcast %c1_i32 : i32 to vector<512x16xi32>
    %23 = arith.cmpi sge, %17, %22 : vector<512x16xi32>
    %c15_i32_12 = arith.constant 15 : i32
    %24 = vector.broadcast %c15_i32_12 : i32 to vector<512x16xi32>
    %25 = arith.cmpi slt, %17, %24 : vector<512x16xi32>
    %c7 = arith.constant 7 : index
    %c0_13 = arith.constant 0 : index
    %26 = vector.load %arg22[%c7, %c0_13] : memref<560x16xf32, #tpu.memory_space<vmem>>, vector<512x16xf32>
    %27 = arith.andi %19, %23 : vector<512x16xi1>
    %cst_14 = arith.constant 0.000000e+00 : f32
    %28 = vector.broadcast %cst_14 : f32 to vector<512x16xf32>
    %29 = arith.select %27, %26, %28 : vector<512x16xi1>, vector<512x16xf32>
    %c0_15 = arith.constant 0 : index
    %c0_16 = arith.constant 0 : index
    %c0_17 = arith.constant 0 : index
    %30 = vector.load %arg5[%c0_15, %c0_16, %c0_17] : memref<9x16x32xf32, #tpu.memory_space<vmem>>, vector<1x16x32xf32>
    %31 = vector.shape_cast %30 : vector<1x16x32xf32> to vector<16x32xf32>
    %cst_18 = arith.constant dense<0.000000e+00> : vector<512x32xf32>
    %32 = tpu.matmul %29, %31, %cst_18 {dimension_numbers = #tpu.dot_dimension_numbers<[1], [0], [0], [1], [0, 0, 1, 1], [], []>} : vector<512x16xf32>, vector<16x32xf32>, vector<512x32xf32> -> vector<512x32xf32>
    %c8 = arith.constant 8 : index
    %c0_19 = arith.constant 0 : index
    %33 = vector.load %arg22[%c8, %c0_19] : memref<560x16xf32, #tpu.memory_space<vmem>>, vector<512x16xf32>
    %cst_20 = arith.constant 0.000000e+00 : f32
    %34 = vector.broadcast %cst_20 : f32 to vector<512x16xf32>
    %35 = arith.select %19, %33, %34 : vector<512x16xi1>, vector<512x16xf32>
    %c1 = arith.constant 1 : index
    %c0_21 = arith.constant 0 : index
    %c0_22 = arith.constant 0 : index
    %36 = vector.load %arg5[%c1, %c0_21, %c0_22] : memref<9x16x32xf32, #tpu.memory_space<vmem>>, vector<1x16x32xf32>
    %37 = vector.shape_cast %36 : vector<1x16x32xf32> to vector<16x32xf32>
    %cst_23 = arith.constant dense<0.000000e+00> : vector<512x32xf32>
    %38 = tpu.matmul %35, %37, %cst_23 {dimension_numbers = #tpu.dot_dimension_numbers<[1], [0], [0], [1], [0, 0, 1, 1], [], []>} : vector<512x16xf32>, vector<16x32xf32>, vector<512x32xf32> -> vector<512x32xf32>
    %39 = arith.addf %32, %38 : vector<512x32xf32>
    %c9 = arith.constant 9 : index
    %c0_24 = arith.constant 0 : index
    %40 = vector.load %arg22[%c9, %c0_24] : memref<560x16xf32, #tpu.memory_space<vmem>>, vector<512x16xf32>
    %41 = arith.andi %19, %25 : vector<512x16xi1>
    %cst_25 = arith.constant 0.000000e+00 : f32
    %42 = vector.broadcast %cst_25 : f32 to vector<512x16xf32>
    %43 = arith.select %41, %40, %42 : vector<512x16xi1>, vector<512x16xf32>
    %c2 = arith.constant 2 : index
    %c0_26 = arith.constant 0 : index
    %c0_27 = arith.constant 0 : index
    %44 = vector.load %arg5[%c2, %c0_26, %c0_27] : memref<9x16x32xf32, #tpu.memory_space<vmem>>, vector<1x16x32xf32>
    %45 = vector.shape_cast %44 : vector<1x16x32xf32> to vector<16x32xf32>
    %cst_28 = arith.constant dense<0.000000e+00> : vector<512x32xf32>
    %46 = tpu.matmul %43, %45, %cst_28 {dimension_numbers = #tpu.dot_dimension_numbers<[1], [0], [0], [1], [0, 0, 1, 1], [], []>} : vector<512x16xf32>, vector<16x32xf32>, vector<512x32xf32> -> vector<512x32xf32>
    %47 = arith.addf %39, %46 : vector<512x32xf32>
    %c23 = arith.constant 23 : index
    %c0_29 = arith.constant 0 : index
    %48 = vector.load %arg22[%c23, %c0_29] : memref<560x16xf32, #tpu.memory_space<vmem>>, vector<512x16xf32>
    %cst_30 = arith.constant 0.000000e+00 : f32
    %49 = vector.broadcast %cst_30 : f32 to vector<512x16xf32>
    %50 = arith.select %23, %48, %49 : vector<512x16xi1>, vector<512x16xf32>
    %c3 = arith.constant 3 : index
    %c0_31 = arith.constant 0 : index
    %c0_32 = arith.constant 0 : index
    %51 = vector.load %arg5[%c3, %c0_31, %c0_32] : memref<9x16x32xf32, #tpu.memory_space<vmem>>, vector<1x16x32xf32>
    %52 = vector.shape_cast %51 : vector<1x16x32xf32> to vector<16x32xf32>
    %cst_33 = arith.constant dense<0.000000e+00> : vector<512x32xf32>
    %53 = tpu.matmul %50, %52, %cst_33 {dimension_numbers = #tpu.dot_dimension_numbers<[1], [0], [0], [1], [0, 0, 1, 1], [], []>} : vector<512x16xf32>, vector<16x32xf32>, vector<512x32xf32> -> vector<512x32xf32>
    %54 = arith.addf %47, %53 : vector<512x32xf32>
    %c24_34 = arith.constant 24 : index
    %c0_35 = arith.constant 0 : index
    %55 = vector.load %arg22[%c24_34, %c0_35] : memref<560x16xf32, #tpu.memory_space<vmem>>, vector<512x16xf32>
    %c4 = arith.constant 4 : index
    %c0_36 = arith.constant 0 : index
    %c0_37 = arith.constant 0 : index
    %56 = vector.load %arg5[%c4, %c0_36, %c0_37] : memref<9x16x32xf32, #tpu.memory_space<vmem>>, vector<1x16x32xf32>
    %57 = vector.shape_cast %56 : vector<1x16x32xf32> to vector<16x32xf32>
    %cst_38 = arith.constant dense<0.000000e+00> : vector<512x32xf32>
    %58 = tpu.matmul %55, %57, %cst_38 {dimension_numbers = #tpu.dot_dimension_numbers<[1], [0], [0], [1], [0, 0, 1, 1], [], []>} : vector<512x16xf32>, vector<16x32xf32>, vector<512x32xf32> -> vector<512x32xf32>
    %59 = arith.addf %54, %58 : vector<512x32xf32>
    %c25 = arith.constant 25 : index
    %c0_39 = arith.constant 0 : index
    %60 = vector.load %arg22[%c25, %c0_39] : memref<560x16xf32, #tpu.memory_space<vmem>>, vector<512x16xf32>
    %cst_40 = arith.constant 0.000000e+00 : f32
    %61 = vector.broadcast %cst_40 : f32 to vector<512x16xf32>
    %62 = arith.select %25, %60, %61 : vector<512x16xi1>, vector<512x16xf32>
    %c5 = arith.constant 5 : index
    %c0_41 = arith.constant 0 : index
    %c0_42 = arith.constant 0 : index
    %63 = vector.load %arg5[%c5, %c0_41, %c0_42] : memref<9x16x32xf32, #tpu.memory_space<vmem>>, vector<1x16x32xf32>
    %64 = vector.shape_cast %63 : vector<1x16x32xf32> to vector<16x32xf32>
    %cst_43 = arith.constant dense<0.000000e+00> : vector<512x32xf32>
    %65 = tpu.matmul %62, %64, %cst_43 {dimension_numbers = #tpu.dot_dimension_numbers<[1], [0], [0], [1], [0, 0, 1, 1], [], []>} : vector<512x16xf32>, vector<16x32xf32>, vector<512x32xf32> -> vector<512x32xf32>
    %66 = arith.addf %59, %65 : vector<512x32xf32>
    %c39 = arith.constant 39 : index
    %c0_44 = arith.constant 0 : index
    %67 = vector.load %arg22[%c39, %c0_44] : memref<560x16xf32, #tpu.memory_space<vmem>>, vector<512x16xf32>
    %68 = arith.andi %21, %23 : vector<512x16xi1>
    %cst_45 = arith.constant 0.000000e+00 : f32
    %69 = vector.broadcast %cst_45 : f32 to vector<512x16xf32>
    %70 = arith.select %68, %67, %69 : vector<512x16xi1>, vector<512x16xf32>
    %c6 = arith.constant 6 : index
    %c0_46 = arith.constant 0 : index
    %c0_47 = arith.constant 0 : index
    %71 = vector.load %arg5[%c6, %c0_46, %c0_47] : memref<9x16x32xf32, #tpu.memory_space<vmem>>, vector<1x16x32xf32>
    %72 = vector.shape_cast %71 : vector<1x16x32xf32> to vector<16x32xf32>
    %cst_48 = arith.constant dense<0.000000e+00> : vector<512x32xf32>
    %73 = tpu.matmul %70, %72, %cst_48 {dimension_numbers = #tpu.dot_dimension_numbers<[1], [0], [0], [1], [0, 0, 1, 1], [], []>} : vector<512x16xf32>, vector<16x32xf32>, vector<512x32xf32> -> vector<512x32xf32>
    %74 = arith.addf %66, %73 : vector<512x32xf32>
    %c40 = arith.constant 40 : index
    %c0_49 = arith.constant 0 : index
    %75 = vector.load %arg22[%c40, %c0_49] : memref<560x16xf32, #tpu.memory_space<vmem>>, vector<512x16xf32>
    %cst_50 = arith.constant 0.000000e+00 : f32
    %76 = vector.broadcast %cst_50 : f32 to vector<512x16xf32>
    %77 = arith.select %21, %75, %76 : vector<512x16xi1>, vector<512x16xf32>
    %c7_51 = arith.constant 7 : index
    %c0_52 = arith.constant 0 : index
    %c0_53 = arith.constant 0 : index
    %78 = vector.load %arg5[%c7_51, %c0_52, %c0_53] : memref<9x16x32xf32, #tpu.memory_space<vmem>>, vector<1x16x32xf32>
    %79 = vector.shape_cast %78 : vector<1x16x32xf32> to vector<16x32xf32>
    %cst_54 = arith.constant dense<0.000000e+00> : vector<512x32xf32>
    %80 = tpu.matmul %77, %79, %cst_54 {dimension_numbers = #tpu.dot_dimension_numbers<[1], [0], [0], [1], [0, 0, 1, 1], [], []>} : vector<512x16xf32>, vector<16x32xf32>, vector<512x32xf32> -> vector<512x32xf32>
    %81 = arith.addf %74, %80 : vector<512x32xf32>
    %c41 = arith.constant 41 : index
    %c0_55 = arith.constant 0 : index
    %82 = vector.load %arg22[%c41, %c0_55] : memref<560x16xf32, #tpu.memory_space<vmem>>, vector<512x16xf32>
    %83 = arith.andi %21, %25 : vector<512x16xi1>
    %cst_56 = arith.constant 0.000000e+00 : f32
    %84 = vector.broadcast %cst_56 : f32 to vector<512x16xf32>
    %85 = arith.select %83, %82, %84 : vector<512x16xi1>, vector<512x16xf32>
    %c8_57 = arith.constant 8 : index
    %c0_58 = arith.constant 0 : index
    %c0_59 = arith.constant 0 : index
    %86 = vector.load %arg5[%c8_57, %c0_58, %c0_59] : memref<9x16x32xf32, #tpu.memory_space<vmem>>, vector<1x16x32xf32>
    %87 = vector.shape_cast %86 : vector<1x16x32xf32> to vector<16x32xf32>
    %cst_60 = arith.constant dense<0.000000e+00> : vector<512x32xf32>
    %88 = tpu.matmul %85, %87, %cst_60 {dimension_numbers = #tpu.dot_dimension_numbers<[1], [0], [0], [1], [0, 0, 1, 1], [], []>} : vector<512x16xf32>, vector<16x32xf32>, vector<512x32xf32> -> vector<512x32xf32>
    %89 = arith.addf %81, %88 : vector<512x32xf32>
    %c0_61 = arith.constant 0 : index
    %c0_62 = arith.constant 0 : index
    %90 = vector.load %arg6[%c0_61, %c0_62] : memref<1x32xf32, #tpu.memory_space<vmem>>, vector<1x32xf32>
    %91 = vector.broadcast %90 : vector<1x32xf32> to vector<512x32xf32>
    %92 = arith.addf %89, %91 : vector<512x32xf32>
    %cst_63 = arith.constant 0.000000e+00 : f32
    %93 = vector.broadcast %cst_63 : f32 to vector<512x32xf32>
    %94 = arith.maximumf %92, %93 : vector<512x32xf32>
    %c0_64 = arith.constant 0 : index
    %c0_65 = arith.constant 0 : index
    %95 = vector.load %arg1[%c0_64, %c0_65] : memref<2x512xf32, #tpu.memory_space<vmem>>, vector<2x512xf32>
    %cst_66 = arith.constant dense<0.000000e+00> : vector<2x32xf32>
    %96 = tpu.matmul %95, %94, %cst_66 {dimension_numbers = #tpu.dot_dimension_numbers<[1], [0], [0], [1], [0, 0, 1, 1], [], []>} : vector<2x512xf32>, vector<512x32xf32>, vector<2x32xf32> -> vector<2x32xf32>
    %c0_67 = arith.constant 0 : index
    %c0_68 = arith.constant 0 : index
    %97 = vector.load %arg7[%c0_67, %c0_68] : memref<32x32xf32, #tpu.memory_space<vmem>>, vector<32x32xf32>
    %cst_69 = arith.constant dense<0.000000e+00> : vector<2x32xf32>
    %98 = tpu.matmul %96, %97, %cst_69 {dimension_numbers = #tpu.dot_dimension_numbers<[1], [0], [0], [1], [0, 0, 1, 1], [], []>} : vector<2x32xf32>, vector<32x32xf32>, vector<2x32xf32> -> vector<2x32xf32>
    %c0_70 = arith.constant 0 : index
    %c0_71 = arith.constant 0 : index
    %99 = vector.load %arg8[%c0_70, %c0_71] : memref<1x32xf32, #tpu.memory_space<vmem>>, vector<1x32xf32>
    %100 = vector.broadcast %99 : vector<1x32xf32> to vector<2x32xf32>
    %101 = arith.addf %98, %100 : vector<2x32xf32>
    %cst_72 = arith.constant 0.000000e+00 : f32
    %102 = vector.broadcast %cst_72 : f32 to vector<2x32xf32>
    %103 = arith.maximumf %101, %102 : vector<2x32xf32>
    %c0_73 = arith.constant 0 : index
    %c0_74 = arith.constant 0 : index
    %104 = vector.load %arg2[%c0_73, %c0_74] : memref<16x8xf32, #tpu.memory_space<vmem>>, vector<16x8xf32>
    %c0_75 = arith.constant 0 : index
    %c0_76 = arith.constant 0 : index
    %105 = vector.load %arg9[%c0_75, %c0_76] : memref<8x256xf32, #tpu.memory_space<vmem>>, vector<8x256xf32>
    %cst_77 = arith.constant dense<0.000000e+00> : vector<16x256xf32>
    %106 = tpu.matmul %104, %105, %cst_77 {dimension_numbers = #tpu.dot_dimension_numbers<[1], [0], [0], [1], [0, 0, 1, 1], [], []>} : vector<16x8xf32>, vector<8x256xf32>, vector<16x256xf32> -> vector<16x256xf32>
    %c0_78 = arith.constant 0 : index
    %c0_79 = arith.constant 0 : index
    %107 = vector.load %arg11[%c0_78, %c0_79] : memref<1x256xf32, #tpu.memory_space<vmem>>, vector<1x256xf32>
    %108 = vector.broadcast %107 : vector<1x256xf32> to vector<16x256xf32>
    %109 = arith.addf %106, %108 : vector<16x256xf32>
    %c0_80 = arith.constant 0 : index
    %c0_81 = arith.constant 0 : index
    %110 = vector.load %arg10[%c0_80, %c0_81] : memref<32x256xf32, #tpu.memory_space<vmem>>, vector<32x256xf32>
    %111 = vector.extract_strided_slice %109 {offsets = [0, 0], sizes = [2, 128], strides = [1, 1]} : vector<16x256xf32> to vector<2x128xf32>
    %112 = vector.extract_strided_slice %109 {offsets = [14, 128], sizes = [2, 128], strides = [1, 1]} : vector<16x256xf32> to vector<2x128xf32>
    %113 = tpu.concatenate %111, %112 in 0 : vector<2x128xf32>, vector<2x128xf32> -> vector<4x128xf32>
    %114 = vector.extract_strided_slice %113 {offsets = [0, 0], sizes = [4, 32], strides = [1, 1]} : vector<4x128xf32> to vector<4x32xf32>
    %115 = arith.negf %114 : vector<4x32xf32>
    %116 = math.exp %115 : vector<4x32xf32>
    %cst_82 = arith.constant 1.000000e+00 : f32
    %117 = vector.broadcast %cst_82 : f32 to vector<4x32xf32>
    %118 = arith.addf %117, %116 : vector<4x32xf32>
    %119 = arith.divf %117, %118 : vector<4x32xf32>
    %120 = vector.extract_strided_slice %113 {offsets = [0, 64], sizes = [4, 32], strides = [1, 1]} : vector<4x128xf32> to vector<4x32xf32>
    %121 = math.tanh %120 : vector<4x32xf32>
    %122 = vector.extract_strided_slice %113 {offsets = [0, 96], sizes = [4, 32], strides = [1, 1]} : vector<4x128xf32> to vector<4x32xf32>
    %123 = arith.negf %122 : vector<4x32xf32>
    %124 = math.exp %123 : vector<4x32xf32>
    %cst_83 = arith.constant 1.000000e+00 : f32
    %125 = vector.broadcast %cst_83 : f32 to vector<4x32xf32>
    %126 = arith.addf %125, %124 : vector<4x32xf32>
    %127 = arith.divf %125, %126 : vector<4x32xf32>
    %128 = arith.mulf %119, %121 : vector<4x32xf32>
    %129 = math.tanh %128 : vector<4x32xf32>
    %130 = arith.mulf %127, %129 : vector<4x32xf32>
    %131 = vector.extract_strided_slice %130 {offsets = [0, 0], sizes = [2, 32], strides = [1, 1]} : vector<4x32xf32> to vector<2x32xf32>
    %132 = vector.extract_strided_slice %130 {offsets = [2, 0], sizes = [2, 32], strides = [1, 1]} : vector<4x32xf32> to vector<2x32xf32>
    %133 = vector.extract_strided_slice %109 {offsets = [2, 0], sizes = [2, 128], strides = [1, 1]} : vector<16x256xf32> to vector<2x128xf32>
    %134 = vector.extract_strided_slice %109 {offsets = [12, 128], sizes = [2, 128], strides = [1, 1]} : vector<16x256xf32> to vector<2x128xf32>
    %cst_84 = arith.constant dense<0.000000e+00> : vector<4x256xf32>
    %135 = tpu.matmul %130, %110, %cst_84 {dimension_numbers = #tpu.dot_dimension_numbers<[1], [0], [0], [1], [0, 0, 1, 1], [], []>} : vector<4x32xf32>, vector<32x256xf32>, vector<4x256xf32> -> vector<4x256xf32>
    %136 = vector.extract_strided_slice %135 {offsets = [0, 0], sizes = [2, 128], strides = [1, 1]} : vector<4x256xf32> to vector<2x128xf32>
    %137 = arith.addf %133, %136 : vector<2x128xf32>
    %138 = vector.extract_strided_slice %135 {offsets = [2, 128], sizes = [2, 128], strides = [1, 1]} : vector<4x256xf32> to vector<2x128xf32>
    %139 = arith.addf %134, %138 : vector<2x128xf32>
    %140 = tpu.concatenate %137, %139 in 0 : vector<2x128xf32>, vector<2x128xf32> -> vector<4x128xf32>
    %141 = vector.extract_strided_slice %140 {offsets = [0, 0], sizes = [4, 32], strides = [1, 1]} : vector<4x128xf32> to vector<4x32xf32>
    %142 = arith.negf %141 : vector<4x32xf32>
    %143 = math.exp %142 : vector<4x32xf32>
    %cst_85 = arith.constant 1.000000e+00 : f32
    %144 = vector.broadcast %cst_85 : f32 to vector<4x32xf32>
    %145 = arith.addf %144, %143 : vector<4x32xf32>
    %146 = arith.divf %144, %145 : vector<4x32xf32>
    %147 = vector.extract_strided_slice %140 {offsets = [0, 32], sizes = [4, 32], strides = [1, 1]} : vector<4x128xf32> to vector<4x32xf32>
    %148 = arith.negf %147 : vector<4x32xf32>
    %149 = math.exp %148 : vector<4x32xf32>
    %cst_86 = arith.constant 1.000000e+00 : f32
    %150 = vector.broadcast %cst_86 : f32 to vector<4x32xf32>
    %151 = arith.addf %150, %149 : vector<4x32xf32>
    %152 = arith.divf %150, %151 : vector<4x32xf32>
    %153 = vector.extract_strided_slice %140 {offsets = [0, 64], sizes = [4, 32], strides = [1, 1]} : vector<4x128xf32> to vector<4x32xf32>
    %154 = math.tanh %153 : vector<4x32xf32>
    %155 = vector.extract_strided_slice %140 {offsets = [0, 96], sizes = [4, 32], strides = [1, 1]} : vector<4x128xf32> to vector<4x32xf32>
    %156 = arith.negf %155 : vector<4x32xf32>
    %157 = math.exp %156 : vector<4x32xf32>
    %cst_87 = arith.constant 1.000000e+00 : f32
    %158 = vector.broadcast %cst_87 : f32 to vector<4x32xf32>
    %159 = arith.addf %158, %157 : vector<4x32xf32>
    %160 = arith.divf %158, %159 : vector<4x32xf32>
    %161 = arith.mulf %152, %128 : vector<4x32xf32>
    %162 = arith.mulf %146, %154 : vector<4x32xf32>
    %163 = arith.addf %161, %162 : vector<4x32xf32>
    %164 = math.tanh %163 : vector<4x32xf32>
    %165 = arith.mulf %160, %164 : vector<4x32xf32>
    %166 = vector.extract_strided_slice %165 {offsets = [0, 0], sizes = [2, 32], strides = [1, 1]} : vector<4x32xf32> to vector<2x32xf32>
    %167 = vector.extract_strided_slice %165 {offsets = [2, 0], sizes = [2, 32], strides = [1, 1]} : vector<4x32xf32> to vector<2x32xf32>
    %168 = vector.extract_strided_slice %109 {offsets = [4, 0], sizes = [2, 128], strides = [1, 1]} : vector<16x256xf32> to vector<2x128xf32>
    %169 = vector.extract_strided_slice %109 {offsets = [10, 128], sizes = [2, 128], strides = [1, 1]} : vector<16x256xf32> to vector<2x128xf32>
    %cst_88 = arith.constant dense<0.000000e+00> : vector<4x256xf32>
    %170 = tpu.matmul %165, %110, %cst_88 {dimension_numbers = #tpu.dot_dimension_numbers<[1], [0], [0], [1], [0, 0, 1, 1], [], []>} : vector<4x32xf32>, vector<32x256xf32>, vector<4x256xf32> -> vector<4x256xf32>
    %171 = vector.extract_strided_slice %170 {offsets = [0, 0], sizes = [2, 128], strides = [1, 1]} : vector<4x256xf32> to vector<2x128xf32>
    %172 = arith.addf %168, %171 : vector<2x128xf32>
    %173 = vector.extract_strided_slice %170 {offsets = [2, 128], sizes = [2, 128], strides = [1, 1]} : vector<4x256xf32> to vector<2x128xf32>
    %174 = arith.addf %169, %173 : vector<2x128xf32>
    %175 = tpu.concatenate %172, %174 in 0 : vector<2x128xf32>, vector<2x128xf32> -> vector<4x128xf32>
    %176 = vector.extract_strided_slice %175 {offsets = [0, 0], sizes = [4, 32], strides = [1, 1]} : vector<4x128xf32> to vector<4x32xf32>
    %177 = arith.negf %176 : vector<4x32xf32>
    %178 = math.exp %177 : vector<4x32xf32>
    %cst_89 = arith.constant 1.000000e+00 : f32
    %179 = vector.broadcast %cst_89 : f32 to vector<4x32xf32>
    %180 = arith.addf %179, %178 : vector<4x32xf32>
    %181 = arith.divf %179, %180 : vector<4x32xf32>
    %182 = vector.extract_strided_slice %175 {offsets = [0, 32], sizes = [4, 32], strides = [1, 1]} : vector<4x128xf32> to vector<4x32xf32>
    %183 = arith.negf %182 : vector<4x32xf32>
    %184 = math.exp %183 : vector<4x32xf32>
    %cst_90 = arith.constant 1.000000e+00 : f32
    %185 = vector.broadcast %cst_90 : f32 to vector<4x32xf32>
    %186 = arith.addf %185, %184 : vector<4x32xf32>
    %187 = arith.divf %185, %186 : vector<4x32xf32>
    %188 = vector.extract_strided_slice %175 {offsets = [0, 64], sizes = [4, 32], strides = [1, 1]} : vector<4x128xf32> to vector<4x32xf32>
    %189 = math.tanh %188 : vector<4x32xf32>
    %190 = vector.extract_strided_slice %175 {offsets = [0, 96], sizes = [4, 32], strides = [1, 1]} : vector<4x128xf32> to vector<4x32xf32>
    %191 = arith.negf %190 : vector<4x32xf32>
    %192 = math.exp %191 : vector<4x32xf32>
    %cst_91 = arith.constant 1.000000e+00 : f32
    %193 = vector.broadcast %cst_91 : f32 to vector<4x32xf32>
    %194 = arith.addf %193, %192 : vector<4x32xf32>
    %195 = arith.divf %193, %194 : vector<4x32xf32>
    %196 = arith.mulf %187, %163 : vector<4x32xf32>
    %197 = arith.mulf %181, %189 : vector<4x32xf32>
    %198 = arith.addf %196, %197 : vector<4x32xf32>
    %199 = math.tanh %198 : vector<4x32xf32>
    %200 = arith.mulf %195, %199 : vector<4x32xf32>
    %201 = vector.extract_strided_slice %200 {offsets = [0, 0], sizes = [2, 32], strides = [1, 1]} : vector<4x32xf32> to vector<2x32xf32>
    %202 = vector.extract_strided_slice %200 {offsets = [2, 0], sizes = [2, 32], strides = [1, 1]} : vector<4x32xf32> to vector<2x32xf32>
    %203 = vector.extract_strided_slice %109 {offsets = [6, 0], sizes = [2, 128], strides = [1, 1]} : vector<16x256xf32> to vector<2x128xf32>
    %204 = vector.extract_strided_slice %109 {offsets = [8, 128], sizes = [2, 128], strides = [1, 1]} : vector<16x256xf32> to vector<2x128xf32>
    %cst_92 = arith.constant dense<0.000000e+00> : vector<4x256xf32>
    %205 = tpu.matmul %200, %110, %cst_92 {dimension_numbers = #tpu.dot_dimension_numbers<[1], [0], [0], [1], [0, 0, 1, 1], [], []>} : vector<4x32xf32>, vector<32x256xf32>, vector<4x256xf32> -> vector<4x256xf32>
    %206 = vector.extract_strided_slice %205 {offsets = [0, 0], sizes = [2, 128], strides = [1, 1]} : vector<4x256xf32> to vector<2x128xf32>
    %207 = arith.addf %203, %206 : vector<2x128xf32>
    %208 = vector.extract_strided_slice %205 {offsets = [2, 128], sizes = [2, 128], strides = [1, 1]} : vector<4x256xf32> to vector<2x128xf32>
    %209 = arith.addf %204, %208 : vector<2x128xf32>
    %210 = tpu.concatenate %207, %209 in 0 : vector<2x128xf32>, vector<2x128xf32> -> vector<4x128xf32>
    %211 = vector.extract_strided_slice %210 {offsets = [0, 0], sizes = [4, 32], strides = [1, 1]} : vector<4x128xf32> to vector<4x32xf32>
    %212 = arith.negf %211 : vector<4x32xf32>
    %213 = math.exp %212 : vector<4x32xf32>
    %cst_93 = arith.constant 1.000000e+00 : f32
    %214 = vector.broadcast %cst_93 : f32 to vector<4x32xf32>
    %215 = arith.addf %214, %213 : vector<4x32xf32>
    %216 = arith.divf %214, %215 : vector<4x32xf32>
    %217 = vector.extract_strided_slice %210 {offsets = [0, 32], sizes = [4, 32], strides = [1, 1]} : vector<4x128xf32> to vector<4x32xf32>
    %218 = arith.negf %217 : vector<4x32xf32>
    %219 = math.exp %218 : vector<4x32xf32>
    %cst_94 = arith.constant 1.000000e+00 : f32
    %220 = vector.broadcast %cst_94 : f32 to vector<4x32xf32>
    %221 = arith.addf %220, %219 : vector<4x32xf32>
    %222 = arith.divf %220, %221 : vector<4x32xf32>
    %223 = vector.extract_strided_slice %210 {offsets = [0, 64], sizes = [4, 32], strides = [1, 1]} : vector<4x128xf32> to vector<4x32xf32>
    %224 = math.tanh %223 : vector<4x32xf32>
    %225 = vector.extract_strided_slice %210 {offsets = [0, 96], sizes = [4, 32], strides = [1, 1]} : vector<4x128xf32> to vector<4x32xf32>
    %226 = arith.negf %225 : vector<4x32xf32>
    %227 = math.exp %226 : vector<4x32xf32>
    %cst_95 = arith.constant 1.000000e+00 : f32
    %228 = vector.broadcast %cst_95 : f32 to vector<4x32xf32>
    %229 = arith.addf %228, %227 : vector<4x32xf32>
    %230 = arith.divf %228, %229 : vector<4x32xf32>
    %231 = arith.mulf %222, %198 : vector<4x32xf32>
    %232 = arith.mulf %216, %224 : vector<4x32xf32>
    %233 = arith.addf %231, %232 : vector<4x32xf32>
    %234 = math.tanh %233 : vector<4x32xf32>
    %235 = arith.mulf %230, %234 : vector<4x32xf32>
    %236 = vector.extract_strided_slice %235 {offsets = [0, 0], sizes = [2, 32], strides = [1, 1]} : vector<4x32xf32> to vector<2x32xf32>
    %237 = vector.extract_strided_slice %235 {offsets = [2, 0], sizes = [2, 32], strides = [1, 1]} : vector<4x32xf32> to vector<2x32xf32>
    %238 = vector.extract_strided_slice %109 {offsets = [8, 0], sizes = [2, 128], strides = [1, 1]} : vector<16x256xf32> to vector<2x128xf32>
    %239 = vector.extract_strided_slice %109 {offsets = [6, 128], sizes = [2, 128], strides = [1, 1]} : vector<16x256xf32> to vector<2x128xf32>
    %cst_96 = arith.constant dense<0.000000e+00> : vector<4x256xf32>
    %240 = tpu.matmul %235, %110, %cst_96 {dimension_numbers = #tpu.dot_dimension_numbers<[1], [0], [0], [1], [0, 0, 1, 1], [], []>} : vector<4x32xf32>, vector<32x256xf32>, vector<4x256xf32> -> vector<4x256xf32>
    %241 = vector.extract_strided_slice %240 {offsets = [0, 0], sizes = [2, 128], strides = [1, 1]} : vector<4x256xf32> to vector<2x128xf32>
    %242 = arith.addf %238, %241 : vector<2x128xf32>
    %243 = vector.extract_strided_slice %240 {offsets = [2, 128], sizes = [2, 128], strides = [1, 1]} : vector<4x256xf32> to vector<2x128xf32>
    %244 = arith.addf %239, %243 : vector<2x128xf32>
    %245 = tpu.concatenate %242, %244 in 0 : vector<2x128xf32>, vector<2x128xf32> -> vector<4x128xf32>
    %246 = vector.extract_strided_slice %245 {offsets = [0, 0], sizes = [4, 32], strides = [1, 1]} : vector<4x128xf32> to vector<4x32xf32>
    %247 = arith.negf %246 : vector<4x32xf32>
    %248 = math.exp %247 : vector<4x32xf32>
    %cst_97 = arith.constant 1.000000e+00 : f32
    %249 = vector.broadcast %cst_97 : f32 to vector<4x32xf32>
    %250 = arith.addf %249, %248 : vector<4x32xf32>
    %251 = arith.divf %249, %250 : vector<4x32xf32>
    %252 = vector.extract_strided_slice %245 {offsets = [0, 32], sizes = [4, 32], strides = [1, 1]} : vector<4x128xf32> to vector<4x32xf32>
    %253 = arith.negf %252 : vector<4x32xf32>
    %254 = math.exp %253 : vector<4x32xf32>
    %cst_98 = arith.constant 1.000000e+00 : f32
    %255 = vector.broadcast %cst_98 : f32 to vector<4x32xf32>
    %256 = arith.addf %255, %254 : vector<4x32xf32>
    %257 = arith.divf %255, %256 : vector<4x32xf32>
    %258 = vector.extract_strided_slice %245 {offsets = [0, 64], sizes = [4, 32], strides = [1, 1]} : vector<4x128xf32> to vector<4x32xf32>
    %259 = math.tanh %258 : vector<4x32xf32>
    %260 = vector.extract_strided_slice %245 {offsets = [0, 96], sizes = [4, 32], strides = [1, 1]} : vector<4x128xf32> to vector<4x32xf32>
    %261 = arith.negf %260 : vector<4x32xf32>
    %262 = math.exp %261 : vector<4x32xf32>
    %cst_99 = arith.constant 1.000000e+00 : f32
    %263 = vector.broadcast %cst_99 : f32 to vector<4x32xf32>
    %264 = arith.addf %263, %262 : vector<4x32xf32>
    %265 = arith.divf %263, %264 : vector<4x32xf32>
    %266 = arith.mulf %257, %233 : vector<4x32xf32>
    %267 = arith.mulf %251, %259 : vector<4x32xf32>
    %268 = arith.addf %266, %267 : vector<4x32xf32>
    %269 = math.tanh %268 : vector<4x32xf32>
    %270 = arith.mulf %265, %269 : vector<4x32xf32>
    %271 = vector.extract_strided_slice %270 {offsets = [0, 0], sizes = [2, 32], strides = [1, 1]} : vector<4x32xf32> to vector<2x32xf32>
    %272 = vector.extract_strided_slice %270 {offsets = [2, 0], sizes = [2, 32], strides = [1, 1]} : vector<4x32xf32> to vector<2x32xf32>
    %273 = vector.extract_strided_slice %109 {offsets = [10, 0], sizes = [2, 128], strides = [1, 1]} : vector<16x256xf32> to vector<2x128xf32>
    %274 = vector.extract_strided_slice %109 {offsets = [4, 128], sizes = [2, 128], strides = [1, 1]} : vector<16x256xf32> to vector<2x128xf32>
    %cst_100 = arith.constant dense<0.000000e+00> : vector<4x256xf32>
    %275 = tpu.matmul %270, %110, %cst_100 {dimension_numbers = #tpu.dot_dimension_numbers<[1], [0], [0], [1], [0, 0, 1, 1], [], []>} : vector<4x32xf32>, vector<32x256xf32>, vector<4x256xf32> -> vector<4x256xf32>
    %276 = vector.extract_strided_slice %275 {offsets = [0, 0], sizes = [2, 128], strides = [1, 1]} : vector<4x256xf32> to vector<2x128xf32>
    %277 = arith.addf %273, %276 : vector<2x128xf32>
    %278 = vector.extract_strided_slice %275 {offsets = [2, 128], sizes = [2, 128], strides = [1, 1]} : vector<4x256xf32> to vector<2x128xf32>
    %279 = arith.addf %274, %278 : vector<2x128xf32>
    %280 = tpu.concatenate %277, %279 in 0 : vector<2x128xf32>, vector<2x128xf32> -> vector<4x128xf32>
    %281 = vector.extract_strided_slice %280 {offsets = [0, 0], sizes = [4, 32], strides = [1, 1]} : vector<4x128xf32> to vector<4x32xf32>
    %282 = arith.negf %281 : vector<4x32xf32>
    %283 = math.exp %282 : vector<4x32xf32>
    %cst_101 = arith.constant 1.000000e+00 : f32
    %284 = vector.broadcast %cst_101 : f32 to vector<4x32xf32>
    %285 = arith.addf %284, %283 : vector<4x32xf32>
    %286 = arith.divf %284, %285 : vector<4x32xf32>
    %287 = vector.extract_strided_slice %280 {offsets = [0, 32], sizes = [4, 32], strides = [1, 1]} : vector<4x128xf32> to vector<4x32xf32>
    %288 = arith.negf %287 : vector<4x32xf32>
    %289 = math.exp %288 : vector<4x32xf32>
    %cst_102 = arith.constant 1.000000e+00 : f32
    %290 = vector.broadcast %cst_102 : f32 to vector<4x32xf32>
    %291 = arith.addf %290, %289 : vector<4x32xf32>
    %292 = arith.divf %290, %291 : vector<4x32xf32>
    %293 = vector.extract_strided_slice %280 {offsets = [0, 64], sizes = [4, 32], strides = [1, 1]} : vector<4x128xf32> to vector<4x32xf32>
    %294 = math.tanh %293 : vector<4x32xf32>
    %295 = vector.extract_strided_slice %280 {offsets = [0, 96], sizes = [4, 32], strides = [1, 1]} : vector<4x128xf32> to vector<4x32xf32>
    %296 = arith.negf %295 : vector<4x32xf32>
    %297 = math.exp %296 : vector<4x32xf32>
    %cst_103 = arith.constant 1.000000e+00 : f32
    %298 = vector.broadcast %cst_103 : f32 to vector<4x32xf32>
    %299 = arith.addf %298, %297 : vector<4x32xf32>
    %300 = arith.divf %298, %299 : vector<4x32xf32>
    %301 = arith.mulf %292, %268 : vector<4x32xf32>
    %302 = arith.mulf %286, %294 : vector<4x32xf32>
    %303 = arith.addf %301, %302 : vector<4x32xf32>
    %304 = math.tanh %303 : vector<4x32xf32>
    %305 = arith.mulf %300, %304 : vector<4x32xf32>
    %306 = vector.extract_strided_slice %305 {offsets = [0, 0], sizes = [2, 32], strides = [1, 1]} : vector<4x32xf32> to vector<2x32xf32>
    %307 = vector.extract_strided_slice %305 {offsets = [2, 0], sizes = [2, 32], strides = [1, 1]} : vector<4x32xf32> to vector<2x32xf32>
    %308 = vector.extract_strided_slice %109 {offsets = [12, 0], sizes = [2, 128], strides = [1, 1]} : vector<16x256xf32> to vector<2x128xf32>
    %309 = vector.extract_strided_slice %109 {offsets = [2, 128], sizes = [2, 128], strides = [1, 1]} : vector<16x256xf32> to vector<2x128xf32>
    %cst_104 = arith.constant dense<0.000000e+00> : vector<4x256xf32>
    %310 = tpu.matmul %305, %110, %cst_104 {dimension_numbers = #tpu.dot_dimension_numbers<[1], [0], [0], [1], [0, 0, 1, 1], [], []>} : vector<4x32xf32>, vector<32x256xf32>, vector<4x256xf32> -> vector<4x256xf32>
    %311 = vector.extract_strided_slice %310 {offsets = [0, 0], sizes = [2, 128], strides = [1, 1]} : vector<4x256xf32> to vector<2x128xf32>
    %312 = arith.addf %308, %311 : vector<2x128xf32>
    %313 = vector.extract_strided_slice %310 {offsets = [2, 128], sizes = [2, 128], strides = [1, 1]} : vector<4x256xf32> to vector<2x128xf32>
    %314 = arith.addf %309, %313 : vector<2x128xf32>
    %315 = tpu.concatenate %312, %314 in 0 : vector<2x128xf32>, vector<2x128xf32> -> vector<4x128xf32>
    %316 = vector.extract_strided_slice %315 {offsets = [0, 0], sizes = [4, 32], strides = [1, 1]} : vector<4x128xf32> to vector<4x32xf32>
    %317 = arith.negf %316 : vector<4x32xf32>
    %318 = math.exp %317 : vector<4x32xf32>
    %cst_105 = arith.constant 1.000000e+00 : f32
    %319 = vector.broadcast %cst_105 : f32 to vector<4x32xf32>
    %320 = arith.addf %319, %318 : vector<4x32xf32>
    %321 = arith.divf %319, %320 : vector<4x32xf32>
    %322 = vector.extract_strided_slice %315 {offsets = [0, 32], sizes = [4, 32], strides = [1, 1]} : vector<4x128xf32> to vector<4x32xf32>
    %323 = arith.negf %322 : vector<4x32xf32>
    %324 = math.exp %323 : vector<4x32xf32>
    %cst_106 = arith.constant 1.000000e+00 : f32
    %325 = vector.broadcast %cst_106 : f32 to vector<4x32xf32>
    %326 = arith.addf %325, %324 : vector<4x32xf32>
    %327 = arith.divf %325, %326 : vector<4x32xf32>
    %328 = vector.extract_strided_slice %315 {offsets = [0, 64], sizes = [4, 32], strides = [1, 1]} : vector<4x128xf32> to vector<4x32xf32>
    %329 = math.tanh %328 : vector<4x32xf32>
    %330 = vector.extract_strided_slice %315 {offsets = [0, 96], sizes = [4, 32], strides = [1, 1]} : vector<4x128xf32> to vector<4x32xf32>
    %331 = arith.negf %330 : vector<4x32xf32>
    %332 = math.exp %331 : vector<4x32xf32>
    %cst_107 = arith.constant 1.000000e+00 : f32
    %333 = vector.broadcast %cst_107 : f32 to vector<4x32xf32>
    %334 = arith.addf %333, %332 : vector<4x32xf32>
    %335 = arith.divf %333, %334 : vector<4x32xf32>
    %336 = arith.mulf %327, %303 : vector<4x32xf32>
    %337 = arith.mulf %321, %329 : vector<4x32xf32>
    %338 = arith.addf %336, %337 : vector<4x32xf32>
    %339 = math.tanh %338 : vector<4x32xf32>
    %340 = arith.mulf %335, %339 : vector<4x32xf32>
    %341 = vector.extract_strided_slice %340 {offsets = [0, 0], sizes = [2, 32], strides = [1, 1]} : vector<4x32xf32> to vector<2x32xf32>
    %342 = vector.extract_strided_slice %340 {offsets = [2, 0], sizes = [2, 32], strides = [1, 1]} : vector<4x32xf32> to vector<2x32xf32>
    %343 = vector.extract_strided_slice %109 {offsets = [14, 0], sizes = [2, 128], strides = [1, 1]} : vector<16x256xf32> to vector<2x128xf32>
    %344 = vector.extract_strided_slice %109 {offsets = [0, 128], sizes = [2, 128], strides = [1, 1]} : vector<16x256xf32> to vector<2x128xf32>
    %cst_108 = arith.constant dense<0.000000e+00> : vector<4x256xf32>
    %345 = tpu.matmul %340, %110, %cst_108 {dimension_numbers = #tpu.dot_dimension_numbers<[1], [0], [0], [1], [0, 0, 1, 1], [], []>} : vector<4x32xf32>, vector<32x256xf32>, vector<4x256xf32> -> vector<4x256xf32>
    %346 = vector.extract_strided_slice %345 {offsets = [0, 0], sizes = [2, 128], strides = [1, 1]} : vector<4x256xf32> to vector<2x128xf32>
    %347 = arith.addf %343, %346 : vector<2x128xf32>
    %348 = vector.extract_strided_slice %345 {offsets = [2, 128], sizes = [2, 128], strides = [1, 1]} : vector<4x256xf32> to vector<2x128xf32>
    %349 = arith.addf %344, %348 : vector<2x128xf32>
    %350 = tpu.concatenate %347, %349 in 0 : vector<2x128xf32>, vector<2x128xf32> -> vector<4x128xf32>
    %351 = vector.extract_strided_slice %350 {offsets = [0, 0], sizes = [4, 32], strides = [1, 1]} : vector<4x128xf32> to vector<4x32xf32>
    %352 = arith.negf %351 : vector<4x32xf32>
    %353 = math.exp %352 : vector<4x32xf32>
    %cst_109 = arith.constant 1.000000e+00 : f32
    %354 = vector.broadcast %cst_109 : f32 to vector<4x32xf32>
    %355 = arith.addf %354, %353 : vector<4x32xf32>
    %356 = arith.divf %354, %355 : vector<4x32xf32>
    %357 = vector.extract_strided_slice %350 {offsets = [0, 32], sizes = [4, 32], strides = [1, 1]} : vector<4x128xf32> to vector<4x32xf32>
    %358 = arith.negf %357 : vector<4x32xf32>
    %359 = math.exp %358 : vector<4x32xf32>
    %cst_110 = arith.constant 1.000000e+00 : f32
    %360 = vector.broadcast %cst_110 : f32 to vector<4x32xf32>
    %361 = arith.addf %360, %359 : vector<4x32xf32>
    %362 = arith.divf %360, %361 : vector<4x32xf32>
    %363 = vector.extract_strided_slice %350 {offsets = [0, 64], sizes = [4, 32], strides = [1, 1]} : vector<4x128xf32> to vector<4x32xf32>
    %364 = math.tanh %363 : vector<4x32xf32>
    %365 = vector.extract_strided_slice %350 {offsets = [0, 96], sizes = [4, 32], strides = [1, 1]} : vector<4x128xf32> to vector<4x32xf32>
    %366 = arith.negf %365 : vector<4x32xf32>
    %367 = math.exp %366 : vector<4x32xf32>
    %cst_111 = arith.constant 1.000000e+00 : f32
    %368 = vector.broadcast %cst_111 : f32 to vector<4x32xf32>
    %369 = arith.addf %368, %367 : vector<4x32xf32>
    %370 = arith.divf %368, %369 : vector<4x32xf32>
    %371 = arith.mulf %362, %338 : vector<4x32xf32>
    %372 = arith.mulf %356, %364 : vector<4x32xf32>
    %373 = arith.addf %371, %372 : vector<4x32xf32>
    %374 = math.tanh %373 : vector<4x32xf32>
    %375 = arith.mulf %370, %374 : vector<4x32xf32>
    %376 = vector.extract_strided_slice %375 {offsets = [0, 0], sizes = [2, 32], strides = [1, 1]} : vector<4x32xf32> to vector<2x32xf32>
    %377 = vector.extract_strided_slice %375 {offsets = [2, 0], sizes = [2, 32], strides = [1, 1]} : vector<4x32xf32> to vector<2x32xf32>
    %378 = tpu.concatenate %131, %166, %201, %236, %271, %306, %341, %376 in 0 : vector<2x32xf32>, vector<2x32xf32>, vector<2x32xf32>, vector<2x32xf32>, vector<2x32xf32>, vector<2x32xf32>, vector<2x32xf32>, vector<2x32xf32> -> vector<16x32xf32>
    %379 = tpu.concatenate %377, %342, %307, %272, %237, %202, %167, %132 in 0 : vector<2x32xf32>, vector<2x32xf32>, vector<2x32xf32>, vector<2x32xf32>, vector<2x32xf32>, vector<2x32xf32>, vector<2x32xf32>, vector<2x32xf32> -> vector<16x32xf32>
    %c0_112 = arith.constant 0 : index
    %c0_113 = arith.constant 0 : index
    %380 = vector.load %arg12[%c0_112, %c0_113] : memref<64x256xf32, #tpu.memory_space<vmem>>, vector<64x256xf32>
    %381 = vector.extract_strided_slice %380 {offsets = [0, 0], sizes = [32, 256], strides = [1, 1]} : vector<64x256xf32> to vector<32x256xf32>
    %cst_114 = arith.constant dense<0.000000e+00> : vector<16x256xf32>
    %382 = tpu.matmul %378, %381, %cst_114 {dimension_numbers = #tpu.dot_dimension_numbers<[1], [0], [0], [1], [0, 0, 1, 1], [], []>} : vector<16x32xf32>, vector<32x256xf32>, vector<16x256xf32> -> vector<16x256xf32>
    %383 = vector.extract_strided_slice %380 {offsets = [32, 0], sizes = [32, 256], strides = [1, 1]} : vector<64x256xf32> to vector<32x256xf32>
    %cst_115 = arith.constant dense<0.000000e+00> : vector<16x256xf32>
    %384 = tpu.matmul %379, %383, %cst_115 {dimension_numbers = #tpu.dot_dimension_numbers<[1], [0], [0], [1], [0, 0, 1, 1], [], []>} : vector<16x32xf32>, vector<32x256xf32>, vector<16x256xf32> -> vector<16x256xf32>
    %385 = arith.addf %382, %384 : vector<16x256xf32>
    %c0_116 = arith.constant 0 : index
    %c0_117 = arith.constant 0 : index
    %386 = vector.load %arg14[%c0_116, %c0_117] : memref<1x256xf32, #tpu.memory_space<vmem>>, vector<1x256xf32>
    %387 = vector.broadcast %386 : vector<1x256xf32> to vector<16x256xf32>
    %388 = arith.addf %385, %387 : vector<16x256xf32>
    %c0_118 = arith.constant 0 : index
    %c0_119 = arith.constant 0 : index
    %389 = vector.load %arg13[%c0_118, %c0_119] : memref<32x256xf32, #tpu.memory_space<vmem>>, vector<32x256xf32>
    %390 = vector.extract_strided_slice %388 {offsets = [0, 0], sizes = [2, 128], strides = [1, 1]} : vector<16x256xf32> to vector<2x128xf32>
    %391 = vector.extract_strided_slice %388 {offsets = [14, 128], sizes = [2, 128], strides = [1, 1]} : vector<16x256xf32> to vector<2x128xf32>
    %392 = tpu.concatenate %390, %391 in 0 : vector<2x128xf32>, vector<2x128xf32> -> vector<4x128xf32>
    %393 = vector.extract_strided_slice %392 {offsets = [0, 0], sizes = [4, 32], strides = [1, 1]} : vector<4x128xf32> to vector<4x32xf32>
    %394 = arith.negf %393 : vector<4x32xf32>
    %395 = math.exp %394 : vector<4x32xf32>
    %cst_120 = arith.constant 1.000000e+00 : f32
    %396 = vector.broadcast %cst_120 : f32 to vector<4x32xf32>
    %397 = arith.addf %396, %395 : vector<4x32xf32>
    %398 = arith.divf %396, %397 : vector<4x32xf32>
    %399 = vector.extract_strided_slice %392 {offsets = [0, 64], sizes = [4, 32], strides = [1, 1]} : vector<4x128xf32> to vector<4x32xf32>
    %400 = math.tanh %399 : vector<4x32xf32>
    %401 = vector.extract_strided_slice %392 {offsets = [0, 96], sizes = [4, 32], strides = [1, 1]} : vector<4x128xf32> to vector<4x32xf32>
    %402 = arith.negf %401 : vector<4x32xf32>
    %403 = math.exp %402 : vector<4x32xf32>
    %cst_121 = arith.constant 1.000000e+00 : f32
    %404 = vector.broadcast %cst_121 : f32 to vector<4x32xf32>
    %405 = arith.addf %404, %403 : vector<4x32xf32>
    %406 = arith.divf %404, %405 : vector<4x32xf32>
    %407 = arith.mulf %398, %400 : vector<4x32xf32>
    %408 = math.tanh %407 : vector<4x32xf32>
    %409 = arith.mulf %406, %408 : vector<4x32xf32>
    %410 = vector.extract_strided_slice %388 {offsets = [2, 0], sizes = [2, 128], strides = [1, 1]} : vector<16x256xf32> to vector<2x128xf32>
    %411 = vector.extract_strided_slice %388 {offsets = [12, 128], sizes = [2, 128], strides = [1, 1]} : vector<16x256xf32> to vector<2x128xf32>
    %cst_122 = arith.constant dense<0.000000e+00> : vector<4x256xf32>
    %412 = tpu.matmul %409, %389, %cst_122 {dimension_numbers = #tpu.dot_dimension_numbers<[1], [0], [0], [1], [0, 0, 1, 1], [], []>} : vector<4x32xf32>, vector<32x256xf32>, vector<4x256xf32> -> vector<4x256xf32>
    %413 = vector.extract_strided_slice %412 {offsets = [0, 0], sizes = [2, 128], strides = [1, 1]} : vector<4x256xf32> to vector<2x128xf32>
    %414 = arith.addf %410, %413 : vector<2x128xf32>
    %415 = vector.extract_strided_slice %412 {offsets = [2, 128], sizes = [2, 128], strides = [1, 1]} : vector<4x256xf32> to vector<2x128xf32>
    %416 = arith.addf %411, %415 : vector<2x128xf32>
    %417 = tpu.concatenate %414, %416 in 0 : vector<2x128xf32>, vector<2x128xf32> -> vector<4x128xf32>
    %418 = vector.extract_strided_slice %417 {offsets = [0, 0], sizes = [4, 32], strides = [1, 1]} : vector<4x128xf32> to vector<4x32xf32>
    %419 = arith.negf %418 : vector<4x32xf32>
    %420 = math.exp %419 : vector<4x32xf32>
    %cst_123 = arith.constant 1.000000e+00 : f32
    %421 = vector.broadcast %cst_123 : f32 to vector<4x32xf32>
    %422 = arith.addf %421, %420 : vector<4x32xf32>
    %423 = arith.divf %421, %422 : vector<4x32xf32>
    %424 = vector.extract_strided_slice %417 {offsets = [0, 32], sizes = [4, 32], strides = [1, 1]} : vector<4x128xf32> to vector<4x32xf32>
    %425 = arith.negf %424 : vector<4x32xf32>
    %426 = math.exp %425 : vector<4x32xf32>
    %cst_124 = arith.constant 1.000000e+00 : f32
    %427 = vector.broadcast %cst_124 : f32 to vector<4x32xf32>
    %428 = arith.addf %427, %426 : vector<4x32xf32>
    %429 = arith.divf %427, %428 : vector<4x32xf32>
    %430 = vector.extract_strided_slice %417 {offsets = [0, 64], sizes = [4, 32], strides = [1, 1]} : vector<4x128xf32> to vector<4x32xf32>
    %431 = math.tanh %430 : vector<4x32xf32>
    %432 = vector.extract_strided_slice %417 {offsets = [0, 96], sizes = [4, 32], strides = [1, 1]} : vector<4x128xf32> to vector<4x32xf32>
    %433 = arith.negf %432 : vector<4x32xf32>
    %434 = math.exp %433 : vector<4x32xf32>
    %cst_125 = arith.constant 1.000000e+00 : f32
    %435 = vector.broadcast %cst_125 : f32 to vector<4x32xf32>
    %436 = arith.addf %435, %434 : vector<4x32xf32>
    %437 = arith.divf %435, %436 : vector<4x32xf32>
    %438 = arith.mulf %429, %407 : vector<4x32xf32>
    %439 = arith.mulf %423, %431 : vector<4x32xf32>
    %440 = arith.addf %438, %439 : vector<4x32xf32>
    %441 = math.tanh %440 : vector<4x32xf32>
    %442 = arith.mulf %437, %441 : vector<4x32xf32>
    %443 = vector.extract_strided_slice %388 {offsets = [4, 0], sizes = [2, 128], strides = [1, 1]} : vector<16x256xf32> to vector<2x128xf32>
    %444 = vector.extract_strided_slice %388 {offsets = [10, 128], sizes = [2, 128], strides = [1, 1]} : vector<16x256xf32> to vector<2x128xf32>
    %cst_126 = arith.constant dense<0.000000e+00> : vector<4x256xf32>
    %445 = tpu.matmul %442, %389, %cst_126 {dimension_numbers = #tpu.dot_dimension_numbers<[1], [0], [0], [1], [0, 0, 1, 1], [], []>} : vector<4x32xf32>, vector<32x256xf32>, vector<4x256xf32> -> vector<4x256xf32>
    %446 = vector.extract_strided_slice %445 {offsets = [0, 0], sizes = [2, 128], strides = [1, 1]} : vector<4x256xf32> to vector<2x128xf32>
    %447 = arith.addf %443, %446 : vector<2x128xf32>
    %448 = vector.extract_strided_slice %445 {offsets = [2, 128], sizes = [2, 128], strides = [1, 1]} : vector<4x256xf32> to vector<2x128xf32>
    %449 = arith.addf %444, %448 : vector<2x128xf32>
    %450 = tpu.concatenate %447, %449 in 0 : vector<2x128xf32>, vector<2x128xf32> -> vector<4x128xf32>
    %451 = vector.extract_strided_slice %450 {offsets = [0, 0], sizes = [4, 32], strides = [1, 1]} : vector<4x128xf32> to vector<4x32xf32>
    %452 = arith.negf %451 : vector<4x32xf32>
    %453 = math.exp %452 : vector<4x32xf32>
    %cst_127 = arith.constant 1.000000e+00 : f32
    %454 = vector.broadcast %cst_127 : f32 to vector<4x32xf32>
    %455 = arith.addf %454, %453 : vector<4x32xf32>
    %456 = arith.divf %454, %455 : vector<4x32xf32>
    %457 = vector.extract_strided_slice %450 {offsets = [0, 32], sizes = [4, 32], strides = [1, 1]} : vector<4x128xf32> to vector<4x32xf32>
    %458 = arith.negf %457 : vector<4x32xf32>
    %459 = math.exp %458 : vector<4x32xf32>
    %cst_128 = arith.constant 1.000000e+00 : f32
    %460 = vector.broadcast %cst_128 : f32 to vector<4x32xf32>
    %461 = arith.addf %460, %459 : vector<4x32xf32>
    %462 = arith.divf %460, %461 : vector<4x32xf32>
    %463 = vector.extract_strided_slice %450 {offsets = [0, 64], sizes = [4, 32], strides = [1, 1]} : vector<4x128xf32> to vector<4x32xf32>
    %464 = math.tanh %463 : vector<4x32xf32>
    %465 = vector.extract_strided_slice %450 {offsets = [0, 96], sizes = [4, 32], strides = [1, 1]} : vector<4x128xf32> to vector<4x32xf32>
    %466 = arith.negf %465 : vector<4x32xf32>
    %467 = math.exp %466 : vector<4x32xf32>
    %cst_129 = arith.constant 1.000000e+00 : f32
    %468 = vector.broadcast %cst_129 : f32 to vector<4x32xf32>
    %469 = arith.addf %468, %467 : vector<4x32xf32>
    %470 = arith.divf %468, %469 : vector<4x32xf32>
    %471 = arith.mulf %462, %440 : vector<4x32xf32>
    %472 = arith.mulf %456, %464 : vector<4x32xf32>
    %473 = arith.addf %471, %472 : vector<4x32xf32>
    %474 = math.tanh %473 : vector<4x32xf32>
    %475 = arith.mulf %470, %474 : vector<4x32xf32>
    %476 = vector.extract_strided_slice %388 {offsets = [6, 0], sizes = [2, 128], strides = [1, 1]} : vector<16x256xf32> to vector<2x128xf32>
    %477 = vector.extract_strided_slice %388 {offsets = [8, 128], sizes = [2, 128], strides = [1, 1]} : vector<16x256xf32> to vector<2x128xf32>
    %cst_130 = arith.constant dense<0.000000e+00> : vector<4x256xf32>
    %478 = tpu.matmul %475, %389, %cst_130 {dimension_numbers = #tpu.dot_dimension_numbers<[1], [0], [0], [1], [0, 0, 1, 1], [], []>} : vector<4x32xf32>, vector<32x256xf32>, vector<4x256xf32> -> vector<4x256xf32>
    %479 = vector.extract_strided_slice %478 {offsets = [0, 0], sizes = [2, 128], strides = [1, 1]} : vector<4x256xf32> to vector<2x128xf32>
    %480 = arith.addf %476, %479 : vector<2x128xf32>
    %481 = vector.extract_strided_slice %478 {offsets = [2, 128], sizes = [2, 128], strides = [1, 1]} : vector<4x256xf32> to vector<2x128xf32>
    %482 = arith.addf %477, %481 : vector<2x128xf32>
    %483 = tpu.concatenate %480, %482 in 0 : vector<2x128xf32>, vector<2x128xf32> -> vector<4x128xf32>
    %484 = vector.extract_strided_slice %483 {offsets = [0, 0], sizes = [4, 32], strides = [1, 1]} : vector<4x128xf32> to vector<4x32xf32>
    %485 = arith.negf %484 : vector<4x32xf32>
    %486 = math.exp %485 : vector<4x32xf32>
    %cst_131 = arith.constant 1.000000e+00 : f32
    %487 = vector.broadcast %cst_131 : f32 to vector<4x32xf32>
    %488 = arith.addf %487, %486 : vector<4x32xf32>
    %489 = arith.divf %487, %488 : vector<4x32xf32>
    %490 = vector.extract_strided_slice %483 {offsets = [0, 32], sizes = [4, 32], strides = [1, 1]} : vector<4x128xf32> to vector<4x32xf32>
    %491 = arith.negf %490 : vector<4x32xf32>
    %492 = math.exp %491 : vector<4x32xf32>
    %cst_132 = arith.constant 1.000000e+00 : f32
    %493 = vector.broadcast %cst_132 : f32 to vector<4x32xf32>
    %494 = arith.addf %493, %492 : vector<4x32xf32>
    %495 = arith.divf %493, %494 : vector<4x32xf32>
    %496 = vector.extract_strided_slice %483 {offsets = [0, 64], sizes = [4, 32], strides = [1, 1]} : vector<4x128xf32> to vector<4x32xf32>
    %497 = math.tanh %496 : vector<4x32xf32>
    %498 = vector.extract_strided_slice %483 {offsets = [0, 96], sizes = [4, 32], strides = [1, 1]} : vector<4x128xf32> to vector<4x32xf32>
    %499 = arith.negf %498 : vector<4x32xf32>
    %500 = math.exp %499 : vector<4x32xf32>
    %cst_133 = arith.constant 1.000000e+00 : f32
    %501 = vector.broadcast %cst_133 : f32 to vector<4x32xf32>
    %502 = arith.addf %501, %500 : vector<4x32xf32>
    %503 = arith.divf %501, %502 : vector<4x32xf32>
    %504 = arith.mulf %495, %473 : vector<4x32xf32>
    %505 = arith.mulf %489, %497 : vector<4x32xf32>
    %506 = arith.addf %504, %505 : vector<4x32xf32>
    %507 = math.tanh %506 : vector<4x32xf32>
    %508 = arith.mulf %503, %507 : vector<4x32xf32>
    %509 = vector.extract_strided_slice %388 {offsets = [8, 0], sizes = [2, 128], strides = [1, 1]} : vector<16x256xf32> to vector<2x128xf32>
    %510 = vector.extract_strided_slice %388 {offsets = [6, 128], sizes = [2, 128], strides = [1, 1]} : vector<16x256xf32> to vector<2x128xf32>
    %cst_134 = arith.constant dense<0.000000e+00> : vector<4x256xf32>
    %511 = tpu.matmul %508, %389, %cst_134 {dimension_numbers = #tpu.dot_dimension_numbers<[1], [0], [0], [1], [0, 0, 1, 1], [], []>} : vector<4x32xf32>, vector<32x256xf32>, vector<4x256xf32> -> vector<4x256xf32>
    %512 = vector.extract_strided_slice %511 {offsets = [0, 0], sizes = [2, 128], strides = [1, 1]} : vector<4x256xf32> to vector<2x128xf32>
    %513 = arith.addf %509, %512 : vector<2x128xf32>
    %514 = vector.extract_strided_slice %511 {offsets = [2, 128], sizes = [2, 128], strides = [1, 1]} : vector<4x256xf32> to vector<2x128xf32>
    %515 = arith.addf %510, %514 : vector<2x128xf32>
    %516 = tpu.concatenate %513, %515 in 0 : vector<2x128xf32>, vector<2x128xf32> -> vector<4x128xf32>
    %517 = vector.extract_strided_slice %516 {offsets = [0, 0], sizes = [4, 32], strides = [1, 1]} : vector<4x128xf32> to vector<4x32xf32>
    %518 = arith.negf %517 : vector<4x32xf32>
    %519 = math.exp %518 : vector<4x32xf32>
    %cst_135 = arith.constant 1.000000e+00 : f32
    %520 = vector.broadcast %cst_135 : f32 to vector<4x32xf32>
    %521 = arith.addf %520, %519 : vector<4x32xf32>
    %522 = arith.divf %520, %521 : vector<4x32xf32>
    %523 = vector.extract_strided_slice %516 {offsets = [0, 32], sizes = [4, 32], strides = [1, 1]} : vector<4x128xf32> to vector<4x32xf32>
    %524 = arith.negf %523 : vector<4x32xf32>
    %525 = math.exp %524 : vector<4x32xf32>
    %cst_136 = arith.constant 1.000000e+00 : f32
    %526 = vector.broadcast %cst_136 : f32 to vector<4x32xf32>
    %527 = arith.addf %526, %525 : vector<4x32xf32>
    %528 = arith.divf %526, %527 : vector<4x32xf32>
    %529 = vector.extract_strided_slice %516 {offsets = [0, 64], sizes = [4, 32], strides = [1, 1]} : vector<4x128xf32> to vector<4x32xf32>
    %530 = math.tanh %529 : vector<4x32xf32>
    %531 = vector.extract_strided_slice %516 {offsets = [0, 96], sizes = [4, 32], strides = [1, 1]} : vector<4x128xf32> to vector<4x32xf32>
    %532 = arith.negf %531 : vector<4x32xf32>
    %533 = math.exp %532 : vector<4x32xf32>
    %cst_137 = arith.constant 1.000000e+00 : f32
    %534 = vector.broadcast %cst_137 : f32 to vector<4x32xf32>
    %535 = arith.addf %534, %533 : vector<4x32xf32>
    %536 = arith.divf %534, %535 : vector<4x32xf32>
    %537 = arith.mulf %528, %506 : vector<4x32xf32>
    %538 = arith.mulf %522, %530 : vector<4x32xf32>
    %539 = arith.addf %537, %538 : vector<4x32xf32>
    %540 = math.tanh %539 : vector<4x32xf32>
    %541 = arith.mulf %536, %540 : vector<4x32xf32>
    %542 = vector.extract_strided_slice %388 {offsets = [10, 0], sizes = [2, 128], strides = [1, 1]} : vector<16x256xf32> to vector<2x128xf32>
    %543 = vector.extract_strided_slice %388 {offsets = [4, 128], sizes = [2, 128], strides = [1, 1]} : vector<16x256xf32> to vector<2x128xf32>
    %cst_138 = arith.constant dense<0.000000e+00> : vector<4x256xf32>
    %544 = tpu.matmul %541, %389, %cst_138 {dimension_numbers = #tpu.dot_dimension_numbers<[1], [0], [0], [1], [0, 0, 1, 1], [], []>} : vector<4x32xf32>, vector<32x256xf32>, vector<4x256xf32> -> vector<4x256xf32>
    %545 = vector.extract_strided_slice %544 {offsets = [0, 0], sizes = [2, 128], strides = [1, 1]} : vector<4x256xf32> to vector<2x128xf32>
    %546 = arith.addf %542, %545 : vector<2x128xf32>
    %547 = vector.extract_strided_slice %544 {offsets = [2, 128], sizes = [2, 128], strides = [1, 1]} : vector<4x256xf32> to vector<2x128xf32>
    %548 = arith.addf %543, %547 : vector<2x128xf32>
    %549 = tpu.concatenate %546, %548 in 0 : vector<2x128xf32>, vector<2x128xf32> -> vector<4x128xf32>
    %550 = vector.extract_strided_slice %549 {offsets = [0, 0], sizes = [4, 32], strides = [1, 1]} : vector<4x128xf32> to vector<4x32xf32>
    %551 = arith.negf %550 : vector<4x32xf32>
    %552 = math.exp %551 : vector<4x32xf32>
    %cst_139 = arith.constant 1.000000e+00 : f32
    %553 = vector.broadcast %cst_139 : f32 to vector<4x32xf32>
    %554 = arith.addf %553, %552 : vector<4x32xf32>
    %555 = arith.divf %553, %554 : vector<4x32xf32>
    %556 = vector.extract_strided_slice %549 {offsets = [0, 32], sizes = [4, 32], strides = [1, 1]} : vector<4x128xf32> to vector<4x32xf32>
    %557 = arith.negf %556 : vector<4x32xf32>
    %558 = math.exp %557 : vector<4x32xf32>
    %cst_140 = arith.constant 1.000000e+00 : f32
    %559 = vector.broadcast %cst_140 : f32 to vector<4x32xf32>
    %560 = arith.addf %559, %558 : vector<4x32xf32>
    %561 = arith.divf %559, %560 : vector<4x32xf32>
    %562 = vector.extract_strided_slice %549 {offsets = [0, 64], sizes = [4, 32], strides = [1, 1]} : vector<4x128xf32> to vector<4x32xf32>
    %563 = math.tanh %562 : vector<4x32xf32>
    %564 = vector.extract_strided_slice %549 {offsets = [0, 96], sizes = [4, 32], strides = [1, 1]} : vector<4x128xf32> to vector<4x32xf32>
    %565 = arith.negf %564 : vector<4x32xf32>
    %566 = math.exp %565 : vector<4x32xf32>
    %cst_141 = arith.constant 1.000000e+00 : f32
    %567 = vector.broadcast %cst_141 : f32 to vector<4x32xf32>
    %568 = arith.addf %567, %566 : vector<4x32xf32>
    %569 = arith.divf %567, %568 : vector<4x32xf32>
    %570 = arith.mulf %561, %539 : vector<4x32xf32>
    %571 = arith.mulf %555, %563 : vector<4x32xf32>
    %572 = arith.addf %570, %571 : vector<4x32xf32>
    %573 = math.tanh %572 : vector<4x32xf32>
    %574 = arith.mulf %569, %573 : vector<4x32xf32>
    %575 = vector.extract_strided_slice %388 {offsets = [12, 0], sizes = [2, 128], strides = [1, 1]} : vector<16x256xf32> to vector<2x128xf32>
    %576 = vector.extract_strided_slice %388 {offsets = [2, 128], sizes = [2, 128], strides = [1, 1]} : vector<16x256xf32> to vector<2x128xf32>
    %cst_142 = arith.constant dense<0.000000e+00> : vector<4x256xf32>
    %577 = tpu.matmul %574, %389, %cst_142 {dimension_numbers = #tpu.dot_dimension_numbers<[1], [0], [0], [1], [0, 0, 1, 1], [], []>} : vector<4x32xf32>, vector<32x256xf32>, vector<4x256xf32> -> vector<4x256xf32>
    %578 = vector.extract_strided_slice %577 {offsets = [0, 0], sizes = [2, 128], strides = [1, 1]} : vector<4x256xf32> to vector<2x128xf32>
    %579 = arith.addf %575, %578 : vector<2x128xf32>
    %580 = vector.extract_strided_slice %577 {offsets = [2, 128], sizes = [2, 128], strides = [1, 1]} : vector<4x256xf32> to vector<2x128xf32>
    %581 = arith.addf %576, %580 : vector<2x128xf32>
    %582 = tpu.concatenate %579, %581 in 0 : vector<2x128xf32>, vector<2x128xf32> -> vector<4x128xf32>
    %583 = vector.extract_strided_slice %582 {offsets = [0, 0], sizes = [4, 32], strides = [1, 1]} : vector<4x128xf32> to vector<4x32xf32>
    %584 = arith.negf %583 : vector<4x32xf32>
    %585 = math.exp %584 : vector<4x32xf32>
    %cst_143 = arith.constant 1.000000e+00 : f32
    %586 = vector.broadcast %cst_143 : f32 to vector<4x32xf32>
    %587 = arith.addf %586, %585 : vector<4x32xf32>
    %588 = arith.divf %586, %587 : vector<4x32xf32>
    %589 = vector.extract_strided_slice %582 {offsets = [0, 32], sizes = [4, 32], strides = [1, 1]} : vector<4x128xf32> to vector<4x32xf32>
    %590 = arith.negf %589 : vector<4x32xf32>
    %591 = math.exp %590 : vector<4x32xf32>
    %cst_144 = arith.constant 1.000000e+00 : f32
    %592 = vector.broadcast %cst_144 : f32 to vector<4x32xf32>
    %593 = arith.addf %592, %591 : vector<4x32xf32>
    %594 = arith.divf %592, %593 : vector<4x32xf32>
    %595 = vector.extract_strided_slice %582 {offsets = [0, 64], sizes = [4, 32], strides = [1, 1]} : vector<4x128xf32> to vector<4x32xf32>
    %596 = math.tanh %595 : vector<4x32xf32>
    %597 = vector.extract_strided_slice %582 {offsets = [0, 96], sizes = [4, 32], strides = [1, 1]} : vector<4x128xf32> to vector<4x32xf32>
    %598 = arith.negf %597 : vector<4x32xf32>
    %599 = math.exp %598 : vector<4x32xf32>
    %cst_145 = arith.constant 1.000000e+00 : f32
    %600 = vector.broadcast %cst_145 : f32 to vector<4x32xf32>
    %601 = arith.addf %600, %599 : vector<4x32xf32>
    %602 = arith.divf %600, %601 : vector<4x32xf32>
    %603 = arith.mulf %594, %572 : vector<4x32xf32>
    %604 = arith.mulf %588, %596 : vector<4x32xf32>
    %605 = arith.addf %603, %604 : vector<4x32xf32>
    %606 = math.tanh %605 : vector<4x32xf32>
    %607 = arith.mulf %602, %606 : vector<4x32xf32>
    %608 = vector.extract_strided_slice %388 {offsets = [14, 0], sizes = [2, 128], strides = [1, 1]} : vector<16x256xf32> to vector<2x128xf32>
    %609 = vector.extract_strided_slice %388 {offsets = [0, 128], sizes = [2, 128], strides = [1, 1]} : vector<16x256xf32> to vector<2x128xf32>
    %cst_146 = arith.constant dense<0.000000e+00> : vector<4x256xf32>
    %610 = tpu.matmul %607, %389, %cst_146 {dimension_numbers = #tpu.dot_dimension_numbers<[1], [0], [0], [1], [0, 0, 1, 1], [], []>} : vector<4x32xf32>, vector<32x256xf32>, vector<4x256xf32> -> vector<4x256xf32>
    %611 = vector.extract_strided_slice %610 {offsets = [0, 0], sizes = [2, 128], strides = [1, 1]} : vector<4x256xf32> to vector<2x128xf32>
    %612 = arith.addf %608, %611 : vector<2x128xf32>
    %613 = vector.extract_strided_slice %610 {offsets = [2, 128], sizes = [2, 128], strides = [1, 1]} : vector<4x256xf32> to vector<2x128xf32>
    %614 = arith.addf %609, %613 : vector<2x128xf32>
    %615 = tpu.concatenate %612, %614 in 0 : vector<2x128xf32>, vector<2x128xf32> -> vector<4x128xf32>
    %616 = vector.extract_strided_slice %615 {offsets = [0, 0], sizes = [4, 32], strides = [1, 1]} : vector<4x128xf32> to vector<4x32xf32>
    %617 = arith.negf %616 : vector<4x32xf32>
    %618 = math.exp %617 : vector<4x32xf32>
    %cst_147 = arith.constant 1.000000e+00 : f32
    %619 = vector.broadcast %cst_147 : f32 to vector<4x32xf32>
    %620 = arith.addf %619, %618 : vector<4x32xf32>
    %621 = arith.divf %619, %620 : vector<4x32xf32>
    %622 = vector.extract_strided_slice %615 {offsets = [0, 32], sizes = [4, 32], strides = [1, 1]} : vector<4x128xf32> to vector<4x32xf32>
    %623 = arith.negf %622 : vector<4x32xf32>
    %624 = math.exp %623 : vector<4x32xf32>
    %cst_148 = arith.constant 1.000000e+00 : f32
    %625 = vector.broadcast %cst_148 : f32 to vector<4x32xf32>
    %626 = arith.addf %625, %624 : vector<4x32xf32>
    %627 = arith.divf %625, %626 : vector<4x32xf32>
    %628 = vector.extract_strided_slice %615 {offsets = [0, 64], sizes = [4, 32], strides = [1, 1]} : vector<4x128xf32> to vector<4x32xf32>
    %629 = math.tanh %628 : vector<4x32xf32>
    %630 = vector.extract_strided_slice %615 {offsets = [0, 96], sizes = [4, 32], strides = [1, 1]} : vector<4x128xf32> to vector<4x32xf32>
    %631 = arith.negf %630 : vector<4x32xf32>
    %632 = math.exp %631 : vector<4x32xf32>
    %cst_149 = arith.constant 1.000000e+00 : f32
    %633 = vector.broadcast %cst_149 : f32 to vector<4x32xf32>
    %634 = arith.addf %633, %632 : vector<4x32xf32>
    %635 = arith.divf %633, %634 : vector<4x32xf32>
    %636 = arith.mulf %627, %605 : vector<4x32xf32>
    %637 = arith.mulf %621, %629 : vector<4x32xf32>
    %638 = arith.addf %636, %637 : vector<4x32xf32>
    %639 = math.tanh %638 : vector<4x32xf32>
    %640 = arith.mulf %635, %639 : vector<4x32xf32>
    %c0_150 = arith.constant 0 : index
    %c0_151 = arith.constant 0 : index
    %641 = vector.load %arg15[%c0_150, %c0_151] : memref<64x32xf32, #tpu.memory_space<vmem>>, vector<64x32xf32>
    %642 = vector.extract_strided_slice %640 {offsets = [0, 0], sizes = [2, 32], strides = [1, 1]} : vector<4x32xf32> to vector<2x32xf32>
    %643 = vector.extract_strided_slice %641 {offsets = [0, 0], sizes = [32, 32], strides = [1, 1]} : vector<64x32xf32> to vector<32x32xf32>
    %cst_152 = arith.constant dense<0.000000e+00> : vector<2x32xf32>
    %644 = tpu.matmul %642, %643, %cst_152 {dimension_numbers = #tpu.dot_dimension_numbers<[1], [0], [0], [1], [0, 0, 1, 1], [], []>} : vector<2x32xf32>, vector<32x32xf32>, vector<2x32xf32> -> vector<2x32xf32>
    %645 = vector.extract_strided_slice %640 {offsets = [2, 0], sizes = [2, 32], strides = [1, 1]} : vector<4x32xf32> to vector<2x32xf32>
    %646 = vector.extract_strided_slice %641 {offsets = [32, 0], sizes = [32, 32], strides = [1, 1]} : vector<64x32xf32> to vector<32x32xf32>
    %cst_153 = arith.constant dense<0.000000e+00> : vector<2x32xf32>
    %647 = tpu.matmul %645, %646, %cst_153 {dimension_numbers = #tpu.dot_dimension_numbers<[1], [0], [0], [1], [0, 0, 1, 1], [], []>} : vector<2x32xf32>, vector<32x32xf32>, vector<2x32xf32> -> vector<2x32xf32>
    %648 = arith.addf %644, %647 : vector<2x32xf32>
    %c0_154 = arith.constant 0 : index
    %c0_155 = arith.constant 0 : index
    %649 = vector.load %arg16[%c0_154, %c0_155] : memref<1x32xf32, #tpu.memory_space<vmem>>, vector<1x32xf32>
    %650 = vector.broadcast %649 : vector<1x32xf32> to vector<2x32xf32>
    %651 = arith.addf %648, %650 : vector<2x32xf32>
    %cst_156 = arith.constant 0.000000e+00 : f32
    %652 = vector.broadcast %cst_156 : f32 to vector<2x32xf32>
    %653 = arith.maximumf %651, %652 : vector<2x32xf32>
    %c0_157 = arith.constant 0 : index
    %c0_158 = arith.constant 0 : index
    %654 = vector.load %arg17[%c0_157, %c0_158] : memref<64x16xf32, #tpu.memory_space<vmem>>, vector<64x16xf32>
    %655 = vector.extract_strided_slice %654 {offsets = [0, 0], sizes = [32, 16], strides = [1, 1]} : vector<64x16xf32> to vector<32x16xf32>
    %cst_159 = arith.constant dense<0.000000e+00> : vector<2x16xf32>
    %656 = tpu.matmul %103, %655, %cst_159 {dimension_numbers = #tpu.dot_dimension_numbers<[1], [0], [0], [1], [0, 0, 1, 1], [], []>} : vector<2x32xf32>, vector<32x16xf32>, vector<2x16xf32> -> vector<2x16xf32>
    %657 = vector.extract_strided_slice %654 {offsets = [32, 0], sizes = [32, 16], strides = [1, 1]} : vector<64x16xf32> to vector<32x16xf32>
    %cst_160 = arith.constant dense<0.000000e+00> : vector<2x16xf32>
    %658 = tpu.matmul %653, %657, %cst_160 {dimension_numbers = #tpu.dot_dimension_numbers<[1], [0], [0], [1], [0, 0, 1, 1], [], []>} : vector<2x32xf32>, vector<32x16xf32>, vector<2x16xf32> -> vector<2x16xf32>
    %659 = arith.addf %656, %658 : vector<2x16xf32>
    %c0_161 = arith.constant 0 : index
    %c0_162 = arith.constant 0 : index
    %660 = vector.load %arg18[%c0_161, %c0_162] : memref<1x16xf32, #tpu.memory_space<vmem>>, vector<1x16xf32>
    %661 = vector.broadcast %660 : vector<1x16xf32> to vector<2x16xf32>
    %662 = arith.addf %659, %661 : vector<2x16xf32>
    %cst_163 = arith.constant 0.000000e+00 : f32
    %663 = vector.broadcast %cst_163 : f32 to vector<2x16xf32>
    %664 = arith.maximumf %662, %663 : vector<2x16xf32>
    %c0_164 = arith.constant 0 : index
    %c0_165 = arith.constant 0 : index
    %665 = vector.load %arg19[%c0_164, %c0_165] : memref<16x16xf32, #tpu.memory_space<vmem>>, vector<16x16xf32>
    %cst_166 = arith.constant dense<0.000000e+00> : vector<2x16xf32>
    %666 = tpu.matmul %664, %665, %cst_166 {dimension_numbers = #tpu.dot_dimension_numbers<[1], [0], [0], [1], [0, 0, 1, 1], [], []>} : vector<2x16xf32>, vector<16x16xf32>, vector<2x16xf32> -> vector<2x16xf32>
    %c0_167 = arith.constant 0 : index
    %c0_168 = arith.constant 0 : index
    %667 = vector.load %arg20[%c0_167, %c0_168] : memref<1x16xf32, #tpu.memory_space<vmem>>, vector<1x16xf32>
    %668 = vector.broadcast %667 : vector<1x16xf32> to vector<2x16xf32>
    %669 = arith.addf %666, %668 : vector<2x16xf32>
    %c0_169 = arith.constant 0 : index
    %c0_170 = arith.constant 0 : index
    %670 = vector.load %arg21[%c0_169, %c0_170] : memref<2x16xf32, #tpu.memory_space<vmem>>, vector<2x16xf32>
    tpu.vector_store %arg21[%c0_169, %c0_170], %669 {strides = array<i32>} : memref<2x16xf32, #tpu.memory_space<vmem>>, vector<2x16xf32>,
    return
  }
}

</mosaic_0001>

<bundles_post_ra>
// kernel: cnn_lstm_forward.1
= control target key start
LH: loop header
LB: loop body
LE: loop exit
PB: predicated region body
PF: predicated region fallthrough
CT: control target
= control target key end

     0   :  { %s18684_s0 = inlined_call_operand.vmem [shape: f32[512,36], index: 0, kind: input, shape index: {}]   ;;  %s18685_s1 = inlined_call_operand.vmem [shape: f32[2,512], index: 1, kind: input, shape index: {}]   ;;  %s18686_s2 = inlined_call_operand.vmem [shape: f32[16,8], index: 2, kind: input, shape index: {}]   ;;  %s18687_s3 = inlined_call_operand.vmem [shape: f32[36,16], index: 3, kind: input, shape index: {}]   ;;  %s18688_s4 = inlined_call_operand.vmem [shape: f32[1,16], index: 4, kind: input, shape index: {}]   ;;  %s18689_s5 = inlined_call_operand.vmem [shape: f32[9,16,32], index: 5, kind: input, shape index: {}]   ;;  %s18690_s6 = inlined_call_operand.vmem [shape: f32[1,32], index: 6, kind: input, shape index: {}]   ;;  %s18691_s7 = inlined_call_operand.vmem [shape: f32[32,32], index: 7, kind: input, shape index: {}]   ;;  %s18692_s8 = inlined_call_operand.vmem [shape: f32[1,32], index: 8, kind: input, shape index: {}]   ;;  %s18693_s9 = inlined_call_operand.vmem [shape: f32[8,256], index: 9, kind: input, shape index: {}]   ;;  %s18694_s10 = inlined_call_operand.vmem [shape: f32[32,256], index: 10, kind: input, shape index: {}]   ;;  %s18695_s11 = inlined_call_operand.vmem [shape: f32[1,256], index: 11, kind: input, shape index: {}]   ;;  %s18696_s12 = inlined_call_operand.vmem [shape: f32[64,256], index: 12, kind: input, shape index: {}]   ;;  %s18697_s13 = inlined_call_operand.vmem [shape: f32[32,256], index: 13, kind: input, shape index: {}]   ;;  %s18698_s14 = inlined_call_operand.vmem [shape: f32[1,256], index: 14, kind: input, shape index: {}]   ;;  %s18699_s15 = inlined_call_operand.vmem [shape: f32[64,32], index: 15, kind: input, shape index: {}]   ;;  %s18700_s16 = inlined_call_operand.vmem [shape: f32[1,32], index: 16, kind: input, shape index: {}]   ;;  %s18701_s17 = inlined_call_operand.vmem [shape: f32[64,16], index: 17, kind: input, shape index: {}]   ;;  %s18702_s18 = inlined_call_operand.vmem [shape: f32[1,16], index: 18, kind: input, shape index: {}]   ;;  %s18703_s19 = inlined_call_operand.vmem [shape: f32[16,16], index: 19, kind: input, shape index: {}]   ;;  %s18704_s20 = inlined_call_operand.vmem [shape: f32[1,16], index: 20, kind: input, shape index: {}]   ;;  %s18705_s21 = inlined_call_operand.hbm [shape: f32[2,16], index: 21, kind: output, shape index: {}]  }
   0x1   :  { %18964 = sst [smem:[#allocation227_spill]] %s18684_s0 }
   0x2   :  { %18965 = sst [smem:[#allocation228_spill]] %s18685_s1 }
   0x3   :  { %18966 = sst [smem:[#allocation229_spill]] %s18686_s2 }
   0x4   :  { %18967 = sst [smem:[#allocation230_spill]] %s18687_s3 }
   0x5   :  { %18968 = sst [smem:[#allocation231_spill]] %s18688_s4 }
   0x6   :  { %18969 = sst [smem:[#allocation232_spill]] %s18689_s5 }
   0x7   :  { %s18970_s26 = sld [smem:[#allocation230_spill]]  ;;  %vm18711_vm0 = vcmask 1043456   ;;  %vm145_vm1 = vcmask 293888  }
   0x8   :  { %s18971_s0 = sld [smem:[#allocation227_spill]] }
   0xd   :  { %v137_v0 = vld [vmem:[%s18970_s26 + $0x20] sm:$0xf]  ;;  %v136_v1 = vld [vmem:[%s18970_s26 + $0x18] sm:$0xff]  ;;  %v135_v3 = vld [vmem:[%s18970_s26 + $0x10] sm:$0xff] }
   0xe   :  { %12555 = vmatprep.subr.msk.mxu0 %vm18711_vm0, %v137_v0  ;;  %v69_v2 = vld [vmem:[%s18971_s0] sm:$0xff]  ;;  %v134_v4 = vld [vmem:[%s18970_s26 + $0x8] sm:$0xff]  ;;  %v71_v7 = vld [vmem:[%s18971_s0 + $0x10] sm:$0xff] }
   0xf   :  { %12556 = vmatpush3.msk.msra.mxu0 %vm18711_vm0, %v137_v0  ;;  %12565 = vmatprep.mubr.msk.f32.mxu0 %vm145_vm1, %v69_v2  ;;  %v133_v5 = vld [vmem:[%s18970_s26] sm:$0xff]  ;;  %v70_v6 = vld [vmem:[%s18971_s0 + $0x8] sm:$0xff]  ;;  %v72_v8 = vld [vmem:[%s18971_s0 + $0x18] sm:$0xff] }
  0x10   :  { %12557 = vmatprep.subr.mxu0 %v136_v1  ;;  %v73_v9 = vld [vmem:[%s18971_s0 + $0x20] sm:$0xff]  ;;  %v74_v10 = vld [vmem:[%s18971_s0 + $0x28] sm:$0xff]  ;;  %v75_v11 = vld [vmem:[%s18971_s0 + $0x30] sm:$0xff] }
  0x11   :  { %12558 = vmatpush3.msra.mxu0 %v136_v1  ;;  %v76_v12 = vld [vmem:[%s18971_s0 + $0x38] sm:$0xff]  ;;  %v77_v13 = vld [vmem:[%s18971_s0 + $0x40] sm:$0xff] }
  0x12   :  { %12559 = vmatprep.subr.mxu0 %v135_v3 }
  0x13   :  { %12560 = vmatpush3.msra.mxu0 %v135_v3 }
  0x14   :  { %12561 = vmatprep.subr.mxu0 %v134_v4 }
  0x15   :  { %12562 = vmatpush3.msra.mxu0 %v134_v4 }
  0x16   :  { %12563 = vmatprep.subr.mxu0 %v133_v5 }
  0x17   :  { %12564 = vmatpush3.msra.mxu0 %v133_v5 }
  0x18   :  { %12566 = vmatmul.mubr.msk.f32.vlgmr.msra.gmra.mxu0 %vm145_vm1, %v70_v6 }
  0x19   :  { %12568 = vmatprep.mubr.msk.f32.mxu0 %vm145_vm1, %v71_v7 }
  0x1c   :  { %12569 = vmatmul.mubr.msk.f32.gmra.mxu0 %vm145_vm1, %v72_v8 }
  0x1d   :  { %12571 = vmatprep.mubr.msk.f32.mxu0 %vm145_vm1, %v73_v9 }
  0x20   :  { %12572 = vmatmul.mubr.msk.f32.gmra.mxu0 %vm145_vm1, %v74_v10 }
  0x21   :  { %12574 = vmatprep.mubr.msk.f32.mxu0 %vm145_vm1, %v75_v11 }
  0x24   :  { %12575 = vmatmul.mubr.msk.f32.gmra.mxu0 %vm145_vm1, %v76_v12 }
  0x25   :  { %26 = vsyncpa [#allocation4], 0  ;;  %12577 = vmatprep.mubr.msk.f32.mxu0 %vm145_vm1, %v77_v13  ;;  %v78_v14 = vld [vmem:[%s18971_s0 + $0x48] sm:$0xff]  ;;  %v79_v15 = vld [vmem:[%s18971_s0 + $0x50] sm:$0xff]  ;;  %s18972_s26 = sld [smem:[#allocation232_spill]]  ;;  %vm791_vm2 = vcmask 130048  }
  0x26   :  { %v80_v16 = vld [vmem:[%s18971_s0 + $0x58] sm:$0xff]  ;;  %v81_v17 = vld [vmem:[%s18971_s0 + $0x60] sm:$0xff]  ;;  %v82_v18 = vld [vmem:[%s18971_s0 + $0x68] sm:$0xff]  ;;  %v18743_v46 = vmov 0.0   ;;  %s18973_s27 = sld [smem:[#allocation231_spill]]  ;;  %s13805_s28 = smov 96  }
  0x27   :  { %v83_v19 = vld [vmem:[%s18971_s0 + $0x70] sm:$0xff]  ;;  %v84_v20 = vld [vmem:[%s18971_s0 + $0x78] sm:$0xff]  ;;  %v85_v21 = vld [vmem:[%s18971_s0 + $0x80] sm:$0xff]  ;;  %12665 = vmatprep.mubr.f32.mxu1 %v18743_v46  ;;  %794 = vst.msk [vmem:[#allocation2 + $0x10] sm:$0xff] %vm791_vm2, %v18743_v46  ;;  %s19964_s3 = sld [smem:[#allocation228_spill]]  ;;  %s13806_s29 = smov 32  }
  0x28   :  { %12578 = vmatmul.mubr.msk.f32.gmra.mxu0 %vm145_vm1, %v78_v14  ;;  %v86_v22 = vld [vmem:[%s18971_s0 + $0x88] sm:$0xff]  ;;  %v87_v23 = vld [vmem:[%s18971_s0 + $0x90] sm:$0xff]  ;;  %v88_v24 = vld [vmem:[%s18971_s0 + $0x98] sm:$0xff]  ;;  %795 = vst.msk [vmem:[#allocation2 + $0x218] sm:$0xff] %vm791_vm2, %v18743_v46  ;;  %s20190_s1 = sld [smem:[#allocation229_spill]] }
  0x29   :  { %12580 = vmatprep.mubr.msk.f32.mxu0 %vm145_vm1, %v79_v15  ;;  %v89_v25 = vld [vmem:[%s18971_s0 + $0xa0] sm:$0xff]  ;;  %v90_v26 = vld [vmem:[%s18971_s0 + $0xa8] sm:$0xff]  ;;  %v91_v27 = vld [vmem:[%s18971_s0 + $0xb0] sm:$0xff]  ;;  %v862_v15 = vlaneseq }
  0x2a   :  { %v92_v28 = vld [vmem:[%s18971_s0 + $0xb8] sm:$0xff]  ;;  %v93_v29 = vld [vmem:[%s18971_s0 + $0xc0] sm:$0xff]  ;;  %v94_v30 = vld [vmem:[%s18971_s0 + $0xc8] sm:$0xff] }
  0x2b   :  { %v95_v31 = vld [vmem:[%s18971_s0 + $0xd0] sm:$0xff]  ;;  %v96_v32 = vld [vmem:[%s18971_s0 + $0xd8] sm:$0xff]  ;;  %v97_v33 = vld [vmem:[%s18971_s0 + $0xe0] sm:$0xff] }
  0x2c   :  { %12581 = vmatmul.mubr.msk.f32.gmra.mxu0 %vm145_vm1, %v80_v16  ;;  %v98_v34 = vld [vmem:[%s18971_s0 + $0xe8] sm:$0xff]  ;;  %v99_v35 = vld [vmem:[%s18971_s0 + $0xf0] sm:$0xff]  ;;  %v100_v36 = vld [vmem:[%s18971_s0 + $0xf8] sm:$0xff] }
  0x2d   :  { %12583 = vmatprep.mubr.msk.f32.mxu0 %vm145_vm1, %v81_v17  ;;  %v101_v37 = vld [vmem:[%s18971_s0 + $0x100] sm:$0xff]  ;;  %v102_v38 = vld [vmem:[%s18971_s0 + $0x108] sm:$0xff]  ;;  %v103_v39 = vld [vmem:[%s18971_s0 + $0x110] sm:$0xff] }
  0x2e   :  { %v104_v40 = vld [vmem:[%s18971_s0 + $0x118] sm:$0xff]  ;;  %v105_v41 = vld [vmem:[%s18971_s0 + $0x120] sm:$0xff]  ;;  %v106_v42 = vld [vmem:[%s18971_s0 + $0x128] sm:$0xff] }
  0x2f   :  { %v11180_v43 = vld [vmem:[%s18972_s26 + $0x18] sm:$0xff]  ;;  %v107_v44 = vld [vmem:[%s18971_s0 + $0x130] sm:$0xff]  ;;  %v11302_v48 = vld [vmem:[%s18972_s26 + $0x28] sm:$0xff] }
  0x30   :  { %12584 = vmatmul.mubr.msk.f32.gmra.mxu0 %vm145_vm1, %v82_v18  ;;  %12661 = vmatprep.subr.mxu1 %v11180_v43  ;;  %v11179_v45 = vld [vmem:[%s18972_s26 + $0x10] sm:$0xff]  ;;  %v108_v47 = vld [vmem:[%s18971_s0 + $0x138] sm:$0xff]  ;;  %v109_v49 = vld [vmem:[%s18971_s0 + $0x140] sm:$0xff] }
  0x31   :  { %12586 = vmatprep.mubr.msk.f32.mxu0 %vm145_vm1, %v83_v19  ;;  %12662 = vmatpush3.msra.mxu1 %v11180_v43  ;;  %v11301_v50 = vld [vmem:[%s18972_s26 + $0x20] sm:$0xff]  ;;  %v110_v51 = vld [vmem:[%s18971_s0 + $0x148] sm:$0xff]  ;;  %v111_v52 = vld [vmem:[%s18971_s0 + $0x150] sm:$0xff] }
  0x32   :  { %12663 = vmatprep.subr.mxu1 %v11179_v45  ;;  %12861 = vmatprep.subr.mxu0 %v11302_v48  ;;  %v112_v53 = vld [vmem:[%s18971_s0 + $0x158] sm:$0xff]  ;;  %v113_v54 = vld [vmem:[%s18971_s0 + $0x160] sm:$0xff]  ;;  %v114_v55 = vld [vmem:[%s18971_s0 + $0x168] sm:$0xff] }
  0x33   :  { %12664 = vmatpush3.msra.mxu1 %v11179_v45  ;;  %12862 = vmatpush3.msra.mxu0 %v11302_v48  ;;  %v115_v56 = vld [vmem:[%s18971_s0 + $0x170] sm:$0xff]  ;;  %v116_v57 = vld [vmem:[%s18971_s0 + $0x178] sm:$0xff]  ;;  %v117_v58 = vld [vmem:[%s18971_s0 + $0x180] sm:$0xff] }
  0x34   :  { %12587 = vmatmul.mubr.msk.f32.gmra.mxu0 %vm145_vm1, %v84_v20  ;;  %12666 = vmatmul.mubr.f32.vlgmr.msra.gmra.mxu1 %v18743_v46  ;;  %v118_v59 = vld [vmem:[%s18971_s0 + $0x188] sm:$0xff]  ;;  %v119_v60 = vld [vmem:[%s18971_s0 + $0x190] sm:$0xff]  ;;  %v120_v61 = vld [vmem:[%s18971_s0 + $0x198] sm:$0xff] }
  0x35   :  { %12589 = vmatprep.mubr.msk.f32.mxu0 %vm145_vm1, %v85_v21  ;;  %12863 = vmatprep.subr.mxu0 %v11301_v50  ;;  %v121_v62 = vld [vmem:[%s18971_s0 + $0x1a0] sm:$0xff]  ;;  %v122_v63 = vld [vmem:[%s18971_s0 + $0x1a8] sm:$0xff]  ;;  %v123_v0 = vld [vmem:[%s18971_s0 + $0x1b0] sm:$0xff] }
  0x36   :  { %12864 = vmatpush3.msra.mxu0 %v11301_v50  ;;  %v124_v1 = vld [vmem:[%s18971_s0 + $0x1b8] sm:$0xff]  ;;  %v125_v2 = vld [vmem:[%s18971_s0 + $0x1c0] sm:$0xff]  ;;  %v126_v3 = vld [vmem:[%s18971_s0 + $0x1c8] sm:$0xff] }
  0x37   :  { %v127_v4 = vld [vmem:[%s18971_s0 + $0x1d0] sm:$0xff]  ;;  %v128_v5 = vld [vmem:[%s18971_s0 + $0x1d8] sm:$0xff]  ;;  %v129_v6 = vld [vmem:[%s18971_s0 + $0x1e0] sm:$0xff] }
  0x38   :  { %12590 = vmatmul.mubr.msk.f32.gmra.mxu0 %vm145_vm1, %v86_v22  ;;  %v130_v7 = vld [vmem:[%s18971_s0 + $0x1e8] sm:$0xff]  ;;  %v131_v8 = vld [vmem:[%s18971_s0 + $0x1f0] sm:$0xff]  ;;  %v132_v9 = vld [vmem:[%s18971_s0 + $0x1f8] sm:$0xff]  ;;  %v14223_v22 = vshrl.u32 %v862_v15, 7  ;;  %v18985_v15 = vmov 0 }
  0x39   :  { %12592 = vmatprep.mubr.msk.f32.mxu0 %vm145_vm1, %v87_v23  ;;  %v1504_v10 = vld [vmem:[%s18972_s26 + $0x8] sm:$0xff]  ;;  %v14217_v11 = vld [vmem:[%s18973_s27] ss:$0 sm:$0xff] }
  0x3a   :  { %12761 = vmatprep.subr.mxu1 %v1504_v10  ;;  %18974 = vst [vmem:[#allocation6_spill] sm:$0xff] %v14223_v22  ;;  %v867_v45 = vadd.s32 32, %v14223_v22 }
  0x3b   :  { %12762 = vmatpush3.msra.mxu1 %v1504_v10 }
  0x3c   :  { %12593 = vmatmul.mubr.msk.f32.gmra.mxu0 %vm145_vm1, %v88_v24 }
  0x3d   :  { %12595 = vmatprep.mubr.msk.f32.mxu0 %vm145_vm1, %v89_v25 }
  0x40   :  { %12596 = vmatmul.mubr.msk.f32.gmra.mxu0 %vm145_vm1, %v90_v26  ;;  %v866_v26 = vadd.s32 24, %v14223_v22 }
  0x41   :  { %12598 = vmatprep.mubr.msk.f32.mxu0 %vm145_vm1, %v91_v27 }
  0x44   :  { %12599 = vmatmul.mubr.msk.f32.gmra.mxu0 %vm145_vm1, %v92_v28 }
  0x45   :  { %12601 = vmatprep.mubr.msk.f32.mxu0 %vm145_vm1, %v93_v29  ;;  %v1503_v29 = vld [vmem:[%s18972_s26] sm:$0xff] }
  0x46   :  { %12763 = vmatprep.subr.mxu1 %v1503_v29 }
  0x47   :  { %12764 = vmatpush3.msra.mxu1 %v1503_v29 }
  0x48   :  { %12602 = vmatmul.mubr.msk.f32.gmra.mxu0 %vm145_vm1, %v94_v30 }
  0x49   :  { %12604 = vmatprep.mubr.msk.f32.mxu0 %vm145_vm1, %v95_v31  ;;  %v865_v31 = vadd.s32 16, %v14223_v22 }
  0x4c   :  { %12605 = vmatmul.mubr.msk.f32.gmra.mxu0 %vm145_vm1, %v96_v32 }
  0x4d   :  { %12607 = vmatprep.mubr.msk.f32.mxu0 %vm145_vm1, %v97_v33 }
  0x50   :  { %12608 = vmatmul.mubr.msk.f32.gmra.mxu0 %vm145_vm1, %v98_v34  ;;  %v11430_v34 = vld [vmem:[%s18972_s26 + $0x48] sm:$0xff] }
  0x51   :  { %12610 = vmatprep.mubr.msk.f32.mxu0 %vm145_vm1, %v99_v35  ;;  %13061 = vmatprep.subr.mxu0 %v11430_v34 }
  0x54   :  { %12611 = vmatmul.mubr.msk.f32.gmra.mxu0 %vm145_vm1, %v100_v36  ;;  %v994_v36 = vand.u32 15, %v866_v26 }
  0x55   :  { %12613 = vmatprep.mubr.msk.f32.mxu0 %vm145_vm1, %v101_v37  ;;  %v868_v37 = vadd.s32 40, %v14223_v22 }
  0x56   :  { %vm14251_vm3 = vcmp.lt.s32.totalorder %v994_v36, 15 }
  0x58   :  { %12614 = vmatmul.mubr.msk.f32.gmra.mxu0 %vm145_vm1, %v102_v38 }
  0x59   :  { %12616 = vmatprep.mubr.msk.f32.mxu0 %vm145_vm1, %v103_v39 }
  0x5c   :  { %12617 = vmatmul.mubr.msk.f32.gmra.mxu0 %vm145_vm1, %v104_v40  ;;  %v11429_v40 = vld [vmem:[%s18972_s26 + $0x40] sm:$0xff] }
  0x5d   :  { %12619 = vmatprep.mubr.msk.f32.mxu0 %vm145_vm1, %v105_v41 }
  0x60   :  { %12620 = vmatmul.mubr.msk.f32.gmra.mxu0 %vm145_vm1, %v106_v42 }
  0x61   :  { %12622 = vmatprep.mubr.msk.f32.mxu0 %vm145_vm1, %v107_v44  ;;  %v993_v44 = vand.u32 15, %v865_v31 }
  0x63   :  { %vm14258_vm4 = vcmp.ge.s32.totalorder %v993_v44, 1 }
  0x64   :  { %12623 = vmatmul.mubr.msk.f32.gmra.mxu0 %vm145_vm1, %v108_v47 }
  0x65   :  { %12625 = vmatprep.mubr.msk.f32.mxu0 %vm145_vm1, %v109_v49 }
  0x68   :  { %12626 = vmatmul.mubr.msk.f32.gmra.mxu0 %vm145_vm1, %v110_v51  ;;  %v18975_v51 = vmov 0 }
  0x69   :  { %12628 = vmatprep.mubr.msk.f32.mxu0 %vm145_vm1, %v111_v52  ;;  %v18976_v51 = vsel %vm14251_vm3, 4294967295, %v18975_v51  ;;  %v996_v52 = vand.u32 15, %v868_v37 }
  0x6a   :  { %18977 = vst [vmem:[#allocation7_spill] sm:$0xff] %v18976_v51 }
  0x6b   :  { %vm14273_vm5 = vcmp.lt.s32.totalorder %v996_v52, 15 }
  0x6c   :  { %12629 = vmatmul.mubr.msk.f32.gmra.mxu0 %vm145_vm1, %v112_v53  ;;  %v870_v53 = vadd.s32 56, %v14223_v22 }
  0x6d   :  { %12631 = vmatprep.mubr.msk.f32.mxu0 %vm145_vm1, %v113_v54 }
  0x70   :  { %12632 = vmatmul.mubr.msk.f32.gmra.mxu0 %vm145_vm1, %v114_v55 }
  0x71   :  { %12634 = vmatprep.mubr.msk.f32.mxu0 %vm145_vm1, %v115_v56 }
  0x74   :  { %12635 = vmatmul.mubr.msk.f32.gmra.mxu0 %vm145_vm1, %v116_v57 }
  0x75   :  { %12637 = vmatprep.mubr.msk.f32.mxu0 %vm145_vm1, %v117_v58 }
  0x78   :  { %12638 = vmatmul.mubr.msk.f32.gmra.mxu0 %vm145_vm1, %v118_v59  ;;  %v18978_v59 = vmov 0 }
  0x79   :  { %12640 = vmatprep.mubr.msk.f32.mxu0 %vm145_vm1, %v119_v60  ;;  %v18979_v59 = vsel %vm14258_vm4, 4294967295, %v18978_v59  ;;  %v995_v60 = vand.u32 15, %v867_v45 }
  0x7a   :  { %18980 = vst [vmem:[#allocation8_spill] sm:$0xff] %v18979_v59 }
  0x7b   :  { %vm14283_vm6 = vcmp.ge.s32.totalorder %v995_v60, 1 }
  0x7c   :  { %12641 = vmatmul.mubr.msk.f32.gmra.mxu0 %vm145_vm1, %v120_v61  ;;  %v869_v61 = vadd.s32 48, %v14223_v22  ;;  %v18986_v15 = vsel %vm14283_vm6, 4294967295, %v18985_v15 }
  0x7d   :  { %12643 = vmatprep.mubr.msk.f32.mxu0 %vm145_vm1, %v121_v62  ;;  %18987 = vst [vmem:[#allocation11_spill] sm:$0xff] %v18986_v15 }
  0x80   :  { %12644 = vmatmul.mubr.msk.f32.gmra.mxu0 %vm145_vm1, %v122_v63 }
  0x81   :  { %12646 = vmatprep.mubr.msk.f32.mxu0 %vm145_vm1, %v123_v0 }
  0x84   :  { %12647 = vmatmul.mubr.msk.f32.gmra.mxu0 %vm145_vm1, %v124_v1 }
  0x85   :  { %12649 = vmatprep.mubr.msk.f32.mxu0 %vm145_vm1, %v125_v2  ;;  %v872_v2 = vadd.s32 72, %v14223_v22 }
  0x88   :  { %12650 = vmatmul.mubr.msk.f32.gmra.mxu0 %vm145_vm1, %v126_v3 }
  0x89   :  { %12652 = vmatprep.mubr.msk.f32.mxu0 %vm145_vm1, %v127_v4 }
  0x8c   :  { %12653 = vmatmul.mubr.msk.f32.gmra.mxu0 %vm145_vm1, %v128_v5 }
  0x8d   :  { %12655 = vmatprep.mubr.msk.f32.mxu0 %vm145_vm1, %v129_v6  ;;  %v18982_v6 = vmov 0 }
  0x8e   :  { %v18983_v6 = vsel %vm14273_vm5, 4294967295, %v18982_v6 }
  0x8f   :  { %18984 = vst [vmem:[#allocation10_spill] sm:$0xff] %v18983_v6 }
  0x90   :  { %12656 = vmatmul.mubr.msk.f32.gmra.mxu0 %vm145_vm1, %v130_v7  ;;  %v998_v7 = vand.u32 15, %v870_v53 }
  0x91   :  { %12658 = vmatprep.mubr.msk.f32.mxu0 %vm145_vm1, %v131_v8 }
  0x92   :  { %vm14297_vm7 = vcmp.lt.s32.totalorder %v998_v7, 15 }
  0x94   :  { %12659 = vmatmul.mubr.msk.f32.gmra.mxu0 %vm145_vm1, %v132_v9 }
  0x95   :  { %12865 = vmatprep.mubr.f32.mxu0 %v18743_v46 }
  0x98   :  { %12866 = vmatmul.mubr.f32.vlgmr.msra.gmra.mxu0 %v18743_v46 }
  0x99   :  { %13062 = vmatpush3.msra.mxu0 %v11430_v34 }
  0x9a   :  { %13063 = vmatprep.subr.mxu0 %v11429_v40 }
  0x9b   :  { %13064 = vmatpush3.msra.mxu0 %v11429_v40 }
  0xd8   :  { %v12567_v12 = vpop.f32.mrf.mxu0 }
  0xd9   :  { %v414_v13 = vadd.f32 %v12567_v12, %v14217_v11 }
  0xda   :  { %v408_v14 = vpop.f32.mrf.mxu0 }
  0xdb   :  { %v728_v16 = vmax.f32 %v414_v13, 0.0  ;;  %v409_v17 = vadd.f32 %v14217_v11, %v408_v14 }
  0xdc   :  { %v12570_v18 = vpop.f32.mrf.mxu0 }
  0xdd   :  { %799 = vst.msk [vmem:[#allocation2 + $0x20] sm:$0xff] %vm791_vm2, %v728_v16  ;;  %v727_v19 = vmax.f32 %v409_v17, 0.0  ;;  %v424_v20 = vadd.f32 %v12570_v18, %v14217_v11  ;;  %v997_v16 = vand.u32 15, %v869_v61  ;;  %v871_v17 = vadd.s32 64, %v14223_v22 }
  0xde   :  { %v418_v21 = vpop.f32.mrf.mxu0  ;;  %v875_v61 = vadd.s32 96, %v14223_v22 }
  0xdf   :  { %798 = vst.msk [vmem:[#allocation2 + $0x18] sm:$0xff] %vm791_vm2, %v727_v19  ;;  %v730_v23 = vmax.f32 %v424_v20, 0.0  ;;  %v419_v24 = vadd.f32 %v14217_v11, %v418_v21  ;;  %vm14311_vm8 = vcmp.ge.s32.totalorder %v997_v16, 1  ;;  %v999_v37 = vand.u32 15, %v871_v17 }
  0xe0   :  { %v12573_v25 = vpop.f32.mrf.mxu0 }
  0xe1   :  { %801 = vst.msk [vmem:[#allocation2 + $0x30] sm:$0xff] %vm791_vm2, %v730_v23  ;;  %v729_v27 = vmax.f32 %v419_v24, 0.0  ;;  %v434_v28 = vadd.f32 %v12573_v25, %v14217_v11  ;;  %v1000_v23 = vand.u32 15, %v872_v2  ;;  %vm14339_vm10 = vcmp.ge.s32.totalorder %v999_v37, 1 }
  0xe2   :  { %v428_v30 = vpop.f32.mrf.mxu0  ;;  %v878_v2 = vadd.s32 120, %v14223_v22  ;;  %v19009_v37 = vmov 0 }
  0xe3   :  { %800 = vst.msk [vmem:[#allocation2 + $0x28] sm:$0xff] %vm791_vm2, %v729_v27  ;;  %v732_v32 = vmax.f32 %v434_v28, 0.0  ;;  %v429_v33 = vadd.f32 %v14217_v11, %v428_v30  ;;  %v18989_v27 = vmov 0  ;;  %v874_v28 = vadd.s32 88, %v14223_v22 }
  0xe4   :  { %v12576_v35 = vpop.f32.mrf.mxu0  ;;  %v1508_v49 = vld [vmem:[#allocation2 + $0x20] sm:$0xff]  ;;  %v18990_v27 = vsel %vm14297_vm7, 4294967295, %v18989_v27  ;;  %vm14321_vm9 = vcmp.lt.s32.totalorder %v1000_v23, 15  ;;  %v877_v23 = vadd.s32 112, %v14223_v22 }
  0xe5   :  { %803 = vst.msk [vmem:[#allocation2 + $0x40] sm:$0xff] %vm791_vm2, %v732_v32  ;;  %v731_v38 = vmax.f32 %v429_v33, 0.0  ;;  %v444_v39 = vadd.f32 %v12576_v35, %v14217_v11  ;;  %18991 = vst [vmem:[#allocation13_spill] sm:$0xff] %v18990_v27  ;;  %v907_v27 = vadd.s32 352, %v14223_v22 }
  0xe6   :  { %v438_v41 = vpop.f32.mrf.mxu0  ;;  %v1507_v42 = vld [vmem:[#allocation2 + $0x18] sm:$0xff] }
  0xe7   :  { %v2792_v43 = vld [vmem:[#allocation2 + $0x19] sm:$0xff]  ;;  %802 = vst.msk [vmem:[#allocation2 + $0x38] sm:$0xff] %vm791_vm2, %v731_v38  ;;  %v734_v47 = vmax.f32 %v444_v39, 0.0  ;;  %v439_v48 = vadd.f32 %v14217_v11, %v438_v41  ;;  %12668 = vmatprep.mubr.msk.f32.mxu1 %vm791_vm2, %v1507_v42  ;;  %v873_v38 = vadd.s32 80, %v14223_v22 }
  0xe8   :  { %12868 = vmatprep.mubr.msk.f32.mxu0 %vm791_vm2, %v2792_v43  ;;  %v12579_v50 = vpop.f32.mrf.mxu0  ;;  %12669 = vmatmul.mubr.msk.f32.gmra.mxu1 %vm791_vm2, %v1508_v49  ;;  %v1510_v0 = vld [vmem:[#allocation2 + $0x30] sm:$0xff]  ;;  %v18994_v43 = vmov 0  ;;  %v876_v49 = vadd.s32 104, %v14223_v22 }
  0xe9   :  { %805 = vst.msk [vmem:[#allocation2 + $0x50] sm:$0xff] %vm791_vm2, %v734_v47  ;;  %v733_v54 = vmax.f32 %v439_v48, 0.0  ;;  %v454_v55 = vadd.f32 %v12579_v50, %v14217_v11  ;;  %v18995_v43 = vsel %vm14321_vm9, 4294967295, %v18994_v43  ;;  %v1002_v48 = vand.u32 15, %v874_v28 }
  0xea   :  { %v448_v56 = vpop.f32.mrf.mxu0  ;;  %v1509_v57 = vld [vmem:[#allocation2 + $0x28] sm:$0xff]  ;;  %18996 = vst [vmem:[#allocation14_spill] sm:$0xff] %v18995_v43  ;;  %v1001_v60 = vand.u32 15, %v873_v38  ;;  %v880_v38 = vadd.s32 136, %v14223_v22  ;;  %v19092_v43 = vmov 0 }
  0xeb   :  { %v2793_v58 = vld [vmem:[#allocation2 + $0x21] sm:$0xff]  ;;  %804 = vst.msk [vmem:[#allocation2 + $0x48] sm:$0xff] %vm791_vm2, %v733_v54  ;;  %v736_v62 = vmax.f32 %v454_v55, 0.0  ;;  %v449_v63 = vadd.f32 %v14217_v11, %v448_v56  ;;  %12671 = vmatprep.mubr.msk.f32.mxu1 %vm791_vm2, %v1509_v57  ;;  %v2794_v5 = vld [vmem:[#allocation2 + $0x29] sm:$0xff]  ;;  %vm14354_vm11 = vcmp.lt.s32.totalorder %v1002_v48, 15 }
  0xec   :  { %v2921_v1 = vsel %vm14251_vm3, %v2793_v58, 0.0  ;;  %v14269_v3 = vld [vmem:[#allocation2 + $0x27] sm:$0xff]  ;;  %v12582_v4 = vpop.f32.mrf.mxu0  ;;  %12672 = vmatmul.mubr.msk.f32.gmra.mxu1 %vm791_vm2, %v1510_v0  ;;  %v18998_v58 = vmov 0  ;;  %vm14367_vm12 = vcmp.ge.s32.totalorder %v1001_v60, 1 }
  0xed   :  { %18981 = vst [vmem:[#allocation9_spill] sm:$0xff] %v14269_v3  ;;  %12869 = vmatmul.mubr.msk.f32.gmra.mxu0 %vm791_vm2, %v2921_v1  ;;  %807 = vst.msk [vmem:[#allocation2 + $0x60] sm:$0xff] %vm791_vm2, %v736_v62  ;;  %v735_v9 = vmax.f32 %v449_v63, 0.0  ;;  %v464_v10 = vadd.f32 %v12582_v4, %v14217_v11  ;;  %v1512_v20 = vld [vmem:[#allocation2 + $0x40] sm:$0xff]  ;;  %v18999_v58 = vsel %vm14339_vm10, 4294967295, %v18998_v58  ;;  %v19117_v3 = vmov 0 }
  0xee   :  { %12871 = vmatprep.mubr.msk.f32.mxu0 %vm791_vm2, %v2794_v5  ;;  %v458_v12 = vpop.f32.mrf.mxu0  ;;  %v1511_v13 = vld [vmem:[#allocation2 + $0x38] sm:$0xff]  ;;  %19000 = vst [vmem:[#allocation16_spill] sm:$0xff] %v18999_v58  ;;  %v4400_v59 = vld [vmem:[#allocation2 + $0x28] sm:$0xff] }
  0xef   :  { %v2795_v14 = vld [vmem:[#allocation2 + $0x31] sm:$0xff]  ;;  %806 = vst.msk [vmem:[#allocation2 + $0x58] sm:$0xff] %vm791_vm2, %v735_v9  ;;  %v738_v18 = vmax.f32 %v464_v10, 0.0  ;;  %v459_v19 = vadd.f32 %v14217_v11, %v458_v12  ;;  %12674 = vmatprep.mubr.msk.f32.mxu1 %vm791_vm2, %v1511_v13  ;;  %v2796_v26 = vld [vmem:[#allocation2 + $0x39] sm:$0xff]  ;;  %v19002_v9 = vmov 0  ;;  %v1004_v10 = vand.u32 15, %v876_v49 }
  0xf0   :  { %v2923_v21 = vsel %vm14273_vm5, %v2795_v14, 0.0  ;;  %v14293_v24 = vld [vmem:[#allocation2 + $0x37] sm:$0xff]  ;;  %v12585_v25 = vpop.f32.mrf.mxu0  ;;  %12675 = vmatmul.mubr.msk.f32.gmra.mxu1 %vm791_vm2, %v1512_v20  ;;  %v19003_v9 = vsel %vm14354_vm11, 4294967295, %v19002_v9  ;;  %v19005_v20 = vmov 0  ;;  %v19012_v49 = vmov 0 }
  0xf1   :  { %18988 = vst [vmem:[#allocation12_spill] sm:$0xff] %v14293_v24  ;;  %12872 = vmatmul.mubr.msk.f32.gmra.mxu0 %vm791_vm2, %v2923_v21  ;;  %809 = vst.msk [vmem:[#allocation2 + $0x70] sm:$0xff] %vm791_vm2, %v738_v18  ;;  %v737_v31 = vmax.f32 %v459_v19, 0.0  ;;  %v474_v32 = vadd.f32 %v12585_v25, %v14217_v11  ;;  %v1514_v41 = vld [vmem:[#allocation2 + $0x50] sm:$0xff]  ;;  %v19006_v20 = vsel %vm14367_vm12, 4294967295, %v19005_v20  ;;  %v1003_v21 = vand.u32 15, %v875_v61 }
  0xf2   :  { %12874 = vmatprep.mubr.msk.f32.mxu0 %vm791_vm2, %v2796_v26  ;;  %v468_v33 = vpop.f32.mrf.mxu0  ;;  %v1513_v34 = vld [vmem:[#allocation2 + $0x48] sm:$0xff]  ;;  %19004 = vst [vmem:[#allocation18_spill] sm:$0xff] %v19003_v9  ;;  %19007 = vst [vmem:[#allocation19_spill] sm:$0xff] %v19006_v20  ;;  %vm14381_vm13 = vcmp.lt.s32.totalorder %v1004_v10, 15  ;;  %v19015_v61 = vmov 0  ;;  %v13761_v15 = vld [vmem:[#allocation2 + $0x37] sm:$0xff] }
  0xf3   :  { %v2797_v35 = vld [vmem:[#allocation2 + $0x41] sm:$0xff]  ;;  %808 = vst.msk [vmem:[#allocation2 + $0x68] sm:$0xff] %vm791_vm2, %v737_v31  ;;  %v740_v39 = vmax.f32 %v474_v32, 0.0  ;;  %v469_v40 = vadd.f32 %v14217_v11, %v468_v33  ;;  %12677 = vmatprep.mubr.msk.f32.mxu1 %vm791_vm2, %v1513_v34  ;;  %v2798_v47 = vld [vmem:[#allocation2 + $0x49] sm:$0xff]  ;;  %v1006_v32 = vand.u32 15, %v878_v2  ;;  %v19010_v37 = vsel %vm14381_vm13, 4294967295, %v19009_v37 }
  0xf4   :  { %v2925_v42 = vsel %vm14297_vm7, %v2797_v35, 0.0  ;;  %v14325_v44 = vld [vmem:[#allocation2 + $0x47] sm:$0xff]  ;;  %v12588_v45 = vpop.f32.mrf.mxu0  ;;  %12678 = vmatmul.mubr.msk.f32.gmra.mxu1 %vm791_vm2, %v1514_v41  ;;  %19011 = vst [vmem:[#allocation21_spill] sm:$0xff] %v19010_v37  ;;  %vm14395_vm14 = vcmp.ge.s32.totalorder %v1003_v21, 1  ;;  %v882_v2 = vadd.s32 152, %v14223_v22 }
  0xf5   :  { %18997 = vst [vmem:[#allocation15_spill] sm:$0xff] %v14325_v44  ;;  %12875 = vmatmul.mubr.msk.f32.gmra.mxu0 %vm791_vm2, %v2925_v42  ;;  %811 = vst.msk [vmem:[#allocation2 + $0x80] sm:$0xff] %vm791_vm2, %v740_v39  ;;  %v739_v53 = vmax.f32 %v469_v40, 0.0  ;;  %v484_v54 = vadd.f32 %v12588_v45, %v14217_v11  ;;  %v1516_v0 = vld [vmem:[#allocation2 + $0x60] sm:$0xff]  ;;  %v19013_v49 = vsel %vm14395_vm14, 4294967295, %v19012_v49  ;;  %vm14405_vm15 = vcmp.lt.s32.totalorder %v1006_v32, 15 }
  0xf6   :  { %12877 = vmatprep.mubr.msk.f32.mxu0 %vm791_vm2, %v2798_v47  ;;  %v478_v55 = vpop.f32.mrf.mxu0  ;;  %v1515_v56 = vld [vmem:[#allocation2 + $0x58] sm:$0xff]  ;;  %19014 = vst [vmem:[#allocation22_spill] sm:$0xff] %v19013_v49  ;;  %v19016_v61 = vsel %vm14405_vm15, 4294967295, %v19015_v61  ;;  %v884_v32 = vadd.s32 168, %v14223_v22  ;;  %v19061_v40 = vmov 0 }
  0xf7   :  { %v2799_v57 = vld [vmem:[#allocation2 + $0x51] sm:$0xff]  ;;  %810 = vst.msk [vmem:[#allocation2 + $0x78] sm:$0xff] %vm791_vm2, %v739_v53  ;;  %v742_v62 = vmax.f32 %v484_v54, 0.0  ;;  %v479_v63 = vadd.f32 %v14217_v11, %v478_v55  ;;  %12680 = vmatprep.mubr.msk.f32.mxu1 %vm791_vm2, %v1515_v56  ;;  %v2800_v7 = vld [vmem:[#allocation2 + $0x59] sm:$0xff]  ;;  %v1005_v53 = vand.u32 15, %v877_v23  ;;  %v879_v54 = vadd.s32 128, %v14223_v22 }
  0xf8   :  { %v2927_v1 = vsel %vm14321_vm9, %v2799_v57, 0.0  ;;  %v14350_v4 = vld [vmem:[#allocation2 + $0x57] sm:$0xff]  ;;  %v12591_v5 = vpop.f32.mrf.mxu0  ;;  %12681 = vmatmul.mubr.msk.f32.gmra.mxu1 %vm791_vm2, %v1516_v0  ;;  %19017 = vst [vmem:[#allocation23_spill] sm:$0xff] %v19016_v61  ;;  %v881_v23 = vadd.s32 144, %v14223_v22  ;;  %v905_v61 = vadd.s32 336, %v14223_v22 }
  0xf9   :  { %19001 = vst [vmem:[#allocation17_spill] sm:$0xff] %v14350_v4  ;;  %12878 = vmatmul.mubr.msk.f32.gmra.mxu0 %vm791_vm2, %v2927_v1  ;;  %813 = vst.msk [vmem:[#allocation2 + $0x90] sm:$0xff] %vm791_vm2, %v742_v62  ;;  %v741_v14 = vmax.f32 %v479_v63, 0.0  ;;  %v494_v16 = vadd.f32 %v12591_v5, %v14217_v11  ;;  %v1518_v28 = vld [vmem:[#allocation2 + $0x70] sm:$0xff]  ;;  %v1008_v1 = vand.u32 15, %v880_v38  ;;  %vm14423_vm1 = vcmp.ge.s32.totalorder %v1005_v53, 1 }
  0xfa   :  { %12880 = vmatprep.mubr.msk.f32.mxu0 %vm791_vm2, %v2800_v7  ;;  %v488_v17 = vpop.f32.mrf.mxu0  ;;  %v1517_v18 = vld [vmem:[#allocation2 + $0x68] sm:$0xff]  ;;  %v1007_v21 = vand.u32 15, %v879_v54  ;;  %v915_v4 = vadd.s32 416, %v14223_v22 }
  0xfb   :  { %v2801_v19 = vld [vmem:[#allocation2 + $0x61] sm:$0xff]  ;;  %812 = vst.msk [vmem:[#allocation2 + $0x88] sm:$0xff] %vm791_vm2, %v741_v14  ;;  %v744_v25 = vmax.f32 %v494_v16, 0.0  ;;  %v489_v26 = vadd.f32 %v14217_v11, %v488_v17  ;;  %12683 = vmatprep.mubr.msk.f32.mxu1 %vm791_vm2, %v1517_v18  ;;  %v2802_v35 = vld [vmem:[#allocation2 + $0x69] sm:$0xff]  ;;  %vm14438_vm0 = vcmp.lt.s32.totalorder %v1008_v1, 15 }
  0xfc   :  { %v2929_v31 = vsel %vm14354_vm11, %v2801_v19, 0.0  ;;  %v14377_v33 = vld [vmem:[#allocation2 + $0x67] sm:$0xff]  ;;  %v12594_v34 = vpop.f32.mrf.mxu0  ;;  %12684 = vmatmul.mubr.msk.f32.gmra.mxu1 %vm791_vm2, %v1518_v28  ;;  %v19019_v19 = vmov 0 }
  0xfd   :  { %19008 = vst [vmem:[#allocation20_spill] sm:$0xff] %v14377_v33  ;;  %12881 = vmatmul.mubr.msk.f32.gmra.mxu0 %vm791_vm2, %v2929_v31  ;;  %815 = vst.msk [vmem:[#allocation2 + $0xa0] sm:$0xff] %vm791_vm2, %v744_v25  ;;  %v743_v41 = vmax.f32 %v489_v26, 0.0  ;;  %v504_v42 = vadd.f32 %v12594_v34, %v14217_v11  ;;  %v1520_v57 = vld [vmem:[#allocation2 + $0x80] sm:$0xff]  ;;  %v19020_v19 = vsel %vm14423_vm1, 4294967295, %v19019_v19  ;;  %v913_v33 = vadd.s32 400, %v14223_v22 }
  0xfe   :  { %12883 = vmatprep.mubr.msk.f32.mxu0 %vm791_vm2, %v2802_v35  ;;  %v498_v45 = vpop.f32.mrf.mxu0  ;;  %v1519_v47 = vld [vmem:[#allocation2 + $0x78] sm:$0xff]  ;;  %19021 = vst [vmem:[#allocation25_spill] sm:$0xff] %v19020_v19  ;;  %v4408_v58 = vld [vmem:[#allocation2 + $0x68] sm:$0xff] }
  0xff   :  { %v2803_v48 = vld [vmem:[#allocation2 + $0x71] sm:$0xff]  ;;  %814 = vst.msk [vmem:[#allocation2 + $0x98] sm:$0xff] %vm791_vm2, %v743_v41  ;;  %v746_v55 = vmax.f32 %v504_v42, 0.0  ;;  %v499_v56 = vadd.f32 %v14217_v11, %v498_v45  ;;  %12686 = vmatprep.mubr.msk.f32.mxu1 %vm791_vm2, %v1519_v47  ;;  %v2804_v0 = vld [vmem:[#allocation2 + $0x79] sm:$0xff]  ;;  %v19023_v41 = vmov 0  ;;  %v1010_v42 = vand.u32 15, %v882_v2 }
 0x100   :  { %v2931_v60 = vsel %vm14381_vm13, %v2803_v48, 0.0  ;;  %v14409_v62 = vld [vmem:[#allocation2 + $0x77] sm:$0xff]  ;;  %v12597_v63 = vpop.f32.mrf.mxu0  ;;  %12687 = vmatmul.mubr.msk.f32.gmra.mxu1 %vm791_vm2, %v1520_v57  ;;  %v19024_v41 = vsel %vm14438_vm0, 4294967295, %v19023_v41  ;;  %v19026_v57 = vmov 0  ;;  %v19054_v45 = vmov 0 }
 0x101   :  { %19018 = vst [vmem:[#allocation24_spill] sm:$0xff] %v14409_v62  ;;  %12884 = vmatmul.mubr.msk.f32.gmra.mxu0 %vm791_vm2, %v2931_v60  ;;  %817 = vst.msk [vmem:[#allocation2 + $0xb0] sm:$0xff] %vm791_vm2, %v746_v55  ;;  %v745_v10 = vmax.f32 %v499_v56, 0.0  ;;  %v514_v14 = vadd.f32 %v12597_v63, %v14217_v11  ;;  %v1522_v28 = vld [vmem:[#allocation2 + $0x90] sm:$0xff]  ;;  %v1009_v60 = vand.u32 15, %v881_v23  ;;  %v883_v63 = vadd.s32 160, %v14223_v22 }
 0x102   :  { %12886 = vmatprep.mubr.msk.f32.mxu0 %vm791_vm2, %v2804_v0  ;;  %v508_v16 = vpop.f32.mrf.mxu0  ;;  %v1521_v17 = vld [vmem:[#allocation2 + $0x88] sm:$0xff]  ;;  %19025 = vst [vmem:[#allocation27_spill] sm:$0xff] %v19024_v41  ;;  %vm14465_vm13 = vcmp.lt.s32.totalorder %v1010_v42, 15  ;;  %v886_v23 = vadd.s32 184, %v14223_v22  ;;  %v19033_v42 = vmov 0  ;;  %v19087_v41 = vmov 0 }
 0x103   :  { %v2805_v18 = vld [vmem:[#allocation2 + $0x81] sm:$0xff]  ;;  %816 = vst.msk [vmem:[#allocation2 + $0xa8] sm:$0xff] %vm791_vm2, %v745_v10  ;;  %v748_v25 = vmax.f32 %v514_v14, 0.0  ;;  %v509_v26 = vadd.f32 %v14217_v11, %v508_v16  ;;  %12689 = vmatprep.mubr.msk.f32.mxu1 %vm791_vm2, %v1521_v17  ;;  %v2806_v38 = vld [vmem:[#allocation2 + $0x89] sm:$0xff]  ;;  %v1012_v14 = vand.u32 15, %v884_v32  ;;  %v19109_v62 = vmov 0 }
 0x104   :  { %v2933_v31 = vsel %vm14405_vm15, %v2805_v18, 0.0  ;;  %v14434_v34 = vld [vmem:[#allocation2 + $0x87] sm:$0xff]  ;;  %v12600_v35 = vpop.f32.mrf.mxu0  ;;  %12690 = vmatmul.mubr.msk.f32.gmra.mxu1 %vm791_vm2, %v1522_v28  ;;  %vm14451_vm15 = vcmp.ge.s32.totalorder %v1007_v21, 1  ;;  %v19030_v21 = vmov 0  ;;  %v4410_v20 = vld [vmem:[#allocation2 + $0x78] sm:$0xff] }
 0x105   :  { %19022 = vst [vmem:[#allocation26_spill] sm:$0xff] %v14434_v34  ;;  %12887 = vmatmul.mubr.msk.f32.gmra.mxu0 %vm791_vm2, %v2933_v31  ;;  %819 = vst.msk [vmem:[#allocation2 + $0xc0] sm:$0xff] %vm791_vm2, %v748_v25  ;;  %v747_v48 = vmax.f32 %v509_v26, 0.0  ;;  %v524_v53 = vadd.f32 %v12600_v35, %v14217_v11  ;;  %v19027_v57 = vsel %vm14451_vm15, 4294967295, %v19026_v57  ;;  %v1524_v2 = vld [vmem:[#allocation2 + $0xa0] sm:$0xff]  ;;  %v19031_v21 = vsel %vm14465_vm13, 4294967295, %v19030_v21 }
 0x106   :  { %12889 = vmatprep.mubr.msk.f32.mxu0 %vm791_vm2, %v2806_v38  ;;  %v518_v54 = vpop.f32.mrf.mxu0  ;;  %v1523_v55 = vld [vmem:[#allocation2 + $0x98] sm:$0xff]  ;;  %19028 = vst [vmem:[#allocation28_spill] sm:$0xff] %v19027_v57  ;;  %19032 = vst [vmem:[#allocation30_spill] sm:$0xff] %v19031_v21  ;;  %vm14489_vm11 = vcmp.lt.s32.totalorder %v1012_v14, 15  ;;  %v4412_v49 = vld [vmem:[#allocation2 + $0x88] sm:$0xff] }
 0x107   :  { %v2807_v56 = vld [vmem:[#allocation2 + $0x91] sm:$0xff]  ;;  %818 = vst.msk [vmem:[#allocation2 + $0xb8] sm:$0xff] %vm791_vm2, %v747_v48  ;;  %v750_v0 = vmax.f32 %v524_v53, 0.0  ;;  %v519_v1 = vadd.f32 %v14217_v11, %v518_v54  ;;  %12692 = vmatprep.mubr.msk.f32.mxu1 %vm791_vm2, %v1523_v55  ;;  %v2808_v18 = vld [vmem:[#allocation2 + $0x99] sm:$0xff]  ;;  %v1011_v48 = vand.u32 15, %v883_v63  ;;  %v885_v53 = vadd.s32 176, %v14223_v22 }
 0x108   :  { %v2935_v10 = vsel %vm14438_vm0, %v2807_v56, 0.0  ;;  %v14461_v16 = vld [vmem:[#allocation2 + $0x97] sm:$0xff]  ;;  %v12603_v17 = vpop.f32.mrf.mxu0  ;;  %12693 = vmatmul.mubr.msk.f32.gmra.mxu1 %vm791_vm2, %v1524_v2  ;;  %vm14479_vm0 = vcmp.ge.s32.totalorder %v1009_v60, 1  ;;  %v19308_v36 = vld [vmem:[#allocation20_spill] sm:$0xff] }
 0x109   :  { %19029 = vst [vmem:[#allocation29_spill] sm:$0xff] %v14461_v16  ;;  %12890 = vmatmul.mubr.msk.f32.gmra.mxu0 %vm791_vm2, %v2935_v10  ;;  %821 = vst.msk [vmem:[#allocation2 + $0xd0] sm:$0xff] %vm791_vm2, %v750_v0  ;;  %v749_v28 = vmax.f32 %v519_v1, 0.0  ;;  %v534_v31 = vadd.f32 %v12603_v17, %v14217_v11  ;;  %v19034_v42 = vsel %vm14479_vm0, 4294967295, %v19033_v42  ;;  %v1526_v56 = vld [vmem:[#allocation2 + $0xb0] sm:$0xff]  ;;  %v19036_v1 = vmov 0 }
 0x10a   :  { %12892 = vmatprep.mubr.msk.f32.mxu0 %vm791_vm2, %v2808_v18  ;;  %v528_v32 = vpop.f32.mrf.mxu0  ;;  %v1525_v35 = vld [vmem:[#allocation2 + $0xa8] sm:$0xff]  ;;  %19035 = vst [vmem:[#allocation31_spill] sm:$0xff] %v19034_v42  ;;  %v19037_v1 = vsel %vm14489_vm11, 4294967295, %v19036_v1  ;;  %v1014_v10 = vand.u32 15, %v886_v23  ;;  %v888_v17 = vadd.s32 200, %v14223_v22  ;;  %v4414_v19 = vld [vmem:[#allocation2 + $0x98] sm:$0xff] }
 0x10b   :  { %v2809_v38 = vld [vmem:[#allocation2 + $0xa1] sm:$0xff]  ;;  %820 = vst.msk [vmem:[#allocation2 + $0xc8] sm:$0xff] %vm791_vm2, %v749_v28  ;;  %v752_v54 = vmax.f32 %v534_v31, 0.0  ;;  %v529_v55 = vadd.f32 %v14217_v11, %v528_v32  ;;  %12695 = vmatprep.mubr.msk.f32.mxu1 %vm791_vm2, %v1525_v35  ;;  %19038 = vst [vmem:[#allocation32_spill] sm:$0xff] %v19037_v1  ;;  %v2810_v2 = vld [vmem:[#allocation2 + $0xa9] sm:$0xff] }
 0x10c   :  { %v2937_v0 = vsel %vm14465_vm13, %v2809_v38, 0.0  ;;  %v14493_v60 = vld [vmem:[#allocation2 + $0xa7] sm:$0xff]  ;;  %v12606_v63 = vpop.f32.mrf.mxu0  ;;  %12696 = vmatmul.mubr.msk.f32.gmra.mxu1 %vm791_vm2, %v1526_v56  ;;  %vm14507_vm13 = vcmp.ge.s32.totalorder %v1011_v48, 1  ;;  %v19040_v38 = vmov 0  ;;  %v1013_v56 = vand.u32 15, %v885_v53 }
 0x10d   :  { %19039 = vst [vmem:[#allocation33_spill] sm:$0xff] %v14493_v60  ;;  %12893 = vmatmul.mubr.msk.f32.gmra.mxu0 %vm791_vm2, %v2937_v0  ;;  %823 = vst.msk [vmem:[#allocation2 + $0xe0] sm:$0xff] %vm791_vm2, %v752_v54  ;;  %v751_v28 = vmax.f32 %v529_v55, 0.0  ;;  %v544_v31 = vadd.f32 %v12606_v63, %v14217_v11  ;;  %v19041_v38 = vsel %vm14507_vm13, 4294967295, %v19040_v38  ;;  %v887_v0 = vadd.s32 192, %v14223_v22  ;;  %v1528_v55 = vld [vmem:[#allocation2 + $0xc0] sm:$0xff] }
 0x10e   :  { %12895 = vmatprep.mubr.msk.f32.mxu0 %vm791_vm2, %v2810_v2  ;;  %v538_v32 = vpop.f32.mrf.mxu0  ;;  %v1527_v35 = vld [vmem:[#allocation2 + $0xb8] sm:$0xff]  ;;  %19042 = vst [vmem:[#allocation34_spill] sm:$0xff] %v19041_v38  ;;  %v890_v2 = vadd.s32 216, %v14223_v22  ;;  %vm14522_vm9 = vcmp.lt.s32.totalorder %v1014_v10, 15  ;;  %v911_v60 = vadd.s32 384, %v14223_v22  ;;  %v4416_v57 = vld [vmem:[#allocation2 + $0xa8] sm:$0xff] }
 0x10f   :  { %v2811_v23 = vld [vmem:[#allocation2 + $0xb1] sm:$0xff]  ;;  %822 = vst.msk [vmem:[#allocation2 + $0xd8] sm:$0xff] %vm791_vm2, %v751_v28  ;;  %v754_v14 = vmax.f32 %v544_v31, 0.0  ;;  %v539_v54 = vadd.f32 %v14217_v11, %v538_v32  ;;  %12698 = vmatprep.mubr.msk.f32.mxu1 %vm791_vm2, %v1527_v35  ;;  %v2812_v53 = vld [vmem:[#allocation2 + $0xb9] sm:$0xff]  ;;  %v19044_v28 = vmov 0  ;;  %v1016_v31 = vand.u32 15, %v888_v17 }
 0x110   :  { %v2939_v63 = vsel %vm14489_vm11, %v2811_v23, 0.0  ;;  %v14518_v48 = vld [vmem:[#allocation2 + $0xb7] sm:$0xff]  ;;  %v12609_v18 = vpop.f32.mrf.mxu0  ;;  %12699 = vmatmul.mubr.msk.f32.gmra.mxu1 %vm791_vm2, %v1528_v55  ;;  %v19045_v28 = vsel %vm14522_vm9, 4294967295, %v19044_v28  ;;  %vm14535_vm11 = vcmp.ge.s32.totalorder %v1013_v56, 1  ;;  %v19047_v17 = vmov 0 }
 0x111   :  { %19043 = vst [vmem:[#allocation35_spill] sm:$0xff] %v14518_v48  ;;  %12896 = vmatmul.mubr.msk.f32.gmra.mxu0 %vm791_vm2, %v2939_v63  ;;  %19046 = vst [vmem:[#allocation36_spill] sm:$0xff] %v19045_v28  ;;  %v753_v23 = vmax.f32 %v539_v54, 0.0  ;;  %v554_v55 = vadd.f32 %v12609_v18, %v14217_v11  ;;  %v19048_v17 = vsel %vm14535_vm11, 4294967295, %v19047_v17  ;;  %v1015_v25 = vand.u32 15, %v887_v0  ;;  %v1530_v18 = vld [vmem:[#allocation2 + $0xd0] sm:$0xff] }
 0x112   :  { %825 = vst.msk [vmem:[#allocation2 + $0xf0] sm:$0xff] %vm791_vm2, %v754_v14  ;;  %12898 = vmatprep.mubr.msk.f32.mxu0 %vm791_vm2, %v2812_v53  ;;  %v548_v10 = vpop.f32.mrf.mxu0  ;;  %v1529_v63 = vld [vmem:[#allocation2 + $0xc8] sm:$0xff]  ;;  %19049 = vst [vmem:[#allocation37_spill] sm:$0xff] %v19048_v17  ;;  %v889_v32 = vadd.s32 208, %v14223_v22  ;;  %v1018_v53 = vand.u32 15, %v890_v2  ;;  %vm14549_vm7 = vcmp.lt.s32.totalorder %v1016_v31, 15 }
 0x113   :  { %v2813_v26 = vld [vmem:[#allocation2 + $0xc1] sm:$0xff]  ;;  %824 = vst.msk [vmem:[#allocation2 + $0xe8] sm:$0xff] %vm791_vm2, %v753_v23  ;;  %v756_v35 = vmax.f32 %v554_v55, 0.0  ;;  %v549_v14 = vadd.f32 %v14217_v11, %v548_v10  ;;  %12701 = vmatprep.mubr.msk.f32.mxu1 %vm791_vm2, %v1529_v63  ;;  %v2814_v0 = vld [vmem:[#allocation2 + $0xc9] sm:$0xff]  ;;  %v19051_v23 = vmov 0  ;;  %v892_v55 = vadd.s32 232, %v14223_v22 }
 0x114   :  { %v2941_v54 = vsel %vm14522_vm9, %v2813_v26, 0.0  ;;  %v14545_v47 = vld [vmem:[#allocation2 + $0xc7] sm:$0xff]  ;;  %v12612_v56 = vpop.f32.mrf.mxu0  ;;  %12702 = vmatmul.mubr.msk.f32.gmra.mxu1 %vm791_vm2, %v1530_v18  ;;  %v19052_v23 = vsel %vm14549_vm7, 4294967295, %v19051_v23  ;;  %vm14563_vm9 = vcmp.ge.s32.totalorder %v1015_v25, 1  ;;  %v1017_v7 = vand.u32 15, %v889_v32  ;;  %v4418_v42 = vld [vmem:[#allocation2 + $0xb8] sm:$0xff] }
 0x115   :  { %19050 = vst [vmem:[#allocation38_spill] sm:$0xff] %v14545_v47  ;;  %12899 = vmatmul.mubr.msk.f32.gmra.mxu0 %vm791_vm2, %v2941_v54  ;;  %19053 = vst [vmem:[#allocation39_spill] sm:$0xff] %v19052_v23  ;;  %v755_v2 = vmax.f32 %v549_v14, 0.0  ;;  %v564_v63 = vadd.f32 %v12612_v56, %v14217_v11  ;;  %v19055_v45 = vsel %vm14563_vm9, 4294967295, %v19054_v45  ;;  %v891_v10 = vadd.s32 224, %v14223_v22  ;;  %v1532_v14 = vld [vmem:[#allocation2 + $0xe0] sm:$0xff] }
 0x116   :  { %827 = vst.msk [vmem:[#allocation2 + $0x100] sm:$0xff] %vm791_vm2, %v756_v35  ;;  %12901 = vmatprep.mubr.msk.f32.mxu0 %vm791_vm2, %v2814_v0  ;;  %v558_v31 = vpop.f32.mrf.mxu0  ;;  %v1531_v18 = vld [vmem:[#allocation2 + $0xd8] sm:$0xff]  ;;  %19056 = vst [vmem:[#allocation40_spill] sm:$0xff] %v19055_v45  ;;  %vm14573_vm5 = vcmp.lt.s32.totalorder %v1018_v53, 15  ;;  %v19057_v0 = vmov 0  ;;  %v903_v28 = vadd.s32 320, %v14223_v22 }
 0x117   :  { %v2815_v54 = vld [vmem:[#allocation2 + $0xd1] sm:$0xff]  ;;  %826 = vst.msk [vmem:[#allocation2 + $0xf8] sm:$0xff] %vm791_vm2, %v755_v2  ;;  %v758_v26 = vmax.f32 %v564_v63, 0.0  ;;  %v559_v35 = vadd.f32 %v14217_v11, %v558_v31  ;;  %12704 = vmatprep.mubr.msk.f32.mxu1 %vm791_vm2, %v1531_v18  ;;  %v19058_v0 = vsel %vm14573_vm5, 4294967295, %v19057_v0  ;;  %v2816_v2 = vld [vmem:[#allocation2 + $0xd9] sm:$0xff]  ;;  %v1020_v63 = vand.u32 15, %v892_v55 }
 0x118   :  { %v2943_v56 = vsel %vm14549_vm7, %v2815_v54, 0.0  ;;  %19059 = vst [vmem:[#allocation41_spill] sm:$0xff] %v19058_v0  ;;  %v14577_v25 = vld [vmem:[#allocation2 + $0xd7] sm:$0xff]  ;;  %v12615_v32 = vpop.f32.mrf.mxu0  ;;  %12705 = vmatmul.mubr.msk.f32.gmra.mxu1 %vm791_vm2, %v1532_v14  ;;  %v894_v31 = vadd.s32 248, %v14223_v22  ;;  %vm14591_vm7 = vcmp.ge.s32.totalorder %v1017_v7, 1  ;;  %v19102_v48 = vmov 0 }
 0x119   :  { %19060 = vst [vmem:[#allocation42_spill] sm:$0xff] %v14577_v25  ;;  %12902 = vmatmul.mubr.msk.f32.gmra.mxu0 %vm791_vm2, %v2943_v56  ;;  %829 = vst.msk [vmem:[#allocation2 + $0x110] sm:$0xff] %vm791_vm2, %v758_v26  ;;  %v757_v54 = vmax.f32 %v559_v35, 0.0  ;;  %v574_v5 = vadd.f32 %v12615_v32, %v14217_v11  ;;  %v19062_v40 = vsel %vm14591_vm7, 4294967295, %v19061_v40  ;;  %v1534_v26 = vld [vmem:[#allocation2 + $0xf0] sm:$0xff]  ;;  %v1019_v32 = vand.u32 15, %v891_v10 }
 0x11a   :  { %12904 = vmatprep.mubr.msk.f32.mxu0 %vm791_vm2, %v2816_v2  ;;  %v568_v14 = vpop.f32.mrf.mxu0  ;;  %v1533_v56 = vld [vmem:[#allocation2 + $0xe8] sm:$0xff]  ;;  %vm14604_vm3 = vcmp.lt.s32.totalorder %v1020_v63, 15  ;;  %v4423_v17 = vld [vmem:[#allocation2 + $0xe0] sm:$0xff] }
 0x11b   :  { %v2817_v55 = vld [vmem:[#allocation2 + $0xe1] sm:$0xff]  ;;  %828 = vst.msk [vmem:[#allocation2 + $0x108] sm:$0xff] %vm791_vm2, %v757_v54  ;;  %v760_v18 = vmax.f32 %v574_v5, 0.0  ;;  %v569_v39 = vadd.f32 %v14217_v11, %v568_v14  ;;  %12707 = vmatprep.mubr.msk.f32.mxu1 %vm791_vm2, %v1533_v56  ;;  %v2818_v7 = vld [vmem:[#allocation2 + $0xe9] sm:$0xff]  ;;  %v19064_v54 = vmov 0  ;;  %v1022_v5 = vand.u32 15, %v894_v31 }
 0x11c   :  { %v2945_v35 = vsel %vm14573_vm5, %v2817_v55, 0.0  ;;  %v14600_v2 = vld [vmem:[#allocation2 + $0xe7] sm:$0xff]  ;;  %v12618_v53 = vpop.f32.mrf.mxu0  ;;  %12708 = vmatmul.mubr.msk.f32.gmra.mxu1 %vm791_vm2, %v1534_v26  ;;  %v19065_v54 = vsel %vm14604_vm3, 4294967295, %v19064_v54  ;;  %vm14622_vm5 = vcmp.ge.s32.totalorder %v1019_v32, 1 }
 0x11d   :  { %19063 = vst [vmem:[#allocation43_spill] sm:$0xff] %v14600_v2  ;;  %12905 = vmatmul.mubr.msk.f32.gmra.mxu0 %vm791_vm2, %v2945_v35  ;;  %19066 = vst [vmem:[#allocation44_spill] sm:$0xff] %v19065_v54  ;;  %v759_v56 = vmax.f32 %v569_v39, 0.0  ;;  %v584_v55 = vadd.f32 %v12618_v53, %v14217_v11  ;;  %v1536_v14 = vld [vmem:[#allocation2 + $0x100] sm:$0xff]  ;;  %v19067_v39 = vmov 0  ;;  %vm14630_vm9 = vcmp.lt.s32.totalorder %v1022_v5, 15 }
 0x11e   :  { %831 = vst.msk [vmem:[#allocation2 + $0x120] sm:$0xff] %vm791_vm2, %v760_v18  ;;  %12907 = vmatprep.mubr.msk.f32.mxu0 %vm791_vm2, %v2818_v7  ;;  %v578_v63 = vpop.f32.mrf.mxu0  ;;  %v1535_v26 = vld [vmem:[#allocation2 + $0xf8] sm:$0xff]  ;;  %v19068_v39 = vsel %vm14622_vm5, 4294967295, %v19067_v39  ;;  %v909_v2 = vadd.s32 368, %v14223_v22  ;;  %v4420_v38 = vld [vmem:[#allocation2 + $0xc8] sm:$0xff] }
 0x11f   :  { %v2819_v35 = vld [vmem:[#allocation2 + $0xf1] sm:$0xff]  ;;  %830 = vst.msk [vmem:[#allocation2 + $0x118] sm:$0xff] %vm791_vm2, %v759_v56  ;;  %v762_v31 = vmax.f32 %v584_v55, 0.0  ;;  %v579_v13 = vadd.f32 %v14217_v11, %v578_v63  ;;  %12710 = vmatprep.mubr.msk.f32.mxu1 %vm791_vm2, %v1535_v26  ;;  %19069 = vst [vmem:[#allocation45_spill] sm:$0xff] %v19068_v39  ;;  %v2820_v7 = vld [vmem:[#allocation2 + $0xf9] sm:$0xff]  ;;  %v19071_v56 = vmov 0 }
 0x120   :  { %v2947_v10 = vsel %vm14604_vm3, %v2819_v35, 0.0  ;;  %v14626_v18 = vld [vmem:[#allocation2 + $0xf7] sm:$0xff]  ;;  %v12621_v53 = vpop.f32.mrf.mxu0  ;;  %12711 = vmatmul.mubr.msk.f32.gmra.mxu1 %vm791_vm2, %v1536_v14  ;;  %v19072_v56 = vsel %vm14630_vm9, 4294967295, %v19071_v56  ;;  %v898_v55 = vadd.s32 280, %v14223_v22  ;;  %v897_v35 = vadd.s32 272, %v14223_v22 }
 0x121   :  { %19070 = vst [vmem:[#allocation46_spill] sm:$0xff] %v14626_v18  ;;  %12908 = vmatmul.mubr.msk.f32.gmra.mxu0 %vm791_vm2, %v2947_v10  ;;  %19073 = vst [vmem:[#allocation47_spill] sm:$0xff] %v19072_v56  ;;  %v761_v14 = vmax.f32 %v579_v13, 0.0  ;;  %v594_v10 = vadd.f32 %v12621_v53, %v14217_v11  ;;  %12713 = vmatprep.mubr.f32.mxu1 %v18743_v46  ;;  %v900_v53 = vadd.s32 296, %v14223_v22 }
 0x122   :  { %833 = vst.msk [vmem:[#allocation2 + $0x130] sm:$0xff] %vm791_vm2, %v762_v31  ;;  %12910 = vmatprep.mubr.msk.f32.mxu0 %vm791_vm2, %v2820_v7  ;;  %v588_v5 = vpop.f32.mrf.mxu0  ;;  %v2821_v26 = vld [vmem:[#allocation2 + $0x101] sm:$0xff]  ;;  %v1026_v13 = vand.u32 15, %v898_v55 }
 0x123   :  { %832 = vst.msk [vmem:[#allocation2 + $0x128] sm:$0xff] %vm791_vm2, %v761_v14  ;;  %v764_v32 = vmax.f32 %v594_v10, 0.0  ;;  %v589_v12 = vadd.f32 %v14217_v11, %v588_v5  ;;  %v2949_v63 = vsel %vm14630_vm9, %v2821_v26, 0.0  ;;  %v1025_v5 = vand.u32 15, %v897_v35 }
 0x124   :  { %v12624_v31 = vpop.f32.mrf.mxu0  ;;  %12714 = vmatmul.mubr.f32.gmra.mxu1 %v18743_v46  ;;  %v899_v26 = vadd.s32 288, %v14223_v22  ;;  %vm14668_vm9 = vcmp.lt.s32.totalorder %v1026_v13, 15  ;;  %v19074_v35 = vmov 0 }
 0x125   :  { %12911 = vmatmul.mubr.msk.f32.gmra.mxu0 %vm791_vm2, %v2949_v63  ;;  %835 = vst.msk [vmem:[#allocation2 + $0x140] sm:$0xff] %vm791_vm2, %v764_v32  ;;  %v763_v7 = vmax.f32 %v589_v12, 0.0  ;;  %v604_v52 = vadd.f32 %v12624_v31, %v14217_v11  ;;  %v14663_v32 = vld [vmem:[#allocation2 + $0x120] sm:$0xff]  ;;  %v19075_v35 = vsel %vm14668_vm9, 4294967295, %v19074_v35  ;;  %v1028_v31 = vand.u32 15, %v900_v53 }
 0x126   :  { %12913 = vmatprep.mubr.f32.mxu0 %v18743_v46  ;;  %v598_v14 = vpop.f32.mrf.mxu0  ;;  %v14656_v10 = vld [vmem:[#allocation2 + $0x118] sm:$0xff]  ;;  %19076 = vst [vmem:[#allocation48_spill] sm:$0xff] %v19075_v35  ;;  %vm14678_vm3 = vcmp.ge.s32.totalorder %v1025_v5, 1  ;;  %v1027_v13 = vand.u32 15, %v899_v26  ;;  %v901_v53 = vadd.s32 304, %v14223_v22  ;;  %v904_v5 = vadd.s32 328, %v14223_v22 }
 0x127   :  { %834 = vst.msk [vmem:[#allocation2 + $0x138] sm:$0xff] %vm791_vm2, %v763_v7  ;;  %v766_v50 = vmax.f32 %v604_v52, 0.0  ;;  %v599_v55 = vadd.f32 %v14217_v11, %v598_v14  ;;  %12716 = vmatprep.mubr.msk.f32.mxu1 %vm791_vm2, %v14656_v10  ;;  %v2824_v63 = vld [vmem:[#allocation2 + $0x119] sm:$0xff]  ;;  %v902_v52 = vadd.s32 312, %v14223_v22  ;;  %vm14697_vm5 = vcmp.lt.s32.totalorder %v1028_v31, 15 }
 0x128   :  { %v12627_v12 = vpop.f32.mrf.mxu0  ;;  %12717 = vmatmul.mubr.msk.f32.gmra.mxu1 %vm791_vm2, %v14663_v32  ;;  %v19082_v31 = vmov 0 }
 0x129   :  { %12914 = vmatmul.mubr.f32.gmra.mxu0 %v18743_v46  ;;  %837 = vst.msk [vmem:[#allocation2 + $0x150] sm:$0xff] %vm791_vm2, %v766_v50  ;;  %v765_v7 = vmax.f32 %v599_v55, 0.0  ;;  %v614_v14 = vadd.f32 %v12627_v12, %v14217_v11  ;;  %v19077_v46 = vmov 0  ;;  %v14687_v55 = vld [vmem:[#allocation2 + $0x130] sm:$0xff] }
 0x12a   :  { %12916 = vmatprep.mubr.msk.f32.mxu0 %vm791_vm2, %v2824_v63  ;;  %v608_v30 = vpop.f32.mrf.mxu0  ;;  %v14676_v29 = vld [vmem:[#allocation2 + $0x128] sm:$0xff]  ;;  %v19078_v46 = vsel %vm14678_vm3, 4294967295, %v19077_v46 }
 0x12b   :  { %v2825_v8 = vld [vmem:[#allocation2 + $0x121] sm:$0xff]  ;;  %836 = vst.msk [vmem:[#allocation2 + $0x148] sm:$0xff] %vm791_vm2, %v765_v7  ;;  %v768_v56 = vmax.f32 %v614_v14, 0.0  ;;  %v609_v50 = vadd.f32 %v14217_v11, %v608_v30  ;;  %12719 = vmatprep.mubr.msk.f32.mxu1 %vm791_vm2, %v14676_v29  ;;  %v2826_v7 = vld [vmem:[#allocation2 + $0x129] sm:$0xff]  ;;  %v19079_v30 = vmov 0  ;;  %v1030_v14 = vand.u32 15, %v902_v52 }
 0x12c   :  { %v2953_v12 = vsel %vm14668_vm9, %v2825_v8, 0.0  ;;  %v14692_v63 = vld [vmem:[#allocation2 + $0x127] sm:$0xff]  ;;  %v12630_v26 = vpop.f32.mrf.mxu0  ;;  %12720 = vmatmul.mubr.msk.f32.gmra.mxu1 %vm791_vm2, %v14687_v55  ;;  %v19080_v30 = vsel %vm14697_vm5, 4294967295, %v19079_v30  ;;  %vm14709_vm9 = vcmp.ge.s32.totalorder %v1027_v13, 1  ;;  %v1029_v52 = vand.u32 15, %v901_v53 }
 0x12d   :  { %12917 = vmatmul.mubr.msk.f32.gmra.mxu0 %vm791_vm2, %v2953_v12  ;;  %19081 = vst [vmem:[#allocation49_spill] sm:$0xff] %v19080_v30  ;;  %839 = vst.msk [vmem:[#allocation2 + $0x160] sm:$0xff] %vm791_vm2, %v768_v56  ;;  %v767_v35 = vmax.f32 %v609_v50, 0.0  ;;  %v624_v54 = vadd.f32 %v12630_v26, %v14217_v11  ;;  %v19083_v31 = vsel %vm14709_vm9, 4294967295, %v19082_v31  ;;  %v14718_v50 = vld [vmem:[#allocation2 + $0x140] sm:$0xff]  ;;  %v1032_v13 = vand.u32 15, %v904_v5 }
 0x12e   :  { %12919 = vmatprep.mubr.msk.f32.mxu0 %vm791_vm2, %v2826_v7  ;;  %v618_v0 = vpop.f32.mrf.mxu0  ;;  %v14707_v23 = vld [vmem:[#allocation2 + $0x138] sm:$0xff]  ;;  %vm14727_vm7 = vcmp.lt.s32.totalorder %v1030_v14, 15  ;;  %v1031_v53 = vand.u32 15, %v903_v28 }
 0x12f   :  { %v2827_v12 = vld [vmem:[#allocation2 + $0x131] sm:$0xff]  ;;  %838 = vst.msk [vmem:[#allocation2 + $0x158] sm:$0xff] %vm791_vm2, %v767_v35  ;;  %v770_v8 = vmax.f32 %v624_v54, 0.0  ;;  %v619_v56 = vadd.f32 %v14217_v11, %v618_v0  ;;  %12722 = vmatprep.mubr.msk.f32.mxu1 %vm791_vm2, %v14707_v23  ;;  %v2828_v54 = vld [vmem:[#allocation2 + $0x139] sm:$0xff]  ;;  %v19084_v0 = vmov 0  ;;  %v906_v35 = vadd.s32 344, %v14223_v22 }
 0x130   :  { %v2955_v26 = vsel %vm14697_vm5, %v2827_v12, 0.0  ;;  %v14722_v7 = vld [vmem:[#allocation2 + $0x137] sm:$0xff]  ;;  %v12633_v1 = vpop.f32.mrf.mxu0  ;;  %12723 = vmatmul.mubr.msk.f32.gmra.mxu1 %vm791_vm2, %v14718_v50  ;;  %v19085_v0 = vsel %vm14727_vm7, 4294967295, %v19084_v0  ;;  %vm14743_vm5 = vcmp.ge.s32.totalorder %v1029_v52, 1  ;;  %vm14761_vm3 = vcmp.lt.s32.totalorder %v1032_v13, 15 }
 0x131   :  { %12920 = vmatmul.mubr.msk.f32.gmra.mxu0 %vm791_vm2, %v2955_v26  ;;  %19086 = vst [vmem:[#allocation50_spill] sm:$0xff] %v19085_v0  ;;  %841 = vst.msk [vmem:[#allocation2 + $0x170] sm:$0xff] %vm791_vm2, %v770_v8  ;;  %v769_v12 = vmax.f32 %v619_v56, 0.0  ;;  %v634_v26 = vadd.f32 %v12633_v1, %v14217_v11  ;;  %v19088_v41 = vsel %vm14743_vm5, 4294967295, %v19087_v41  ;;  %v14752_v11 = vld [vmem:[%s18973_s27] ss:$0 sm:$0xff] }
 0x132   :  { %12922 = vmatprep.mubr.msk.f32.mxu0 %vm791_vm2, %v2828_v54  ;;  %v628_v14 = vpop.f32.mrf.mxu0  ;;  %v14741_v30 = vld [vmem:[#allocation2 + $0x148] sm:$0xff]  ;;  %v14757_v8 = vld [vmem:[#allocation2 + $0x150] sm:$0xff]  ;;  %v19089_v52 = vmov 0 }
 0x133   :  { %v2829_v21 = vld [vmem:[#allocation2 + $0x141] sm:$0xff]  ;;  %840 = vst.msk [vmem:[#allocation2 + $0x168] sm:$0xff] %vm791_vm2, %v769_v12  ;;  %v772_v5 = vmax.f32 %v634_v26, 0.0  ;;  %v629_v1 = vadd.f32 %v14752_v11, %v628_v14  ;;  %12725 = vmatprep.mubr.msk.f32.mxu1 %vm791_vm2, %v14741_v30  ;;  %v19090_v52 = vsel %vm14761_vm3, 4294967295, %v19089_v52  ;;  %v2830_v12 = vld [vmem:[#allocation2 + $0x149] sm:$0xff]  ;;  %v1034_v26 = vand.u32 15, %v906_v35 }
 0x134   :  { %v2957_v28 = vsel %vm14727_vm7, %v2829_v21, 0.0  ;;  %19091 = vst [vmem:[#allocation51_spill] sm:$0xff] %v19090_v52  ;;  %v14765_v56 = vld [vmem:[#allocation2 + $0x147] sm:$0xff]  ;;  %v12636_v54 = vpop.f32.mrf.mxu0  ;;  %12726 = vmatmul.mubr.msk.f32.gmra.mxu1 %vm791_vm2, %v14757_v8  ;;  %v908_v14 = vadd.s32 360, %v14223_v22  ;;  %vm14782_vm7 = vcmp.ge.s32.totalorder %v1031_v53, 1  ;;  %v1033_v21 = vand.u32 15, %v905_v61 }
 0x135   :  { %12923 = vmatmul.mubr.msk.f32.gmra.mxu0 %vm791_vm2, %v2957_v28  ;;  %843 = vst.msk [vmem:[#allocation2 + $0x180] sm:$0xff] %vm791_vm2, %v772_v5  ;;  %v771_v0 = vmax.f32 %v629_v1, 0.0  ;;  %v644_v37 = vadd.f32 %v14752_v11, %v12636_v54  ;;  %v19093_v43 = vsel %vm14782_vm7, 4294967295, %v19092_v43  ;;  %v14791_v1 = vld [vmem:[#allocation2 + $0x160] sm:$0xff]  ;;  %v910_v53 = vadd.s32 376, %v14223_v22 }
 0x136   :  { %12925 = vmatprep.mubr.msk.f32.mxu0 %vm791_vm2, %v2830_v12  ;;  %v638_v28 = vpop.f32.mrf.mxu0  ;;  %v14780_v9 = vld [vmem:[#allocation2 + $0x158] sm:$0xff]  ;;  %vm14801_vm9 = vcmp.lt.s32.totalorder %v1034_v26, 15 }
 0x137   :  { %v2831_v35 = vld [vmem:[#allocation2 + $0x151] sm:$0xff]  ;;  %842 = vst.msk [vmem:[#allocation2 + $0x178] sm:$0xff] %vm791_vm2, %v771_v0  ;;  %v774_v13 = vmax.f32 %v644_v37, 0.0  ;;  %v639_v5 = vadd.f32 %v14752_v11, %v638_v28  ;;  %12728 = vmatprep.mubr.msk.f32.mxu1 %vm791_vm2, %v14780_v9  ;;  %v2832_v37 = vld [vmem:[#allocation2 + $0x159] sm:$0xff]  ;;  %v19094_v0 = vmov 0  ;;  %v1036_v28 = vand.u32 15, %v908_v14 }
 0x138   :  { %v2959_v54 = vsel %vm14761_vm3, %v2831_v35, 0.0  ;;  %v14796_v12 = vld [vmem:[#allocation2 + $0x157] sm:$0xff]  ;;  %v12639_v61 = vpop.f32.mrf.mxu0  ;;  %12729 = vmatmul.mubr.msk.f32.gmra.mxu1 %vm791_vm2, %v14791_v1  ;;  %v19095_v0 = vsel %vm14801_vm9, 4294967295, %v19094_v0  ;;  %vm14816_vm3 = vcmp.ge.s32.totalorder %v1033_v21, 1  ;;  %v19097_v14 = vmov 0 }
 0x139   :  { %12926 = vmatmul.mubr.msk.f32.gmra.mxu0 %vm791_vm2, %v2959_v54  ;;  %19096 = vst [vmem:[#allocation52_spill] sm:$0xff] %v19095_v0  ;;  %845 = vst.msk [vmem:[#allocation2 + $0x190] sm:$0xff] %vm791_vm2, %v774_v13  ;;  %v773_v6 = vmax.f32 %v639_v5, 0.0  ;;  %v654_v51 = vadd.f32 %v14752_v11, %v12639_v61  ;;  %v19098_v14 = vsel %vm14816_vm3, 4294967295, %v19097_v14  ;;  %v1035_v35 = vand.u32 15, %v907_v27  ;;  %v14825_v5 = vld [vmem:[#allocation2 + $0x170] sm:$0xff] }
 0x13a   :  { %12928 = vmatprep.mubr.msk.f32.mxu0 %vm791_vm2, %v2832_v37  ;;  %v648_v26 = vpop.f32.mrf.mxu0  ;;  %v14814_v54 = vld [vmem:[#allocation2 + $0x168] sm:$0xff]  ;;  %v1038_v21 = vand.u32 15, %v910_v53  ;;  %vm14834_vm5 = vcmp.lt.s32.totalorder %v1036_v28, 15  ;;  %v912_v27 = vadd.s32 392, %v14223_v22 }
 0x13b   :  { %v2833_v18 = vld [vmem:[#allocation2 + $0x161] sm:$0xff]  ;;  %844 = vst.msk [vmem:[#allocation2 + $0x188] sm:$0xff] %vm791_vm2, %v773_v6  ;;  %v776_v52 = vmax.f32 %v654_v51, 0.0  ;;  %v649_v13 = vadd.f32 %v14752_v11, %v648_v26  ;;  %12731 = vmatprep.mubr.msk.f32.mxu1 %vm791_vm2, %v14814_v54  ;;  %v2834_v51 = vld [vmem:[#allocation2 + $0x169] sm:$0xff]  ;;  %v19099_v6 = vmov 0 }
 0x13c   :  { %v2961_v61 = vsel %vm14801_vm9, %v2833_v18, 0.0  ;;  %v14829_v37 = vld [vmem:[#allocation2 + $0x167] sm:$0xff]  ;;  %v12642_v25 = vpop.f32.mrf.mxu0  ;;  %12732 = vmatmul.mubr.msk.f32.gmra.mxu1 %vm791_vm2, %v14825_v5  ;;  %v19100_v6 = vsel %vm14834_vm5, 4294967295, %v19099_v6  ;;  %vm14850_vm9 = vcmp.ge.s32.totalorder %v1035_v35, 1  ;;  %v1037_v18 = vand.u32 15, %v909_v2 }
 0x13d   :  { %12929 = vmatmul.mubr.msk.f32.gmra.mxu0 %vm791_vm2, %v2961_v61  ;;  %19101 = vst [vmem:[#allocation53_spill] sm:$0xff] %v19100_v6  ;;  %847 = vst.msk [vmem:[#allocation2 + $0x1a0] sm:$0xff] %vm791_vm2, %v776_v52  ;;  %v775_v26 = vmax.f32 %v649_v13, 0.0  ;;  %v664_v61 = vadd.f32 %v14752_v11, %v12642_v25  ;;  %v19103_v48 = vsel %vm14850_vm9, 4294967295, %v19102_v48  ;;  %v14859_v25 = vld [vmem:[#allocation2 + $0x180] sm:$0xff]  ;;  %vm14863_vm7 = vcmp.lt.s32.totalorder %v1038_v21, 15 }
 0x13e   :  { %12931 = vmatprep.mubr.msk.f32.mxu0 %vm791_vm2, %v2834_v51  ;;  %v658_v28 = vpop.f32.mrf.mxu0  ;;  %v14848_v0 = vld [vmem:[#allocation2 + $0x178] sm:$0xff]  ;;  %19104 = vst [vmem:[#allocation54_spill] sm:$0xff] %v14859_v25  ;;  %v19105_v35 = vmov 0 }
 0x13f   :  { %v2835_v47 = vld [vmem:[#allocation2 + $0x171] sm:$0xff]  ;;  %846 = vst.msk [vmem:[#allocation2 + $0x198] sm:$0xff] %vm791_vm2, %v775_v26  ;;  %v778_v53 = vmax.f32 %v664_v61, 0.0  ;;  %v659_v52 = vadd.f32 %v14752_v11, %v658_v28  ;;  %12734 = vmatprep.mubr.msk.f32.mxu1 %vm791_vm2, %v14848_v0  ;;  %v19106_v35 = vsel %vm14863_vm7, 4294967295, %v19105_v35  ;;  %v2836_v26 = vld [vmem:[#allocation2 + $0x179] sm:$0xff]  ;;  %v1040_v61 = vand.u32 15, %v912_v27 }
 0x140   :  { %v2963_v13 = vsel %vm14834_vm5, %v2835_v47, 0.0  ;;  %19107 = vst [vmem:[#allocation55_spill] sm:$0xff] %v19106_v35  ;;  %v14867_v2 = vld [vmem:[#allocation2 + $0x177] sm:$0xff]  ;;  %v12645_v51 = vpop.f32.mrf.mxu0  ;;  %12735 = vmatmul.mubr.msk.f32.gmra.mxu1 %vm791_vm2, %v14859_v25  ;;  %v914_v28 = vadd.s32 408, %v14223_v22  ;;  %vm14884_vm5 = vcmp.ge.s32.totalorder %v1037_v18, 1  ;;  %v1039_v47 = vand.u32 15, %v911_v60 }
 0x141   :  { %12932 = vmatmul.mubr.msk.f32.gmra.mxu0 %vm791_vm2, %v2963_v13  ;;  %849 = vst.msk [vmem:[#allocation2 + $0x1b0] sm:$0xff] %vm791_vm2, %v778_v53  ;;  %v777_v6 = vmax.f32 %v659_v52, 0.0  ;;  %v674_v16 = vadd.f32 %v14752_v11, %v12645_v51  ;;  %v19110_v62 = vsel %vm14884_vm5, 4294967295, %v19109_v62  ;;  %v14893_v52 = vld [vmem:[#allocation2 + $0x190] sm:$0xff]  ;;  %v916_v18 = vadd.s32 424, %v14223_v22 }
 0x142   :  { %12934 = vmatprep.mubr.msk.f32.mxu0 %vm791_vm2, %v2836_v26  ;;  %v668_v13 = vpop.f32.mrf.mxu0  ;;  %v14882_v34 = vld [vmem:[#allocation2 + $0x188] sm:$0xff]  ;;  %19111 = vst [vmem:[#allocation57_spill] sm:$0xff] %v14893_v52  ;;  %vm14903_vm3 = vcmp.lt.s32.totalorder %v1040_v61, 15  ;;  %v1041_v35 = vand.u32 15, %v913_v33  ;;  %v919_v25 = vadd.s32 448, %v14223_v22 }
 0x143   :  { %19108 = vst [vmem:[#allocation56_spill] sm:$0xff] %v14882_v34  ;;  %v2837_v27 = vld [vmem:[#allocation2 + $0x181] sm:$0xff]  ;;  %848 = vst.msk [vmem:[#allocation2 + $0x1a8] sm:$0xff] %vm791_vm2, %v777_v6  ;;  %v780_v21 = vmax.f32 %v674_v16, 0.0  ;;  %v669_v53 = vadd.f32 %v14752_v11, %v668_v13  ;;  %12737 = vmatprep.mubr.msk.f32.mxu1 %vm791_vm2, %v14882_v34  ;;  %v2838_v16 = vld [vmem:[#allocation2 + $0x189] sm:$0xff]  ;;  %v19113_v6 = vmov 0 }
 0x144   :  { %v2965_v51 = vsel %vm14863_vm7, %v2837_v27, 0.0  ;;  %v14898_v26 = vld [vmem:[#allocation2 + $0x187] sm:$0xff]  ;;  %v12648_v60 = vpop.f32.mrf.mxu0  ;;  %12738 = vmatmul.mubr.msk.f32.gmra.mxu1 %vm791_vm2, %v14893_v52  ;;  %v19114_v6 = vsel %vm14903_vm3, 4294967295, %v19113_v6  ;;  %v1042_v13 = vand.u32 15, %v914_v28  ;;  %v14910_v27 = vld [vmem:[%s18972_s26 + $0x38] sm:$0xff]  ;;  %vm14924_vm7 = vcmp.ge.s32.totalorder %v1039_v47, 1 }
 0x145   :  { %19112 = vst [vmem:[#allocation58_spill] sm:$0xff] %v14898_v26  ;;  %12935 = vmatmul.mubr.msk.f32.gmra.mxu0 %vm791_vm2, %v2965_v51  ;;  %19115 = vst [vmem:[#allocation59_spill] sm:$0xff] %v19114_v6  ;;  %v779_v61 = vmax.f32 %v669_v53, 0.0  ;;  %v684_v51 = vadd.f32 %v14752_v11, %v12648_v60  ;;  %12961 = vmatprep.subr.mxu1 %v14910_v27  ;;  %v19118_v3 = vsel %vm14924_vm7, 4294967295, %v19117_v3  ;;  %v14933_v60 = vld [vmem:[#allocation2 + $0x1a0] sm:$0xff]  ;;  %v1044_v47 = vand.u32 15, %v916_v18 }
 0x146   :  { %851 = vst.msk [vmem:[#allocation2 + $0x1c0] sm:$0xff] %vm791_vm2, %v780_v21  ;;  %12937 = vmatprep.mubr.msk.f32.mxu0 %vm791_vm2, %v2838_v16  ;;  %v678_v28 = vpop.f32.mrf.mxu0  ;;  %v14922_v44 = vld [vmem:[#allocation2 + $0x198] sm:$0xff]  ;;  %19119 = vst [vmem:[#allocation61_spill] sm:$0xff] %v19118_v3  ;;  %vm14942_vm9 = vcmp.lt.s32.totalorder %v1042_v13, 15  ;;  %v917_v26 = vadd.s32 432, %v14223_v22  ;;  %v921_v3 = vadd.s32 464, %v14223_v22 }
 0x147   :  { %19116 = vst [vmem:[#allocation60_spill] sm:$0xff] %v14922_v44  ;;  %v2839_v24 = vld [vmem:[#allocation2 + $0x191] sm:$0xff]  ;;  %850 = vst.msk [vmem:[#allocation2 + $0x1b8] sm:$0xff] %vm791_vm2, %v779_v61  ;;  %v782_v21 = vmax.f32 %v684_v51, 0.0  ;;  %v679_v53 = vadd.f32 %v14752_v11, %v678_v28  ;;  %12740 = vmatprep.mubr.msk.f32.mxu1 %vm791_vm2, %v14922_v44  ;;  %v2840_v33 = vld [vmem:[#allocation2 + $0x199] sm:$0xff]  ;;  %v19122_v61 = vmov 0 }
 0x148   :  { %19120 = vst [vmem:[#allocation62_spill] sm:$0xff] %v14933_v60  ;;  %v2967_v16 = vsel %vm14903_vm3, %v2839_v24, 0.0  ;;  %v14937_v52 = vld [vmem:[#allocation2 + $0x197] sm:$0xff]  ;;  %v12651_v34 = vpop.f32.mrf.mxu0  ;;  %12741 = vmatmul.mubr.msk.f32.gmra.mxu1 %vm791_vm2, %v14933_v60  ;;  %v19123_v61 = vsel %vm14942_vm9, 4294967295, %v19122_v61  ;;  %v918_v51 = vadd.s32 440, %v14223_v22  ;;  %vm14958_vm3 = vcmp.ge.s32.totalorder %v1041_v35, 1 }
 0x149   :  { %19121 = vst [vmem:[#allocation63_spill] sm:$0xff] %v14937_v52  ;;  %12938 = vmatmul.mubr.msk.f32.gmra.mxu0 %vm791_vm2, %v2967_v16  ;;  %19124 = vst [vmem:[#allocation64_spill] sm:$0xff] %v19123_v61  ;;  %v781_v28 = vmax.f32 %v679_v53, 0.0  ;;  %v694_v16 = vadd.f32 %v14752_v11, %v12651_v34  ;;  %v19126_v44 = vmov 0  ;;  %v1043_v24 = vand.u32 15, %v915_v4  ;;  %v14967_v34 = vld [vmem:[#allocation2 + $0x1b0] sm:$0xff] }
 0x14a   :  { %853 = vst.msk [vmem:[#allocation2 + $0x1d0] sm:$0xff] %vm791_vm2, %v782_v21  ;;  %12940 = vmatprep.mubr.msk.f32.mxu0 %vm791_vm2, %v2840_v33  ;;  %v688_v13 = vpop.f32.mrf.mxu0  ;;  %v14956_v6 = vld [vmem:[#allocation2 + $0x1a8] sm:$0xff]  ;;  %v19127_v44 = vsel %vm14958_vm3, 4294967295, %v19126_v44  ;;  %19129 = vst [vmem:[#allocation67_spill] sm:$0xff] %v14967_v34  ;;  %vm14971_vm5 = vcmp.lt.s32.totalorder %v1044_v47, 15  ;;  %v19130_v35 = vmov 0 }
 0x14b   :  { %19125 = vst [vmem:[#allocation65_spill] sm:$0xff] %v14956_v6  ;;  %v2841_v60 = vld [vmem:[#allocation2 + $0x1a1] sm:$0xff]  ;;  %19128 = vst [vmem:[#allocation66_spill] sm:$0xff] %v19127_v44  ;;  %v784_v18 = vmax.f32 %v694_v16, 0.0  ;;  %v689_v21 = vadd.f32 %v14752_v11, %v688_v13  ;;  %12743 = vmatprep.mubr.msk.f32.mxu1 %vm791_vm2, %v14956_v6  ;;  %v19131_v35 = vsel %vm14971_vm5, 4294967295, %v19130_v35  ;;  %v1046_v16 = vand.u32 15, %v918_v51 }
 0x14c   :  { %852 = vst.msk [vmem:[#allocation2 + $0x1c8] sm:$0xff] %vm791_vm2, %v781_v28  ;;  %v2969_v53 = vsel %vm14942_vm9, %v2841_v60, 0.0  ;;  %19132 = vst [vmem:[#allocation68_spill] sm:$0xff] %v19131_v35  ;;  %v14975_v4 = vld [vmem:[#allocation2 + $0x1a7] sm:$0xff]  ;;  %v12654_v33 = vpop.f32.mrf.mxu0  ;;  %12744 = vmatmul.mubr.msk.f32.gmra.mxu1 %vm791_vm2, %v14967_v34  ;;  %v920_v13 = vadd.s32 456, %v14223_v22  ;;  %vm14992_vm9 = vcmp.ge.s32.totalorder %v1043_v24, 1 }
 0x14d   :  { %19133 = vst [vmem:[#allocation69_spill] sm:$0xff] %v14975_v4  ;;  %12941 = vmatmul.mubr.msk.f32.gmra.mxu0 %vm791_vm2, %v2969_v53  ;;  %v2842_v28 = vld [vmem:[#allocation2 + $0x1a9] sm:$0xff]  ;;  %855 = vst.msk [vmem:[#allocation2 + $0x1e0] sm:$0xff] %vm791_vm2, %v784_v18  ;;  %v783_v61 = vmax.f32 %v689_v21, 0.0  ;;  %v704_v6 = vadd.f32 %v14752_v11, %v12654_v33  ;;  %v19135_v52 = vmov 0  ;;  %v1045_v60 = vand.u32 15, %v917_v26 }
 0x14e   :  { %12943 = vmatprep.mubr.msk.f32.mxu0 %vm791_vm2, %v2842_v28  ;;  %v698_v53 = vpop.f32.mrf.mxu0  ;;  %v14990_v34 = vld [vmem:[#allocation2 + $0x1b8] sm:$0xff]  ;;  %v19136_v52 = vsel %vm14992_vm9, 4294967295, %v19135_v52  ;;  %v15001_v21 = vld [vmem:[#allocation2 + $0x1c0] sm:$0xff]  ;;  %v922_v24 = vadd.s32 472, %v14223_v22  ;;  %vm15011_vm7 = vcmp.lt.s32.totalorder %v1046_v16, 15  ;;  %v923_v44 = vadd.s32 480, %v14223_v22 }
 0x14f   :  { %19134 = vst [vmem:[#allocation70_spill] sm:$0xff] %v14990_v34  ;;  %v2843_v51 = vld [vmem:[#allocation2 + $0x1b1] sm:$0xff]  ;;  %19137 = vst [vmem:[#allocation71_spill] sm:$0xff] %v19136_v52  ;;  %v786_v47 = vmax.f32 %v704_v6, 0.0  ;;  %v699_v18 = vadd.f32 %v14752_v11, %v698_v53  ;;  %12746 = vmatprep.mubr.msk.f32.mxu1 %vm791_vm2, %v14990_v34  ;;  %v2844_v6 = vld [vmem:[#allocation2 + $0x1b9] sm:$0xff]  ;;  %v1048_v53 = vand.u32 15, %v920_v13 }
 0x150   :  { %854 = vst.msk [vmem:[#allocation2 + $0x1d8] sm:$0xff] %vm791_vm2, %v783_v61  ;;  %19138 = vst [vmem:[#allocation72_spill] sm:$0xff] %v15001_v21  ;;  %v2971_v33 = vsel %vm14971_vm5, %v2843_v51, 0.0  ;;  %v15006_v28 = vld [vmem:[#allocation2 + $0x1b7] sm:$0xff]  ;;  %v12657_v26 = vpop.f32.mrf.mxu0  ;;  %12747 = vmatmul.mubr.msk.f32.gmra.mxu1 %vm791_vm2, %v15001_v21  ;;  %v19140_v61 = vmov 0  ;;  %vm15026_vm5 = vcmp.ge.s32.totalorder %v1045_v60, 1 }
 0x151   :  { %19139 = vst [vmem:[#allocation73_spill] sm:$0xff] %v15006_v28  ;;  %12944 = vmatmul.mubr.msk.f32.gmra.mxu0 %vm791_vm2, %v2971_v33  ;;  %v19141_v61 = vsel %vm15011_vm7, 4294967295, %v19140_v61  ;;  %857 = vst.msk [vmem:[#allocation2 + $0x1f0] sm:$0xff] %vm791_vm2, %v786_v47  ;;  %v785_v34 = vmax.f32 %v699_v18, 0.0  ;;  %v714_v21 = vadd.f32 %v14752_v11, %v12657_v26  ;;  %v19144_v13 = vmov 0  ;;  %v15035_v18 = vld [vmem:[#allocation2 + $0x1d0] sm:$0xff] }
 0x152   :  { %19142 = vst [vmem:[#allocation74_spill] sm:$0xff] %v19141_v61  ;;  %12946 = vmatprep.mubr.msk.f32.mxu0 %vm791_vm2, %v2844_v6  ;;  %v708_v16 = vpop.f32.mrf.mxu0  ;;  %v19145_v13 = vsel %vm15026_vm5, 4294967295, %v19144_v13  ;;  %v1047_v51 = vand.u32 15, %v919_v25  ;;  %19147 = vst [vmem:[#allocation77_spill] sm:$0xff] %v15035_v18  ;;  %v1050_v60 = vand.u32 15, %v922_v24  ;;  %vm15044_vm3 = vcmp.lt.s32.totalorder %v1048_v53, 15 }
 0x153   :  { %v15024_v33 = vld [vmem:[#allocation2 + $0x1c8] sm:$0xff]  ;;  %19146 = vst [vmem:[#allocation76_spill] sm:$0xff] %v19145_v13  ;;  %856 = vst.msk [vmem:[#allocation2 + $0x1e8] sm:$0xff] %vm791_vm2, %v785_v34  ;;  %v788_v35 = vmax.f32 %v714_v21, 0.0  ;;  %v709_v47 = vadd.f32 %v14752_v11, %v708_v16  ;;  %v19148_v34 = vmov 0  ;;  %v924_v21 = vadd.s32 488, %v14223_v22 }
 0x154   :  { %19143 = vst [vmem:[#allocation75_spill] sm:$0xff] %v15024_v33  ;;  %v2845_v4 = vld [vmem:[#allocation2 + $0x1c1] sm:$0xff]  ;;  %12749 = vmatprep.mubr.msk.f32.mxu1 %vm791_vm2, %v15024_v33  ;;  %v12660_v28 = vpop.f32.mrf.mxu0  ;;  %v2846_v25 = vld [vmem:[#allocation2 + $0x1c9] sm:$0xff]  ;;  %v19149_v34 = vsel %vm15044_vm3, 4294967295, %v19148_v34  ;;  %v19151_v33 = vmov 0  ;;  %vm15073_vm9 = vcmp.lt.s32.totalorder %v1050_v60, 15 }
 0x155   :  { %v2973_v26 = vsel %vm15011_vm7, %v2845_v4, 0.0  ;;  %v15039_v6 = vld [vmem:[#allocation2 + $0x1c7] sm:$0xff]  ;;  %12750 = vmatmul.mubr.msk.f32.gmra.mxu1 %vm791_vm2, %v15035_v18  ;;  %19150 = vst [vmem:[#allocation78_spill] sm:$0xff] %v19149_v34  ;;  %859 = vst.msk [vmem:[#allocation2 + $0x200] sm:$0xff] %vm791_vm2, %v788_v35  ;;  %v787_v16 = vmax.f32 %v709_v47, 0.0  ;;  %vm15060_vm7 = vcmp.ge.s32.totalorder %v1047_v51, 1 }
 0x156   :  { %12947 = vmatmul.mubr.msk.f32.gmra.mxu0 %vm791_vm2, %v2973_v26  ;;  %v724_v26 = vadd.f32 %v14752_v11, %v12660_v28  ;;  %v718_v53 = vpop.f32.mrf.mxu0  ;;  %v19152_v33 = vsel %vm15060_vm7, 4294967295, %v19151_v33  ;;  %v1049_v4 = vand.u32 15, %v921_v3  ;;  %v15069_v28 = vld [vmem:[#allocation2 + $0x1e0] sm:$0xff]  ;;  %v19154_v51 = vmov 0 }
 0x157   :  { %12949 = vmatprep.mubr.msk.f32.mxu0 %vm791_vm2, %v2846_v25  ;;  %v15058_v61 = vld [vmem:[#allocation2 + $0x1d8] sm:$0xff]  ;;  %19153 = vst [vmem:[#allocation79_spill] sm:$0xff] %v19152_v33  ;;  %858 = vst.msk [vmem:[#allocation2 + $0x1f8] sm:$0xff] %vm791_vm2, %v787_v16  ;;  %v719_v35 = vadd.f32 %v14752_v11, %v718_v53  ;;  %v19155_v51 = vsel %vm15073_vm9, 4294967295, %v19154_v51  ;;  %v1052_v25 = vand.u32 15, %v924_v21  ;;  %v926_v16 = vadd.s32 504, %v14223_v22 }
 0x158   :  { %v2847_v18 = vld [vmem:[#allocation2 + $0x1d1] sm:$0xff]  ;;  %v790_v24 = vmax.f32 %v724_v26, 0.0  ;;  %12752 = vmatprep.mubr.msk.f32.mxu1 %vm791_vm2, %v15058_v61  ;;  %19156 = vst [vmem:[#allocation80_spill] sm:$0xff] %v19155_v51  ;;  %v2848_v11 = vld [vmem:[#allocation2 + $0x1d9] sm:$0xff] }
 0x159   :  { %v2975_v47 = vsel %vm15044_vm3, %v2847_v18, 0.0  ;;  %v15077_v3 = vld [vmem:[#allocation2 + $0x1d7] sm:$0xff]  ;;  %12753 = vmatmul.mubr.msk.f32.gmra.mxu1 %vm791_vm2, %v15069_v28  ;;  %v789_v60 = vmax.f32 %v719_v35, 0.0  ;;  %vm15100_vm3 = vcmp.ge.s32.totalorder %v1049_v4, 1  ;;  %v19157_v18 = vmov 0 }
 0x15a   :  { %12950 = vmatmul.mubr.msk.f32.gmra.mxu0 %vm791_vm2, %v2975_v47  ;;  %861 = vst.msk [vmem:[#allocation2 + $0x210] sm:$0xff] %vm791_vm2, %v790_v24  ;;  %v15091_v53 = vld [vmem:[#allocation2 + $0x1e8] sm:$0xff]  ;;  %v15096_v21 = vld [vmem:[#allocation2 + $0x1f0] sm:$0xff]  ;;  %v19158_v18 = vsel %vm15100_vm3, 4294967295, %v19157_v18  ;;  %v1051_v24 = vand.u32 15, %v923_v44  ;;  %vm15109_vm5 = vcmp.lt.s32.totalorder %v1052_v25, 15 }
 0x15b   :  { %12952 = vmatprep.mubr.msk.f32.mxu0 %vm791_vm2, %v2848_v11  ;;  %v2849_v47 = vld [vmem:[#allocation2 + $0x1e1] sm:$0xff]  ;;  %860 = vst.msk [vmem:[#allocation2 + $0x208] sm:$0xff] %vm791_vm2, %v789_v60  ;;  %12755 = vmatprep.mubr.msk.f32.mxu1 %vm791_vm2, %v15091_v53  ;;  %v2850_v11 = vld [vmem:[#allocation2 + $0x1e9] sm:$0xff]  ;;  %v19159_v60 = vmov 0  ;;  %v1054_v34 = vand.u32 15, %v926_v16  ;;  %v19166_v44 = vmov 0 }
 0x15c   :  { %v2977_v26 = vsel %vm15073_vm9, %v2849_v47, 0.0  ;;  %v15104_v35 = vld [vmem:[#allocation2 + $0x1e7] sm:$0xff]  ;;  %v19160_v60 = vsel %vm15109_vm5, 4294967295, %v19159_v60  ;;  %vm15128_vm9 = vcmp.ge.s32.totalorder %v1051_v24, 1 }
 0x15d   :  { %12756 = vmatmul.mubr.msk.f32.gmra.mxu1 %vm791_vm2, %v15096_v21  ;;  %19161 = vst [vmem:[#allocation81_spill] sm:$0xff] %v19160_v60  ;;  %v15124_v25 = vld [vmem:[#allocation2 + $0x200] sm:$0xff]  ;;  %vm15137_vm7 = vcmp.lt.s32.totalorder %v1054_v34, 15  ;;  %v19169_v60 = vmov 0.0   ;;  %v11562_v24 = vld [vmem:[%s18972_s26 + $0x68] sm:$0xff] }
 0x15e   :  { %12953 = vmatmul.mubr.msk.f32.gmra.mxu0 %vm791_vm2, %v2977_v26  ;;  %v15120_v47 = vld [vmem:[#allocation2 + $0x1f8] sm:$0xff]  ;;  %19163 = vst [vmem:[#allocation83_spill] sm:$0xff] %v15124_v25  ;;  %v19164_v26 = vmov 0  ;;  %v19167_v44 = vsel %vm15137_vm7, 4294967295, %v19166_v44  ;;  %13261 = vmatprep.subr.mxu0 %v11562_v24 }
 0x15f   :  { %12955 = vmatprep.mubr.msk.f32.mxu0 %vm791_vm2, %v2850_v11  ;;  %19162 = vst [vmem:[#allocation82_spill] sm:$0xff] %v15120_v47  ;;  %v2851_v51 = vld [vmem:[#allocation2 + $0x1f1] sm:$0xff]  ;;  %12758 = vmatprep.mubr.msk.f32.mxu1 %vm791_vm2, %v15120_v47  ;;  %v19165_v26 = vsel %vm15128_vm9, 4294967295, %v19164_v26  ;;  %v2852_v11 = vld [vmem:[#allocation2 + $0x1f9] sm:$0xff]  ;;  %19168 = vst [vmem:[#allocation84_spill] sm:$0xff] %v19167_v44 }
 0x160   :  { %v2979_v16 = vsel %vm15109_vm5, %v2851_v51, 0.0  ;;  %v15132_v4 = vld [vmem:[#allocation2 + $0x1f7] sm:$0xff]  ;;  %v15172_v44 = vld [vmem:[#allocation2 + $0x27] sm:$0xff]  ;;  %vm19174_vm5 = vnez %v19062_v40 }
 0x161   :  { %12759 = vmatmul.mubr.msk.f32.gmra.mxu1 %vm791_vm2, %v15124_v25  ;;  %v15149_v25 = vld [vmem:[#allocation2 + $0x17] sm:$0xff]  ;;  %19171 = vst [vmem:[#allocation86_spill] sm:$0xff] %v15172_v44 }
 0x162   :  { %12956 = vmatmul.mubr.msk.f32.gmra.mxu0 %vm791_vm2, %v2979_v16  ;;  %12765 = vmatprep.mubr.f32.mxu1 %v19169_v60  ;;  %v2853_v16 = vld [vmem:[#allocation2 + $0x201] sm:$0xff]  ;;  %v1441_v51 = vsel %vm14258_vm4, %v15149_v25, 0.0  ;;  %v4398_v47 = vld [vmem:[#allocation2 + $0x18] sm:$0xff] }
 0x163   :  { %12958 = vmatprep.mubr.msk.f32.mxu0 %vm791_vm2, %v2852_v11  ;;  %v2981_v34 = vsel %vm15137_vm7, %v2853_v16, 0.0  ;;  %v11363_v11 = vld [vmem:[%s18972_s26 + $0x30] sm:$0xff]  ;;  %v15167_v16 = vld [vmem:[#allocation2 + $0x1f] sm:$0xff]  ;;  %vm19172_vm7 = vnez %v19055_v45 }
 0x164   :  { %19170 = vst [vmem:[#allocation85_spill] sm:$0xff] %v15167_v16 }
 0x165   :  { %12766 = vmatmul.mubr.f32.vlgmr.msra.gmra.mxu1 %v19169_v60 }
 0x166   :  { %12959 = vmatmul.mubr.msk.f32.gmra.mxu0 %vm791_vm2, %v2981_v34  ;;  %12768 = vmatprep.mubr.msk.f32.mxu1 %vm791_vm2, %v1441_v51  ;;  %v4399_v34 = vld [vmem:[#allocation2 + $0x20] sm:$0xff]  ;;  %v1443_v51 = vsel %vm14283_vm6, %v15172_v44, 0.0  ;;  %v1445_v44 = vsel %vm14311_vm8, %v13761_v15, 0.0  ;;  %v15200_v15 = vld [vmem:[#allocation2 + $0x4f] sm:$0xff] }
 0x167   :  { %13065 = vmatprep.mubr.msk.f32.mxu0 %vm791_vm2, %v4398_v47  ;;  %12962 = vmatpush3.msra.mxu1 %v14910_v27  ;;  %v11561_v27 = vld [vmem:[%s18972_s26 + $0x60] sm:$0xff]  ;;  %v15182_v47 = vld [vmem:[#allocation2 + $0x2f] sm:$0xff] }
 0x168   :  { %12963 = vmatprep.subr.mxu1 %v11363_v11 }
 0x169   :  { %12769 = vmatmul.mubr.msk.f32.gmra.mxu1 %vm791_vm2, %v15167_v16  ;;  %v4402_v16 = vld [vmem:[#allocation2 + $0x38] sm:$0xff] }
 0x16a   :  { %13066 = vmatmul.mubr.msk.f32.vlgmr.msra.gmra.mxu0 %vm791_vm2, %v4399_v34  ;;  %12771 = vmatprep.mubr.msk.f32.mxu1 %vm791_vm2, %v1443_v51  ;;  %v4401_v34 = vld [vmem:[#allocation2 + $0x30] sm:$0xff] }
 0x16b   :  { %13068 = vmatprep.mubr.msk.f32.mxu0 %vm791_vm2, %v4400_v59  ;;  %12964 = vmatpush3.msra.mxu1 %v11363_v11  ;;  %v15191_v59 = vld [vmem:[#allocation2 + $0x3f] sm:$0xff]  ;;  %v13762_v11 = vld [vmem:[#allocation2 + $0x47] sm:$0xff] }
 0x16c   :  { %13262 = vmatpush3.msra.mxu0 %v11562_v24  ;;  %v4403_v24 = vld [vmem:[#allocation2 + $0x40] sm:$0xff]  ;;  %v1447_v51 = vsel %vm14339_vm10, %v13762_v11, 0.0 }
 0x16d   :  { %13263 = vmatprep.subr.mxu0 %v11561_v27  ;;  %12772 = vmatmul.mubr.msk.f32.gmra.mxu1 %vm791_vm2, %v15182_v47  ;;  %v15209_v11 = vld [vmem:[#allocation2 + $0x5f] sm:$0xff] }
 0x16e   :  { %13069 = vmatmul.mubr.msk.f32.gmra.mxu0 %vm791_vm2, %v4401_v34  ;;  %12774 = vmatprep.mubr.msk.f32.mxu1 %vm791_vm2, %v1445_v44  ;;  %v4404_v34 = vld [vmem:[#allocation2 + $0x48] sm:$0xff]  ;;  %v4405_v44 = vld [vmem:[#allocation2 + $0x50] sm:$0xff] }
 0x16f   :  { %13071 = vmatprep.mubr.msk.f32.mxu0 %vm791_vm2, %v4402_v16  ;;  %13264 = vmatpush3.msra.mxu0 %v11561_v27  ;;  %v13763_v16 = vld [vmem:[#allocation2 + $0x57] sm:$0xff] }
 0x170   :  { %v1449_v27 = vsel %vm14367_vm12, %v13763_v16, 0.0  ;;  %v15218_v16 = vld [vmem:[#allocation2 + $0x6f] sm:$0xff] }
 0x171   :  { %12775 = vmatmul.mubr.msk.f32.gmra.mxu1 %vm791_vm2, %v15191_v59 }
 0x172   :  { %13072 = vmatmul.mubr.msk.f32.gmra.mxu0 %vm791_vm2, %v4403_v24  ;;  %12777 = vmatprep.mubr.msk.f32.mxu1 %vm791_vm2, %v1447_v51  ;;  %v4406_v24 = vld [vmem:[#allocation2 + $0x58] sm:$0xff]  ;;  %v4407_v51 = vld [vmem:[#allocation2 + $0x60] sm:$0xff] }
 0x173   :  { %13074 = vmatprep.mubr.msk.f32.mxu0 %vm791_vm2, %v4404_v34  ;;  %v13764_v34 = vld [vmem:[#allocation2 + $0x67] sm:$0xff] }
 0x175   :  { %12778 = vmatmul.mubr.msk.f32.gmra.mxu1 %vm791_vm2, %v15200_v15 }
 0x176   :  { %13075 = vmatmul.mubr.msk.f32.gmra.mxu0 %vm791_vm2, %v4405_v44  ;;  %12780 = vmatprep.mubr.msk.f32.mxu1 %vm791_vm2, %v1449_v27  ;;  %v1451_v44 = vsel %vm14395_vm14, %v13764_v34, 0.0  ;;  %v4409_v27 = vld [vmem:[#allocation2 + $0x70] sm:$0xff]  ;;  %v15227_v34 = vld [vmem:[#allocation2 + $0x7f] sm:$0xff] }
 0x177   :  { %13077 = vmatprep.mubr.msk.f32.mxu0 %vm791_vm2, %v4406_v24  ;;  %v13765_v24 = vld [vmem:[#allocation2 + $0x77] sm:$0xff] }
 0x179   :  { %12781 = vmatmul.mubr.msk.f32.gmra.mxu1 %vm791_vm2, %v15209_v11 }
 0x17a   :  { %13078 = vmatmul.mubr.msk.f32.gmra.mxu0 %vm791_vm2, %v4407_v51  ;;  %12783 = vmatprep.mubr.msk.f32.mxu1 %vm791_vm2, %v1451_v44  ;;  %v1453_v51 = vsel %vm14423_vm1, %v13765_v24, 0.0  ;;  %v13766_v44 = vld [vmem:[#allocation2 + $0x87] sm:$0xff]  ;;  %v15236_v24 = vld [vmem:[#allocation2 + $0x8f] sm:$0xff] }
 0x17b   :  { %13080 = vmatprep.mubr.msk.f32.mxu0 %vm791_vm2, %v4408_v58  ;;  %v4411_v58 = vld [vmem:[#allocation2 + $0x80] sm:$0xff] }
 0x17d   :  { %12784 = vmatmul.mubr.msk.f32.gmra.mxu1 %vm791_vm2, %v15218_v16 }
 0x17e   :  { %13081 = vmatmul.mubr.msk.f32.gmra.mxu0 %vm791_vm2, %v4409_v27  ;;  %12786 = vmatprep.mubr.msk.f32.mxu1 %vm791_vm2, %v1453_v51  ;;  %v1455_v27 = vsel %vm14451_vm15, %v13766_v44, 0.0  ;;  %v13767_v51 = vld [vmem:[#allocation2 + $0x97] sm:$0xff]  ;;  %v15245_v44 = vld [vmem:[#allocation2 + $0x9f] sm:$0xff] }
 0x17f   :  { %13083 = vmatprep.mubr.msk.f32.mxu0 %vm791_vm2, %v4410_v20  ;;  %v4413_v20 = vld [vmem:[#allocation2 + $0x90] sm:$0xff] }
 0x181   :  { %12787 = vmatmul.mubr.msk.f32.gmra.mxu1 %vm791_vm2, %v15227_v34 }
 0x182   :  { %13084 = vmatmul.mubr.msk.f32.gmra.mxu0 %vm791_vm2, %v4411_v58  ;;  %12789 = vmatprep.mubr.msk.f32.mxu1 %vm791_vm2, %v1455_v27  ;;  %v1457_v58 = vsel %vm14479_vm0, %v13767_v51, 0.0  ;;  %v13768_v27 = vld [vmem:[#allocation2 + $0xa7] sm:$0xff]  ;;  %v15254_v51 = vld [vmem:[#allocation2 + $0xaf] sm:$0xff] }
 0x183   :  { %13086 = vmatprep.mubr.msk.f32.mxu0 %vm791_vm2, %v4412_v49  ;;  %v4415_v49 = vld [vmem:[#allocation2 + $0xa0] sm:$0xff] }
 0x185   :  { %12790 = vmatmul.mubr.msk.f32.gmra.mxu1 %vm791_vm2, %v15236_v24 }
 0x186   :  { %13087 = vmatmul.mubr.msk.f32.gmra.mxu0 %vm791_vm2, %v4413_v20  ;;  %12792 = vmatprep.mubr.msk.f32.mxu1 %vm791_vm2, %v1457_v58  ;;  %v1459_v20 = vsel %vm14507_vm13, %v13768_v27, 0.0  ;;  %v13769_v58 = vld [vmem:[#allocation2 + $0xb7] sm:$0xff]  ;;  %v15263_v27 = vld [vmem:[#allocation2 + $0xbf] sm:$0xff] }
 0x187   :  { %13089 = vmatprep.mubr.msk.f32.mxu0 %vm791_vm2, %v4414_v19  ;;  %v4417_v19 = vld [vmem:[#allocation2 + $0xb0] sm:$0xff] }
 0x189   :  { %12793 = vmatmul.mubr.msk.f32.gmra.mxu1 %vm791_vm2, %v15245_v44 }
 0x18a   :  { %13090 = vmatmul.mubr.msk.f32.gmra.mxu0 %vm791_vm2, %v4415_v49  ;;  %12795 = vmatprep.mubr.msk.f32.mxu1 %vm791_vm2, %v1459_v20  ;;  %v1461_v49 = vsel %vm14535_vm11, %v13769_v58, 0.0  ;;  %v13770_v20 = vld [vmem:[#allocation2 + $0xc7] sm:$0xff]  ;;  %v893_v58 = vadd.s32 240, %v14223_v22 }
 0x18b   :  { %13092 = vmatprep.mubr.msk.f32.mxu0 %vm791_vm2, %v4416_v57  ;;  %v4419_v57 = vld [vmem:[#allocation2 + $0xc0] sm:$0xff] }
 0x18d   :  { %12796 = vmatmul.mubr.msk.f32.gmra.mxu1 %vm791_vm2, %v15254_v51 }
 0x18e   :  { %13093 = vmatmul.mubr.msk.f32.gmra.mxu0 %vm791_vm2, %v4417_v19  ;;  %12798 = vmatprep.mubr.msk.f32.mxu1 %vm791_vm2, %v1461_v49  ;;  %v1463_v19 = vsel %vm19172_vm7, %v13770_v20, 0.0  ;;  %v4421_v49 = vld [vmem:[#allocation2 + $0xd0] sm:$0xff]  ;;  %v4422_v20 = vld [vmem:[#allocation2 + $0xd8] sm:$0xff]  ;;  %vm19175_vm7 = vnez %v19068_v39  ;;  %v4428_v39 = vld [vmem:[#allocation2 + $0x108] sm:$0xff] }
 0x18f   :  { %13095 = vmatprep.mubr.msk.f32.mxu0 %vm791_vm2, %v4418_v42  ;;  %v15273_v42 = vld [vmem:[#allocation2 + $0xcf] sm:$0xff] }
 0x190   :  { %19173 = vst [vmem:[#allocation87_spill] sm:$0xff] %v15273_v42 }
 0x191   :  { %12799 = vmatmul.mubr.msk.f32.gmra.mxu1 %vm791_vm2, %v15263_v27 }
 0x192   :  { %13096 = vmatmul.mubr.msk.f32.gmra.mxu0 %vm791_vm2, %v4419_v57  ;;  %12801 = vmatprep.mubr.msk.f32.mxu1 %vm791_vm2, %v1463_v19  ;;  %v13771_v57 = vld [vmem:[#allocation2 + $0xd7] sm:$0xff]  ;;  %v15282_v19 = vld [vmem:[#allocation2 + $0xdf] sm:$0xff] }
 0x193   :  { %13098 = vmatprep.mubr.msk.f32.mxu0 %vm791_vm2, %v4420_v38  ;;  %v1465_v45 = vsel %vm19174_vm5, %v13771_v57, 0.0  ;;  %v1021_v38 = vand.u32 15, %v893_v58  ;;  %v13773_v57 = vld [vmem:[#allocation2 + $0xe8] sm:$0xff] }
 0x194   :  { %v15295_v58 = vld [vmem:[#allocation2 + $0xef] sm:$0xff] }
 0x195   :  { %12802 = vmatmul.mubr.msk.f32.gmra.mxu1 %vm791_vm2, %v15273_v42  ;;  %v13772_v42 = vld [vmem:[#allocation2 + $0xe7] sm:$0xff]  ;;  %vm15291_vm5 = vcmp.ge.s32.totalorder %v1021_v38, 1  ;;  %v15304_v38 = vld [vmem:[#allocation2 + $0xff] sm:$0xff] }
 0x196   :  { %13099 = vmatmul.mubr.msk.f32.gmra.mxu0 %vm791_vm2, %v4421_v49  ;;  %12804 = vmatprep.mubr.msk.f32.mxu1 %vm791_vm2, %v1465_v45  ;;  %v1467_v49 = vsel %vm19175_vm7, %v13772_v42, 0.0  ;;  %v19176_v45 = vmov 0 }
 0x197   :  { %13101 = vmatprep.mubr.msk.f32.mxu0 %vm791_vm2, %v4422_v20  ;;  %v19177_v45 = vsel %vm15291_vm5, 4294967295, %v19176_v45  ;;  %v13774_v20 = vld [vmem:[#allocation2 + $0xf0] sm:$0xff] }
 0x198   :  { %19178 = vst [vmem:[#allocation88_spill] sm:$0xff] %v19177_v45  ;;  %v15320_v45 = vpop.f32.mrf.mxu0 }
 0x199   :  { %12805 = vmatmul.mubr.msk.f32.gmra.mxu1 %vm791_vm2, %v15282_v19  ;;  %19181 = vst [vmem:[#allocation90_spill] sm:$0xff] %v15320_v45  ;;  %v15345_v45 = vld [vmem:[#allocation2 + $0x12f] sm:$0xff] }
 0x19a   :  { %13102 = vmatmul.mubr.msk.f32.gmra.mxu0 %vm791_vm2, %v4423_v17  ;;  %12807 = vmatprep.mubr.msk.f32.mxu1 %vm791_vm2, %v1467_v49  ;;  %v13775_v17 = vld [vmem:[#allocation2 + $0xf7] sm:$0xff] }
 0x19b   :  { %13104 = vmatprep.mubr.msk.f32.mxu0 %vm791_vm2, %v13773_v57  ;;  %v1469_v42 = vsel %vm15291_vm5, %v13775_v17, 0.0  ;;  %v13776_v49 = vld [vmem:[#allocation2 + $0xf8] sm:$0xff]  ;;  %v13777_v57 = vld [vmem:[#allocation2 + $0x100] sm:$0xff]  ;;  %v15313_v17 = vpop.f32.mrf.mxu1  ;;  %vm19180_vm5 = vnez %v19078_v46 }
 0x19c   :  { %19179 = vst [vmem:[#allocation89_spill] sm:$0xff] %v15313_v17 }
 0x19d   :  { %12808 = vmatmul.mubr.msk.f32.gmra.mxu1 %vm791_vm2, %v15295_v58 }
 0x19e   :  { %13105 = vmatmul.mubr.msk.f32.gmra.mxu0 %vm791_vm2, %v13774_v20  ;;  %12810 = vmatprep.mubr.msk.f32.mxu1 %vm791_vm2, %v1469_v42  ;;  %v15311_v20 = vld [vmem:[#allocation2 + $0x117] sm:$0xff] }
 0x19f   :  { %13107 = vmatprep.mubr.msk.f32.mxu0 %vm791_vm2, %v13776_v49  ;;  %v4429_v42 = vld [vmem:[#allocation2 + $0x110] sm:$0xff]  ;;  %v1473_v49 = vsel %vm19180_vm5, %v15311_v20, 0.0  ;;  %vm19184_vm5 = vnez %v19083_v31 }
 0x1a1   :  { %12811 = vmatmul.mubr.msk.f32.gmra.mxu1 %vm791_vm2, %v15304_v38 }
 0x1a2   :  { %13108 = vmatmul.mubr.msk.f32.gmra.mxu0 %vm791_vm2, %v13777_v57  ;;  %12813 = vmatprep.mubr.f32.mxu1 %v19169_v60  ;;  %v15327_v57 = vld [vmem:[#allocation2 + $0x11f] sm:$0xff] }
 0x1a3   :  { %13110 = vmatprep.mubr.msk.f32.mxu0 %vm791_vm2, %v4428_v39  ;;  %v15325_v39 = vpop.f32.mrf.mxu1 }
 0x1a4   :  { %19182 = vst [vmem:[#allocation91_spill] sm:$0xff] %v15325_v39 }
 0x1a5   :  { %12814 = vmatmul.mubr.f32.gmra.mxu1 %v19169_v60 }
 0x1a6   :  { %13111 = vmatmul.mubr.msk.f32.gmra.mxu0 %vm791_vm2, %v4429_v42  ;;  %12816 = vmatprep.mubr.msk.f32.mxu1 %vm791_vm2, %v1473_v49  ;;  %v1475_v42 = vsel %vm19184_vm5, %v14692_v63, 0.0  ;;  %v15338_v49 = vpop.f32.mrf.mxu0  ;;  %vm19189_vm5 = vnez %v19088_v41 }
 0x1a7   :  { %13113 = vmatprep.mubr.msk.f32.mxu0 %vm791_vm2, %v14656_v10  ;;  %19185 = vst [vmem:[#allocation93_spill] sm:$0xff] %v15338_v49  ;;  %v15365_v49 = vld [vmem:[#allocation2 + $0x13f] sm:$0xff] }
 0x1a8   :  { %v15329_v17 = vpop.f32.mrf.mxu1 }
 0x1a9   :  { %19183 = vst [vmem:[#allocation92_spill] sm:$0xff] %v15329_v17  ;;  %12817 = vmatmul.mubr.msk.f32.gmra.mxu1 %vm791_vm2, %v15327_v57 }
 0x1aa   :  { %13114 = vmatmul.mubr.msk.f32.gmra.mxu0 %vm791_vm2, %v14663_v32  ;;  %12819 = vmatprep.mubr.msk.f32.mxu1 %vm791_vm2, %v1475_v42  ;;  %v15343_v10 = vpop.f32.mrf.mxu1  ;;  %v1477_v42 = vsel %vm19189_vm5, %v14722_v7, 0.0  ;;  %vm19194_vm5 = vnez %v19093_v43 }
 0x1ab   :  { %13116 = vmatprep.mubr.msk.f32.mxu0 %vm791_vm2, %v14676_v29  ;;  %19186 = vst [vmem:[#allocation94_spill] sm:$0xff] %v15343_v10 }
 0x1ac   :  { %v15347_v17 = vpop.f32.mrf.mxu1 }
 0x1ad   :  { %19187 = vst [vmem:[#allocation95_spill] sm:$0xff] %v15347_v17  ;;  %12820 = vmatmul.mubr.msk.f32.gmra.mxu1 %vm791_vm2, %v15345_v45  ;;  %v15351_v32 = vpop.f32.mrf.mxu0 }
 0x1ae   :  { %19188 = vst [vmem:[#allocation96_spill] sm:$0xff] %v15351_v32  ;;  %13117 = vmatmul.mubr.msk.f32.gmra.mxu0 %vm791_vm2, %v14687_v55  ;;  %12822 = vmatprep.mubr.msk.f32.mxu1 %vm791_vm2, %v1477_v42  ;;  %v15361_v29 = vpop.f32.mrf.mxu1  ;;  %v19225_v32 = vld [vmem:[#allocation66_spill] sm:$0xff] }
 0x1af   :  { %13119 = vmatprep.mubr.msk.f32.mxu0 %vm791_vm2, %v14707_v23  ;;  %19190 = vst [vmem:[#allocation97_spill] sm:$0xff] %v15361_v29  ;;  %v15363_v17 = vpop.f32.mrf.mxu0  ;;  %v1479_v23 = vsel %vm19194_vm5, %v14765_v56, 0.0  ;;  %vm19199_vm5 = vnez %v19098_v14 }
 0x1b0   :  { %19191 = vst [vmem:[#allocation98_spill] sm:$0xff] %v15363_v17  ;;  %v15367_v10 = vpop.f32.mrf.mxu1  ;;  %v15385_v17 = vld [vmem:[#allocation2 + $0x14f] sm:$0xff] }
 0x1b1   :  { %19192 = vst [vmem:[#allocation99_spill] sm:$0xff] %v15367_v10  ;;  %12823 = vmatmul.mubr.msk.f32.gmra.mxu1 %vm791_vm2, %v15365_v49  ;;  %v15371_v55 = vpop.f32.mrf.mxu0 }
 0x1b2   :  { %19193 = vst [vmem:[#allocation100_spill] sm:$0xff] %v15371_v55  ;;  %13120 = vmatmul.mubr.msk.f32.gmra.mxu0 %vm791_vm2, %v14718_v50  ;;  %12825 = vmatprep.mubr.msk.f32.mxu1 %vm791_vm2, %v1479_v23  ;;  %v15381_v42 = vpop.f32.mrf.mxu1 }
 0x1b3   :  { %13122 = vmatprep.mubr.msk.f32.mxu0 %vm791_vm2, %v14741_v30  ;;  %19195 = vst [vmem:[#allocation101_spill] sm:$0xff] %v15381_v42  ;;  %v15383_v10 = vpop.f32.mrf.mxu0  ;;  %v1481_v30 = vsel %vm19199_vm5, %v14796_v12, 0.0  ;;  %vm19204_vm5 = vnez %v19103_v48 }
 0x1b4   :  { %19196 = vst [vmem:[#allocation102_spill] sm:$0xff] %v15383_v10  ;;  %v15387_v29 = vpop.f32.mrf.mxu1  ;;  %v15405_v10 = vld [vmem:[#allocation2 + $0x15f] sm:$0xff] }
 0x1b5   :  { %19197 = vst [vmem:[#allocation103_spill] sm:$0xff] %v15387_v29  ;;  %12826 = vmatmul.mubr.msk.f32.gmra.mxu1 %vm791_vm2, %v15385_v17  ;;  %v15391_v50 = vpop.f32.mrf.mxu0 }
 0x1b6   :  { %19198 = vst [vmem:[#allocation104_spill] sm:$0xff] %v15391_v50  ;;  %13123 = vmatmul.mubr.msk.f32.gmra.mxu0 %vm791_vm2, %v14757_v8  ;;  %12828 = vmatprep.mubr.msk.f32.mxu1 %vm791_vm2, %v1481_v30  ;;  %v15401_v23 = vpop.f32.mrf.mxu1  ;;  %v15465_v50 = vld [vmem:[#allocation2 + $0x18f] sm:$0xff] }
 0x1b7   :  { %13125 = vmatprep.mubr.msk.f32.mxu0 %vm791_vm2, %v14780_v9  ;;  %19200 = vst [vmem:[#allocation105_spill] sm:$0xff] %v15401_v23  ;;  %v15403_v29 = vpop.f32.mrf.mxu0  ;;  %v1483_v9 = vsel %vm19204_vm5, %v14829_v37, 0.0  ;;  %vm19209_vm5 = vnez %v19110_v62 }
 0x1b8   :  { %19201 = vst [vmem:[#allocation106_spill] sm:$0xff] %v15403_v29  ;;  %v15407_v42 = vpop.f32.mrf.mxu1  ;;  %v15425_v29 = vld [vmem:[#allocation2 + $0x16f] sm:$0xff] }
 0x1b9   :  { %19202 = vst [vmem:[#allocation107_spill] sm:$0xff] %v15407_v42  ;;  %12829 = vmatmul.mubr.msk.f32.gmra.mxu1 %vm791_vm2, %v15405_v10  ;;  %v15411_v8 = vpop.f32.mrf.mxu0 }
 0x1ba   :  { %19203 = vst [vmem:[#allocation108_spill] sm:$0xff] %v15411_v8  ;;  %13126 = vmatmul.mubr.msk.f32.gmra.mxu0 %vm791_vm2, %v14791_v1  ;;  %12831 = vmatprep.mubr.msk.f32.mxu1 %vm791_vm2, %v1483_v9  ;;  %v15421_v30 = vpop.f32.mrf.mxu1  ;;  %v19216_v8 = vld [vmem:[#allocation61_spill] sm:$0xff] }
 0x1bb   :  { %13128 = vmatprep.mubr.msk.f32.mxu0 %vm791_vm2, %v14814_v54  ;;  %19205 = vst [vmem:[#allocation109_spill] sm:$0xff] %v15421_v30  ;;  %v15423_v42 = vpop.f32.mrf.mxu0  ;;  %v1485_v54 = vsel %vm19209_vm5, %v14867_v2, 0.0  ;;  %vm19217_vm5 = vnez %v19216_v8  ;;  %v15511_v8 = vld [vmem:[#allocation2 + $0x1af] sm:$0xff] }
 0x1bc   :  { %19206 = vst [vmem:[#allocation110_spill] sm:$0xff] %v15423_v42  ;;  %v15427_v23 = vpop.f32.mrf.mxu1  ;;  %v15445_v42 = vld [vmem:[#allocation2 + $0x17f] sm:$0xff] }
 0x1bd   :  { %19207 = vst [vmem:[#allocation111_spill] sm:$0xff] %v15427_v23  ;;  %12832 = vmatmul.mubr.msk.f32.gmra.mxu1 %vm791_vm2, %v15425_v29  ;;  %v15431_v1 = vpop.f32.mrf.mxu0 }
 0x1be   :  { %19208 = vst [vmem:[#allocation112_spill] sm:$0xff] %v15431_v1  ;;  %13129 = vmatmul.mubr.msk.f32.gmra.mxu0 %vm791_vm2, %v14825_v5  ;;  %12834 = vmatprep.mubr.msk.f32.mxu1 %vm791_vm2, %v1485_v54  ;;  %v15441_v9 = vpop.f32.mrf.mxu1  ;;  %v19214_v1 = vld [vmem:[#allocation54_spill] sm:$0xff] }
 0x1bf   :  { %13131 = vmatprep.mubr.msk.f32.mxu0 %vm791_vm2, %v14848_v0  ;;  %19210 = vst [vmem:[#allocation113_spill] sm:$0xff] %v15441_v9  ;;  %v15443_v23 = vpop.f32.mrf.mxu0  ;;  %v19215_v54 = vld [vmem:[#allocation58_spill] sm:$0xff]  ;;  %v19218_v9 = vld [vmem:[#allocation56_spill] sm:$0xff] }
 0x1c0   :  { %19211 = vst [vmem:[#allocation114_spill] sm:$0xff] %v15443_v23  ;;  %v15447_v30 = vpop.f32.mrf.mxu1  ;;  %v1487_v0 = vsel %vm19217_vm5, %v19215_v54, 0.0  ;;  %vm19226_vm5 = vnez %v19225_v32  ;;  %v19234_v32 = vld [vmem:[#allocation69_spill] sm:$0xff] }
 0x1c1   :  { %19212 = vst [vmem:[#allocation115_spill] sm:$0xff] %v15447_v30  ;;  %12835 = vmatmul.mubr.msk.f32.gmra.mxu1 %vm791_vm2, %v15445_v42  ;;  %v15451_v5 = vpop.f32.mrf.mxu0 }
 0x1c2   :  { %19213 = vst [vmem:[#allocation116_spill] sm:$0xff] %v15451_v5  ;;  %13132 = vmatmul.mubr.msk.f32.gmra.mxu0 %vm791_vm2, %v19214_v1  ;;  %12837 = vmatprep.mubr.msk.f32.mxu1 %vm791_vm2, %v1487_v0  ;;  %v15461_v23 = vpop.f32.mrf.mxu1  ;;  %v19223_v5 = vld [vmem:[#allocation57_spill] sm:$0xff]  ;;  %v19224_v0 = vld [vmem:[#allocation63_spill] sm:$0xff] }
 0x1c3   :  { %13134 = vmatprep.mubr.msk.f32.mxu0 %vm791_vm2, %v19218_v9  ;;  %19219 = vst [vmem:[#allocation54_spill] sm:$0xff] %v15461_v23  ;;  %v15463_v30 = vpop.f32.mrf.mxu0  ;;  %v1489_v9 = vsel %vm19226_vm5, %v19224_v0, 0.0  ;;  %v19227_v23 = vld [vmem:[#allocation60_spill] sm:$0xff]  ;;  %vm19235_vm5 = vnez %v19136_v52 }
 0x1c4   :  { %19220 = vst [vmem:[#allocation58_spill] sm:$0xff] %v15463_v30  ;;  %v15467_v55 = vpop.f32.mrf.mxu1  ;;  %v15531_v52 = vld [vmem:[#allocation2 + $0x1bf] sm:$0xff] }
 0x1c5   :  { %19221 = vst [vmem:[#allocation56_spill] sm:$0xff] %v15467_v55  ;;  %12838 = vmatmul.mubr.msk.f32.gmra.mxu1 %vm791_vm2, %v15465_v50  ;;  %v15471_v1 = vpop.f32.mrf.mxu0  ;;  %v15484_v55 = vld [vmem:[%s18972_s26 + $0x58] sm:$0xff] }
 0x1c6   :  { %19222 = vst [vmem:[#allocation117_spill] sm:$0xff] %v15471_v1  ;;  %13135 = vmatmul.mubr.msk.f32.gmra.mxu0 %vm791_vm2, %v19223_v5  ;;  %12840 = vmatprep.mubr.msk.f32.mxu1 %vm791_vm2, %v1489_v9  ;;  %v15486_v30 = vpop.f32.mrf.mxu1  ;;  %v15491_v5 = vld [vmem:[#allocation2 + $0x19f] sm:$0xff] }
 0x1c7   :  { %13137 = vmatprep.mubr.msk.f32.mxu0 %vm791_vm2, %v19227_v23  ;;  %19228 = vst [vmem:[#allocation57_spill] sm:$0xff] %v15486_v30  ;;  %v15488_v1 = vpop.f32.mrf.mxu0  ;;  %13161 = vmatprep.subr.mxu1 %v15484_v55  ;;  %19230 = vst [vmem:[#allocation118_spill] sm:$0xff] %v15491_v5  ;;  %v19233_v23 = vld [vmem:[#allocation62_spill] sm:$0xff]  ;;  %v1491_v30 = vsel %vm19235_vm5, %v19234_v32, 0.0  ;;  %vm19244_vm5 = vnez %v19145_v13 }
 0x1c8   :  { %19229 = vst [vmem:[#allocation60_spill] sm:$0xff] %v15488_v1  ;;  %v15493_v39 = vpop.f32.mrf.mxu1  ;;  %v19236_v1 = vld [vmem:[#allocation65_spill] sm:$0xff] }
 0x1c9   :  { %19231 = vst [vmem:[#allocation119_spill] sm:$0xff] %v15493_v39  ;;  %12841 = vmatmul.mubr.msk.f32.gmra.mxu1 %vm791_vm2, %v15491_v5  ;;  %v15497_v9 = vpop.f32.mrf.mxu0  ;;  %19239 = vst [vmem:[#allocation65_spill] sm:$0xff] %v15511_v8  ;;  %v15552_v13 = vld [vmem:[#allocation2 + $0x1cf] sm:$0xff] }
 0x1ca   :  { %19232 = vst [vmem:[#allocation120_spill] sm:$0xff] %v15497_v9  ;;  %13138 = vmatmul.mubr.msk.f32.gmra.mxu0 %vm791_vm2, %v19233_v23  ;;  %12843 = vmatprep.mubr.msk.f32.mxu1 %vm791_vm2, %v1491_v30  ;;  %v15507_v0 = vpop.f32.mrf.mxu1  ;;  %v19242_v9 = vld [vmem:[#allocation67_spill] sm:$0xff]  ;;  %v19243_v30 = vld [vmem:[#allocation73_spill] sm:$0xff] }
 0x1cb   :  { %13140 = vmatprep.mubr.msk.f32.mxu0 %vm791_vm2, %v19236_v1  ;;  %19237 = vst [vmem:[#allocation62_spill] sm:$0xff] %v15507_v0  ;;  %v15509_v39 = vpop.f32.mrf.mxu0  ;;  %v1493_v1 = vsel %vm19244_vm5, %v19243_v30, 0.0  ;;  %v19245_v0 = vld [vmem:[#allocation70_spill] sm:$0xff]  ;;  %vm19251_vm5 = vnez %v19152_v33  ;;  %v19257_v33 = vld [vmem:[#allocation77_spill] sm:$0xff] }
 0x1cc   :  { %19238 = vst [vmem:[#allocation69_spill] sm:$0xff] %v15509_v39  ;;  %v15513_v5 = vpop.f32.mrf.mxu1 }
 0x1cd   :  { %19240 = vst [vmem:[#allocation121_spill] sm:$0xff] %v15513_v5  ;;  %12844 = vmatmul.mubr.msk.f32.gmra.mxu1 %vm791_vm2, %v15511_v8  ;;  %v15517_v23 = vpop.f32.mrf.mxu0 }
 0x1ce   :  { %19241 = vst [vmem:[#allocation122_spill] sm:$0xff] %v15517_v23  ;;  %13141 = vmatmul.mubr.msk.f32.gmra.mxu0 %vm791_vm2, %v19242_v9  ;;  %12846 = vmatprep.mubr.msk.f32.mxu1 %vm791_vm2, %v1493_v1  ;;  %v15527_v39 = vpop.f32.mrf.mxu1  ;;  %v19250_v23 = vld [vmem:[#allocation72_spill] sm:$0xff]  ;;  %v19252_v1 = vld [vmem:[#allocation75_spill] sm:$0xff] }
 0x1cf   :  { %13143 = vmatprep.mubr.msk.f32.mxu0 %vm791_vm2, %v19245_v0  ;;  %19246 = vst [vmem:[#allocation67_spill] sm:$0xff] %v15527_v39  ;;  %v15529_v5 = vpop.f32.mrf.mxu0  ;;  %v1495_v0 = vsel %vm19251_vm5, %v15039_v6, 0.0 }
 0x1d0   :  { %19247 = vst [vmem:[#allocation73_spill] sm:$0xff] %v15529_v5  ;;  %v15533_v8 = vpop.f32.mrf.mxu1  ;;  %v925_v5 = vadd.s32 496, %v14223_v22 }
 0x1d1   :  { %19248 = vst [vmem:[#allocation70_spill] sm:$0xff] %v15533_v8  ;;  %12847 = vmatmul.mubr.msk.f32.gmra.mxu1 %vm791_vm2, %v15531_v52  ;;  %v15537_v9 = vpop.f32.mrf.mxu0 }
 0x1d2   :  { %19249 = vst [vmem:[#allocation123_spill] sm:$0xff] %v15537_v9  ;;  %13144 = vmatmul.mubr.msk.f32.gmra.mxu0 %vm791_vm2, %v19250_v23  ;;  %12849 = vmatprep.mubr.msk.f32.mxu1 %vm791_vm2, %v1495_v0  ;;  %v15548_v8 = vpop.f32.mrf.mxu1  ;;  %v1497_v0 = vsel %vm15100_vm3, %v15077_v3, 0.0 }
 0x1d3   :  { %13146 = vmatprep.mubr.msk.f32.mxu0 %vm791_vm2, %v19252_v1  ;;  %19253 = vst [vmem:[#allocation72_spill] sm:$0xff] %v15548_v8  ;;  %v15550_v39 = vpop.f32.mrf.mxu0  ;;  %v1053_v1 = vand.u32 15, %v925_v5  ;;  %v15572_v8 = vld [vmem:[#allocation2 + $0x1df] sm:$0xff]  ;;  %v19262_v5 = vmov 0 }
 0x1d4   :  { %19254 = vst [vmem:[#allocation75_spill] sm:$0xff] %v15550_v39  ;;  %v15554_v9 = vpop.f32.mrf.mxu1 }
 0x1d5   :  { %19255 = vst [vmem:[#allocation124_spill] sm:$0xff] %v15554_v9  ;;  %12850 = vmatmul.mubr.msk.f32.gmra.mxu1 %vm791_vm2, %v15552_v13  ;;  %v15558_v23 = vpop.f32.mrf.mxu0  ;;  %vm15588_vm3 = vcmp.ge.s32.totalorder %v1053_v1, 1  ;;  %v19269_v1 = vld [vmem:[#allocation82_spill] sm:$0xff] }
 0x1d6   :  { %19256 = vst [vmem:[#allocation125_spill] sm:$0xff] %v15558_v23  ;;  %13147 = vmatmul.mubr.msk.f32.gmra.mxu0 %vm791_vm2, %v19257_v33  ;;  %12852 = vmatprep.mubr.msk.f32.mxu1 %vm791_vm2, %v1497_v0  ;;  %v15568_v39 = vpop.f32.mrf.mxu1  ;;  %v19263_v5 = vsel %vm15588_vm3, 4294967295, %v19262_v5  ;;  %v991_v0 = vand.u32 15, %v14223_v22 }
 0x1d7   :  { %13149 = vmatprep.mubr.msk.f32.mxu0 %vm791_vm2, %v15058_v61  ;;  %19258 = vst [vmem:[#allocation77_spill] sm:$0xff] %v15568_v39  ;;  %v15570_v9 = vpop.f32.mrf.mxu0  ;;  %v1499_v61 = vsel %vm15128_vm9, %v15104_v35, 0.0  ;;  %19264 = vst [vmem:[#allocation129_spill] sm:$0xff] %v19263_v5 }
 0x1d8   :  { %19259 = vst [vmem:[#allocation126_spill] sm:$0xff] %v15570_v9  ;;  %v15574_v23 = vpop.f32.mrf.mxu1  ;;  %vm15613_vm9 = vcmp.ge.s32.totalorder %v991_v0, 1 }
 0x1d9   :  { %19260 = vst [vmem:[#allocation127_spill] sm:$0xff] %v15574_v23  ;;  %12853 = vmatmul.mubr.msk.f32.gmra.mxu1 %vm791_vm2, %v15572_v8  ;;  %v15578_v33 = vpop.f32.mrf.mxu0  ;;  %v3690_v0 = vsel %vm15613_vm9, %v15149_v25, 0.0  ;;  %v19282_v25 = vld [vmem:[#allocation86_spill] sm:$0xff] }
 0x1da   :  { %19261 = vst [vmem:[#allocation128_spill] sm:$0xff] %v15578_v33  ;;  %13150 = vmatmul.mubr.msk.f32.gmra.mxu0 %vm791_vm2, %v15069_v28  ;;  %12855 = vmatprep.mubr.msk.f32.mxu1 %vm791_vm2, %v1499_v61  ;;  %v15593_v23 = vpop.f32.mrf.mxu1  ;;  %v15597_v28 = vld [vmem:[#allocation2 + $0x1ef] sm:$0xff] }
 0x1db   :  { %13152 = vmatprep.mubr.msk.f32.mxu0 %vm791_vm2, %v15091_v53  ;;  %19265 = vst [vmem:[#allocation130_spill] sm:$0xff] %v15593_v23  ;;  %v15595_v33 = vpop.f32.mrf.mxu0  ;;  %v1501_v53 = vsel %vm15588_vm3, %v15132_v4, 0.0 }
 0x1dc   :  { %19266 = vst [vmem:[#allocation131_spill] sm:$0xff] %v15595_v33  ;;  %v15599_v9 = vpop.f32.mrf.mxu1 }
 0x1dd   :  { %19267 = vst [vmem:[#allocation132_spill] sm:$0xff] %v15599_v9  ;;  %12856 = vmatmul.mubr.msk.f32.gmra.mxu1 %vm791_vm2, %v15597_v28  ;;  %v15603_v61 = vpop.f32.mrf.mxu0 }
 0x1de   :  { %19268 = vst [vmem:[#allocation133_spill] sm:$0xff] %v15603_v61  ;;  %13153 = vmatmul.mubr.msk.f32.gmra.mxu0 %vm791_vm2, %v15096_v21  ;;  %12858 = vmatprep.mubr.msk.f32.mxu1 %vm791_vm2, %v1501_v53  ;;  %v15617_v9 = vpop.f32.mrf.mxu1  ;;  %v15621_v61 = vld [vmem:[#allocation2 + $0x1ff] sm:$0xff] }
 0x1df   :  { %13155 = vmatprep.mubr.msk.f32.mxu0 %vm791_vm2, %v19269_v1  ;;  %19272 = vst [vmem:[#allocation82_spill] sm:$0xff] %v15617_v9  ;;  %v15619_v23 = vpop.f32.mrf.mxu0  ;;  %19274 = vst [vmem:[#allocation135_spill] sm:$0xff] %v15621_v61  ;;  %v19277_v53 = vld [vmem:[#allocation83_spill] sm:$0xff]  ;;  %v4460_v1 = vld [vmem:[#allocation2 + $0x208] sm:$0xff] }
 0x1e0   :  { %19273 = vst [vmem:[#allocation134_spill] sm:$0xff] %v15619_v23  ;;  %v15623_v21 = vpop.f32.mrf.mxu1  ;;  %v4461_v9 = vld [vmem:[#allocation2 + $0x210] sm:$0xff] }
 0x1e1   :  { %19275 = vst [vmem:[#allocation136_spill] sm:$0xff] %v15623_v21  ;;  %12859 = vmatmul.mubr.msk.f32.gmra.mxu1 %vm791_vm2, %v15621_v61  ;;  %v15627_v39 = vpop.f32.mrf.mxu0  ;;  %v19281_v61 = vld [vmem:[#allocation85_spill] sm:$0xff] }
 0x1e2   :  { %19276 = vst [vmem:[#allocation137_spill] sm:$0xff] %v15627_v39  ;;  %13156 = vmatmul.mubr.msk.f32.gmra.mxu0 %vm791_vm2, %v19277_v53  ;;  %12965 = vmatprep.mubr.msk.f32.mxu1 %vm791_vm2, %v3690_v0  ;;  %v15636_v23 = vpop.f32.mrf.mxu1  ;;  %v6006_v53 = vsel %vm15613_vm9, %v19282_v25, 0.0  ;;  %v11495_v0 = vld [vmem:[%s18972_s26 + $0x50] sm:$0xff]  ;;  %vm19404_vm9 = vnez %v19083_v31 }
 0x1e3   :  { %13158 = vmatprep.mubr.msk.f32.mxu0 %vm791_vm2, %v4460_v1  ;;  %19278 = vst [vmem:[#allocation83_spill] sm:$0xff] %v15636_v23  ;;  %v15638_v21 = vpop.f32.mrf.mxu0 }
 0x1e4   :  { %19279 = vst [vmem:[#allocation138_spill] sm:$0xff] %v15638_v21  ;;  %v15640_v5 = vpop.f32.mrf.mxu1  ;;  %v19284_v21 = vld [vmem:[#allocation9_spill] sm:$0xff] }
 0x1e5   :  { %v15642_v39 = vpop.f32.mrf.mxu0  ;;  %12966 = vmatmul.mubr.msk.f32.vlgmr.msra.gmra.mxu1 %vm791_vm2, %v19281_v61  ;;  %v19285_v23 = vsel %vm14258_vm4, %v19284_v21, 0.0  ;;  %v19316_v21 = vld [vmem:[#allocation24_spill] sm:$0xff] }
 0x1e6   :  { %19280 = vst [vmem:[#allocation139_spill] sm:$0xff] %v15642_v39  ;;  %13159 = vmatmul.mubr.msk.f32.gmra.mxu0 %vm791_vm2, %v4461_v9  ;;  %12968 = vmatprep.mubr.msk.f32.mxu1 %vm791_vm2, %v19285_v23  ;;  %v11686_v9 = vld [vmem:[%s18972_s26 + $0x88] sm:$0xff]  ;;  %v15662_v61 = vpop.f32.mrf.mxu1  ;;  %v11685_v23 = vld [vmem:[%s18972_s26 + $0x80] sm:$0xff] }
 0x1e7   :  { %13265 = vmatprep.mubr.msk.f32.mxu0 %vm791_vm2, %v6006_v53  ;;  %19286 = vst [vmem:[#allocation85_spill] sm:$0xff] %v15662_v61  ;;  %v15664_v33 = vpop.f32.mrf.mxu0  ;;  %13162 = vmatpush3.msra.mxu1 %v15484_v55  ;;  %v19291_v53 = vld [vmem:[#allocation12_spill] sm:$0xff] }
 0x1e8   :  { %19287 = vst [vmem:[#allocation86_spill] sm:$0xff] %v15664_v33  ;;  %13461 = vmatprep.subr.mxu0 %v11686_v9  ;;  %13163 = vmatprep.subr.mxu1 %v11495_v0  ;;  %v15667_v25 = vpop.f32.mrf.mxu1  ;;  %v19292_v55 = vsel %vm14283_vm6, %v19291_v53, 0.0 }
 0x1e9   :  { %19288 = vst [vmem:[#allocation8_spill] sm:$0xff] %v15667_v25  ;;  %v15669_v39 = vpop.f32.mrf.mxu0  ;;  %12969 = vmatmul.mubr.msk.f32.gmra.mxu1 %vm791_vm2, %v15182_v47 }
 0x1ea   :  { %19289 = vst [vmem:[#allocation9_spill] sm:$0xff] %v15669_v39  ;;  %13266 = vmatmul.mubr.msk.f32.vlgmr.msra.gmra.mxu0 %vm791_vm2, %v15182_v47  ;;  %12971 = vmatprep.mubr.msk.f32.mxu1 %vm791_vm2, %v19292_v55  ;;  %v19293_v39 = vsel %vm14258_vm4, %v19291_v53, 0.0  ;;  %v15688_v25 = vpop.f32.mrf.mxu1  ;;  %vm19373_vm4 = vnez %v19062_v40  ;;  %v19389_v40 = vld [vmem:[#allocation88_spill] sm:$0xff] }
 0x1eb   :  { %13268 = vmatprep.mubr.msk.f32.mxu0 %vm791_vm2, %v19293_v39  ;;  %v15690_v33 = vpop.f32.mrf.mxu0  ;;  %13164 = vmatpush3.msra.mxu1 %v11495_v0  ;;  %v19294_v39 = vld [vmem:[#allocation15_spill] sm:$0xff] }
 0x1ec   :  { %13462 = vmatpush3.msra.mxu0 %v11686_v9  ;;  %v15692_v47 = vpop.f32.mrf.mxu1  ;;  %v19295_v1 = vsel %vm14311_vm8, %v19294_v39, 0.0  ;;  %v19296_v0 = vsel %vm14283_vm6, %v19294_v39, 0.0  ;;  %v19301_v39 = vld [vmem:[#allocation17_spill] sm:$0xff]  ;;  %vm19390_vm6 = vnez %v19389_v40 }
 0x1ed   :  { %13463 = vmatprep.subr.mxu0 %v11685_v23  ;;  %v15694_v61 = vpop.f32.mrf.mxu0  ;;  %12972 = vmatmul.mubr.msk.f32.gmra.mxu1 %vm791_vm2, %v15191_v59 }
 0x1ee   :  { %13269 = vmatmul.mubr.msk.f32.gmra.mxu0 %vm791_vm2, %v15191_v59  ;;  %12974 = vmatprep.mubr.msk.f32.mxu1 %vm791_vm2, %v19295_v1  ;;  %v15710_v9 = vpop.f32.mrf.mxu1  ;;  %v19302_v1 = vsel %vm14339_vm10, %v19301_v39, 0.0 }
 0x1ef   :  { %13271 = vmatprep.mubr.msk.f32.mxu0 %vm791_vm2, %v19296_v0  ;;  %v15712_v53 = vpop.f32.mrf.mxu0  ;;  %13464 = vmatpush3.msra.mxu0 %v11685_v23  ;;  %v19303_v23 = vsel %vm14311_vm8, %v19301_v39, 0.0  ;;  %v19309_v39 = vsel %vm14367_vm12, %v19308_v36, 0.0 }
 0x1f0   :  { %19297 = vst [vmem:[#allocation11_spill] sm:$0xff] %v15712_v53  ;;  %v15714_v55 = vpop.f32.mrf.mxu1 }
 0x1f1   :  { %19298 = vst [vmem:[#allocation12_spill] sm:$0xff] %v15714_v55  ;;  %v15716_v59 = vpop.f32.mrf.mxu0  ;;  %12975 = vmatmul.mubr.msk.f32.gmra.mxu1 %vm791_vm2, %v15200_v15 }
 0x1f2   :  { %19299 = vst [vmem:[#allocation15_spill] sm:$0xff] %v15716_v59  ;;  %13272 = vmatmul.mubr.msk.f32.gmra.mxu0 %vm791_vm2, %v15200_v15  ;;  %12977 = vmatprep.mubr.msk.f32.mxu1 %vm791_vm2, %v19302_v1  ;;  %v15732_v0 = vpop.f32.mrf.mxu1  ;;  %v19310_v1 = vsel %vm14339_vm10, %v19308_v36, 0.0  ;;  %v19317_v36 = vsel %vm14395_vm14, %v19316_v21, 0.0  ;;  %v19324_v15 = vld [vmem:[#allocation26_spill] sm:$0xff]  ;;  %vm19409_vm10 = vnez %v19088_v41 }
 0x1f3   :  { %13274 = vmatprep.mubr.msk.f32.mxu0 %vm791_vm2, %v19303_v23  ;;  %v15734_v59 = vpop.f32.mrf.mxu0 }
 0x1f4   :  { %19304 = vst [vmem:[#allocation16_spill] sm:$0xff] %v15734_v59  ;;  %v15736_v55 = vpop.f32.mrf.mxu1 }
 0x1f5   :  { %19305 = vst [vmem:[#allocation17_spill] sm:$0xff] %v15736_v55  ;;  %v15738_v53 = vpop.f32.mrf.mxu0  ;;  %12978 = vmatmul.mubr.msk.f32.gmra.mxu1 %vm791_vm2, %v15209_v11 }
 0x1f6   :  { %19306 = vst [vmem:[#allocation140_spill] sm:$0xff] %v15738_v53  ;;  %13275 = vmatmul.mubr.msk.f32.gmra.mxu0 %vm791_vm2, %v15209_v11  ;;  %12980 = vmatprep.mubr.msk.f32.mxu1 %vm791_vm2, %v19309_v39  ;;  %v15754_v23 = vpop.f32.mrf.mxu1  ;;  %v19318_v39 = vsel %vm14367_vm12, %v19316_v21, 0.0  ;;  %v19325_v21 = vsel %vm14423_vm1, %v19324_v15, 0.0  ;;  %v19332_v11 = vld [vmem:[#allocation29_spill] sm:$0xff]  ;;  %vm19419_vm12 = vnez %v19098_v14 }
 0x1f7   :  { %13277 = vmatprep.mubr.msk.f32.mxu0 %vm791_vm2, %v19310_v1  ;;  %19311 = vst [vmem:[#allocation19_spill] sm:$0xff] %v15754_v23  ;;  %v15756_v53 = vpop.f32.mrf.mxu0  ;;  %v19420_v41 = vsel %vm19419_vm12, %v14829_v37, 0.0 }
 0x1f8   :  { %19312 = vst [vmem:[#allocation20_spill] sm:$0xff] %v15756_v53  ;;  %v15758_v55 = vpop.f32.mrf.mxu1 }
 0x1f9   :  { %19313 = vst [vmem:[#allocation141_spill] sm:$0xff] %v15758_v55  ;;  %v15760_v59 = vpop.f32.mrf.mxu0  ;;  %12981 = vmatmul.mubr.msk.f32.gmra.mxu1 %vm791_vm2, %v15218_v16 }
 0x1fa   :  { %19314 = vst [vmem:[#allocation142_spill] sm:$0xff] %v15760_v59  ;;  %13278 = vmatmul.mubr.msk.f32.gmra.mxu0 %vm791_vm2, %v15218_v16  ;;  %12983 = vmatprep.mubr.msk.f32.mxu1 %vm791_vm2, %v19317_v36  ;;  %v15776_v1 = vpop.f32.mrf.mxu1  ;;  %v19326_v36 = vsel %vm14395_vm14, %v19324_v15, 0.0  ;;  %v19333_v15 = vsel %vm14451_vm15, %v19332_v11, 0.0  ;;  %v19340_v16 = vld [vmem:[#allocation33_spill] sm:$0xff]  ;;  %vm19429_vm14 = vnez %v19110_v62 }
 0x1fb   :  { %13280 = vmatprep.mubr.msk.f32.mxu0 %vm791_vm2, %v19318_v39  ;;  %19319 = vst [vmem:[#allocation22_spill] sm:$0xff] %v15776_v1  ;;  %v15778_v59 = vpop.f32.mrf.mxu0  ;;  %v19430_v14 = vsel %vm19429_vm14, %v19215_v54, 0.0 }
 0x1fc   :  { %19320 = vst [vmem:[#allocation24_spill] sm:$0xff] %v15778_v59  ;;  %v15780_v55 = vpop.f32.mrf.mxu1 }
 0x1fd   :  { %19321 = vst [vmem:[#allocation143_spill] sm:$0xff] %v15780_v55  ;;  %v15782_v53 = vpop.f32.mrf.mxu0  ;;  %12984 = vmatmul.mubr.msk.f32.gmra.mxu1 %vm791_vm2, %v15227_v34 }
 0x1fe   :  { %19322 = vst [vmem:[#allocation144_spill] sm:$0xff] %v15782_v53  ;;  %13281 = vmatmul.mubr.msk.f32.gmra.mxu0 %vm791_vm2, %v15227_v34  ;;  %12986 = vmatprep.mubr.msk.f32.mxu1 %vm791_vm2, %v19325_v21  ;;  %v15798_v39 = vpop.f32.mrf.mxu1  ;;  %v19334_v21 = vsel %vm14423_vm1, %v19332_v11, 0.0  ;;  %v19341_v11 = vsel %vm14479_vm0, %v19340_v16, 0.0  ;;  %v19348_v34 = vld [vmem:[#allocation35_spill] sm:$0xff] }
 0x1ff   :  { %13283 = vmatprep.mubr.msk.f32.mxu0 %vm791_vm2, %v19326_v36  ;;  %19327 = vst [vmem:[#allocation25_spill] sm:$0xff] %v15798_v39  ;;  %v15800_v53 = vpop.f32.mrf.mxu0 }
 0x200   :  { %19328 = vst [vmem:[#allocation26_spill] sm:$0xff] %v15800_v53  ;;  %v15802_v55 = vpop.f32.mrf.mxu1 }
 0x201   :  { %19329 = vst [vmem:[#allocation145_spill] sm:$0xff] %v15802_v55  ;;  %v15804_v59 = vpop.f32.mrf.mxu0  ;;  %12987 = vmatmul.mubr.msk.f32.gmra.mxu1 %vm791_vm2, %v15236_v24 }
 0x202   :  { %19330 = vst [vmem:[#allocation146_spill] sm:$0xff] %v15804_v59  ;;  %13284 = vmatmul.mubr.msk.f32.gmra.mxu0 %vm791_vm2, %v15236_v24  ;;  %12989 = vmatprep.mubr.msk.f32.mxu1 %vm791_vm2, %v19333_v15  ;;  %v15820_v36 = vpop.f32.mrf.mxu1  ;;  %v19342_v15 = vsel %vm14451_vm15, %v19340_v16, 0.0  ;;  %v19349_v16 = vsel %vm14507_vm13, %v19348_v34, 0.0  ;;  %v19356_v24 = vld [vmem:[#allocation38_spill] sm:$0xff] }
 0x203   :  { %13286 = vmatprep.mubr.msk.f32.mxu0 %vm791_vm2, %v19334_v21  ;;  %19335 = vst [vmem:[#allocation28_spill] sm:$0xff] %v15820_v36  ;;  %v15822_v59 = vpop.f32.mrf.mxu0 }
 0x204   :  { %19336 = vst [vmem:[#allocation29_spill] sm:$0xff] %v15822_v59  ;;  %v15824_v55 = vpop.f32.mrf.mxu1 }
 0x205   :  { %19337 = vst [vmem:[#allocation147_spill] sm:$0xff] %v15824_v55  ;;  %v15826_v53 = vpop.f32.mrf.mxu0  ;;  %12990 = vmatmul.mubr.msk.f32.gmra.mxu1 %vm791_vm2, %v15245_v44 }
 0x206   :  { %19338 = vst [vmem:[#allocation148_spill] sm:$0xff] %v15826_v53  ;;  %13287 = vmatmul.mubr.msk.f32.gmra.mxu0 %vm791_vm2, %v15245_v44  ;;  %12992 = vmatprep.mubr.msk.f32.mxu1 %vm791_vm2, %v19341_v11  ;;  %v15842_v21 = vpop.f32.mrf.mxu1  ;;  %v19350_v11 = vsel %vm14479_vm0, %v19348_v34, 0.0  ;;  %v19357_v34 = vsel %vm14535_vm11, %v19356_v24, 0.0  ;;  %v19366_v44 = vld [vmem:[#allocation42_spill] sm:$0xff] }
 0x207   :  { %13289 = vmatprep.mubr.msk.f32.mxu0 %vm791_vm2, %v19342_v15  ;;  %19343 = vst [vmem:[#allocation31_spill] sm:$0xff] %v15842_v21  ;;  %v15844_v53 = vpop.f32.mrf.mxu0 }
 0x208   :  { %19344 = vst [vmem:[#allocation33_spill] sm:$0xff] %v15844_v53  ;;  %v15846_v55 = vpop.f32.mrf.mxu1 }
 0x209   :  { %19345 = vst [vmem:[#allocation149_spill] sm:$0xff] %v15846_v55  ;;  %v15848_v59 = vpop.f32.mrf.mxu0  ;;  %12993 = vmatmul.mubr.msk.f32.gmra.mxu1 %vm791_vm2, %v15254_v51 }
 0x20a   :  { %19346 = vst [vmem:[#allocation150_spill] sm:$0xff] %v15848_v59  ;;  %13290 = vmatmul.mubr.msk.f32.gmra.mxu0 %vm791_vm2, %v15254_v51  ;;  %12995 = vmatprep.mubr.msk.f32.mxu1 %vm791_vm2, %v19349_v16  ;;  %v15864_v15 = vpop.f32.mrf.mxu1  ;;  %v19358_v16 = vsel %vm14507_vm13, %v19356_v24, 0.0  ;;  %v19374_v51 = vld [vmem:[#allocation43_spill] sm:$0xff]  ;;  %vm19424_vm13 = vnez %v19103_v48 }
 0x20b   :  { %13292 = vmatprep.mubr.msk.f32.mxu0 %vm791_vm2, %v19350_v11  ;;  %19351 = vst [vmem:[#allocation34_spill] sm:$0xff] %v15864_v15  ;;  %v15866_v59 = vpop.f32.mrf.mxu0  ;;  %v19436_v48 = vld [vmem:[#allocation63_spill] sm:$0xff] }
 0x20c   :  { %19352 = vst [vmem:[#allocation35_spill] sm:$0xff] %v15866_v59  ;;  %v15868_v55 = vpop.f32.mrf.mxu1 }
 0x20d   :  { %19353 = vst [vmem:[#allocation151_spill] sm:$0xff] %v15868_v55  ;;  %v15870_v53 = vpop.f32.mrf.mxu0  ;;  %12996 = vmatmul.mubr.msk.f32.gmra.mxu1 %vm791_vm2, %v15263_v27 }
 0x20e   :  { %19354 = vst [vmem:[#allocation152_spill] sm:$0xff] %v15870_v53  ;;  %13293 = vmatmul.mubr.msk.f32.gmra.mxu0 %vm791_vm2, %v15263_v27  ;;  %12998 = vmatprep.mubr.msk.f32.mxu1 %vm791_vm2, %v19357_v34  ;;  %v15886_v11 = vpop.f32.mrf.mxu1  ;;  %v19363_v27 = vld [vmem:[#allocation87_spill] sm:$0xff]  ;;  %v19364_v34 = vld [vmem:[#allocation40_spill] sm:$0xff] }
 0x20f   :  { %13295 = vmatprep.mubr.msk.f32.mxu0 %vm791_vm2, %v19358_v16  ;;  %19359 = vst [vmem:[#allocation37_spill] sm:$0xff] %v15886_v11  ;;  %v15888_v53 = vpop.f32.mrf.mxu0  ;;  %vm19365_vm0 = vnez %v19364_v34  ;;  %v19368_v16 = vsel %vm14535_vm11, %v19366_v44, 0.0  ;;  %vm19414_vm11 = vnez %v19093_v43  ;;  %v19425_v43 = vsel %vm19424_vm13, %v14867_v2, 0.0 }
 0x210   :  { %19360 = vst [vmem:[#allocation38_spill] sm:$0xff] %v15888_v53  ;;  %v15890_v55 = vpop.f32.mrf.mxu1  ;;  %v19367_v24 = vsel %vm19365_vm0, %v19366_v44, 0.0  ;;  %v19376_v44 = vsel %vm19365_vm0, %v19374_v51, 0.0  ;;  %v19415_v31 = vsel %vm19414_vm11, %v14796_v12, 0.0 }
 0x211   :  { %19361 = vst [vmem:[#allocation153_spill] sm:$0xff] %v15890_v55  ;;  %v15892_v59 = vpop.f32.mrf.mxu0  ;;  %12999 = vmatmul.mubr.msk.f32.gmra.mxu1 %vm791_vm2, %v19363_v27 }
 0x212   :  { %19362 = vst [vmem:[#allocation154_spill] sm:$0xff] %v15892_v59  ;;  %13296 = vmatmul.mubr.msk.f32.gmra.mxu0 %vm791_vm2, %v19363_v27  ;;  %13001 = vmatprep.mubr.msk.f32.mxu1 %vm791_vm2, %v19367_v24  ;;  %v15908_v55 = vpop.f32.mrf.mxu1  ;;  %v19375_v27 = vsel %vm19373_vm4, %v19374_v51, 0.0  ;;  %v895_v24 = vadd.s32 256, %v14223_v22  ;;  %v19382_v51 = vld [vmem:[#allocation46_spill] sm:$0xff] }
 0x213   :  { %13298 = vmatprep.mubr.msk.f32.mxu0 %vm791_vm2, %v19368_v16  ;;  %19369 = vst [vmem:[#allocation87_spill] sm:$0xff] %v15908_v55  ;;  %v15910_v59 = vpop.f32.mrf.mxu0 }
 0x214   :  { %19370 = vst [vmem:[#allocation40_spill] sm:$0xff] %v15910_v59 }
 0x215   :  { %v15912_v53 = vpop.f32.mrf.mxu1  ;;  %13002 = vmatmul.mubr.msk.f32.gmra.mxu1 %vm791_vm2, %v15282_v19 }
 0x216   :  { %19371 = vst [vmem:[#allocation42_spill] sm:$0xff] %v15912_v53  ;;  %v15914_v11 = vpop.f32.mrf.mxu0  ;;  %13299 = vmatmul.mubr.msk.f32.gmra.mxu0 %vm791_vm2, %v15282_v19  ;;  %13004 = vmatprep.mubr.msk.f32.mxu1 %vm791_vm2, %v19375_v27  ;;  %v19383_v27 = vsel %vm19175_vm7, %v19382_v51, 0.0 }
 0x217   :  { %19372 = vst [vmem:[#allocation155_spill] sm:$0xff] %v15914_v11  ;;  %13301 = vmatprep.mubr.msk.f32.mxu0 %vm791_vm2, %v19376_v44  ;;  %v15931_v16 = vpop.f32.mrf.mxu1  ;;  %v19384_v44 = vsel %vm19373_vm4, %v19382_v51, 0.0 }
 0x218   :  { %19377 = vst [vmem:[#allocation43_spill] sm:$0xff] %v15931_v16  ;;  %v15933_v11 = vpop.f32.mrf.mxu0 }
 0x219   :  { %19378 = vst [vmem:[#allocation156_spill] sm:$0xff] %v15933_v11  ;;  %v15935_v53 = vpop.f32.mrf.mxu1  ;;  %13005 = vmatmul.mubr.msk.f32.gmra.mxu1 %vm791_vm2, %v15295_v58 }
 0x21a   :  { %19379 = vst [vmem:[#allocation157_spill] sm:$0xff] %v15935_v53  ;;  %v15937_v19 = vpop.f32.mrf.mxu0  ;;  %13302 = vmatmul.mubr.msk.f32.gmra.mxu0 %vm791_vm2, %v15295_v58  ;;  %13007 = vmatprep.mubr.msk.f32.mxu1 %vm791_vm2, %v19383_v27  ;;  %v3656_v53 = vld [vmem:[#allocation2 + $0x107] sm:$0xff] }
 0x21b   :  { %19380 = vst [vmem:[#allocation158_spill] sm:$0xff] %v15937_v19  ;;  %13304 = vmatprep.mubr.msk.f32.mxu0 %vm791_vm2, %v19384_v44  ;;  %v1023_v19 = vand.u32 15, %v895_v24  ;;  %v15953_v11 = vpop.f32.mrf.mxu1  ;;  %v3720_v51 = vsel %vm19390_vm6, %v3656_v53, 0.0  ;;  %v6034_v24 = vsel %vm19175_vm7, %v3656_v53, 0.0  ;;  %vm19400_vm7 = vnez %v19078_v46 }
 0x21c   :  { %19385 = vst [vmem:[#allocation45_spill] sm:$0xff] %v15953_v11  ;;  %v15955_v16 = vpop.f32.mrf.mxu0  ;;  %v19406_v27 = vsel %vm19400_vm7, %v14722_v7, 0.0  ;;  %v19410_v46 = vsel %vm19409_vm10, %v14765_v56, 0.0  ;;  %vm19466_vm6 = vnez %v19158_v18 }
 0x21d   :  { %19386 = vst [vmem:[#allocation46_spill] sm:$0xff] %v15955_v16  ;;  %v15957_v59 = vpop.f32.mrf.mxu1  ;;  %13008 = vmatmul.mubr.msk.f32.gmra.mxu1 %vm791_vm2, %v15304_v38  ;;  %vm15971_vm8 = vcmp.ge.s32.totalorder %v1023_v19, 1  ;;  %v5113_v16 = vld [vmem:[#allocation2 + $0x51] sm:$0xff] }
 0x21e   :  { %19387 = vst [vmem:[#allocation159_spill] sm:$0xff] %v15957_v59  ;;  %v15959_v58 = vpop.f32.mrf.mxu0  ;;  %13305 = vmatmul.mubr.msk.f32.gmra.mxu0 %vm791_vm2, %v15304_v38  ;;  %13010 = vmatprep.mubr.msk.f32.mxu1 %vm791_vm2, %v3720_v51  ;;  %v3657_v59 = vld [vmem:[#allocation2 + $0x10f] sm:$0xff]  ;;  %v3722_v53 = vsel %vm15971_vm8, %v15311_v20, 0.0 }
 0x21f   :  { %19388 = vst [vmem:[#allocation160_spill] sm:$0xff] %v15959_v58  ;;  %13307 = vmatprep.mubr.msk.f32.mxu0 %vm791_vm2, %v6034_v24  ;;  %v15975_v44 = vpop.f32.mrf.mxu1 }
 0x220   :  { %19393 = vst [vmem:[#allocation88_spill] sm:$0xff] %v15975_v44  ;;  %v15977_v58 = vpop.f32.mrf.mxu0  ;;  %v5111_v44 = vld [vmem:[#allocation2 + $0x41] sm:$0xff] }
 0x221   :  { %19394 = vst [vmem:[#allocation161_spill] sm:$0xff] %v15977_v58  ;;  %v15979_v38 = vpop.f32.mrf.mxu1  ;;  %13011 = vmatmul.mubr.msk.f32.gmra.mxu1 %vm791_vm2, %v3657_v59 }
 0x222   :  { %19395 = vst [vmem:[#allocation162_spill] sm:$0xff] %v15979_v38  ;;  %v15981_v40 = vpop.f32.mrf.mxu0  ;;  %13308 = vmatmul.mubr.msk.f32.gmra.mxu0 %vm791_vm2, %v3657_v59  ;;  %13013 = vmatprep.mubr.msk.f32.mxu1 %vm791_vm2, %v3722_v53  ;;  %v13778_v59 = vld [vmem:[#allocation2 + $0x127] sm:$0xff]  ;;  %v19401_v53 = vsel %vm19400_vm7, %v14692_v63, 0.0  ;;  %v19405_v63 = vsel %vm19404_vm9, %v14722_v7, 0.0  ;;  %v19411_v7 = vsel %vm19404_vm9, %v14765_v56, 0.0  ;;  %v19416_v56 = vsel %vm19409_vm10, %v14796_v12, 0.0 }
 0x223   :  { %19396 = vst [vmem:[#allocation163_spill] sm:$0xff] %v15981_v40  ;;  %13310 = vmatprep.mubr.f32.mxu0 %v19169_v60  ;;  %v15990_v19 = vpop.f32.mrf.mxu1  ;;  %v6038_v20 = vsel %vm15971_vm8, %v13778_v59, 0.0  ;;  %v19421_v12 = vsel %vm19414_vm11, %v14829_v37, 0.0  ;;  %v19426_v37 = vsel %vm19419_vm12, %v14867_v2, 0.0  ;;  %v19431_v2 = vsel %vm19424_vm13, %v19215_v54, 0.0 }
 0x224   :  { %19397 = vst [vmem:[#allocation164_spill] sm:$0xff] %v15990_v19  ;;  %v15992_v34 = vpop.f32.mrf.mxu0 }
 0x225   :  { %19398 = vst [vmem:[#allocation165_spill] sm:$0xff] %v15992_v34  ;;  %v15994_v51 = vpop.f32.mrf.mxu1  ;;  %13014 = vmatmul.mubr.msk.f32.gmra.mxu1 %vm791_vm2, %v15327_v57 }
 0x226   :  { %v15996_v24 = vpop.f32.mrf.mxu0  ;;  %13311 = vmatmul.mubr.f32.gmra.mxu0 %v19169_v60  ;;  %13016 = vmatprep.mubr.msk.f32.mxu1 %vm791_vm2, %v19401_v53 }
 0x227   :  { %19399 = vst [vmem:[#allocation166_spill] sm:$0xff] %v15996_v24  ;;  %13313 = vmatprep.mubr.msk.f32.mxu0 %vm791_vm2, %v6038_v20  ;;  %v16009_v34 = vpop.f32.mrf.mxu1 }
 0x228   :  { %v16011_v24 = vpop.f32.mrf.mxu0 }
 0x229   :  { %19402 = vst [vmem:[#allocation167_spill] sm:$0xff] %v16011_v24  ;;  %v16013_v19 = vpop.f32.mrf.mxu1  ;;  %13017 = vmatmul.mubr.msk.f32.gmra.mxu1 %vm791_vm2, %v15345_v45  ;;  %v3689_v24 = vld [vmem:[#allocation2 + $0x20f] sm:$0xff] }
 0x22a   :  { %v16017_v57 = vpop.f32.mrf.mxu0  ;;  %13314 = vmatmul.mubr.msk.f32.gmra.mxu0 %vm791_vm2, %v15345_v45  ;;  %13019 = vmatprep.mubr.msk.f32.mxu1 %vm791_vm2, %v19405_v63 }
 0x22b   :  { %19403 = vst [vmem:[#allocation168_spill] sm:$0xff] %v16017_v57  ;;  %13316 = vmatprep.mubr.msk.f32.mxu0 %vm791_vm2, %v19406_v27  ;;  %v16031_v59 = vpop.f32.mrf.mxu1 }
 0x22c   :  { %v16033_v20 = vpop.f32.mrf.mxu0 }
 0x22d   :  { %19407 = vst [vmem:[#allocation169_spill] sm:$0xff] %v16033_v20  ;;  %v16035_v53 = vpop.f32.mrf.mxu1  ;;  %13020 = vmatmul.mubr.msk.f32.gmra.mxu1 %vm791_vm2, %v15365_v49 }
 0x22e   :  { %v16039_v45 = vpop.f32.mrf.mxu0  ;;  %13317 = vmatmul.mubr.msk.f32.gmra.mxu0 %vm791_vm2, %v15365_v49  ;;  %13022 = vmatprep.mubr.msk.f32.mxu1 %vm791_vm2, %v19410_v46 }
 0x22f   :  { %19408 = vst [vmem:[#allocation170_spill] sm:$0xff] %v16039_v45  ;;  %13319 = vmatprep.mubr.msk.f32.mxu0 %vm791_vm2, %v19411_v7  ;;  %v16053_v63 = vpop.f32.mrf.mxu1 }
 0x230   :  { %v16055_v27 = vpop.f32.mrf.mxu0 }
 0x231   :  { %19412 = vst [vmem:[#allocation171_spill] sm:$0xff] %v16055_v27  ;;  %v16057_v45 = vpop.f32.mrf.mxu1  ;;  %13023 = vmatmul.mubr.msk.f32.gmra.mxu1 %vm791_vm2, %v15385_v17 }
 0x232   :  { %v16061_v49 = vpop.f32.mrf.mxu0  ;;  %13320 = vmatmul.mubr.msk.f32.gmra.mxu0 %vm791_vm2, %v15385_v17  ;;  %13025 = vmatprep.mubr.msk.f32.mxu1 %vm791_vm2, %v19415_v31 }
 0x233   :  { %19413 = vst [vmem:[#allocation172_spill] sm:$0xff] %v16061_v49  ;;  %13322 = vmatprep.mubr.msk.f32.mxu0 %vm791_vm2, %v19416_v56  ;;  %v16075_v46 = vpop.f32.mrf.mxu1 }
 0x234   :  { %v16077_v7 = vpop.f32.mrf.mxu0 }
 0x235   :  { %19417 = vst [vmem:[#allocation173_spill] sm:$0xff] %v16077_v7  ;;  %v16079_v49 = vpop.f32.mrf.mxu1  ;;  %13026 = vmatmul.mubr.msk.f32.gmra.mxu1 %vm791_vm2, %v15405_v10 }
 0x236   :  { %v16083_v17 = vpop.f32.mrf.mxu0  ;;  %13323 = vmatmul.mubr.msk.f32.gmra.mxu0 %vm791_vm2, %v15405_v10  ;;  %13028 = vmatprep.mubr.msk.f32.mxu1 %vm791_vm2, %v19420_v41 }
 0x237   :  { %19418 = vst [vmem:[#allocation174_spill] sm:$0xff] %v16083_v17  ;;  %13325 = vmatprep.mubr.msk.f32.mxu0 %vm791_vm2, %v19421_v12  ;;  %v16097_v31 = vpop.f32.mrf.mxu1 }
 0x238   :  { %v16099_v56 = vpop.f32.mrf.mxu0 }
 0x239   :  { %19422 = vst [vmem:[#allocation175_spill] sm:$0xff] %v16099_v56  ;;  %v16101_v17 = vpop.f32.mrf.mxu1  ;;  %13029 = vmatmul.mubr.msk.f32.gmra.mxu1 %vm791_vm2, %v15425_v29  ;;  %v19440_v56 = vld [vmem:[#allocation118_spill] sm:$0xff] }
 0x23a   :  { %v16105_v10 = vpop.f32.mrf.mxu0  ;;  %13326 = vmatmul.mubr.msk.f32.gmra.mxu0 %vm791_vm2, %v15425_v29  ;;  %13031 = vmatprep.mubr.msk.f32.mxu1 %vm791_vm2, %v19425_v43 }
 0x23b   :  { %19423 = vst [vmem:[#allocation176_spill] sm:$0xff] %v16105_v10  ;;  %13328 = vmatprep.mubr.msk.f32.mxu0 %vm791_vm2, %v19426_v37  ;;  %v16119_v41 = vpop.f32.mrf.mxu1 }
 0x23c   :  { %v16121_v12 = vpop.f32.mrf.mxu0 }
 0x23d   :  { %19427 = vst [vmem:[#allocation177_spill] sm:$0xff] %v16121_v12  ;;  %v16123_v10 = vpop.f32.mrf.mxu1  ;;  %13032 = vmatmul.mubr.msk.f32.gmra.mxu1 %vm791_vm2, %v15445_v42 }
 0x23e   :  { %v16127_v29 = vpop.f32.mrf.mxu0  ;;  %13329 = vmatmul.mubr.msk.f32.gmra.mxu0 %vm791_vm2, %v15445_v42  ;;  %13034 = vmatprep.mubr.msk.f32.mxu1 %vm791_vm2, %v19430_v14  ;;  %v19434_v14 = vld [vmem:[#allocation61_spill] sm:$0xff] }
 0x23f   :  { %19428 = vst [vmem:[#allocation178_spill] sm:$0xff] %v16127_v29  ;;  %13331 = vmatprep.mubr.msk.f32.mxu0 %vm791_vm2, %v19431_v2  ;;  %v16141_v43 = vpop.f32.mrf.mxu1  ;;  %vm19435_vm15 = vnez %v19434_v14  ;;  %v19438_v2 = vsel %vm19429_vm14, %v19436_v48, 0.0 }
 0x240   :  { %v16143_v37 = vpop.f32.mrf.mxu0  ;;  %v19437_v54 = vsel %vm19435_vm15, %v19436_v48, 0.0  ;;  %v19445_v48 = vsel %vm19435_vm15, %v19234_v32, 0.0 }
 0x241   :  { %19432 = vst [vmem:[#allocation179_spill] sm:$0xff] %v16143_v37  ;;  %v16145_v29 = vpop.f32.mrf.mxu1  ;;  %13035 = vmatmul.mubr.msk.f32.gmra.mxu1 %vm791_vm2, %v15465_v50 }
 0x242   :  { %v16149_v42 = vpop.f32.mrf.mxu0  ;;  %13332 = vmatmul.mubr.msk.f32.gmra.mxu0 %vm791_vm2, %v15465_v50  ;;  %13037 = vmatprep.mubr.msk.f32.mxu1 %vm791_vm2, %v19437_v54  ;;  %v19442_v54 = vld [vmem:[#allocation66_spill] sm:$0xff] }
 0x243   :  { %19433 = vst [vmem:[#allocation180_spill] sm:$0xff] %v16149_v42  ;;  %13334 = vmatprep.mubr.msk.f32.mxu0 %vm791_vm2, %v19438_v2  ;;  %v16163_v37 = vpop.f32.mrf.mxu1  ;;  %vm19443_vm1 = vnez %v19442_v54  ;;  %v16188_v2 = vld [vmem:[%s18972_s26 + $0x78] sm:$0xff] }
 0x244   :  { %v16165_v12 = vpop.f32.mrf.mxu0  ;;  %v19444_v62 = vsel %vm19443_vm1, %v19234_v32, 0.0  ;;  %13361 = vmatprep.subr.mxu1 %v16188_v2  ;;  %v19449_v32 = vld [vmem:[#allocation71_spill] sm:$0xff] }
 0x245   :  { %19439 = vst [vmem:[#allocation61_spill] sm:$0xff] %v16165_v12  ;;  %v16167_v42 = vpop.f32.mrf.mxu1  ;;  %13038 = vmatmul.mubr.msk.f32.gmra.mxu1 %vm791_vm2, %v19440_v56  ;;  %vm19450_vm0 = vnez %v19449_v32 }
 0x246   :  { %v16171_v50 = vpop.f32.mrf.mxu0  ;;  %13335 = vmatmul.mubr.msk.f32.gmra.mxu0 %vm791_vm2, %v19440_v56  ;;  %13040 = vmatprep.mubr.msk.f32.mxu1 %vm791_vm2, %v19444_v62  ;;  %v19447_v62 = vld [vmem:[#allocation65_spill] sm:$0xff]  ;;  %v19458_v54 = vsel %vm19450_vm0, %v15039_v6, 0.0 }
 0x247   :  { %19441 = vst [vmem:[#allocation63_spill] sm:$0xff] %v16171_v50  ;;  %13337 = vmatprep.mubr.msk.f32.mxu0 %vm791_vm2, %v19445_v48  ;;  %v16190_v50 = vpop.f32.mrf.mxu1  ;;  %v19451_v48 = vsel %vm19450_vm0, %v19243_v30, 0.0 }
 0x248   :  { %v16192_v56 = vpop.f32.mrf.mxu0 }
 0x249   :  { %19446 = vst [vmem:[#allocation118_spill] sm:$0xff] %v16192_v56  ;;  %v16195_v12 = vpop.f32.mrf.mxu1  ;;  %13041 = vmatmul.mubr.msk.f32.gmra.mxu1 %vm791_vm2, %v19447_v62  ;;  %v19452_v56 = vsel %vm19443_vm1, %v19243_v30, 0.0 }
 0x24a   :  { %v16199_v14 = vpop.f32.mrf.mxu0  ;;  %13338 = vmatmul.mubr.msk.f32.gmra.mxu0 %vm791_vm2, %v19447_v62  ;;  %13043 = vmatprep.mubr.msk.f32.mxu1 %vm791_vm2, %v19451_v48  ;;  %v19455_v48 = vld [vmem:[#allocation76_spill] sm:$0xff] }
 0x24b   :  { %19448 = vst [vmem:[#allocation66_spill] sm:$0xff] %v16199_v14  ;;  %13340 = vmatprep.mubr.msk.f32.mxu0 %vm791_vm2, %v19452_v56  ;;  %v16213_v7 = vpop.f32.mrf.mxu1  ;;  %vm19456_vm4 = vnez %v19455_v48  ;;  %v19468_v48 = vsel %vm19251_vm5, %v15104_v35, 0.0 }
 0x24c   :  { %v16215_v27 = vpop.f32.mrf.mxu0  ;;  %v19457_v30 = vsel %vm19456_vm4, %v15039_v6, 0.0  ;;  %v19462_v6 = vsel %vm19251_vm5, %v15077_v3, 0.0  ;;  %v19463_v32 = vsel %vm19456_vm4, %v15077_v3, 0.0  ;;  %v19467_v3 = vsel %vm19466_vm6, %v15104_v35, 0.0 }
 0x24d   :  { %19453 = vst [vmem:[#allocation65_spill] sm:$0xff] %v16215_v27  ;;  %v16217_v14 = vpop.f32.mrf.mxu1  ;;  %13044 = vmatmul.mubr.msk.f32.gmra.mxu1 %vm791_vm2, %v15531_v52  ;;  %vm19471_vm5 = vnez %v19165_v26  ;;  %v5106_v26 = vld [vmem:[#allocation2 + $0x19] sm:$0xff] }
 0x24e   :  { %v16221_v62 = vpop.f32.mrf.mxu0  ;;  %13341 = vmatmul.mubr.msk.f32.gmra.mxu0 %vm791_vm2, %v15531_v52  ;;  %13046 = vmatprep.mubr.msk.f32.mxu1 %vm791_vm2, %v19457_v30  ;;  %v864_v30 = vadd.s32 8, %v14223_v22  ;;  %v19472_v35 = vsel %vm19471_vm5, %v15132_v4, 0.0 }
 0x24f   :  { %19454 = vst [vmem:[#allocation71_spill] sm:$0xff] %v16221_v62  ;;  %13343 = vmatprep.mubr.msk.f32.mxu0 %vm791_vm2, %v19458_v54  ;;  %v16235_v56 = vpop.f32.mrf.mxu1 }
 0x250   :  { %v16237_v27 = vpop.f32.mrf.mxu0 }
 0x251   :  { %19459 = vst [vmem:[#allocation76_spill] sm:$0xff] %v16237_v27  ;;  %v16239_v62 = vpop.f32.mrf.mxu1  ;;  %13047 = vmatmul.mubr.msk.f32.gmra.mxu1 %vm791_vm2, %v15552_v13 }
 0x252   :  { %v16243_v52 = vpop.f32.mrf.mxu0  ;;  %13344 = vmatmul.mubr.msk.f32.gmra.mxu0 %vm791_vm2, %v15552_v13  ;;  %13049 = vmatprep.mubr.msk.f32.mxu1 %vm791_vm2, %v19462_v6 }
 0x253   :  { %19460 = vst [vmem:[#allocation181_spill] sm:$0xff] %v16243_v52  ;;  %13346 = vmatprep.mubr.msk.f32.mxu0 %vm791_vm2, %v19463_v32  ;;  %v16257_v54 = vpop.f32.mrf.mxu1 }
 0x254   :  { %v16259_v27 = vpop.f32.mrf.mxu0 }
 0x255   :  { %19464 = vst [vmem:[#allocation79_spill] sm:$0xff] %v16259_v27  ;;  %v16261_v52 = vpop.f32.mrf.mxu1  ;;  %13050 = vmatmul.mubr.msk.f32.gmra.mxu1 %vm791_vm2, %v15572_v8 }
 0x256   :  { %v16265_v13 = vpop.f32.mrf.mxu0  ;;  %13347 = vmatmul.mubr.msk.f32.gmra.mxu0 %vm791_vm2, %v15572_v8  ;;  %13052 = vmatprep.mubr.msk.f32.mxu1 %vm791_vm2, %v19467_v3  ;;  %v19473_v3 = vsel %vm19466_vm6, %v15132_v4, 0.0 }
 0x257   :  { %19465 = vst [vmem:[#allocation182_spill] sm:$0xff] %v16265_v13  ;;  %13349 = vmatprep.mubr.msk.f32.mxu0 %vm791_vm2, %v19468_v48  ;;  %v16279_v6 = vpop.f32.mrf.mxu1  ;;  %v3688_v48 = vld [vmem:[#allocation2 + $0x207] sm:$0xff]  ;;  %v19475_v13 = vld [vmem:[#allocation135_spill] sm:$0xff] }
 0x258   :  { %v16281_v32 = vpop.f32.mrf.mxu0  ;;  %v3752_v4 = vsel %vm15588_vm3, %v3688_v48, 0.0 }
 0x259   :  { %19469 = vst [vmem:[#allocation183_spill] sm:$0xff] %v16281_v32  ;;  %v16283_v27 = vpop.f32.mrf.mxu1  ;;  %13053 = vmatmul.mubr.msk.f32.gmra.mxu1 %vm791_vm2, %v15597_v28 }
 0x25a   :  { %v16287_v8 = vpop.f32.mrf.mxu0  ;;  %13350 = vmatmul.mubr.msk.f32.gmra.mxu0 %vm791_vm2, %v15597_v28  ;;  %13055 = vmatprep.mubr.msk.f32.mxu1 %vm791_vm2, %v19472_v35  ;;  %v6066_v35 = vsel %vm19471_vm5, %v3688_v48, 0.0  ;;  %v5107_v48 = vld [vmem:[#allocation2 + $0x21] sm:$0xff] }
 0x25b   :  { %19470 = vst [vmem:[#allocation184_spill] sm:$0xff] %v16287_v8  ;;  %13352 = vmatprep.mubr.msk.f32.mxu0 %vm791_vm2, %v19473_v3  ;;  %v16302_v32 = vpop.f32.mrf.mxu1  ;;  %v992_v3 = vand.u32 15, %v864_v30 }
 0x25c   :  { %v16304_v8 = vpop.f32.mrf.mxu0 }
 0x25d   :  { %19474 = vst [vmem:[#allocation185_spill] sm:$0xff] %v16304_v8  ;;  %v16306_v28 = vpop.f32.mrf.mxu1  ;;  %13056 = vmatmul.mubr.msk.f32.gmra.mxu1 %vm791_vm2, %v19475_v13  ;;  %vm16330_vm3 = vcmp.lt.s32.totalorder %v992_v3, 15  ;;  %v5108_v3 = vld [vmem:[#allocation2 + $0x29] sm:$0xff] }
 0x25e   :  { %v16310_v20 = vpop.f32.mrf.mxu0  ;;  %13353 = vmatmul.mubr.msk.f32.gmra.mxu0 %vm791_vm2, %v19475_v13  ;;  %13058 = vmatprep.mubr.msk.f32.mxu1 %vm791_vm2, %v3752_v4 }
 0x25f   :  { %19476 = vst [vmem:[#allocation135_spill] sm:$0xff] %v16310_v20  ;;  %13355 = vmatprep.mubr.msk.f32.mxu0 %vm791_vm2, %v6066_v35  ;;  %v16320_v8 = vpop.f32.mrf.mxu1  ;;  %v5171_v35 = vsel %vm16330_vm3, %v5107_v48, 0.0 }
 0x260   :  { %v16322_v57 = vpop.f32.mrf.mxu0 }
 0x261   :  { %19478 = vst [vmem:[#allocation129_spill] sm:$0xff] %v16322_v57  ;;  %v16324_v20 = vpop.f32.mrf.mxu1  ;;  %13059 = vmatmul.mubr.msk.f32.gmra.mxu1 %vm791_vm2, %v3689_v24 }
 0x262   :  { %v16327_v13 = vpop.f32.mrf.mxu0  ;;  %13356 = vmatmul.mubr.msk.f32.gmra.mxu0 %vm791_vm2, %v3689_v24  ;;  %13165 = vmatprep.mubr.msk.f32.mxu1 %vm791_vm2, %v5106_v26  ;;  %v11623_v26 = vld [vmem:[%s18972_s26 + $0x70] sm:$0xff] }
 0x263   :  { %19479 = vst [vmem:[#allocation186_spill] sm:$0xff] %v16327_v13  ;;  %13358 = vmatprep.mubr.f32.mxu0 %v19169_v60  ;;  %v16336_v18 = vpop.f32.mrf.mxu1  ;;  %v5109_v13 = vld [vmem:[#allocation2 + $0x31] sm:$0xff] }
 0x264   :  { %v16338_v4 = vpop.f32.mrf.mxu0  ;;  %v7615_v40 = vsel %vm16330_vm3, %v5109_v13, 0.0 }
 0x265   :  { %19482 = vst [vmem:[#allocation187_spill] sm:$0xff] %v16338_v4  ;;  %v16342_v57 = vpop.f32.mrf.mxu1  ;;  %13166 = vmatmul.mubr.msk.f32.vlgmr.msra.gmra.mxu1 %vm791_vm2, %v5171_v35 }
 0x266   :  { %v16344_v24 = vpop.f32.mrf.mxu0  ;;  %13359 = vmatmul.mubr.f32.gmra.mxu0 %v19169_v60  ;;  %13168 = vmatprep.mubr.msk.f32.mxu1 %vm791_vm2, %v5108_v3 }
 0x267   :  { %19483 = vst [vmem:[#allocation188_spill] sm:$0xff] %v16344_v24  ;;  %13465 = vmatprep.mubr.msk.f32.mxu0 %vm791_vm2, %v5108_v3  ;;  %v16353_v4 = vpop.f32.mrf.mxu1  ;;  %13362 = vmatpush3.msra.mxu1 %v16188_v2  ;;  %v19485_v24 = vld [vmem:[#allocation7_spill] sm:$0xff] }
 0x268   :  { %v16355_v48 = vpop.f32.mrf.mxu0  ;;  %vm19486_vm8 = vnez %v19485_v24  ;;  %13363 = vmatprep.subr.mxu1 %v11623_v26  ;;  %v5110_v3 = vld [vmem:[#allocation2 + $0x39] sm:$0xff]  ;;  %v19493_v24 = vld [vmem:[#allocation13_spill] sm:$0xff] }
 0x269   :  { %19484 = vst [vmem:[#allocation189_spill] sm:$0xff] %v16355_v48  ;;  %v5173_v35 = vsel %vm19486_vm8, %v5109_v13, 0.0  ;;  %v16362_v38 = vpop.f32.mrf.mxu1  ;;  %13364 = vmatpush3.msra.mxu1 %v11623_v26  ;;  %v19489_v13 = vld [vmem:[#allocation10_spill] sm:$0xff]  ;;  %vm19494_vm9 = vnez %v19493_v24 }
 0x26a   :  { %v16364_v58 = vpop.f32.mrf.mxu0  ;;  %13169 = vmatmul.mubr.msk.f32.gmra.mxu1 %vm791_vm2, %v5173_v35  ;;  %13466 = vmatmul.mubr.msk.f32.vlgmr.msra.gmra.mxu0 %vm791_vm2, %v7615_v40  ;;  %vm19490_vm7 = vnez %v19489_v13  ;;  %v19497_v13 = vld [vmem:[#allocation14_spill] sm:$0xff] }
 0x26b   :  { %19487 = vst [vmem:[#allocation7_spill] sm:$0xff] %v16364_v58  ;;  %13171 = vmatprep.mubr.msk.f32.mxu1 %vm791_vm2, %v5110_v3  ;;  %13468 = vmatprep.mubr.msk.f32.mxu0 %vm791_vm2, %v5110_v3  ;;  %v16370_v2 = vpop.f32.mrf.mxu1  ;;  %v5175_v30 = vsel %vm19490_vm7, %v5111_v44, 0.0  ;;  %v7617_v58 = vsel %vm19486_vm8, %v5111_v44, 0.0  ;;  %v5112_v3 = vld [vmem:[#allocation2 + $0x49] sm:$0xff]  ;;  %v5177_v44 = vsel %vm19494_vm9, %v5113_v16, 0.0  ;;  %vm19498_vm10 = vnez %v19497_v13  ;;  %v19503_v24 = vld [vmem:[#allocation18_spill] sm:$0xff] }
 0x26c   :  { %v16372_v48 = vpop.f32.mrf.mxu0  ;;  %vm19504_vm11 = vnez %v19503_v24  ;;  %v19509_v13 = vld [vmem:[#allocation21_spill] sm:$0xff]  ;;  %v19515_v24 = vld [vmem:[#allocation23_spill] sm:$0xff] }
 0x26d   :  { %19488 = vst [vmem:[#allocation190_spill] sm:$0xff] %v16372_v48  ;;  %v16378_v35 = vpop.f32.mrf.mxu1  ;;  %vm19510_vm12 = vnez %v19509_v13  ;;  %vm19516_vm13 = vnez %v19515_v24  ;;  %v19521_v13 = vld [vmem:[#allocation27_spill] sm:$0xff]  ;;  %v19527_v24 = vld [vmem:[#allocation30_spill] sm:$0xff] }
 0x26e   :  { %v16380_v40 = vpop.f32.mrf.mxu0  ;;  %13172 = vmatmul.mubr.msk.f32.gmra.mxu1 %vm791_vm2, %v5175_v30  ;;  %13469 = vmatmul.mubr.msk.f32.gmra.mxu0 %vm791_vm2, %v7617_v58  ;;  %v5114_v58 = vld [vmem:[#allocation2 + $0x59] sm:$0xff]  ;;  %vm19522_vm14 = vnez %v19521_v13  ;;  %vm19528_vm15 = vnez %v19527_v24  ;;  %v19533_v13 = vld [vmem:[#allocation32_spill] sm:$0xff] }
 0x26f   :  { %19491 = vst [vmem:[#allocation10_spill] sm:$0xff] %v16380_v40  ;;  %13174 = vmatprep.mubr.msk.f32.mxu1 %vm791_vm2, %v5112_v3  ;;  %13471 = vmatprep.mubr.msk.f32.mxu0 %vm791_vm2, %v5112_v3  ;;  %v16386_v26 = vpop.f32.mrf.mxu1  ;;  %v7619_v40 = vsel %vm19490_vm7, %v5113_v16, 0.0  ;;  %v5115_v3 = vld [vmem:[#allocation2 + $0x61] sm:$0xff]  ;;  %vm19534_vm1 = vnez %v19533_v13 }
 0x270   :  { %v16388_v48 = vpop.f32.mrf.mxu0  ;;  %v5179_v16 = vsel %vm19498_vm10, %v5115_v3, 0.0  ;;  %v19539_v24 = vld [vmem:[#allocation36_spill] sm:$0xff]  ;;  %v19545_v13 = vld [vmem:[#allocation39_spill] sm:$0xff] }
 0x271   :  { %19492 = vst [vmem:[#allocation191_spill] sm:$0xff] %v16388_v48  ;;  %v16394_v11 = vpop.f32.mrf.mxu1  ;;  %vm19540_vm0 = vnez %v19539_v24  ;;  %vm19546_vm4 = vnez %v19545_v13  ;;  %v19551_v24 = vld [vmem:[#allocation41_spill] sm:$0xff] }
 0x272   :  { %v16396_v30 = vpop.f32.mrf.mxu0  ;;  %13175 = vmatmul.mubr.msk.f32.gmra.mxu1 %vm791_vm2, %v5177_v44  ;;  %13472 = vmatmul.mubr.msk.f32.gmra.mxu0 %vm791_vm2, %v7619_v40  ;;  %v5116_v40 = vld [vmem:[#allocation2 + $0x69] sm:$0xff]  ;;  %vm19552_vm6 = vnez %v19551_v24 }
 0x273   :  { %19495 = vst [vmem:[#allocation13_spill] sm:$0xff] %v16396_v30  ;;  %13177 = vmatprep.mubr.msk.f32.mxu1 %vm791_vm2, %v5114_v58  ;;  %13474 = vmatprep.mubr.msk.f32.mxu0 %vm791_vm2, %v5114_v58  ;;  %v16402_v48 = vpop.f32.mrf.mxu1  ;;  %v7621_v30 = vsel %vm19494_vm9, %v5115_v3, 0.0  ;;  %v5117_v58 = vld [vmem:[#allocation2 + $0x71] sm:$0xff] }
 0x274   :  { %v16404_v55 = vpop.f32.mrf.mxu0  ;;  %v5181_v3 = vsel %vm19504_vm11, %v5117_v58, 0.0 }
 0x275   :  { %19496 = vst [vmem:[#allocation192_spill] sm:$0xff] %v16404_v55  ;;  %v16410_v15 = vpop.f32.mrf.mxu1 }
 0x276   :  { %19499 = vst [vmem:[#allocation14_spill] sm:$0xff] %v16410_v15  ;;  %v16412_v44 = vpop.f32.mrf.mxu0  ;;  %13178 = vmatmul.mubr.msk.f32.gmra.mxu1 %vm791_vm2, %v5179_v16  ;;  %13475 = vmatmul.mubr.msk.f32.gmra.mxu0 %vm791_vm2, %v7621_v30  ;;  %v5118_v30 = vld [vmem:[#allocation2 + $0x79] sm:$0xff] }
 0x277   :  { %19500 = vst [vmem:[#allocation193_spill] sm:$0xff] %v16412_v44  ;;  %13180 = vmatprep.mubr.msk.f32.mxu1 %vm791_vm2, %v5116_v40  ;;  %13477 = vmatprep.mubr.msk.f32.mxu0 %vm791_vm2, %v5116_v40  ;;  %v16418_v55 = vpop.f32.mrf.mxu1  ;;  %v7623_v44 = vsel %vm19498_vm10, %v5117_v58, 0.0  ;;  %v5119_v40 = vld [vmem:[#allocation2 + $0x81] sm:$0xff] }
 0x278   :  { %19501 = vst [vmem:[#allocation194_spill] sm:$0xff] %v16418_v55  ;;  %v16420_v21 = vpop.f32.mrf.mxu0  ;;  %v5183_v58 = vsel %vm19510_vm12, %v5119_v40, 0.0  ;;  %v19565_v55 = vld [vmem:[#allocation89_spill] sm:$0xff] }
 0x279   :  { %19502 = vst [vmem:[#allocation195_spill] sm:$0xff] %v16420_v21  ;;  %v16426_v36 = vpop.f32.mrf.mxu1 }
 0x27a   :  { %19505 = vst [vmem:[#allocation18_spill] sm:$0xff] %v16426_v36  ;;  %v16428_v16 = vpop.f32.mrf.mxu0  ;;  %13181 = vmatmul.mubr.msk.f32.gmra.mxu1 %vm791_vm2, %v5181_v3  ;;  %13478 = vmatmul.mubr.msk.f32.gmra.mxu0 %vm791_vm2, %v7623_v44  ;;  %v5120_v44 = vld [vmem:[#allocation2 + $0x89] sm:$0xff] }
 0x27b   :  { %19506 = vst [vmem:[#allocation196_spill] sm:$0xff] %v16428_v16  ;;  %13183 = vmatprep.mubr.msk.f32.mxu1 %vm791_vm2, %v5118_v30  ;;  %13480 = vmatprep.mubr.msk.f32.mxu0 %vm791_vm2, %v5118_v30  ;;  %v16434_v21 = vpop.f32.mrf.mxu1  ;;  %v7625_v16 = vsel %vm19504_vm11, %v5119_v40, 0.0  ;;  %v5121_v30 = vld [vmem:[#allocation2 + $0x91] sm:$0xff] }
 0x27c   :  { %19507 = vst [vmem:[#allocation197_spill] sm:$0xff] %v16434_v21  ;;  %v16436_v39 = vpop.f32.mrf.mxu0  ;;  %v5185_v40 = vsel %vm19516_vm13, %v5121_v30, 0.0 }
 0x27d   :  { %19508 = vst [vmem:[#allocation198_spill] sm:$0xff] %v16436_v39  ;;  %v16442_v1 = vpop.f32.mrf.mxu1 }
 0x27e   :  { %19511 = vst [vmem:[#allocation21_spill] sm:$0xff] %v16442_v1  ;;  %v16444_v3 = vpop.f32.mrf.mxu0  ;;  %13184 = vmatmul.mubr.msk.f32.gmra.mxu1 %vm791_vm2, %v5183_v58  ;;  %13481 = vmatmul.mubr.msk.f32.gmra.mxu0 %vm791_vm2, %v7625_v16  ;;  %v5122_v16 = vld [vmem:[#allocation2 + $0x99] sm:$0xff] }
 0x27f   :  { %19512 = vst [vmem:[#allocation199_spill] sm:$0xff] %v16444_v3  ;;  %13186 = vmatprep.mubr.msk.f32.mxu1 %vm791_vm2, %v5120_v44  ;;  %13483 = vmatprep.mubr.msk.f32.mxu0 %vm791_vm2, %v5120_v44  ;;  %v16450_v39 = vpop.f32.mrf.mxu1  ;;  %v7627_v3 = vsel %vm19510_vm12, %v5121_v30, 0.0  ;;  %v5123_v44 = vld [vmem:[#allocation2 + $0xa1] sm:$0xff] }
 0x280   :  { %19513 = vst [vmem:[#allocation200_spill] sm:$0xff] %v16450_v39  ;;  %v16452_v21 = vpop.f32.mrf.mxu0  ;;  %v5187_v30 = vsel %vm19522_vm14, %v5123_v44, 0.0 }
 0x281   :  { %19514 = vst [vmem:[#allocation201_spill] sm:$0xff] %v16452_v21  ;;  %v16458_v1 = vpop.f32.mrf.mxu1 }
 0x282   :  { %19517 = vst [vmem:[#allocation23_spill] sm:$0xff] %v16458_v1  ;;  %v16460_v58 = vpop.f32.mrf.mxu0  ;;  %13187 = vmatmul.mubr.msk.f32.gmra.mxu1 %vm791_vm2, %v5185_v40  ;;  %13484 = vmatmul.mubr.msk.f32.gmra.mxu0 %vm791_vm2, %v7627_v3  ;;  %v5124_v3 = vld [vmem:[#allocation2 + $0xa9] sm:$0xff] }
 0x283   :  { %19518 = vst [vmem:[#allocation202_spill] sm:$0xff] %v16460_v58  ;;  %13189 = vmatprep.mubr.msk.f32.mxu1 %vm791_vm2, %v5122_v16  ;;  %13486 = vmatprep.mubr.msk.f32.mxu0 %vm791_vm2, %v5122_v16  ;;  %v16466_v21 = vpop.f32.mrf.mxu1  ;;  %v7629_v58 = vsel %vm19516_vm13, %v5123_v44, 0.0  ;;  %v5125_v16 = vld [vmem:[#allocation2 + $0xb1] sm:$0xff] }
 0x284   :  { %19519 = vst [vmem:[#allocation203_spill] sm:$0xff] %v16466_v21  ;;  %v16468_v39 = vpop.f32.mrf.mxu0  ;;  %v5189_v44 = vsel %vm19528_vm15, %v5125_v16, 0.0 }
 0x285   :  { %19520 = vst [vmem:[#allocation204_spill] sm:$0xff] %v16468_v39  ;;  %v16474_v1 = vpop.f32.mrf.mxu1 }
 0x286   :  { %19523 = vst [vmem:[#allocation27_spill] sm:$0xff] %v16474_v1  ;;  %v16476_v40 = vpop.f32.mrf.mxu0  ;;  %13190 = vmatmul.mubr.msk.f32.gmra.mxu1 %vm791_vm2, %v5187_v30  ;;  %13487 = vmatmul.mubr.msk.f32.gmra.mxu0 %vm791_vm2, %v7629_v58  ;;  %v5126_v58 = vld [vmem:[#allocation2 + $0xb9] sm:$0xff] }
 0x287   :  { %19524 = vst [vmem:[#allocation205_spill] sm:$0xff] %v16476_v40  ;;  %13192 = vmatprep.mubr.msk.f32.mxu1 %vm791_vm2, %v5124_v3  ;;  %13489 = vmatprep.mubr.msk.f32.mxu0 %vm791_vm2, %v5124_v3  ;;  %v16482_v39 = vpop.f32.mrf.mxu1  ;;  %v7631_v40 = vsel %vm19522_vm14, %v5125_v16, 0.0  ;;  %v5127_v3 = vld [vmem:[#allocation2 + $0xc1] sm:$0xff] }
 0x288   :  { %19525 = vst [vmem:[#allocation206_spill] sm:$0xff] %v16482_v39  ;;  %v16484_v21 = vpop.f32.mrf.mxu0  ;;  %v5191_v16 = vsel %vm19534_vm1, %v5127_v3, 0.0 }
 0x289   :  { %19526 = vst [vmem:[#allocation207_spill] sm:$0xff] %v16484_v21  ;;  %v16490_v1 = vpop.f32.mrf.mxu1 }
 0x28a   :  { %19529 = vst [vmem:[#allocation30_spill] sm:$0xff] %v16490_v1  ;;  %v16492_v30 = vpop.f32.mrf.mxu0  ;;  %13193 = vmatmul.mubr.msk.f32.gmra.mxu1 %vm791_vm2, %v5189_v44  ;;  %13490 = vmatmul.mubr.msk.f32.gmra.mxu0 %vm791_vm2, %v7631_v40  ;;  %v5128_v40 = vld [vmem:[#allocation2 + $0xc9] sm:$0xff] }
 0x28b   :  { %19530 = vst [vmem:[#allocation208_spill] sm:$0xff] %v16492_v30  ;;  %13195 = vmatprep.mubr.msk.f32.mxu1 %vm791_vm2, %v5126_v58  ;;  %13492 = vmatprep.mubr.msk.f32.mxu0 %vm791_vm2, %v5126_v58  ;;  %v16498_v21 = vpop.f32.mrf.mxu1  ;;  %v7633_v30 = vsel %vm19528_vm15, %v5127_v3, 0.0  ;;  %v5129_v58 = vld [vmem:[#allocation2 + $0xd1] sm:$0xff] }
 0x28c   :  { %19531 = vst [vmem:[#allocation209_spill] sm:$0xff] %v16498_v21  ;;  %v16500_v39 = vpop.f32.mrf.mxu0  ;;  %v5193_v3 = vsel %vm19540_vm0, %v5129_v58, 0.0 }
 0x28d   :  { %19532 = vst [vmem:[#allocation210_spill] sm:$0xff] %v16500_v39  ;;  %v16506_v1 = vpop.f32.mrf.mxu1 }
 0x28e   :  { %19535 = vst [vmem:[#allocation32_spill] sm:$0xff] %v16506_v1  ;;  %v16508_v44 = vpop.f32.mrf.mxu0  ;;  %13196 = vmatmul.mubr.msk.f32.gmra.mxu1 %vm791_vm2, %v5191_v16  ;;  %13493 = vmatmul.mubr.msk.f32.gmra.mxu0 %vm791_vm2, %v7633_v30  ;;  %v5130_v30 = vld [vmem:[#allocation2 + $0xd9] sm:$0xff] }
 0x28f   :  { %19536 = vst [vmem:[#allocation211_spill] sm:$0xff] %v16508_v44  ;;  %13198 = vmatprep.mubr.msk.f32.mxu1 %vm791_vm2, %v5128_v40  ;;  %13495 = vmatprep.mubr.msk.f32.mxu0 %vm791_vm2, %v5128_v40  ;;  %v16514_v39 = vpop.f32.mrf.mxu1  ;;  %v7635_v44 = vsel %vm19534_vm1, %v5129_v58, 0.0  ;;  %v5131_v40 = vld [vmem:[#allocation2 + $0xe1] sm:$0xff] }
 0x290   :  { %19537 = vst [vmem:[#allocation212_spill] sm:$0xff] %v16514_v39  ;;  %v16516_v21 = vpop.f32.mrf.mxu0  ;;  %v5195_v58 = vsel %vm19546_vm4, %v5131_v40, 0.0 }
 0x291   :  { %19538 = vst [vmem:[#allocation213_spill] sm:$0xff] %v16516_v21  ;;  %v16522_v1 = vpop.f32.mrf.mxu1 }
 0x292   :  { %19541 = vst [vmem:[#allocation36_spill] sm:$0xff] %v16522_v1  ;;  %v16524_v16 = vpop.f32.mrf.mxu0  ;;  %13199 = vmatmul.mubr.msk.f32.gmra.mxu1 %vm791_vm2, %v5193_v3  ;;  %13496 = vmatmul.mubr.msk.f32.gmra.mxu0 %vm791_vm2, %v7635_v44  ;;  %v5132_v44 = vld [vmem:[#allocation2 + $0xe9] sm:$0xff] }
 0x293   :  { %19542 = vst [vmem:[#allocation214_spill] sm:$0xff] %v16524_v16  ;;  %13201 = vmatprep.mubr.msk.f32.mxu1 %vm791_vm2, %v5130_v30  ;;  %13498 = vmatprep.mubr.msk.f32.mxu0 %vm791_vm2, %v5130_v30  ;;  %v16530_v21 = vpop.f32.mrf.mxu1  ;;  %v7637_v16 = vsel %vm19540_vm0, %v5131_v40, 0.0  ;;  %v5133_v30 = vld [vmem:[#allocation2 + $0xf1] sm:$0xff] }
 0x294   :  { %19543 = vst [vmem:[#allocation215_spill] sm:$0xff] %v16530_v21  ;;  %v16532_v39 = vpop.f32.mrf.mxu0  ;;  %v5197_v40 = vsel %vm19552_vm6, %v5133_v30, 0.0 }
 0x295   :  { %19544 = vst [vmem:[#allocation216_spill] sm:$0xff] %v16532_v39  ;;  %v16538_v1 = vpop.f32.mrf.mxu1 }
 0x296   :  { %19547 = vst [vmem:[#allocation39_spill] sm:$0xff] %v16538_v1  ;;  %v16540_v3 = vpop.f32.mrf.mxu0  ;;  %13202 = vmatmul.mubr.msk.f32.gmra.mxu1 %vm791_vm2, %v5195_v58  ;;  %13499 = vmatmul.mubr.msk.f32.gmra.mxu0 %vm791_vm2, %v7637_v16  ;;  %v5134_v16 = vld [vmem:[#allocation2 + $0xf9] sm:$0xff] }
 0x297   :  { %19548 = vst [vmem:[#allocation217_spill] sm:$0xff] %v16540_v3  ;;  %13204 = vmatprep.mubr.msk.f32.mxu1 %vm791_vm2, %v5132_v44  ;;  %13501 = vmatprep.mubr.msk.f32.mxu0 %vm791_vm2, %v5132_v44  ;;  %v16546_v39 = vpop.f32.mrf.mxu1  ;;  %v7639_v3 = vsel %vm19546_vm4, %v5133_v30, 0.0  ;;  %v5135_v44 = vld [vmem:[#allocation2 + $0x101] sm:$0xff] }
 0x298   :  { %19549 = vst [vmem:[#allocation218_spill] sm:$0xff] %v16546_v39  ;;  %v16548_v21 = vpop.f32.mrf.mxu0  ;;  %v896_v39 = vadd.s32 264, %v14223_v22  ;;  %v19557_v30 = vld [vmem:[#allocation44_spill] sm:$0xff]  ;;  %v7515_v22 = vld [vmem:[#allocation2 + $0x111] sm:$0xff] }
 0x299   :  { %19550 = vst [vmem:[#allocation219_spill] sm:$0xff] %v16548_v21  ;;  %v16554_v1 = vpop.f32.mrf.mxu1  ;;  %vm19558_vm5 = vnez %v19557_v30  ;;  %v19573_v30 = vld [vmem:[#allocation92_spill] sm:$0xff] }
 0x29a   :  { %19553 = vst [vmem:[#allocation41_spill] sm:$0xff] %v16554_v1  ;;  %v16556_v58 = vpop.f32.mrf.mxu0  ;;  %13205 = vmatmul.mubr.msk.f32.gmra.mxu1 %vm791_vm2, %v5197_v40  ;;  %13502 = vmatmul.mubr.msk.f32.gmra.mxu0 %vm791_vm2, %v7639_v3  ;;  %v5199_v1 = vsel %vm19558_vm5, %v5135_v44, 0.0  ;;  %v7641_v40 = vsel %vm19552_vm6, %v5135_v44, 0.0  ;;  %v19563_v44 = vld [vmem:[#allocation47_spill] sm:$0xff] }
 0x29b   :  { %19554 = vst [vmem:[#allocation220_spill] sm:$0xff] %v16556_v58  ;;  %13207 = vmatprep.mubr.msk.f32.mxu1 %vm791_vm2, %v5134_v16  ;;  %13504 = vmatprep.mubr.msk.f32.mxu0 %vm791_vm2, %v5134_v16  ;;  %v16563_v21 = vpop.f32.mrf.mxu1  ;;  %v5137_v58 = vld [vmem:[#allocation2 + $0x111] sm:$0xff]  ;;  %v5136_v16 = vld [vmem:[#allocation2 + $0x109] sm:$0xff]  ;;  %vm19564_vm3 = vnez %v19563_v44  ;;  %v19570_v44 = vld [vmem:[#allocation91_spill] sm:$0xff] }
 0x29c   :  { %19555 = vst [vmem:[#allocation221_spill] sm:$0xff] %v16563_v21  ;;  %v16565_v13 = vpop.f32.mrf.mxu0  ;;  %v1024_v21 = vand.u32 15, %v896_v39 }
 0x29d   :  { %19556 = vst [vmem:[#allocation222_spill] sm:$0xff] %v16565_v13  ;;  %v16571_v3 = vpop.f32.mrf.mxu1 }
 0x29e   :  { %19559 = vst [vmem:[#allocation44_spill] sm:$0xff] %v16571_v3  ;;  %v16573_v36 = vpop.f32.mrf.mxu0  ;;  %13208 = vmatmul.mubr.msk.f32.gmra.mxu1 %vm791_vm2, %v5199_v1  ;;  %13505 = vmatmul.mubr.msk.f32.gmra.mxu0 %vm791_vm2, %v7641_v40  ;;  %v5201_v3 = vsel %vm19564_vm3, %v5137_v58, 0.0  ;;  %v7643_v1 = vsel %vm19558_vm5, %v7515_v22, 0.0  ;;  %vm16595_vm8 = vcmp.lt.s32.totalorder %v1024_v21, 15  ;;  %v5139_v58 = vld [vmem:[#allocation2 + $0x121] sm:$0xff] }
 0x29f   :  { %19560 = vst [vmem:[#allocation223_spill] sm:$0xff] %v16573_v36  ;;  %13210 = vmatprep.mubr.msk.f32.mxu1 %vm791_vm2, %v5136_v16  ;;  %13507 = vmatprep.mubr.msk.f32.mxu0 %vm791_vm2, %v5136_v16  ;;  %v16579_v13 = vpop.f32.mrf.mxu1  ;;  %v2477_v36 = vadd.f32 %v15994_v51, %v19565_v55  ;;  %v5138_v16 = vld [vmem:[#allocation2 + $0x119] sm:$0xff]  ;;  %v2472_v55 = vadd.f32 %v16009_v34, %v19570_v44  ;;  %v5140_v34 = vld [vmem:[#allocation2 + $0x129] sm:$0xff] }
 0x2a0   :  { %19561 = vst [vmem:[#allocation224_spill] sm:$0xff] %v16579_v13  ;;  %v16581_v24 = vpop.f32.mrf.mxu0 }
 0x2a1   :  { %19562 = vst [vmem:[#allocation225_spill] sm:$0xff] %v16581_v24  ;;  %v16589_v40 = vpop.f32.mrf.mxu1 }
 0x2a2   :  { %19566 = vst [vmem:[#allocation47_spill] sm:$0xff] %v16589_v40  ;;  %v16591_v39 = vpop.f32.mrf.mxu0  ;;  %13211 = vmatmul.mubr.msk.f32.gmra.mxu1 %vm791_vm2, %v5201_v3  ;;  %13508 = vmatmul.mubr.msk.f32.gmra.mxu0 %vm791_vm2, %v7643_v1  ;;  %v2487_v3 = vadd.f32 %v16013_v19, %v19573_v30  ;;  %v19574_v1 = vld [vmem:[#allocation90_spill] sm:$0xff] }
 0x2a3   :  { %19567 = vst [vmem:[#allocation89_spill] sm:$0xff] %v16591_v39  ;;  %13213 = vmatprep.mubr.msk.f32.mxu1 %vm791_vm2, %v5138_v16  ;;  %13510 = vmatprep.mubr.f32.mxu0 %v19169_v60  ;;  %v16603_v22 = vpop.f32.mrf.mxu1  ;;  %v3563_v21 = vadd.f32 %v19574_v1, %v2477_v36  ;;  %v5203_v39 = vsel %vm16595_vm8, %v5139_v58, 0.0  ;;  %v5141_v40 = vld [vmem:[#allocation2 + $0x131] sm:$0xff]  ;;  %v19580_v1 = vld [vmem:[#allocation48_spill] sm:$0xff] }
 0x2a4   :  { %19571 = vst [vmem:[#allocation91_spill] sm:$0xff] %v16603_v22  ;;  %v16605_v51 = vpop.f32.mrf.mxu0  ;;  %v19576_v16 = vld [vmem:[#allocation94_spill] sm:$0xff]  ;;  %v19578_v36 = vld [vmem:[#allocation93_spill] sm:$0xff]  ;;  %vm19581_vm7 = vnez %v19580_v1 }
 0x2a5   :  { %19572 = vst [vmem:[#allocation226_spill] sm:$0xff] %v16605_v51  ;;  %v12967_v13 = vpop.f32.mrf.mxu1  ;;  %v2482_v44 = vadd.f32 %v16031_v59, %v19576_v16  ;;  %v3562_v19 = vadd.f32 %v19578_v36, %v2472_v55  ;;  %v19583_v59 = vld [vmem:[#allocation96_spill] sm:$0xff]  ;;  %v5142_v36 = vld [vmem:[#allocation2 + $0x139] sm:$0xff] }
 0x2a6   :  { %v16612_v23 = vpop.f32.mrf.mxu0  ;;  %13214 = vmatmul.mubr.msk.f32.gmra.mxu1 %vm791_vm2, %v5203_v39  ;;  %13511 = vmatmul.mubr.f32.gmra.mxu0 %v19169_v60  ;;  %v16618_v51 = vadd.f32 %v12967_v13, %v3563_v21  ;;  %v5205_v39 = vsel %vm19581_vm7, %v5141_v40, 0.0  ;;  %v3565_v13 = vadd.f32 %v19583_v59, %v2487_v3  ;;  %v7647_v21 = vsel %vm16595_vm8, %v5141_v40, 0.0  ;;  %v5143_v16 = vld [vmem:[#allocation2 + $0x141] sm:$0xff] }
 0x2a7   :  { %19575 = vst [vmem:[#allocation92_spill] sm:$0xff] %v16612_v23  ;;  %13216 = vmatprep.mubr.msk.f32.mxu1 %vm791_vm2, %v5140_v34  ;;  %13513 = vmatprep.mubr.msk.f32.mxu0 %vm791_vm2, %v5140_v34  ;;  %v4015_v58 = vpop.f32.mrf.mxu1  ;;  %v19582_v23 = vld [vmem:[#allocation95_spill] sm:$0xff] }
 0x2a8   :  { %19577 = vst [vmem:[#allocation90_spill] sm:$0xff] %v16618_v51  ;;  %v16623_v30 = vpop.f32.mrf.mxu0  ;;  %v2497_v22 = vadd.f32 %v16035_v53, %v19582_v23  ;;  %v16629_v15 = vadd.f32 %v4015_v58, %v3562_v19  ;;  %v19586_v53 = vld [vmem:[#allocation98_spill] sm:$0xff]  ;;  %v19588_v19 = vld [vmem:[#allocation49_spill] sm:$0xff] }
 0x2a9   :  { %19579 = vst [vmem:[#allocation94_spill] sm:$0xff] %v16623_v30  ;;  %v12970_v34 = vpop.f32.mrf.mxu1  ;;  %v19585_v30 = vld [vmem:[#allocation97_spill] sm:$0xff]  ;;  %v3564_v24 = vadd.f32 %v19586_v53, %v2482_v44  ;;  %vm19589_vm9 = vnez %v19588_v19  ;;  %v19602_v19 = vld [vmem:[#allocation106_spill] sm:$0xff] }
 0x2aa   :  { %13217 = vmatmul.mubr.msk.f32.gmra.mxu1 %vm791_vm2, %v5205_v39  ;;  %v16635_v55 = vpop.f32.mrf.mxu0  ;;  %13514 = vmatmul.mubr.msk.f32.gmra.mxu0 %vm791_vm2, %v7647_v21  ;;  %v2492_v51 = vadd.f32 %v16053_v63, %v19585_v30  ;;  %v16640_v23 = vadd.f32 %v12970_v34, %v3565_v13  ;;  %v5207_v58 = vsel %vm19589_vm9, %v5143_v16, 0.0  ;;  %v19590_v39 = vld [vmem:[#allocation99_spill] sm:$0xff]  ;;  %v19591_v63 = vld [vmem:[#allocation100_spill] sm:$0xff]  ;;  %v7649_v13 = vsel %vm19581_vm7, %v5143_v16, 0.0  ;;  %v5145_v34 = vld [vmem:[#allocation2 + $0x151] sm:$0xff] }
 0x2ab   :  { %19584 = vst [vmem:[#allocation93_spill] sm:$0xff] %v16635_v55  ;;  %13219 = vmatprep.mubr.msk.f32.mxu1 %vm791_vm2, %v5142_v36  ;;  %13516 = vmatprep.mubr.msk.f32.mxu0 %vm791_vm2, %v5142_v36  ;;  %v4025_v40 = vpop.f32.mrf.mxu1  ;;  %v2507_v59 = vadd.f32 %v16057_v45, %v19590_v39  ;;  %v3567_v30 = vadd.f32 %v19591_v63, %v2497_v22  ;;  %v5144_v53 = vld [vmem:[#allocation2 + $0x149] sm:$0xff]  ;;  %v19594_v22 = vld [vmem:[#allocation102_spill] sm:$0xff]  ;;  %v19598_v39 = vld [vmem:[#allocation103_spill] sm:$0xff]  ;;  %vm8722_vm7 = vcmask 64512  }
 0x2ac   :  { %v16645_v3 = vpop.f32.mrf.mxu0  ;;  %v16651_v21 = vadd.f32 %v4025_v40, %v3564_v24  ;;  %v3566_v1 = vadd.f32 %v19594_v22, %v2492_v51  ;;  %v19596_v40 = vld [vmem:[#allocation50_spill] sm:$0xff]  ;;  %v2517_v63 = vadd.f32 %v16079_v49, %v19598_v39  ;;  %v19606_v39 = vld [vmem:[#allocation107_spill] sm:$0xff] }
 0x2ad   :  { %19587 = vst [vmem:[#allocation48_spill] sm:$0xff] %v16645_v3  ;;  %v12973_v36 = vpop.f32.mrf.mxu1  ;;  %v19593_v3 = vld [vmem:[#allocation101_spill] sm:$0xff]  ;;  %vm19597_vm10 = vnez %v19596_v40  ;;  %v5146_v22 = vld [vmem:[#allocation2 + $0x159] sm:$0xff] }
 0x2ae   :  { %13220 = vmatmul.mubr.msk.f32.gmra.mxu1 %vm791_vm2, %v5207_v58  ;;  %v16657_v44 = vpop.f32.mrf.mxu0  ;;  %13517 = vmatmul.mubr.msk.f32.gmra.mxu0 %vm791_vm2, %v7649_v13  ;;  %v2502_v55 = vadd.f32 %v16075_v46, %v19593_v3  ;;  %v16662_v45 = vadd.f32 %v12973_v36, %v3567_v30  ;;  %v5209_v58 = vsel %vm19597_vm10, %v5145_v34, 0.0  ;;  %v19599_v46 = vld [vmem:[#allocation104_spill] sm:$0xff]  ;;  %v7651_v30 = vsel %vm19589_vm9, %v5145_v34, 0.0  ;;  %v19610_v40 = vld [vmem:[#allocation110_spill] sm:$0xff] }
 0x2af   :  { %19592 = vst [vmem:[#allocation95_spill] sm:$0xff] %v16657_v44  ;;  %13222 = vmatprep.mubr.msk.f32.mxu1 %vm791_vm2, %v5144_v53  ;;  %13519 = vmatprep.mubr.msk.f32.mxu0 %vm791_vm2, %v5144_v53  ;;  %v4035_v16 = vpop.f32.mrf.mxu1  ;;  %v3569_v3 = vadd.f32 %v19599_v46, %v2507_v59  ;;  %v5147_v36 = vld [vmem:[#allocation2 + $0x161] sm:$0xff]  ;;  %v2527_v46 = vadd.f32 %v16101_v17, %v19606_v39  ;;  %vm13803_vm9 = vmmov 0  }
 0x2b0   :  { %v16667_v24 = vpop.f32.mrf.mxu0  ;;  %v16673_v13 = vadd.f32 %v4035_v16, %v3566_v1  ;;  %v3568_v59 = vadd.f32 %v19602_v19, %v2502_v55  ;;  %v19604_v16 = vld [vmem:[#allocation51_spill] sm:$0xff]  ;;  %v5148_v19 = vld [vmem:[#allocation2 + $0x169] sm:$0xff] }
 0x2b1   :  { %19595 = vst [vmem:[#allocation96_spill] sm:$0xff] %v16667_v24  ;;  %v12976_v53 = vpop.f32.mrf.mxu1  ;;  %v19601_v24 = vld [vmem:[#allocation105_spill] sm:$0xff]  ;;  %vm19605_vm11 = vnez %v19604_v16  ;;  %v19614_v39 = vld [vmem:[#allocation111_spill] sm:$0xff]  ;;  %v19618_v16 = vld [vmem:[#allocation114_spill] sm:$0xff] }
 0x2b2   :  { %13223 = vmatmul.mubr.msk.f32.gmra.mxu1 %vm791_vm2, %v5209_v58  ;;  %v16679_v51 = vpop.f32.mrf.mxu0  ;;  %13520 = vmatmul.mubr.msk.f32.gmra.mxu0 %vm791_vm2, %v7651_v30  ;;  %v2512_v44 = vadd.f32 %v16097_v31, %v19601_v24  ;;  %v16684_v49 = vadd.f32 %v12976_v53, %v3569_v3  ;;  %v5211_v58 = vsel %vm19605_vm11, %v5147_v36, 0.0  ;;  %v19607_v31 = vld [vmem:[#allocation108_spill] sm:$0xff]  ;;  %v7653_v3 = vsel %vm19597_vm10, %v5147_v36, 0.0  ;;  %v5149_v53 = vld [vmem:[#allocation2 + $0x171] sm:$0xff] }
 0x2b3   :  { %19600 = vst [vmem:[#allocation97_spill] sm:$0xff] %v16679_v51  ;;  %13225 = vmatprep.mubr.msk.f32.mxu1 %vm791_vm2, %v5146_v22  ;;  %13522 = vmatprep.mubr.msk.f32.mxu0 %vm791_vm2, %v5146_v22  ;;  %v4045_v34 = vpop.f32.mrf.mxu1  ;;  %v3571_v24 = vadd.f32 %v19607_v31, %v2517_v63  ;;  %v2537_v31 = vadd.f32 %v16123_v10, %v19614_v39  ;;  %v19622_v39 = vld [vmem:[#allocation115_spill] sm:$0xff]  ;;  %vm8631_vm10 = vcmask 261120  }
 0x2b4   :  { %v16689_v1 = vpop.f32.mrf.mxu0  ;;  %v16695_v30 = vadd.f32 %v4045_v34, %v3568_v59  ;;  %v3570_v63 = vadd.f32 %v19610_v40, %v2512_v44  ;;  %v19612_v34 = vld [vmem:[#allocation52_spill] sm:$0xff]  ;;  %v5150_v40 = vld [vmem:[#allocation2 + $0x179] sm:$0xff] }
 0x2b5   :  { %19603 = vst [vmem:[#allocation98_spill] sm:$0xff] %v16689_v1  ;;  %v12979_v22 = vpop.f32.mrf.mxu1  ;;  %v19609_v1 = vld [vmem:[#allocation109_spill] sm:$0xff]  ;;  %vm19613_vm12 = vnez %v19612_v34  ;;  %v19626_v34 = vld [vmem:[#allocation58_spill] sm:$0xff] }
 0x2b6   :  { %13226 = vmatmul.mubr.msk.f32.gmra.mxu1 %vm791_vm2, %v5211_v58  ;;  %v16701_v55 = vpop.f32.mrf.mxu0  ;;  %13523 = vmatmul.mubr.msk.f32.gmra.mxu0 %vm791_vm2, %v7653_v3  ;;  %v2522_v51 = vadd.f32 %v16119_v41, %v19609_v1  ;;  %v16706_v17 = vadd.f32 %v12979_v22, %v3571_v24  ;;  %v5213_v58 = vsel %vm19613_vm12, %v5149_v53, 0.0  ;;  %v19615_v41 = vld [vmem:[#allocation112_spill] sm:$0xff]  ;;  %v7655_v24 = vsel %vm19605_vm11, %v5149_v53, 0.0 }
 0x2b7   :  { %19608 = vst [vmem:[#allocation49_spill] sm:$0xff] %v16701_v55  ;;  %13228 = vmatprep.mubr.msk.f32.mxu1 %vm791_vm2, %v5148_v19  ;;  %13525 = vmatprep.mubr.msk.f32.mxu0 %vm791_vm2, %v5148_v19  ;;  %v4055_v36 = vpop.f32.mrf.mxu1  ;;  %v3573_v1 = vadd.f32 %v19615_v41, %v2527_v46  ;;  %v5151_v22 = vld [vmem:[#allocation2 + $0x181] sm:$0xff]  ;;  %v2547_v41 = vadd.f32 %v16145_v29, %v19622_v39  ;;  %vm8817_vm11 = vcmask 1041408  }
 0x2b8   :  { %v16711_v59 = vpop.f32.mrf.mxu0  ;;  %v16717_v3 = vadd.f32 %v4055_v36, %v3570_v63  ;;  %v3572_v46 = vadd.f32 %v19618_v16, %v2522_v51  ;;  %v19620_v36 = vld [vmem:[#allocation53_spill] sm:$0xff]  ;;  %v19630_v39 = vld [vmem:[#allocation56_spill] sm:$0xff] }
 0x2b9   :  { %19611 = vst [vmem:[#allocation99_spill] sm:$0xff] %v16711_v59  ;;  %v12982_v19 = vpop.f32.mrf.mxu1  ;;  %v19617_v59 = vld [vmem:[#allocation113_spill] sm:$0xff]  ;;  %vm19621_vm13 = vnez %v19620_v36  ;;  %v19634_v36 = vld [vmem:[#allocation60_spill] sm:$0xff] }
 0x2ba   :  { %13229 = vmatmul.mubr.msk.f32.gmra.mxu1 %vm791_vm2, %v5213_v58  ;;  %v16723_v44 = vpop.f32.mrf.mxu0  ;;  %13526 = vmatmul.mubr.msk.f32.gmra.mxu0 %vm791_vm2, %v7655_v24  ;;  %v2532_v55 = vadd.f32 %v16141_v43, %v19617_v59  ;;  %v16728_v10 = vadd.f32 %v12982_v19, %v3573_v1  ;;  %v5215_v58 = vsel %vm19621_vm13, %v5151_v22, 0.0  ;;  %v19623_v43 = vld [vmem:[#allocation116_spill] sm:$0xff]  ;;  %v7657_v1 = vsel %vm19613_vm12, %v5151_v22, 0.0  ;;  %v5153_v19 = vld [vmem:[#allocation2 + $0x191] sm:$0xff] }
 0x2bb   :  { %19616 = vst [vmem:[#allocation100_spill] sm:$0xff] %v16723_v44  ;;  %13231 = vmatprep.mubr.msk.f32.mxu1 %vm791_vm2, %v5150_v40  ;;  %13528 = vmatprep.mubr.msk.f32.mxu0 %vm791_vm2, %v5150_v40  ;;  %v4065_v53 = vpop.f32.mrf.mxu1  ;;  %v3575_v59 = vadd.f32 %v19623_v43, %v2537_v31  ;;  %v5152_v16 = vld [vmem:[#allocation2 + $0x189] sm:$0xff]  ;;  %v2557_v43 = vadd.f32 %v16167_v42, %v19630_v39  ;;  %v19638_v39 = vld [vmem:[#allocation119_spill] sm:$0xff]  ;;  %vm9643_vm12 = vcmask 1045504  }
 0x2bc   :  { %v16733_v63 = vpop.f32.mrf.mxu0  ;;  %v16739_v24 = vadd.f32 %v4065_v53, %v3572_v46  ;;  %v3574_v31 = vadd.f32 %v19626_v34, %v2532_v55  ;;  %v19628_v53 = vld [vmem:[#allocation55_spill] sm:$0xff] }
 0x2bd   :  { %19619 = vst [vmem:[#allocation101_spill] sm:$0xff] %v16733_v63  ;;  %v12985_v40 = vpop.f32.mrf.mxu1  ;;  %v19625_v63 = vld [vmem:[#allocation54_spill] sm:$0xff]  ;;  %vm19629_vm14 = vnez %v19628_v53  ;;  %v19642_v53 = vld [vmem:[#allocation69_spill] sm:$0xff] }
 0x2be   :  { %13232 = vmatmul.mubr.msk.f32.gmra.mxu1 %vm791_vm2, %v5215_v58  ;;  %v16745_v51 = vpop.f32.mrf.mxu0  ;;  %13529 = vmatmul.mubr.msk.f32.gmra.mxu0 %vm791_vm2, %v7657_v1  ;;  %v2542_v44 = vadd.f32 %v16163_v37, %v19625_v63  ;;  %v16750_v29 = vadd.f32 %v12985_v40, %v3575_v59  ;;  %v5217_v58 = vsel %vm19629_vm14, %v5153_v19, 0.0  ;;  %v19631_v37 = vld [vmem:[#allocation117_spill] sm:$0xff]  ;;  %v7659_v59 = vsel %vm19621_vm13, %v5153_v19, 0.0  ;;  %v5155_v40 = vld [vmem:[#allocation2 + $0x1a1] sm:$0xff]  ;;  %v5154_v34 = vld [vmem:[#allocation2 + $0x199] sm:$0xff] }
 0x2bf   :  { %19624 = vst [vmem:[#allocation102_spill] sm:$0xff] %v16745_v51  ;;  %13234 = vmatprep.mubr.msk.f32.mxu1 %vm791_vm2, %v5152_v16  ;;  %13531 = vmatprep.mubr.msk.f32.mxu0 %vm791_vm2, %v5152_v16  ;;  %v4075_v22 = vpop.f32.mrf.mxu1  ;;  %v3577_v63 = vadd.f32 %v19631_v37, %v2547_v41  ;;  %v2567_v37 = vadd.f32 %v16195_v12, %v19638_v39  ;;  %v19646_v39 = vld [vmem:[#allocation121_spill] sm:$0xff]  ;;  %vm20192_vm13 = vcmask 1043456  }
 0x2c0   :  { %v16755_v46 = vpop.f32.mrf.mxu0  ;;  %v16761_v1 = vadd.f32 %v4075_v22, %v3574_v31  ;;  %v3576_v41 = vadd.f32 %v19634_v36, %v2542_v44  ;;  %v19636_v22 = vld [vmem:[#allocation59_spill] sm:$0xff]  ;;  %v5156_v36 = vld [vmem:[#allocation2 + $0x1a9] sm:$0xff] }
 0x2c1   :  { %19627 = vst [vmem:[#allocation50_spill] sm:$0xff] %v16755_v46  ;;  %v12988_v16 = vpop.f32.mrf.mxu1  ;;  %v19633_v46 = vld [vmem:[#allocation57_spill] sm:$0xff]  ;;  %vm19637_vm15 = vnez %v19636_v22 }
 0x2c2   :  { %13235 = vmatmul.mubr.msk.f32.gmra.mxu1 %vm791_vm2, %v5217_v58  ;;  %v16767_v55 = vpop.f32.mrf.mxu0  ;;  %13532 = vmatmul.mubr.msk.f32.gmra.mxu0 %vm791_vm2, %v7659_v59  ;;  %v2552_v51 = vadd.f32 %v16190_v50, %v19633_v46  ;;  %v16772_v42 = vadd.f32 %v12988_v16, %v3577_v63  ;;  %v5219_v58 = vsel %vm19637_vm15, %v5155_v40, 0.0  ;;  %v19639_v50 = vld [vmem:[#allocation120_spill] sm:$0xff]  ;;  %v7661_v63 = vsel %vm19629_vm14, %v5155_v40, 0.0  ;;  %v5157_v16 = vld [vmem:[#allocation2 + $0x1b1] sm:$0xff]  ;;  %vm20193_vm14 = vmmov %vm20192_vm13 }
 0x2c3   :  { %19632 = vst [vmem:[#allocation103_spill] sm:$0xff] %v16767_v55  ;;  %13237 = vmatprep.mubr.msk.f32.mxu1 %vm791_vm2, %v5154_v34  ;;  %13534 = vmatprep.mubr.msk.f32.mxu0 %vm791_vm2, %v5154_v34  ;;  %v4085_v19 = vpop.f32.mrf.mxu1  ;;  %v3579_v46 = vadd.f32 %v19639_v50, %v2557_v43  ;;  %v2577_v50 = vadd.f32 %v16217_v14, %v19646_v39  ;;  %v19651_v22 = vld [vmem:[#allocation73_spill] sm:$0xff]  ;;  %v19655_v39 = vld [vmem:[#allocation70_spill] sm:$0xff] }
 0x2c4   :  { %v16777_v31 = vpop.f32.mrf.mxu0  ;;  %v16783_v59 = vadd.f32 %v4085_v19, %v3576_v41  ;;  %v3578_v43 = vadd.f32 %v19642_v53, %v2552_v51  ;;  %v19644_v19 = vld [vmem:[#allocation64_spill] sm:$0xff]  ;;  %v5158_v53 = vld [vmem:[#allocation2 + $0x1b9] sm:$0xff] }
 0x2c5   :  { %19635 = vst [vmem:[#allocation104_spill] sm:$0xff] %v16777_v31  ;;  %v12991_v34 = vpop.f32.mrf.mxu1  ;;  %v19641_v31 = vld [vmem:[#allocation62_spill] sm:$0xff]  ;;  %vm19645_vm1 = vnez %v19644_v19  ;;  %v19660_v19 = vld [vmem:[#allocation75_spill] sm:$0xff] }
 0x2c6   :  { %13238 = vmatmul.mubr.msk.f32.gmra.mxu1 %vm791_vm2, %v5219_v58  ;;  %v16789_v44 = vpop.f32.mrf.mxu0  ;;  %13535 = vmatmul.mubr.msk.f32.gmra.mxu0 %vm791_vm2, %v7661_v63  ;;  %v2562_v55 = vadd.f32 %v16213_v7, %v19641_v31  ;;  %v16794_v12 = vadd.f32 %v12991_v34, %v3579_v46  ;;  %v5221_v58 = vsel %vm19645_vm1, %v5157_v16, 0.0  ;;  %v19648_v7 = vld [vmem:[#allocation122_spill] sm:$0xff]  ;;  %v7663_v46 = vsel %vm19637_vm15, %v5157_v16, 0.0  ;;  %v5159_v34 = vld [vmem:[#allocation2 + $0x1c1] sm:$0xff]  ;;  %vm20194_vm15 = vmmov %vm20192_vm13 }
 0x2c7   :  { %19640 = vst [vmem:[#allocation105_spill] sm:$0xff] %v16789_v44  ;;  %13240 = vmatprep.mubr.msk.f32.mxu1 %vm791_vm2, %v5156_v36  ;;  %13537 = vmatprep.mubr.msk.f32.mxu0 %vm791_vm2, %v5156_v36  ;;  %v4095_v40 = vpop.f32.mrf.mxu1  ;;  %v3581_v31 = vadd.f32 %v19648_v7, %v2567_v37  ;;  %v2587_v7 = vadd.f32 %v16239_v62, %v19655_v39  ;;  %v19664_v39 = vld [vmem:[#allocation124_spill] sm:$0xff] }
 0x2c8   :  { %v16799_v41 = vpop.f32.mrf.mxu0  ;;  %v16805_v63 = vadd.f32 %v4095_v40, %v3578_v43  ;;  %v3580_v37 = vadd.f32 %v19651_v22, %v2562_v55  ;;  %v19653_v40 = vld [vmem:[#allocation68_spill] sm:$0xff] }
 0x2c9   :  { %19643 = vst [vmem:[#allocation106_spill] sm:$0xff] %v16799_v41  ;;  %v12994_v36 = vpop.f32.mrf.mxu1  ;;  %v19650_v41 = vld [vmem:[#allocation67_spill] sm:$0xff]  ;;  %vm19654_vm0 = vnez %v19653_v40  ;;  %v5160_v22 = vld [vmem:[#allocation2 + $0x1c9] sm:$0xff]  ;;  %v19669_v40 = vld [vmem:[#allocation126_spill] sm:$0xff] }
 0x2ca   :  { %19647 = vst [vmem:[#allocation51_spill] sm:$0xff] %v16805_v63  ;;  %13241 = vmatmul.mubr.msk.f32.gmra.mxu1 %vm791_vm2, %v5221_v58  ;;  %v16811_v51 = vpop.f32.mrf.mxu0  ;;  %13538 = vmatmul.mubr.msk.f32.gmra.mxu0 %vm791_vm2, %v7663_v46  ;;  %v2572_v44 = vadd.f32 %v16235_v56, %v19650_v41  ;;  %v16816_v14 = vadd.f32 %v12994_v36, %v3581_v31  ;;  %v5223_v58 = vsel %vm19654_vm0, %v5159_v34, 0.0  ;;  %v19657_v56 = vld [vmem:[#allocation123_spill] sm:$0xff]  ;;  %v7665_v31 = vsel %vm19645_vm1, %v5159_v34, 0.0  ;;  %v5161_v36 = vld [vmem:[#allocation2 + $0x1d1] sm:$0xff]  ;;  %vm20195_vm1 = vmmov %vm20192_vm13 }
 0x2cb   :  { %19649 = vst [vmem:[#allocation107_spill] sm:$0xff] %v16811_v51  ;;  %13243 = vmatprep.mubr.msk.f32.mxu1 %vm791_vm2, %v5158_v53  ;;  %13540 = vmatprep.mubr.msk.f32.mxu0 %vm791_vm2, %v5158_v53  ;;  %v4105_v16 = vpop.f32.mrf.mxu1  ;;  %v3583_v41 = vadd.f32 %v19657_v56, %v2577_v50  ;;  %v2597_v56 = vadd.f32 %v16261_v52, %v19664_v39  ;;  %v19673_v39 = vld [vmem:[#allocation127_spill] sm:$0xff] }
 0x2cc   :  { %v16821_v43 = vpop.f32.mrf.mxu0  ;;  %v16827_v46 = vadd.f32 %v4105_v16, %v3580_v37  ;;  %v3582_v50 = vadd.f32 %v19660_v19, %v2572_v44  ;;  %v19662_v16 = vld [vmem:[#allocation74_spill] sm:$0xff] }
 0x2cd   :  { %19652 = vst [vmem:[#allocation108_spill] sm:$0xff] %v16821_v43  ;;  %v12997_v53 = vpop.f32.mrf.mxu1  ;;  %v19659_v43 = vld [vmem:[#allocation72_spill] sm:$0xff]  ;;  %vm19663_vm4 = vnez %v19662_v16  ;;  %v5162_v19 = vld [vmem:[#allocation2 + $0x1d9] sm:$0xff] }
 0x2ce   :  { %19656 = vst [vmem:[#allocation109_spill] sm:$0xff] %v16827_v46  ;;  %13244 = vmatmul.mubr.msk.f32.gmra.mxu1 %vm791_vm2, %v5223_v58  ;;  %v16833_v55 = vpop.f32.mrf.mxu0  ;;  %13541 = vmatmul.mubr.msk.f32.gmra.mxu0 %vm791_vm2, %v7665_v31  ;;  %v2582_v51 = vadd.f32 %v16257_v54, %v19659_v43  ;;  %v16838_v62 = vadd.f32 %v12997_v53, %v3583_v41  ;;  %v5225_v58 = vsel %vm19663_vm4, %v5161_v36, 0.0  ;;  %v19666_v54 = vld [vmem:[#allocation125_spill] sm:$0xff]  ;;  %v7667_v41 = vsel %vm19654_vm0, %v5161_v36, 0.0  ;;  %v5163_v53 = vld [vmem:[#allocation2 + $0x1e1] sm:$0xff] }
 0x2cf   :  { %19658 = vst [vmem:[#allocation110_spill] sm:$0xff] %v16833_v55  ;;  %13246 = vmatprep.mubr.msk.f32.mxu1 %vm791_vm2, %v5160_v22  ;;  %13543 = vmatprep.mubr.msk.f32.mxu0 %vm791_vm2, %v5160_v22  ;;  %v4115_v34 = vpop.f32.mrf.mxu1  ;;  %v3585_v43 = vadd.f32 %v19666_v54, %v2587_v7  ;;  %v2607_v54 = vadd.f32 %v16283_v27, %v19673_v39  ;;  %v19678_v16 = vld [vmem:[#allocation131_spill] sm:$0xff]  ;;  %v19682_v39 = vld [vmem:[#allocation132_spill] sm:$0xff]  ;;  %vm11097_vm0 = vcmask 123904  }
 0x2d0   :  { %v16843_v37 = vpop.f32.mrf.mxu0  ;;  %v16849_v31 = vadd.f32 %v4115_v34, %v3582_v50  ;;  %v3584_v7 = vadd.f32 %v19669_v40, %v2582_v51  ;;  %v19671_v34 = vld [vmem:[#allocation78_spill] sm:$0xff]  ;;  %v5164_v40 = vld [vmem:[#allocation2 + $0x1e9] sm:$0xff] }
 0x2d1   :  { %19661 = vst [vmem:[#allocation52_spill] sm:$0xff] %v16843_v37  ;;  %v13000_v22 = vpop.f32.mrf.mxu1  ;;  %v19668_v37 = vld [vmem:[#allocation77_spill] sm:$0xff]  ;;  %vm19672_vm6 = vnez %v19671_v34  ;;  %v19687_v34 = vld [vmem:[#allocation134_spill] sm:$0xff] }
 0x2d2   :  { %19665 = vst [vmem:[#allocation111_spill] sm:$0xff] %v16849_v31  ;;  %13247 = vmatmul.mubr.msk.f32.gmra.mxu1 %vm791_vm2, %v5225_v58  ;;  %v16855_v44 = vpop.f32.mrf.mxu0  ;;  %13544 = vmatmul.mubr.msk.f32.gmra.mxu0 %vm791_vm2, %v7667_v41  ;;  %v2592_v55 = vadd.f32 %v16279_v6, %v19668_v37  ;;  %v16860_v52 = vadd.f32 %v13000_v22, %v3585_v43  ;;  %v5227_v58 = vsel %vm19672_vm6, %v5163_v53, 0.0  ;;  %v19675_v6 = vld [vmem:[#allocation128_spill] sm:$0xff]  ;;  %v7669_v43 = vsel %vm19663_vm4, %v5163_v53, 0.0  ;;  %v5165_v22 = vld [vmem:[#allocation2 + $0x1f1] sm:$0xff] }
 0x2d3   :  { %19667 = vst [vmem:[#allocation112_spill] sm:$0xff] %v16855_v44  ;;  %13249 = vmatprep.mubr.msk.f32.mxu1 %vm791_vm2, %v5162_v19  ;;  %13546 = vmatprep.mubr.msk.f32.mxu0 %vm791_vm2, %v5162_v19  ;;  %v4125_v36 = vpop.f32.mrf.mxu1  ;;  %v3587_v37 = vadd.f32 %v19675_v6, %v2597_v56  ;;  %v2617_v6 = vadd.f32 %v16306_v28, %v19682_v39  ;;  %v19691_v39 = vld [vmem:[#allocation136_spill] sm:$0xff] }
 0x2d4   :  { %v16865_v50 = vpop.f32.mrf.mxu0  ;;  %v16871_v41 = vadd.f32 %v4125_v36, %v3584_v7  ;;  %v3586_v56 = vadd.f32 %v19678_v16, %v2592_v55  ;;  %v19680_v36 = vld [vmem:[#allocation80_spill] sm:$0xff]  ;;  %v5166_v16 = vld [vmem:[#allocation2 + $0x1f9] sm:$0xff] }
 0x2d5   :  { %19670 = vst [vmem:[#allocation113_spill] sm:$0xff] %v16865_v50  ;;  %v13003_v19 = vpop.f32.mrf.mxu1  ;;  %v19677_v50 = vld [vmem:[#allocation130_spill] sm:$0xff]  ;;  %vm19681_vm5 = vnez %v19680_v36 }
 0x2d6   :  { %19674 = vst [vmem:[#allocation114_spill] sm:$0xff] %v16871_v41  ;;  %13250 = vmatmul.mubr.msk.f32.gmra.mxu1 %vm791_vm2, %v5227_v58  ;;  %v16877_v51 = vpop.f32.mrf.mxu0  ;;  %13547 = vmatmul.mubr.msk.f32.gmra.mxu0 %vm791_vm2, %v7669_v43  ;;  %v2602_v44 = vadd.f32 %v16302_v32, %v19677_v50  ;;  %v16882_v27 = vadd.f32 %v13003_v19, %v3587_v37  ;;  %v5229_v58 = vsel %vm19681_vm5, %v5165_v22, 0.0  ;;  %v19684_v32 = vld [vmem:[#allocation133_spill] sm:$0xff]  ;;  %v7671_v37 = vsel %vm19672_vm6, %v5165_v22, 0.0  ;;  %v5167_v19 = vld [vmem:[#allocation2 + $0x201] sm:$0xff]  ;;  %v19696_v36 = vld [vmem:[#allocation138_spill] sm:$0xff] }
 0x2d7   :  { %19676 = vst [vmem:[#allocation53_spill] sm:$0xff] %v16877_v51  ;;  %13252 = vmatprep.mubr.msk.f32.mxu1 %vm791_vm2, %v5164_v40  ;;  %13549 = vmatprep.mubr.msk.f32.mxu0 %vm791_vm2, %v5164_v40  ;;  %v4135_v53 = vpop.f32.mrf.mxu1  ;;  %v3589_v50 = vadd.f32 %v19684_v32, %v2607_v54  ;;  %v2627_v32 = vadd.f32 %v16324_v20, %v19691_v39 }
 0x2d8   :  { %v16887_v7 = vpop.f32.mrf.mxu0  ;;  %v16893_v43 = vadd.f32 %v4135_v53, %v3586_v56  ;;  %v3588_v54 = vadd.f32 %v19687_v34, %v2602_v44  ;;  %v19689_v53 = vld [vmem:[#allocation81_spill] sm:$0xff]  ;;  %v2637_v39 = vadd.f32 %v16342_v57, %v15640_v5  ;;  %v19704_v5 = vld [vmem:[#allocation86_spill] sm:$0xff] }
 0x2d9   :  { %19679 = vst [vmem:[#allocation115_spill] sm:$0xff] %v16887_v7  ;;  %v13006_v40 = vpop.f32.mrf.mxu1  ;;  %v19686_v7 = vld [vmem:[#allocation82_spill] sm:$0xff]  ;;  %vm19690_vm3 = vnez %v19689_v53  ;;  %v5168_v34 = vld [vmem:[#allocation2 + $0x209] sm:$0xff] }
 0x2da   :  { %19683 = vst [vmem:[#allocation116_spill] sm:$0xff] %v16893_v43  ;;  %13253 = vmatmul.mubr.msk.f32.gmra.mxu1 %vm791_vm2, %v5229_v58  ;;  %v16899_v55 = vpop.f32.mrf.mxu0  ;;  %13550 = vmatmul.mubr.msk.f32.gmra.mxu0 %vm791_vm2, %v7671_v37  ;;  %v2612_v51 = vadd.f32 %v16320_v8, %v19686_v7  ;;  %v16904_v28 = vadd.f32 %v13006_v40, %v3589_v50  ;;  %v5231_v58 = vsel %vm19690_vm3, %v5167_v19, 0.0  ;;  %v19693_v8 = vld [vmem:[#allocation137_spill] sm:$0xff]  ;;  %v7673_v50 = vsel %vm19681_vm5, %v5167_v19, 0.0 }
 0x2db   :  { %19685 = vst [vmem:[#allocation54_spill] sm:$0xff] %v16899_v55  ;;  %13255 = vmatprep.mubr.msk.f32.mxu1 %vm791_vm2, %v5166_v16  ;;  %13552 = vmatprep.mubr.msk.f32.mxu0 %vm791_vm2, %v5166_v16  ;;  %v4145_v22 = vpop.f32.mrf.mxu1  ;;  %v3591_v7 = vadd.f32 %v19693_v8, %v2617_v6  ;;  %v5169_v40 = vld [vmem:[#allocation2 + $0x211] sm:$0xff] }
 0x2dc   :  { %v16909_v56 = vpop.f32.mrf.mxu0  ;;  %v16915_v37 = vadd.f32 %v4145_v22, %v3588_v54  ;;  %v3590_v6 = vadd.f32 %v19696_v36, %v2612_v51  ;;  %v19698_v22 = vld [vmem:[#allocation84_spill] sm:$0xff] }
 0x2dd   :  { %19688 = vst [vmem:[#allocation58_spill] sm:$0xff] %v16909_v56  ;;  %v13009_v16 = vpop.f32.mrf.mxu1  ;;  %v19695_v56 = vld [vmem:[#allocation83_spill] sm:$0xff]  ;;  %vm19699_vm8 = vnez %v19698_v22 }
 0x2de   :  { %19692 = vst [vmem:[#allocation55_spill] sm:$0xff] %v16915_v37  ;;  %13256 = vmatmul.mubr.msk.f32.gmra.mxu1 %vm791_vm2, %v5231_v58  ;;  %v16921_v44 = vpop.f32.mrf.mxu0  ;;  %13553 = vmatmul.mubr.msk.f32.gmra.mxu0 %vm791_vm2, %v7673_v50  ;;  %v2622_v55 = vadd.f32 %v16336_v18, %v19695_v56  ;;  %v16926_v20 = vadd.f32 %v13009_v16, %v3591_v7  ;;  %v5233_v58 = vsel %vm19699_vm8, %v5169_v40, 0.0  ;;  %v19701_v18 = vld [vmem:[#allocation139_spill] sm:$0xff]  ;;  %v7675_v7 = vsel %vm19690_vm3, %v5169_v40, 0.0  ;;  %v6714_v16 = vld [vmem:[#allocation2 + $0x28] sm:$0xff] }
 0x2df   :  { %19694 = vst [vmem:[#allocation56_spill] sm:$0xff] %v16921_v44  ;;  %13258 = vmatprep.mubr.msk.f32.mxu1 %vm791_vm2, %v5168_v34  ;;  %13555 = vmatprep.mubr.msk.f32.mxu0 %vm791_vm2, %v5168_v34  ;;  %v4155_v19 = vpop.f32.mrf.mxu1  ;;  %v3593_v56 = vadd.f32 %v19701_v18, %v2627_v32  ;;  %v19703_v34 = vld [vmem:[#allocation85_spill] sm:$0xff]  ;;  %v19706_v40 = vld [vmem:[#allocation8_spill] sm:$0xff] }
 0x2e0   :  { %v16931_v54 = vpop.f32.mrf.mxu0  ;;  %v16937_v8 = vadd.f32 %v4155_v19, %v3590_v6  ;;  %v2632_v36 = vadd.f32 %v16353_v4, %v19703_v34  ;;  %v3592_v57 = vadd.f32 %v19704_v5, %v2622_v55  ;;  %v2647_v6 = vadd.f32 %v16362_v38, %v19706_v40  ;;  %v6717_v40 = vld [vmem:[#allocation2 + $0x40] sm:$0xff] }
 0x2e1   :  { %19697 = vst [vmem:[#allocation117_spill] sm:$0xff] %v16931_v54  ;;  %v13012_v50 = vpop.f32.mrf.mxu1  ;;  %v2642_v55 = vadd.f32 %v16370_v2, %v15688_v25  ;;  %v2657_v5 = vadd.f32 %v16378_v35, %v15692_v47  ;;  %v6718_v25 = vld [vmem:[#allocation2 + $0x48] sm:$0xff] }
 0x2e2   :  { %19700 = vst [vmem:[#allocation57_spill] sm:$0xff] %v16937_v8  ;;  %13259 = vmatmul.mubr.msk.f32.gmra.mxu1 %vm791_vm2, %v5233_v58  ;;  %v16943_v51 = vpop.f32.mrf.mxu0  ;;  %13556 = vmatmul.mubr.msk.f32.gmra.mxu0 %vm791_vm2, %v7675_v7  ;;  %v16948_v22 = vadd.f32 %v13012_v50, %v3593_v56  ;;  %v19708_v58 = vld [vmem:[#allocation9_spill] sm:$0xff]  ;;  %v6716_v50 = vld [vmem:[#allocation2 + $0x38] sm:$0xff]  ;;  %v3594_v38 = vadd.f32 %v15690_v33, %v2632_v36 }
 0x2e3   :  { %19702 = vst [vmem:[#allocation60_spill] sm:$0xff] %v16943_v51  ;;  %13365 = vmatprep.mubr.msk.f32.mxu1 %vm791_vm2, %v6714_v16  ;;  %13558 = vmatprep.mubr.f32.mxu0 %v19169_v60  ;;  %v4165_v53 = vpop.f32.mrf.mxu1  ;;  %v3595_v18 = vadd.f32 %v19708_v58, %v2637_v39  ;;  %v6715_v7 = vld [vmem:[#allocation2 + $0x30] sm:$0xff]  ;;  %v2652_v33 = vadd.f32 %v16386_v26, %v15710_v9  ;;  %v19713_v36 = vld [vmem:[#allocation11_spill] sm:$0xff] }
 0x2e4   :  { %v16953_v32 = vpop.f32.mrf.mxu0  ;;  %v16957_v19 = vadd.f32 %v4165_v53, %v3592_v57  ;;  %v3597_v53 = vadd.f32 %v15694_v61, %v2647_v6  ;;  %v3596_v47 = vadd.f32 %v19713_v36, %v2642_v55  ;;  %v19715_v61 = vld [vmem:[#allocation12_spill] sm:$0xff]  ;;  %v6720_v9 = vld [vmem:[#allocation2 + $0x58] sm:$0xff]  ;;  %v2662_v26 = vadd.f32 %v16402_v48, %v15732_v0 }
 0x2e5   :  { %19705 = vst [vmem:[#allocation59_spill] sm:$0xff] %v16953_v32  ;;  %v13015_v4 = vpop.f32.mrf.mxu1  ;;  %v2667_v6 = vadd.f32 %v16394_v11, %v19715_v61  ;;  %v19722_v36 = vld [vmem:[#allocation14_spill] sm:$0xff]  ;;  %v19724_v61 = vld [vmem:[#allocation140_spill] sm:$0xff]  ;;  %v19726_v48 = vld [vmem:[#allocation19_spill] sm:$0xff] }
 0x2e6   :  { %19707 = vst [vmem:[#allocation119_spill] sm:$0xff] %v16957_v19  ;;  %v16960_v56 = vpop.f32.mrf.mxu0  ;;  %13366 = vmatmul.mubr.msk.f32.vlgmr.msra.gmra.mxu1 %vm791_vm2, %v6715_v7  ;;  %13559 = vmatmul.mubr.f32.gmra.mxu0 %v19169_v60  ;;  %v16966_v16 = vadd.f32 %v13015_v4, %v3595_v18  ;;  %v6722_v0 = vld [vmem:[#allocation2 + $0x68] sm:$0xff] }
 0x2e7   :  { %19709 = vst [vmem:[#allocation120_spill] sm:$0xff] %v16960_v56  ;;  %13368 = vmatprep.mubr.msk.f32.mxu1 %vm791_vm2, %v6716_v50  ;;  %v4175_v34 = vpop.f32.mrf.mxu1  ;;  %v19717_v50 = vld [vmem:[#allocation15_spill] sm:$0xff] }
 0x2e8   :  { %v16970_v39 = vpop.f32.mrf.mxu0  ;;  %v16974_v57 = vadd.f32 %v4175_v34, %v3594_v38  ;;  %v3599_v38 = vadd.f32 %v19717_v50, %v2657_v5  ;;  %v6719_v34 = vld [vmem:[#allocation2 + $0x50] sm:$0xff]  ;;  %v3601_v50 = vadd.f32 %v19724_v61, %v2667_v6 }
 0x2e9   :  { %19710 = vst [vmem:[#allocation62_spill] sm:$0xff] %v16970_v39  ;;  %v13018_v58 = vpop.f32.mrf.mxu1  ;;  %v19721_v5 = vld [vmem:[#allocation17_spill] sm:$0xff] }
 0x2ea   :  { %19711 = vst [vmem:[#allocation69_spill] sm:$0xff] %v16974_v57  ;;  %v16977_v7 = vpop.f32.mrf.mxu0  ;;  %13369 = vmatmul.mubr.msk.f32.gmra.mxu1 %vm791_vm2, %v6717_v40  ;;  %v16982_v2 = vadd.f32 %v13018_v58, %v3597_v53  ;;  %v19719_v53 = vld [vmem:[#allocation16_spill] sm:$0xff]  ;;  %v19730_v6 = vld [vmem:[#allocation141_spill] sm:$0xff] }
 0x2eb   :  { %19712 = vst [vmem:[#allocation64_spill] sm:$0xff] %v16977_v7  ;;  %13371 = vmatprep.mubr.msk.f32.mxu1 %vm791_vm2, %v6718_v25  ;;  %v4185_v35 = vpop.f32.mrf.mxu1  ;;  %v3598_v11 = vadd.f32 %v19719_v53, %v2652_v33 }
 0x2ec   :  { %v16986_v18 = vpop.f32.mrf.mxu0  ;;  %v16990_v4 = vadd.f32 %v4185_v35, %v3596_v47  ;;  %v2677_v47 = vadd.f32 %v19722_v36, %v19721_v5  ;;  %v19731_v5 = vld [vmem:[#allocation18_spill] sm:$0xff] }
 0x2ed   :  { %19714 = vst [vmem:[#allocation121_spill] sm:$0xff] %v16986_v18  ;;  %v13021_v40 = vpop.f32.mrf.mxu1  ;;  %v2687_v36 = vadd.f32 %v19731_v5, %v19730_v6 }
 0x2ee   :  { %19716 = vst [vmem:[#allocation122_spill] sm:$0xff] %v16990_v4  ;;  %v16993_v7 = vpop.f32.mrf.mxu0  ;;  %13372 = vmatmul.mubr.msk.f32.gmra.mxu1 %vm791_vm2, %v6719_v34  ;;  %v16998_v55 = vadd.f32 %v13021_v40, %v3599_v38  ;;  %v6721_v34 = vld [vmem:[#allocation2 + $0x60] sm:$0xff]  ;;  %v19727_v38 = vld [vmem:[#allocation194_spill] sm:$0xff] }
 0x2ef   :  { %19718 = vst [vmem:[#allocation67_spill] sm:$0xff] %v16993_v7  ;;  %13374 = vmatprep.mubr.msk.f32.mxu1 %vm791_vm2, %v6720_v9  ;;  %v4195_v58 = vpop.f32.mrf.mxu1  ;;  %v2672_v33 = vadd.f32 %v19727_v38, %v19726_v48  ;;  %v19728_v9 = vld [vmem:[#allocation20_spill] sm:$0xff] }
 0x2f0   :  { %v17002_v25 = vpop.f32.mrf.mxu0  ;;  %v17006_v35 = vadd.f32 %v4195_v58, %v3598_v11  ;;  %v3600_v53 = vadd.f32 %v19728_v9, %v2662_v26  ;;  %v19737_v38 = vld [vmem:[#allocation24_spill] sm:$0xff] }
 0x2f1   :  { %19720 = vst [vmem:[#allocation73_spill] sm:$0xff] %v17002_v25  ;;  %v13024_v7 = vpop.f32.mrf.mxu1  ;;  %v6723_v25 = vld [vmem:[#allocation2 + $0x70] sm:$0xff]  ;;  %v3602_v9 = vadd.f32 %v19737_v38, %v2672_v33 }
 0x2f2   :  { %19723 = vst [vmem:[#allocation68_spill] sm:$0xff] %v17006_v35  ;;  %v17009_v18 = vpop.f32.mrf.mxu0  ;;  %13375 = vmatmul.mubr.msk.f32.gmra.mxu1 %vm791_vm2, %v6721_v34  ;;  %v17014_v40 = vadd.f32 %v13024_v7, %v3601_v50  ;;  %v6724_v7 = vld [vmem:[#allocation2 + $0x78] sm:$0xff] }
 0x2f3   :  { %19725 = vst [vmem:[#allocation70_spill] sm:$0xff] %v17009_v18  ;;  %13377 = vmatprep.mubr.msk.f32.mxu1 %vm791_vm2, %v6722_v0  ;;  %v4205_v11 = vpop.f32.mrf.mxu1  ;;  %v19733_v18 = vld [vmem:[#allocation142_spill] sm:$0xff]  ;;  %v19736_v0 = vld [vmem:[#allocation197_spill] sm:$0xff] }
 0x2f4   :  { %v17018_v58 = vpop.f32.mrf.mxu0  ;;  %v17022_v61 = vadd.f32 %v4205_v11, %v3600_v53  ;;  %v3603_v34 = vadd.f32 %v19733_v18, %v2677_v47  ;;  %v19735_v50 = vld [vmem:[#allocation22_spill] sm:$0xff]  ;;  %v19739_v18 = vld [vmem:[#allocation143_spill] sm:$0xff]  ;;  %v19740_v47 = vld [vmem:[#allocation21_spill] sm:$0xff] }
 0x2f5   :  { %19729 = vst [vmem:[#allocation123_spill] sm:$0xff] %v17018_v58  ;;  %v13027_v39 = vpop.f32.mrf.mxu1  ;;  %v2682_v26 = vadd.f32 %v19736_v0, %v19735_v50  ;;  %v2697_v6 = vadd.f32 %v19740_v47, %v19739_v18  ;;  %v6725_v58 = vld [vmem:[#allocation2 + $0x80] sm:$0xff]  ;;  %v19746_v0 = vld [vmem:[#allocation26_spill] sm:$0xff] }
 0x2f6   :  { %19732 = vst [vmem:[#allocation72_spill] sm:$0xff] %v17022_v61  ;;  %v17025_v56 = vpop.f32.mrf.mxu0  ;;  %13378 = vmatmul.mubr.msk.f32.gmra.mxu1 %vm791_vm2, %v6723_v25  ;;  %v17030_v48 = vadd.f32 %v13027_v39, %v3603_v34  ;;  %v6726_v39 = vld [vmem:[#allocation2 + $0x88] sm:$0xff] }
 0x2f7   :  { %19734 = vst [vmem:[#allocation75_spill] sm:$0xff] %v17025_v56  ;;  %13380 = vmatprep.mubr.msk.f32.mxu1 %vm791_vm2, %v6724_v7  ;;  %v4215_v53 = vpop.f32.mrf.mxu1  ;;  %v19742_v56 = vld [vmem:[#allocation144_spill] sm:$0xff]  ;;  %v19744_v34 = vld [vmem:[#allocation25_spill] sm:$0xff]  ;;  %v3604_v38 = vadd.f32 %v19746_v0, %v2682_v26 }
 0x2f8   :  { %v17034_v11 = vpop.f32.mrf.mxu0  ;;  %v17038_v5 = vadd.f32 %v4215_v53, %v3602_v9  ;;  %v3605_v25 = vadd.f32 %v19742_v56, %v2687_v36  ;;  %v19745_v7 = vld [vmem:[#allocation200_spill] sm:$0xff]  ;;  %v19748_v56 = vld [vmem:[#allocation145_spill] sm:$0xff]  ;;  %v19749_v36 = vld [vmem:[#allocation23_spill] sm:$0xff] }
 0x2f9   :  { %19738 = vst [vmem:[#allocation74_spill] sm:$0xff] %v17034_v11  ;;  %v13030_v32 = vpop.f32.mrf.mxu1  ;;  %v2692_v33 = vadd.f32 %v19745_v7, %v19744_v34  ;;  %v2707_v18 = vadd.f32 %v19749_v36, %v19748_v56  ;;  %v19755_v7 = vld [vmem:[#allocation29_spill] sm:$0xff] }
 0x2fa   :  { %19741 = vst [vmem:[#allocation124_spill] sm:$0xff] %v17038_v5  ;;  %v17041_v51 = vpop.f32.mrf.mxu0  ;;  %13381 = vmatmul.mubr.msk.f32.gmra.mxu1 %vm791_vm2, %v6725_v58  ;;  %v17046_v50 = vadd.f32 %v13030_v32, %v3605_v25  ;;  %v6727_v5 = vld [vmem:[#allocation2 + $0x90] sm:$0xff]  ;;  %v6728_v32 = vld [vmem:[#allocation2 + $0x98] sm:$0xff]  ;;  %v19753_v25 = vld [vmem:[#allocation28_spill] sm:$0xff] }
 0x2fb   :  { %19743 = vst [vmem:[#allocation125_spill] sm:$0xff] %v17041_v51  ;;  %13383 = vmatprep.mubr.msk.f32.mxu1 %vm791_vm2, %v6726_v39  ;;  %v4225_v9 = vpop.f32.mrf.mxu1  ;;  %v19751_v51 = vld [vmem:[#allocation146_spill] sm:$0xff]  ;;  %v19754_v39 = vld [vmem:[#allocation203_spill] sm:$0xff]  ;;  %v3606_v0 = vadd.f32 %v19755_v7, %v2692_v33 }
 0x2fc   :  { %v17050_v53 = vpop.f32.mrf.mxu0  ;;  %v17054_v47 = vadd.f32 %v4225_v9, %v3604_v38  ;;  %v3607_v58 = vadd.f32 %v19751_v51, %v2697_v6  ;;  %v2702_v26 = vadd.f32 %v19754_v39, %v19753_v25  ;;  %v19757_v51 = vld [vmem:[#allocation147_spill] sm:$0xff]  ;;  %v19763_v39 = vld [vmem:[#allocation33_spill] sm:$0xff] }
 0x2fd   :  { %19747 = vst [vmem:[#allocation77_spill] sm:$0xff] %v17050_v53  ;;  %v13033_v11 = vpop.f32.mrf.mxu1  ;;  %v19758_v6 = vld [vmem:[#allocation27_spill] sm:$0xff] }
 0x2fe   :  { %19750 = vst [vmem:[#allocation126_spill] sm:$0xff] %v17054_v47  ;;  %v17057_v54 = vpop.f32.mrf.mxu0  ;;  %13384 = vmatmul.mubr.msk.f32.gmra.mxu1 %vm791_vm2, %v6727_v5  ;;  %v17062_v34 = vadd.f32 %v13033_v11, %v3607_v58  ;;  %v2717_v56 = vadd.f32 %v19758_v6, %v19757_v51  ;;  %v6729_v53 = vld [vmem:[#allocation2 + $0xa0] sm:$0xff]  ;;  %v6730_v11 = vld [vmem:[#allocation2 + $0xa8] sm:$0xff]  ;;  %v3608_v7 = vadd.f32 %v19763_v39, %v2702_v26 }
 0x2ff   :  { %19752 = vst [vmem:[#allocation78_spill] sm:$0xff] %v17057_v54  ;;  %13386 = vmatprep.mubr.msk.f32.mxu1 %vm791_vm2, %v6728_v32  ;;  %v4235_v38 = vpop.f32.mrf.mxu1  ;;  %v19759_v54 = vld [vmem:[#allocation148_spill] sm:$0xff]  ;;  %v19761_v58 = vld [vmem:[#allocation31_spill] sm:$0xff]  ;;  %v19762_v32 = vld [vmem:[#allocation206_spill] sm:$0xff] }
 0x300   :  { %v17066_v9 = vpop.f32.mrf.mxu0  ;;  %v17070_v36 = vadd.f32 %v4235_v38, %v3606_v0  ;;  %v3609_v5 = vadd.f32 %v19759_v54, %v2707_v18  ;;  %v2712_v33 = vadd.f32 %v19762_v32, %v19761_v58  ;;  %v19765_v54 = vld [vmem:[#allocation149_spill] sm:$0xff]  ;;  %v19766_v18 = vld [vmem:[#allocation30_spill] sm:$0xff]  ;;  %v19771_v32 = vld [vmem:[#allocation35_spill] sm:$0xff] }
 0x301   :  { %19756 = vst [vmem:[#allocation127_spill] sm:$0xff] %v17066_v9  ;;  %v13036_v47 = vpop.f32.mrf.mxu1  ;;  %v2727_v51 = vadd.f32 %v19766_v18, %v19765_v54  ;;  %v6731_v9 = vld [vmem:[#allocation2 + $0xb0] sm:$0xff] }
 0x302   :  { %v17073_v44 = vpop.f32.mrf.mxu0  ;;  %13387 = vmatmul.mubr.msk.f32.gmra.mxu1 %vm791_vm2, %v6729_v53  ;;  %v17078_v25 = vadd.f32 %v13036_v47, %v3609_v5  ;;  %v6732_v47 = vld [vmem:[#allocation2 + $0xb8] sm:$0xff]  ;;  %v3610_v39 = vadd.f32 %v19771_v32, %v2712_v33 }
 0x303   :  { %19760 = vst [vmem:[#allocation128_spill] sm:$0xff] %v17073_v44  ;;  %13389 = vmatprep.mubr.msk.f32.mxu1 %vm791_vm2, %v6730_v11  ;;  %v4245_v0 = vpop.f32.mrf.mxu1  ;;  %v19767_v44 = vld [vmem:[#allocation150_spill] sm:$0xff]  ;;  %v19770_v11 = vld [vmem:[#allocation209_spill] sm:$0xff] }
 0x304   :  { %v17082_v38 = vpop.f32.mrf.mxu0  ;;  %v17086_v6 = vadd.f32 %v4245_v0, %v3608_v7  ;;  %v3611_v53 = vadd.f32 %v19767_v44, %v2717_v56  ;;  %v19769_v5 = vld [vmem:[#allocation34_spill] sm:$0xff]  ;;  %v19773_v44 = vld [vmem:[#allocation151_spill] sm:$0xff]  ;;  %v19774_v56 = vld [vmem:[#allocation32_spill] sm:$0xff] }
 0x305   :  { %19764 = vst [vmem:[#allocation130_spill] sm:$0xff] %v17082_v38  ;;  %v13039_v61 = vpop.f32.mrf.mxu1  ;;  %v2722_v26 = vadd.f32 %v19770_v11, %v19769_v5  ;;  %v2737_v54 = vadd.f32 %v19774_v56, %v19773_v44  ;;  %v19775_v38 = vld [vmem:[#allocation152_spill] sm:$0xff]  ;;  %v19779_v11 = vld [vmem:[#allocation38_spill] sm:$0xff] }
 0x306   :  { %v17089_v35 = vpop.f32.mrf.mxu0  ;;  %13390 = vmatmul.mubr.msk.f32.gmra.mxu1 %vm791_vm2, %v6731_v9  ;;  %v17094_v58 = vadd.f32 %v13039_v61, %v3611_v53  ;;  %v3613_v9 = vadd.f32 %v19775_v38, %v2727_v51  ;;  %v6734_v61 = vld [vmem:[#allocation2 + $0xc8] sm:$0xff] }
 0x307   :  { %19768 = vst [vmem:[#allocation131_spill] sm:$0xff] %v17089_v35  ;;  %13392 = vmatprep.mubr.msk.f32.mxu1 %vm791_vm2, %v6732_v47  ;;  %v4255_v7 = vpop.f32.mrf.mxu1  ;;  %v6733_v35 = vld [vmem:[#allocation2 + $0xc0] sm:$0xff]  ;;  %v19777_v53 = vld [vmem:[#allocation37_spill] sm:$0xff]  ;;  %v3612_v32 = vadd.f32 %v19779_v11, %v2722_v26 }
 0x308   :  { %v17098_v0 = vpop.f32.mrf.mxu0  ;;  %v17102_v18 = vadd.f32 %v4255_v7, %v3610_v39  ;;  %v19778_v47 = vld [vmem:[#allocation212_spill] sm:$0xff]  ;;  %v19781_v38 = vld [vmem:[#allocation153_spill] sm:$0xff] }
 0x309   :  { %19772 = vst [vmem:[#allocation80_spill] sm:$0xff] %v17098_v0  ;;  %v13042_v4 = vpop.f32.mrf.mxu1  ;;  %v2732_v33 = vadd.f32 %v19778_v47, %v19777_v53  ;;  %v19782_v51 = vld [vmem:[#allocation36_spill] sm:$0xff]  ;;  %v6735_v0 = vld [vmem:[#allocation2 + $0xd0] sm:$0xff] }
 0x30a   :  { %v17105_v57 = vpop.f32.mrf.mxu0  ;;  %13393 = vmatmul.mubr.msk.f32.gmra.mxu1 %vm791_vm2, %v6733_v35  ;;  %v17110_v5 = vadd.f32 %v13042_v4, %v3613_v9  ;;  %v2747_v44 = vadd.f32 %v19782_v51, %v19781_v38  ;;  %v6736_v4 = vld [vmem:[#allocation2 + $0xd8] sm:$0xff]  ;;  %v19787_v47 = vld [vmem:[#allocation40_spill] sm:$0xff] }
 0x30b   :  { %19776 = vst [vmem:[#allocation132_spill] sm:$0xff] %v17105_v57  ;;  %13395 = vmatprep.mubr.msk.f32.mxu1 %vm791_vm2, %v6734_v61  ;;  %v4265_v39 = vpop.f32.mrf.mxu1  ;;  %v19783_v57 = vld [vmem:[#allocation154_spill] sm:$0xff]  ;;  %v19785_v9 = vld [vmem:[#allocation87_spill] sm:$0xff]  ;;  %v3614_v11 = vadd.f32 %v19787_v47, %v2732_v33 }
 0x30c   :  { %v17114_v7 = vpop.f32.mrf.mxu0  ;;  %v17118_v56 = vadd.f32 %v4265_v39, %v3612_v32  ;;  %v3615_v35 = vadd.f32 %v19783_v57, %v2737_v54  ;;  %v19786_v61 = vld [vmem:[#allocation215_spill] sm:$0xff]  ;;  %v19789_v57 = vld [vmem:[#allocation42_spill] sm:$0xff] }
 0x30d   :  { %19780 = vst [vmem:[#allocation133_spill] sm:$0xff] %v17114_v7  ;;  %v13045_v19 = vpop.f32.mrf.mxu1  ;;  %v2742_v26 = vadd.f32 %v19786_v61, %v19785_v9  ;;  %v19790_v54 = vld [vmem:[#allocation39_spill] sm:$0xff]  ;;  %v19795_v61 = vld [vmem:[#allocation156_spill] sm:$0xff] }
 0x30e   :  { %v17121_v8 = vpop.f32.mrf.mxu0  ;;  %13396 = vmatmul.mubr.msk.f32.gmra.mxu1 %vm791_vm2, %v6735_v0  ;;  %v17126_v53 = vadd.f32 %v13045_v19, %v3615_v35  ;;  %v2757_v38 = vadd.f32 %v19790_v54, %v19789_v57  ;;  %v19791_v7 = vld [vmem:[#allocation155_spill] sm:$0xff]  ;;  %v6738_v19 = vld [vmem:[#allocation2 + $0xe8] sm:$0xff] }
 0x30f   :  { %19784 = vst [vmem:[#allocation82_spill] sm:$0xff] %v17121_v8  ;;  %13398 = vmatprep.mubr.msk.f32.mxu1 %vm791_vm2, %v6736_v4  ;;  %v4275_v32 = vpop.f32.mrf.mxu1  ;;  %v3617_v0 = vadd.f32 %v19791_v7, %v2747_v44  ;;  %v6737_v8 = vld [vmem:[#allocation2 + $0xe0] sm:$0xff]  ;;  %v19794_v4 = vld [vmem:[#allocation218_spill] sm:$0xff]  ;;  %v3616_v47 = vadd.f32 %v19795_v61, %v2742_v26  ;;  %v19797_v7 = vld [vmem:[#allocation157_spill] sm:$0xff] }
 0x310   :  { %v17130_v39 = vpop.f32.mrf.mxu0  ;;  %v17134_v51 = vadd.f32 %v4275_v32, %v3614_v11  ;;  %v19793_v35 = vld [vmem:[#allocation43_spill] sm:$0xff]  ;;  %v19798_v44 = vld [vmem:[#allocation41_spill] sm:$0xff] }
 0x311   :  { %19788 = vst [vmem:[#allocation134_spill] sm:$0xff] %v17130_v39  ;;  %v13048_v37 = vpop.f32.mrf.mxu1  ;;  %v2752_v33 = vadd.f32 %v19794_v4, %v19793_v35  ;;  %v2767_v57 = vadd.f32 %v19798_v44, %v19797_v7  ;;  %v19799_v39 = vld [vmem:[#allocation158_spill] sm:$0xff] }
 0x312   :  { %v17137_v43 = vpop.f32.mrf.mxu0  ;;  %13399 = vmatmul.mubr.msk.f32.gmra.mxu1 %vm791_vm2, %v6737_v8  ;;  %v17142_v9 = vadd.f32 %v13048_v37, %v3617_v0  ;;  %v3619_v8 = vadd.f32 %v19799_v39, %v2757_v38  ;;  %v6740_v37 = vld [vmem:[#allocation2 + $0xf8] sm:$0xff]  ;;  %v19801_v0 = vld [vmem:[#allocation45_spill] sm:$0xff]  ;;  %v19807_v38 = vld [vmem:[#allocation44_spill] sm:$0xff] }
 0x313   :  { %19792 = vst [vmem:[#allocation81_spill] sm:$0xff] %v17137_v43  ;;  %13401 = vmatprep.mubr.msk.f32.mxu1 %vm791_vm2, %v6738_v19  ;;  %v4285_v11 = vpop.f32.mrf.mxu1  ;;  %v6739_v43 = vld [vmem:[#allocation2 + $0xf0] sm:$0xff]  ;;  %v19806_v39 = vld [vmem:[#allocation159_spill] sm:$0xff] }
 0x314   :  { %v17146_v32 = vpop.f32.mrf.mxu0  ;;  %v17150_v54 = vadd.f32 %v4285_v11, %v3616_v47  ;;  %v19802_v19 = vld [vmem:[#allocation221_spill] sm:$0xff]  ;;  %v19804_v4 = vld [vmem:[#allocation46_spill] sm:$0xff]  ;;  %v2777_v7 = vadd.f32 %v19807_v38, %v19806_v39 }
 0x315   :  { %19796 = vst [vmem:[#allocation136_spill] sm:$0xff] %v17146_v32  ;;  %v13051_v41 = vpop.f32.mrf.mxu1  ;;  %v2762_v26 = vadd.f32 %v19802_v19, %v19801_v0  ;;  %v3618_v61 = vadd.f32 %v19804_v4, %v2752_v33  ;;  %v19809_v32 = vld [vmem:[#allocation160_spill] sm:$0xff]  ;;  %v19813_v19 = vld [vmem:[#allocation161_spill] sm:$0xff] }
 0x316   :  { %v17153_v31 = vpop.f32.mrf.mxu0  ;;  %13402 = vmatmul.mubr.msk.f32.gmra.mxu1 %vm791_vm2, %v6739_v43  ;;  %v17158_v35 = vadd.f32 %v13051_v41, %v3619_v8  ;;  %v3621_v43 = vadd.f32 %v19809_v32, %v2767_v57  ;;  %v6742_v41 = vld [vmem:[#allocation2 + $0x108] sm:$0xff]  ;;  %v19815_v32 = vld [vmem:[#allocation162_spill] sm:$0xff]  ;;  %v19816_v57 = vld [vmem:[#allocation47_spill] sm:$0xff] }
 0x317   :  { %19800 = vst [vmem:[#allocation137_spill] sm:$0xff] %v17153_v31  ;;  %13404 = vmatprep.mubr.msk.f32.mxu1 %vm791_vm2, %v6740_v37  ;;  %v4295_v47 = vpop.f32.mrf.mxu1  ;;  %v6741_v31 = vld [vmem:[#allocation2 + $0x100] sm:$0xff]  ;;  %v3620_v4 = vadd.f32 %v19813_v19, %v2762_v26  ;;  %v2787_v39 = vadd.f32 %v19816_v57, %v19815_v32 }
 0x318   :  { %19803 = vst [vmem:[#allocation83_spill] sm:$0xff] %v17158_v35  ;;  %v17162_v11 = vpop.f32.mrf.mxu0  ;;  %v17166_v44 = vadd.f32 %v4295_v47, %v3618_v61  ;;  %v19811_v8 = vld [vmem:[#allocation88_spill] sm:$0xff] }
 0x319   :  { %19805 = vst [vmem:[#allocation138_spill] sm:$0xff] %v17162_v11  ;;  %v13054_v46 = vpop.f32.mrf.mxu1  ;;  %v19812_v37 = vld [vmem:[#allocation224_spill] sm:$0xff]  ;;  %v6743_v11 = vld [vmem:[#allocation2 + $0x110] sm:$0xff] }
 0x31a   :  { %19808 = vst [vmem:[#allocation84_spill] sm:$0xff] %v17166_v44  ;;  %v17169_v63 = vpop.f32.mrf.mxu0  ;;  %13405 = vmatmul.mubr.msk.f32.gmra.mxu1 %vm791_vm2, %v6741_v31  ;;  %v2772_v33 = vadd.f32 %v19812_v37, %v19811_v8  ;;  %v17174_v0 = vadd.f32 %v13054_v46, %v3621_v43  ;;  %v19819_v46 = vld [vmem:[#allocation164_spill] sm:$0xff]  ;;  %v19820_v43 = vld [vmem:[#allocation91_spill] sm:$0xff]  ;;  %v19821_v8 = vld [vmem:[#allocation165_spill] sm:$0xff] }
 0x31b   :  { %19810 = vst [vmem:[#allocation139_spill] sm:$0xff] %v17169_v63  ;;  %13407 = vmatprep.mubr.msk.f32.mxu1 %vm791_vm2, %v6742_v41  ;;  %v4305_v61 = vpop.f32.mrf.mxu1  ;;  %v19817_v63 = vld [vmem:[#allocation163_spill] sm:$0xff]  ;;  %v2782_v41 = vadd.f32 %v19820_v43, %v19819_v46 }
 0x31c   :  { %v17178_v47 = vpop.f32.mrf.mxu0  ;;  %v17182_v38 = vadd.f32 %v4305_v61, %v3620_v4  ;;  %v3623_v31 = vadd.f32 %v19817_v63, %v2777_v7  ;;  %v3622_v37 = vadd.f32 %v19821_v8, %v2772_v33  ;;  %v19823_v63 = vld [vmem:[#allocation166_spill] sm:$0xff] }
 0x31d   :  { %19814 = vst [vmem:[#allocation85_spill] sm:$0xff] %v17178_v47  ;;  %v13057_v44 = vpop.f32.mrf.mxu1  ;;  %v3625_v7 = vadd.f32 %v19823_v63, %v2787_v39  ;;  %v6747_v63 = vld [vmem:[#allocation2 + $0x130] sm:$0xff] }
 0x31e   :  { %v17185_v35 = vpop.f32.mrf.mxu0  ;;  %13408 = vmatmul.mubr.msk.f32.gmra.mxu1 %vm791_vm2, %v6743_v11  ;;  %v17190_v26 = vadd.f32 %v13057_v44, %v3623_v31  ;;  %v6746_v11 = vld [vmem:[#allocation2 + $0x128] sm:$0xff]  ;;  %v19825_v44 = vld [vmem:[#allocation167_spill] sm:$0xff] }
 0x31f   :  { %19818 = vst [vmem:[#allocation86_spill] sm:$0xff] %v17185_v35  ;;  %13410 = vmatprep.mubr.f32.mxu1 %v19169_v60  ;;  %v4315_v19 = vpop.f32.mrf.mxu1  ;;  %v3624_v33 = vadd.f32 %v19825_v44, %v2782_v41  ;;  %v19830_v41 = vld [vmem:[#allocation169_spill] sm:$0xff]  ;;  %v6749_v35 = vld [vmem:[#allocation2 + $0x140] sm:$0xff] }
 0x320   :  { %v17194_v4 = vpop.f32.mrf.mxu0  ;;  %v17196_v61 = vadd.f32 %v4315_v19, %v3622_v37  ;;  %v19827_v37 = vld [vmem:[#allocation90_spill] sm:$0xff]  ;;  %v19828_v19 = vld [vmem:[#allocation168_spill] sm:$0xff] }
 0x321   :  { %19822 = vst [vmem:[#allocation8_spill] sm:$0xff] %v17194_v4  ;;  %v13060_v32 = vpop.f32.mrf.mxu1  ;;  %v5043_v39 = vadd.f32 %v19828_v19, %v19827_v37  ;;  %v19832_v37 = vld [vmem:[#allocation170_spill] sm:$0xff] }
 0x322   :  { %v17199_v57 = vpop.f32.mrf.mxu0  ;;  %13411 = vmatmul.mubr.f32.gmra.mxu1 %v19169_v60  ;;  %v17202_v46 = vadd.f32 %v13060_v32, %v3625_v7  ;;  %v6748_v7 = vld [vmem:[#allocation2 + $0x138] sm:$0xff]  ;;  %v5045_v19 = vadd.f32 %v19832_v37, %v16640_v23  ;;  %v6751_v37 = vld [vmem:[#allocation2 + $0x150] sm:$0xff] }
 0x323   :  { %19824 = vst [vmem:[#allocation9_spill] sm:$0xff] %v17199_v57  ;;  %13413 = vmatprep.mubr.msk.f32.mxu1 %vm791_vm2, %v6746_v11  ;;  %v4325_v31 = vpop.f32.mrf.mxu1  ;;  %v5042_v11 = vadd.f32 %v19830_v41, %v16629_v15 }
 0x324   :  { %v17206_v43 = vpop.f32.mrf.mxu0  ;;  %v17208_v8 = vadd.f32 %v4325_v31, %v3624_v33 }
 0x325   :  { %19826 = vst [vmem:[#allocation11_spill] sm:$0xff] %v17206_v43  ;;  %v13167_v47 = vpop.f32.mrf.mxu1 }
 0x326   :  { %v17212_v4 = vpop.f32.mrf.mxu0  ;;  %13414 = vmatmul.mubr.msk.f32.gmra.mxu1 %vm791_vm2, %v6747_v63  ;;  %v17215_v32 = vadd.f32 %v13167_v47, %v5043_v39  ;;  %v6750_v63 = vld [vmem:[#allocation2 + $0x148] sm:$0xff]  ;;  %v19833_v39 = vld [vmem:[#allocation171_spill] sm:$0xff] }
 0x327   :  { %19829 = vst [vmem:[#allocation12_spill] sm:$0xff] %v17212_v4  ;;  %13416 = vmatprep.mubr.msk.f32.mxu1 %vm791_vm2, %v6748_v7  ;;  %v5495_v44 = vpop.f32.mrf.mxu1  ;;  %v5044_v15 = vadd.f32 %v19833_v39, %v16651_v21 }
 0x328   :  { %v17220_v33 = vpop.f32.mrf.mxu0  ;;  %v17222_v31 = vadd.f32 %v5495_v44, %v5042_v11  ;;  %v19835_v44 = vld [vmem:[#allocation172_spill] sm:$0xff] }
 0x329   :  { %19831 = vst [vmem:[#allocation15_spill] sm:$0xff] %v17220_v33  ;;  %v5047_v23 = vadd.f32 %v19835_v44, %v16662_v45  ;;  %v6753_v44 = vld [vmem:[#allocation2 + $0x160] sm:$0xff] }
 0x32a   :  { %v13170_v4 = vpop.f32.mrf.mxu1  ;;  %13417 = vmatmul.mubr.msk.f32.gmra.mxu1 %vm791_vm2, %v6749_v35  ;;  %v17232_v7 = vpop.f32.mrf.mxu0  ;;  %v6752_v35 = vld [vmem:[#allocation2 + $0x158] sm:$0xff] }
 0x32b   :  { %v17227_v47 = vadd.f32 %v13170_v4, %v5045_v19  ;;  %13419 = vmatprep.mubr.msk.f32.mxu1 %vm791_vm2, %v6750_v63  ;;  %19834 = vst [vmem:[#allocation16_spill] sm:$0xff] %v17232_v7  ;;  %v19836_v19 = vld [vmem:[#allocation173_spill] sm:$0xff] }
 0x32c   :  { %v5505_v41 = vpop.f32.mrf.mxu1  ;;  %v5046_v21 = vadd.f32 %v19836_v19, %v16673_v13  ;;  %v17244_v63 = vpop.f32.mrf.mxu0 }
 0x32d   :  { %v17234_v11 = vadd.f32 %v5505_v41, %v5044_v15  ;;  %19837 = vst [vmem:[#allocation17_spill] sm:$0xff] %v17244_v63  ;;  %v19838_v41 = vld [vmem:[#allocation174_spill] sm:$0xff] }
 0x32e   :  { %v13173_v33 = vpop.f32.mrf.mxu1  ;;  %13420 = vmatmul.mubr.msk.f32.gmra.mxu1 %vm791_vm2, %v6751_v37  ;;  %v5049_v45 = vadd.f32 %v19838_v41, %v16684_v49  ;;  %v6754_v37 = vld [vmem:[#allocation2 + $0x168] sm:$0xff]  ;;  %v6755_v41 = vld [vmem:[#allocation2 + $0x170] sm:$0xff] }
 0x32f   :  { %v17239_v4 = vadd.f32 %v13173_v33, %v5047_v23  ;;  %13422 = vmatprep.mubr.msk.f32.mxu1 %vm791_vm2, %v6752_v35  ;;  %v19839_v23 = vld [vmem:[#allocation175_spill] sm:$0xff]  ;;  %v17256_v35 = vpop.f32.mrf.mxu0 }
 0x330   :  { %v5515_v39 = vpop.f32.mrf.mxu1  ;;  %v5048_v13 = vadd.f32 %v19839_v23, %v16695_v30  ;;  %19840 = vst [vmem:[#allocation14_spill] sm:$0xff] %v17256_v35 }
 0x331   :  { %v17246_v15 = vadd.f32 %v5515_v39, %v5046_v21  ;;  %v19841_v39 = vld [vmem:[#allocation176_spill] sm:$0xff] }
 0x332   :  { %v13176_v43 = vpop.f32.mrf.mxu1  ;;  %13423 = vmatmul.mubr.msk.f32.gmra.mxu1 %vm791_vm2, %v6753_v44  ;;  %v5051_v49 = vadd.f32 %v19841_v39, %v16706_v17  ;;  %v6756_v44 = vld [vmem:[#allocation2 + $0x178] sm:$0xff]  ;;  %v6757_v39 = vld [vmem:[#allocation2 + $0x180] sm:$0xff] }
 0x333   :  { %v17251_v33 = vadd.f32 %v13176_v43, %v5049_v45  ;;  %13425 = vmatprep.mubr.msk.f32.mxu1 %vm791_vm2, %v6754_v37  ;;  %v19842_v45 = vld [vmem:[#allocation177_spill] sm:$0xff]  ;;  %v17268_v37 = vpop.f32.mrf.mxu0 }
 0x334   :  { %v5525_v19 = vpop.f32.mrf.mxu1  ;;  %v5050_v30 = vadd.f32 %v19842_v45, %v16717_v3  ;;  %19843 = vst [vmem:[#allocation140_spill] sm:$0xff] %v17268_v37 }
 0x335   :  { %v17258_v21 = vadd.f32 %v5525_v19, %v5048_v13  ;;  %v19844_v19 = vld [vmem:[#allocation178_spill] sm:$0xff] }
 0x336   :  { %v13179_v57 = vpop.f32.mrf.mxu1  ;;  %13426 = vmatmul.mubr.msk.f32.gmra.mxu1 %vm791_vm2, %v6755_v41  ;;  %v5053_v17 = vadd.f32 %v19844_v19, %v16728_v10  ;;  %v6758_v41 = vld [vmem:[#allocation2 + $0x188] sm:$0xff]  ;;  %v6759_v19 = vld [vmem:[#allocation2 + $0x190] sm:$0xff] }
 0x337   :  { %v17263_v43 = vadd.f32 %v13179_v57, %v5051_v49  ;;  %13428 = vmatprep.mubr.msk.f32.mxu1 %vm791_vm2, %v6756_v44  ;;  %v19845_v49 = vld [vmem:[#allocation179_spill] sm:$0xff]  ;;  %v17280_v44 = vpop.f32.mrf.mxu0 }
 0x338   :  { %v5535_v23 = vpop.f32.mrf.mxu1  ;;  %v5052_v3 = vadd.f32 %v19845_v49, %v16739_v24  ;;  %19846 = vst [vmem:[#allocation19_spill] sm:$0xff] %v17280_v44 }
 0x339   :  { %v17270_v13 = vadd.f32 %v5535_v23, %v5050_v30  ;;  %v19847_v23 = vld [vmem:[#allocation180_spill] sm:$0xff] }
 0x33a   :  { %v13182_v63 = vpop.f32.mrf.mxu1  ;;  %13429 = vmatmul.mubr.msk.f32.gmra.mxu1 %vm791_vm2, %v6757_v39  ;;  %v5055_v10 = vadd.f32 %v19847_v23, %v16750_v29  ;;  %v6760_v39 = vld [vmem:[#allocation2 + $0x198] sm:$0xff]  ;;  %v6761_v23 = vld [vmem:[#allocation2 + $0x1a0] sm:$0xff] }
 0x33b   :  { %v17275_v57 = vadd.f32 %v13182_v63, %v5053_v17  ;;  %13431 = vmatprep.mubr.msk.f32.mxu1 %vm791_vm2, %v6758_v41  ;;  %v19848_v17 = vld [vmem:[#allocation61_spill] sm:$0xff]  ;;  %v17292_v41 = vpop.f32.mrf.mxu0 }
 0x33c   :  { %v5545_v45 = vpop.f32.mrf.mxu1  ;;  %v5054_v24 = vadd.f32 %v19848_v17, %v16761_v1  ;;  %19849 = vst [vmem:[#allocation194_spill] sm:$0xff] %v17292_v41  ;;  %v6767_v41 = vld [vmem:[#allocation2 + $0x1d0] sm:$0xff] }
 0x33d   :  { %v17282_v30 = vadd.f32 %v5545_v45, %v5052_v3  ;;  %v19850_v45 = vld [vmem:[#allocation63_spill] sm:$0xff] }
 0x33e   :  { %v13185_v7 = vpop.f32.mrf.mxu1  ;;  %13432 = vmatmul.mubr.msk.f32.gmra.mxu1 %vm791_vm2, %v6759_v19  ;;  %v5057_v29 = vadd.f32 %v19850_v45, %v16772_v42  ;;  %v6762_v19 = vld [vmem:[#allocation2 + $0x1a8] sm:$0xff]  ;;  %v6763_v45 = vld [vmem:[#allocation2 + $0x1b0] sm:$0xff] }
 0x33f   :  { %v17287_v63 = vadd.f32 %v13185_v7, %v5055_v10  ;;  %13434 = vmatprep.mubr.msk.f32.mxu1 %vm791_vm2, %v6760_v39  ;;  %v19851_v10 = vld [vmem:[#allocation118_spill] sm:$0xff]  ;;  %v17304_v39 = vpop.f32.mrf.mxu0 }
 0x340   :  { %v5555_v49 = vpop.f32.mrf.mxu1  ;;  %v5056_v1 = vadd.f32 %v19851_v10, %v16783_v59 }
 0x341   :  { %v17294_v3 = vadd.f32 %v5555_v49, %v5054_v24  ;;  %v19852_v49 = vld [vmem:[#allocation66_spill] sm:$0xff] }
 0x342   :  { %v13188_v37 = vpop.f32.mrf.mxu1  ;;  %13435 = vmatmul.mubr.msk.f32.gmra.mxu1 %vm791_vm2, %v6761_v23  ;;  %v5059_v42 = vadd.f32 %v19852_v49, %v16794_v12  ;;  %v6764_v23 = vld [vmem:[#allocation2 + $0x1b8] sm:$0xff]  ;;  %v6766_v12 = vld [vmem:[#allocation2 + $0x1c8] sm:$0xff] }
 0x343   :  { %v17299_v7 = vadd.f32 %v13188_v37, %v5057_v29  ;;  %13437 = vmatprep.mubr.msk.f32.mxu1 %vm791_vm2, %v6762_v19  ;;  %v17314_v29 = vpop.f32.mrf.mxu0  ;;  %v19853_v19 = vld [vmem:[#allocation71_spill] sm:$0xff] }
 0x344   :  { %v5565_v17 = vpop.f32.mrf.mxu1  ;;  %v5061_v10 = vadd.f32 %v19853_v19, %v16816_v14  ;;  %v6768_v14 = vld [vmem:[#allocation2 + $0x1d8] sm:$0xff] }
 0x345   :  { %v17306_v24 = vadd.f32 %v5565_v17, %v5056_v1  ;;  %v6765_v1 = vld [vmem:[#allocation2 + $0x1c0] sm:$0xff] }
 0x346   :  { %v13191_v35 = vpop.f32.mrf.mxu1  ;;  %13438 = vmatmul.mubr.msk.f32.gmra.mxu1 %vm791_vm2, %v6763_v45  ;;  %v19856_v45 = vld [vmem:[#allocation181_spill] sm:$0xff] }
 0x347   :  { %v17311_v37 = vadd.f32 %v13191_v35, %v5059_v42  ;;  %13440 = vmatprep.mubr.msk.f32.mxu1 %vm791_vm2, %v6764_v23  ;;  %v17324_v35 = vpop.f32.mrf.mxu0  ;;  %v5063_v23 = vadd.f32 %v19856_v45, %v16838_v62  ;;  %v6770_v62 = vld [vmem:[#allocation2 + $0x1e8] sm:$0xff] }
 0x348   :  { %v17316_v59 = vpop.f32.mrf.mxu1  ;;  %19855 = vst [vmem:[#allocation141_spill] sm:$0xff] %v17324_v35  ;;  %v6769_v35 = vld [vmem:[#allocation2 + $0x1e0] sm:$0xff] }
 0x34a   :  { %v13194_v17 = vpop.f32.mrf.mxu1  ;;  %13441 = vmatmul.mubr.msk.f32.gmra.mxu1 %vm791_vm2, %v6765_v1 }
 0x34b   :  { %v17321_v49 = vadd.f32 %v13194_v17, %v5061_v10  ;;  %13443 = vmatprep.mubr.msk.f32.mxu1 %vm791_vm2, %v6766_v12  ;;  %v17334_v10 = vpop.f32.mrf.mxu0  ;;  %v19859_v17 = vld [vmem:[#allocation182_spill] sm:$0xff] }
 0x34c   :  { %v17326_v42 = vpop.f32.mrf.mxu1  ;;  %19858 = vst [vmem:[#allocation142_spill] sm:$0xff] %v17334_v10  ;;  %v5065_v12 = vadd.f32 %v19859_v17, %v16860_v52  ;;  %v6771_v10 = vld [vmem:[#allocation2 + $0x1f0] sm:$0xff]  ;;  %v6772_v52 = vld [vmem:[#allocation2 + $0x1f8] sm:$0xff] }
 0x34d   :  { %19854 = vst [vmem:[#allocation20_spill] sm:$0xff] %v17321_v49 }
 0x34e   :  { %v13197_v44 = vpop.f32.mrf.mxu1  ;;  %13444 = vmatmul.mubr.msk.f32.gmra.mxu1 %vm791_vm2, %v6767_v41 }
 0x34f   :  { %v17331_v19 = vadd.f32 %v13197_v44, %v5063_v23  ;;  %13446 = vmatprep.mubr.msk.f32.mxu1 %vm791_vm2, %v6768_v14  ;;  %v17344_v44 = vpop.f32.mrf.mxu0  ;;  %v19862_v23 = vld [vmem:[#allocation184_spill] sm:$0xff] }
 0x350   :  { %v17336_v1 = vpop.f32.mrf.mxu1  ;;  %19861 = vst [vmem:[#allocation197_spill] sm:$0xff] %v17344_v44  ;;  %v5067_v14 = vadd.f32 %v19862_v23, %v16882_v27  ;;  %v6773_v44 = vld [vmem:[#allocation2 + $0x200] sm:$0xff]  ;;  %v6774_v27 = vld [vmem:[#allocation2 + $0x208] sm:$0xff] }
 0x351   :  { %19857 = vst [vmem:[#allocation18_spill] sm:$0xff] %v17331_v19 }
 0x352   :  { %v13200_v49 = vpop.f32.mrf.mxu1  ;;  %13447 = vmatmul.mubr.msk.f32.gmra.mxu1 %vm791_vm2, %v6769_v35 }
 0x353   :  { %v17341_v45 = vadd.f32 %v13200_v49, %v5065_v12  ;;  %13449 = vmatprep.mubr.msk.f32.mxu1 %vm791_vm2, %v6770_v62  ;;  %v17354_v49 = vpop.f32.mrf.mxu0  ;;  %v19865_v12 = vld [vmem:[#allocation135_spill] sm:$0xff] }
 0x354   :  { %v17346_v41 = vpop.f32.mrf.mxu1  ;;  %19864 = vst [vmem:[#allocation143_spill] sm:$0xff] %v17354_v49  ;;  %v5069_v62 = vadd.f32 %v19865_v12, %v16904_v28  ;;  %v6775_v49 = vld [vmem:[#allocation2 + $0x210] sm:$0xff]  ;;  %v19871_v12 = vld [vmem:[#allocation188_spill] sm:$0xff] }
 0x355   :  { %19860 = vst [vmem:[#allocation22_spill] sm:$0xff] %v17341_v45 }
 0x356   :  { %v13203_v19 = vpop.f32.mrf.mxu1  ;;  %13450 = vmatmul.mubr.msk.f32.gmra.mxu1 %vm791_vm2, %v6771_v10 }
 0x357   :  { %v17351_v17 = vadd.f32 %v13203_v19, %v5067_v14  ;;  %13452 = vmatprep.mubr.msk.f32.mxu1 %vm791_vm2, %v6772_v52  ;;  %v17364_v19 = vpop.f32.mrf.mxu0  ;;  %v19868_v14 = vld [vmem:[#allocation186_spill] sm:$0xff] }
 0x358   :  { %v17356_v35 = vpop.f32.mrf.mxu1  ;;  %19867 = vst [vmem:[#allocation144_spill] sm:$0xff] %v17364_v19  ;;  %v5071_v52 = vadd.f32 %v19868_v14, %v16926_v20 }
 0x359   :  { %19863 = vst [vmem:[#allocation24_spill] sm:$0xff] %v17351_v17 }
 0x35a   :  { %v13206_v45 = vpop.f32.mrf.mxu1  ;;  %13453 = vmatmul.mubr.msk.f32.gmra.mxu1 %vm791_vm2, %v6773_v44  ;;  %v17374_v44 = vpop.f32.mrf.mxu0 }
 0x35b   :  { %v17361_v23 = vadd.f32 %v13206_v45, %v5069_v62  ;;  %13455 = vmatprep.mubr.msk.f32.mxu1 %vm791_vm2, %v6774_v27  ;;  %19870 = vst [vmem:[#allocation200_spill] sm:$0xff] %v17374_v44  ;;  %v5073_v62 = vadd.f32 %v19871_v12, %v16948_v22  ;;  %v19877_v22 = vld [vmem:[#allocation10_spill] sm:$0xff] }
 0x35c   :  { %v17366_v10 = vpop.f32.mrf.mxu1  ;;  %v17383_v20 = vpop.f32.mrf.mxu0  ;;  %v5077_v12 = vadd.f32 %v19877_v22, %v16982_v2 }
 0x35d   :  { %19866 = vst [vmem:[#allocation21_spill] sm:$0xff] %v17361_v23  ;;  %19873 = vst [vmem:[#allocation145_spill] sm:$0xff] %v17383_v20 }
 0x35e   :  { %v13209_v17 = vpop.f32.mrf.mxu1  ;;  %13456 = vmatmul.mubr.msk.f32.gmra.mxu1 %vm791_vm2, %v6775_v49  ;;  %v17391_v44 = vpop.f32.mrf.mxu0 }
 0x35f   :  { %v17371_v28 = vadd.f32 %v13209_v17, %v5071_v52  ;;  %13458 = vmatprep.mubr.f32.mxu1 %v19169_v60  ;;  %v19874_v17 = vld [vmem:[#allocation7_spill] sm:$0xff]  ;;  %19876 = vst [vmem:[#allocation146_spill] sm:$0xff] %v17391_v44 }
 0x360   :  { %v17376_v45 = vpop.f32.mrf.mxu1  ;;  %v5075_v49 = vadd.f32 %v19874_v17, %v16966_v16 }
 0x361   :  { %19869 = vst [vmem:[#allocation25_spill] sm:$0xff] %v17371_v28 }
 0x362   :  { %v13212_v27 = vpop.f32.mrf.mxu1  ;;  %13459 = vmatmul.mubr.f32.gmra.mxu1 %v19169_v60 }
 0x363   :  { %v17381_v19 = vadd.f32 %v13212_v27, %v5073_v62  ;;  %v17399_v27 = vpop.f32.mrf.mxu0 }
 0x364   :  { %v17385_v14 = vpop.f32.mrf.mxu1  ;;  %19879 = vst [vmem:[#allocation203_spill] sm:$0xff] %v17399_v27 }
 0x365   :  { %19872 = vst [vmem:[#allocation26_spill] sm:$0xff] %v17381_v19  ;;  %v19880_v19 = vld [vmem:[#allocation13_spill] sm:$0xff] }
 0x366   :  { %v13215_v52 = vpop.f32.mrf.mxu1  ;;  %v5079_v16 = vadd.f32 %v19880_v19, %v16998_v55 }
 0x367   :  { %v17389_v28 = vadd.f32 %v13215_v52, %v5075_v49  ;;  %v17407_v52 = vpop.f32.mrf.mxu0 }
 0x368   :  { %v17393_v23 = vpop.f32.mrf.mxu1  ;;  %19882 = vst [vmem:[#allocation147_spill] sm:$0xff] %v17407_v52 }
 0x369   :  { %19875 = vst [vmem:[#allocation23_spill] sm:$0xff] %v17389_v28  ;;  %v19883_v28 = vld [vmem:[#allocation193_spill] sm:$0xff] }
 0x36a   :  { %v13218_v60 = vpop.f32.mrf.mxu1  ;;  %v5081_v2 = vadd.f32 %v19883_v28, %v17014_v40 }
 0x36b   :  { %v17397_v62 = vadd.f32 %v13218_v60, %v5077_v12  ;;  %v17415_v12 = vpop.f32.mrf.mxu0 }
 0x36c   :  { %v17401_v20 = vpop.f32.mrf.mxu1  ;;  %19885 = vst [vmem:[#allocation148_spill] sm:$0xff] %v17415_v12 }
 0x36d   :  { %19878 = vst [vmem:[#allocation28_spill] sm:$0xff] %v17397_v62  ;;  %v19886_v62 = vld [vmem:[#allocation196_spill] sm:$0xff] }
 0x36e   :  { %v13221_v17 = vpop.f32.mrf.mxu1  ;;  %v5083_v55 = vadd.f32 %v19886_v62, %v17030_v48 }
 0x36f   :  { %v17405_v49 = vadd.f32 %v13221_v17, %v5079_v16  ;;  %v17423_v17 = vpop.f32.mrf.mxu0 }
 0x370   :  { %v17409_v44 = vpop.f32.mrf.mxu1  ;;  %19888 = vst [vmem:[#allocation206_spill] sm:$0xff] %v17423_v17 }
 0x371   :  { %19881 = vst [vmem:[#allocation29_spill] sm:$0xff] %v17405_v49  ;;  %v19890_v49 = vld [vmem:[#allocation199_spill] sm:$0xff] }
 0x372   :  { %v13224_v22 = vpop.f32.mrf.mxu1  ;;  %v5085_v40 = vadd.f32 %v19890_v49, %v17046_v50  ;;  %v19899_v49 = vld [vmem:[#allocation205_spill] sm:$0xff] }
 0x373   :  { %v17413_v60 = vadd.f32 %v13224_v22, %v5081_v2  ;;  %v17431_v22 = vpop.f32.mrf.mxu0 }
 0x374   :  { %v17417_v27 = vpop.f32.mrf.mxu1  ;;  %19892 = vst [vmem:[#allocation30_spill] sm:$0xff] %v17431_v22 }
 0x375   :  { %19884 = vst [vmem:[#allocation27_spill] sm:$0xff] %v17413_v60  ;;  %v19894_v60 = vld [vmem:[#allocation202_spill] sm:$0xff] }
 0x376   :  { %v13227_v19 = vpop.f32.mrf.mxu1  ;;  %v5087_v48 = vadd.f32 %v19894_v60, %v17062_v34 }
 0x377   :  { %v17421_v16 = vadd.f32 %v13227_v19, %v5083_v55  ;;  %v19896_v19 = vld [vmem:[#allocation204_spill] sm:$0xff] }
 0x378   :  { %v17425_v52 = vpop.f32.mrf.mxu1 }
 0x379   :  { %19887 = vst [vmem:[#allocation31_spill] sm:$0xff] %v17421_v16  ;;  %19889 = vst [vmem:[#allocation33_spill] sm:$0xff] %v17425_v52  ;;  %v5086_v16 = vadd.f32 %v19896_v19, %v17070_v36  ;;  %v17441_v52 = vpop.f32.mrf.mxu0  ;;  %v19904_v36 = vld [vmem:[#allocation208_spill] sm:$0xff] }
 0x37a   :  { %v13230_v28 = vpop.f32.mrf.mxu1  ;;  %19897 = vst [vmem:[#allocation209_spill] sm:$0xff] %v17441_v52  ;;  %v5091_v19 = vadd.f32 %v19904_v36, %v17094_v58  ;;  %v19986_v52 = vld [vmem:[#allocation185_spill] sm:$0xff] }
 0x37b   :  { %v17429_v2 = vadd.f32 %v13230_v28, %v5085_v40  ;;  %v5089_v40 = vadd.f32 %v19899_v49, %v17078_v25  ;;  %v17451_v60 = vpop.f32.mrf.mxu0 }
 0x37c   :  { %v17433_v12 = vpop.f32.mrf.mxu1  ;;  %19902 = vst [vmem:[#allocation32_spill] sm:$0xff] %v17451_v60  ;;  %v19995_v60 = vld [vmem:[#allocation122_spill] sm:$0xff] }
 0x37d   :  { %19891 = vst [vmem:[#allocation149_spill] sm:$0xff] %v17429_v2  ;;  %19893 = vst [vmem:[#allocation150_spill] sm:$0xff] %v17433_v12  ;;  %v19901_v12 = vld [vmem:[#allocation207_spill] sm:$0xff]  ;;  %v17461_v49 = vpop.f32.mrf.mxu0 }
 0x37e   :  { %v13233_v62 = vpop.f32.mrf.mxu1  ;;  %v5088_v34 = vadd.f32 %v19901_v12, %v17086_v6  ;;  %19907 = vst [vmem:[#allocation212_spill] sm:$0xff] %v17461_v49  ;;  %v19909_v6 = vld [vmem:[#allocation211_spill] sm:$0xff]  ;;  %v19994_v49 = vld [vmem:[#allocation190_spill] sm:$0xff] }
 0x37f   :  { %v17437_v55 = vadd.f32 %v13233_v62, %v5087_v48  ;;  %v5093_v12 = vadd.f32 %v19909_v6, %v17110_v5  ;;  %v17471_v36 = vpop.f32.mrf.mxu0 }
 0x380   :  { %v5715_v17 = vpop.f32.mrf.mxu1 }
 0x381   :  { %19895 = vst [vmem:[#allocation34_spill] sm:$0xff] %v17437_v55  ;;  %v17443_v50 = vadd.f32 %v5715_v17, %v5086_v16  ;;  %v19906_v17 = vld [vmem:[#allocation210_spill] sm:$0xff]  ;;  %v17481_v6 = vpop.f32.mrf.mxu0 }
 0x382   :  { %v13236_v28 = vpop.f32.mrf.mxu1  ;;  %v5090_v25 = vadd.f32 %v19906_v17, %v17102_v18  ;;  %v19913_v18 = vld [vmem:[#allocation214_spill] sm:$0xff]  ;;  %19916 = vst [vmem:[#allocation87_spill] sm:$0xff] %v17481_v6 }
 0x383   :  { %19898 = vst [vmem:[#allocation35_spill] sm:$0xff] %v17443_v50  ;;  %v17447_v2 = vadd.f32 %v13236_v28, %v5089_v40  ;;  %v5095_v17 = vadd.f32 %v19913_v18, %v17126_v53  ;;  %v17491_v18 = vpop.f32.mrf.mxu0 }
 0x384   :  { %v5725_v48 = vpop.f32.mrf.mxu1 }
 0x385   :  { %19900 = vst [vmem:[#allocation151_spill] sm:$0xff] %v17447_v2  ;;  %v17453_v62 = vadd.f32 %v5725_v48, %v5088_v34  ;;  %v19911_v48 = vld [vmem:[#allocation213_spill] sm:$0xff] }
 0x386   :  { %v13239_v55 = vpop.f32.mrf.mxu1  ;;  %v5092_v58 = vadd.f32 %v19911_v48, %v17118_v56  ;;  %v19918_v56 = vld [vmem:[#allocation217_spill] sm:$0xff] }
 0x387   :  { %19903 = vst [vmem:[#allocation152_spill] sm:$0xff] %v17453_v62  ;;  %v17457_v16 = vadd.f32 %v13239_v55, %v5091_v19  ;;  %v5097_v48 = vadd.f32 %v19918_v56, %v17142_v9  ;;  %v17501_v56 = vpop.f32.mrf.mxu0 }
 0x388   :  { %v5735_v40 = vpop.f32.mrf.mxu1 }
 0x389   :  { %19905 = vst [vmem:[#allocation37_spill] sm:$0xff] %v17457_v16  ;;  %v17463_v28 = vadd.f32 %v5735_v40, %v5090_v25  ;;  %v19915_v40 = vld [vmem:[#allocation216_spill] sm:$0xff] }
 0x38a   :  { %v13242_v50 = vpop.f32.mrf.mxu1  ;;  %v5094_v5 = vadd.f32 %v19915_v40, %v17134_v51  ;;  %v19922_v51 = vld [vmem:[#allocation83_spill] sm:$0xff]  ;;  %v19923_v40 = vld [vmem:[#allocation220_spill] sm:$0xff] }
 0x38b   :  { %19908 = vst [vmem:[#allocation38_spill] sm:$0xff] %v17463_v28  ;;  %v17467_v34 = vadd.f32 %v13242_v50, %v5093_v12 }
 0x38c   :  { %v5745_v55 = vpop.f32.mrf.mxu1 }
 0x38d   :  { %19910 = vst [vmem:[#allocation153_spill] sm:$0xff] %v17467_v34  ;;  %v17473_v19 = vadd.f32 %v5745_v55, %v5092_v58  ;;  %v19920_v55 = vld [vmem:[#allocation219_spill] sm:$0xff] }
 0x38e   :  { %v13245_v16 = vpop.f32.mrf.mxu1  ;;  %v5096_v53 = vadd.f32 %v19920_v55, %v17150_v54  ;;  %v19928_v54 = vld [vmem:[#allocation223_spill] sm:$0xff] }
 0x38f   :  { %19912 = vst [vmem:[#allocation36_spill] sm:$0xff] %v17473_v19  ;;  %v17477_v25 = vadd.f32 %v13245_v16, %v5095_v17  ;;  %v5099_v19 = vadd.f32 %v19923_v40, %v19922_v51  ;;  %v5101_v55 = vadd.f32 %v19928_v54, %v17174_v0  ;;  %v17511_v40 = vpop.f32.mrf.mxu0 }
 0x390   :  { %v5755_v50 = vpop.f32.mrf.mxu1 }
 0x391   :  { %19914 = vst [vmem:[#allocation154_spill] sm:$0xff] %v17477_v25  ;;  %v17483_v12 = vadd.f32 %v5755_v50, %v5094_v5  ;;  %v19925_v50 = vld [vmem:[#allocation84_spill] sm:$0xff]  ;;  %v17521_v54 = vpop.f32.mrf.mxu0 }
 0x392   :  { %v13248_v28 = vpop.f32.mrf.mxu1 }
 0x393   :  { %19917 = vst [vmem:[#allocation215_spill] sm:$0xff] %v17483_v12  ;;  %v17487_v58 = vadd.f32 %v13248_v28, %v5097_v48  ;;  %v19926_v12 = vld [vmem:[#allocation222_spill] sm:$0xff] }
 0x394   :  { %v5765_v16 = vpop.f32.mrf.mxu1  ;;  %v5098_v9 = vadd.f32 %v19926_v12, %v19925_v50  ;;  %v19932_v12 = vld [vmem:[#allocation89_spill] sm:$0xff] }
 0x395   :  { %19919 = vst [vmem:[#allocation40_spill] sm:$0xff] %v17487_v58  ;;  %v17493_v17 = vadd.f32 %v5765_v16, %v5096_v53  ;;  %v19930_v16 = vld [vmem:[#allocation225_spill] sm:$0xff]  ;;  %v5103_v50 = vadd.f32 %v19932_v12, %v17190_v26  ;;  %v17531_v12 = vpop.f32.mrf.mxu0  ;;  %v19967_v58 = vld [vmem:[#allocation6_spill] sm:$0xff] }
 0x396   :  { %v13251_v34 = vpop.f32.mrf.mxu1  ;;  %v5100_v51 = vadd.f32 %v19930_v16, %v17182_v38  ;;  %v19936_v38 = vld [vmem:[#allocation92_spill] sm:$0xff] }
 0x397   :  { %19921 = vst [vmem:[#allocation42_spill] sm:$0xff] %v17493_v17  ;;  %v17497_v5 = vadd.f32 %v13251_v34, %v5099_v19  ;;  %v5105_v16 = vadd.f32 %v19936_v38, %v17202_v46  ;;  %v17541_v38 = vpop.f32.mrf.mxu0 }
 0x398   :  { %v5775_v28 = vpop.f32.mrf.mxu1 }
 0x399   :  { %19924 = vst [vmem:[#allocation39_spill] sm:$0xff] %v17497_v5  ;;  %v17503_v48 = vadd.f32 %v5775_v28, %v5098_v9  ;;  %v19934_v28 = vld [vmem:[#allocation226_spill] sm:$0xff] }
 0x39a   :  { %v13254_v25 = vpop.f32.mrf.mxu1  ;;  %v5102_v0 = vadd.f32 %v19934_v28, %v17196_v61  ;;  %v19940_v61 = vld [vmem:[#allocation93_spill] sm:$0xff] }
 0x39b   :  { %19927 = vst [vmem:[#allocation155_spill] sm:$0xff] %v17503_v48  ;;  %v17507_v53 = vadd.f32 %v13254_v25, %v5101_v55  ;;  %v6651_v28 = vadd.f32 %v19940_v61, %v17215_v32  ;;  %v17551_v61 = vpop.f32.mrf.mxu0 }
 0x39c   :  { %v5785_v34 = vpop.f32.mrf.mxu1  ;;  %19947 = vst [vmem:[#allocation159_spill] sm:$0xff] %v17551_v61 }
 0x39d   :  { %19929 = vst [vmem:[#allocation43_spill] sm:$0xff] %v17507_v53  ;;  %v17513_v19 = vadd.f32 %v5785_v34, %v5100_v51  ;;  %v19938_v34 = vld [vmem:[#allocation94_spill] sm:$0xff] }
 0x39e   :  { %v13257_v5 = vpop.f32.mrf.mxu1  ;;  %v5104_v26 = vadd.f32 %v19938_v34, %v17208_v8  ;;  %v19944_v8 = vld [vmem:[#allocation95_spill] sm:$0xff] }
 0x39f   :  { %19931 = vst [vmem:[#allocation218_spill] sm:$0xff] %v17513_v19  ;;  %v17517_v9 = vadd.f32 %v13257_v5, %v5103_v50  ;;  %v6653_v34 = vadd.f32 %v19944_v8, %v17227_v47  ;;  %v17561_v8 = vpop.f32.mrf.mxu0 }
 0x3a0   :  { %v5795_v25 = vpop.f32.mrf.mxu1  ;;  %19952 = vst [vmem:[#allocation88_spill] sm:$0xff] %v17561_v8  ;;  %v8457_v8 = vld [vmem:[%s19964_s3] sm:$0xff] }
 0x3a1   :  { %19933 = vst [vmem:[#allocation156_spill] sm:$0xff] %v17517_v9  ;;  %v17523_v55 = vadd.f32 %v5795_v25, %v5102_v0  ;;  %v19942_v25 = vld [vmem:[#allocation48_spill] sm:$0xff] }
 0x3a2   :  { %v13260_v48 = vpop.f32.mrf.mxu1  ;;  %v6650_v46 = vadd.f32 %v19942_v25, %v17222_v31  ;;  %v19949_v31 = vld [vmem:[#allocation97_spill] sm:$0xff] }
 0x3a3   :  { %19935 = vst [vmem:[#allocation157_spill] sm:$0xff] %v17523_v55  ;;  %v17527_v51 = vadd.f32 %v13260_v48, %v5105_v16  ;;  %v6655_v25 = vadd.f32 %v19949_v31, %v17239_v4  ;;  %v17569_v4 = vpop.f32.mrf.mxu0 }
 0x3a4   :  { %v5805_v5 = vpop.f32.mrf.mxu1  ;;  %19956 = vst [vmem:[#allocation161_spill] sm:$0xff] %v17569_v4 }
 0x3a5   :  { %19937 = vst [vmem:[#allocation41_spill] sm:$0xff] %v17527_v51  ;;  %v17533_v50 = vadd.f32 %v5805_v5, %v5104_v26  ;;  %v19946_v5 = vld [vmem:[#allocation96_spill] sm:$0xff] }
 0x3a6   :  { %v13367_v19 = vpop.f32.mrf.mxu1  ;;  %v6652_v32 = vadd.f32 %v19946_v5, %v17234_v11  ;;  %v19954_v11 = vld [vmem:[#allocation49_spill] sm:$0xff] }
 0x3a7   :  { %19939 = vst [vmem:[#allocation158_spill] sm:$0xff] %v17533_v50  ;;  %v17537_v0 = vadd.f32 %v13367_v19, %v6651_v28  ;;  %v6657_v5 = vadd.f32 %v19954_v11, %v17251_v33 }
 0x3a8   :  { %v7103_v48 = vpop.f32.mrf.mxu1 }
 0x3a9   :  { %19941 = vst [vmem:[#allocation45_spill] sm:$0xff] %v17537_v0  ;;  %v17543_v16 = vadd.f32 %v7103_v48, %v6650_v46  ;;  %v19951_v48 = vld [vmem:[#allocation98_spill] sm:$0xff] }
 0x3aa   :  { %v13370_v53 = vpop.f32.mrf.mxu1  ;;  %v6654_v47 = vadd.f32 %v19951_v48, %v17246_v15 }
 0x3ab   :  { %19943 = vst [vmem:[#allocation221_spill] sm:$0xff] %v17543_v16  ;;  %v17547_v26 = vadd.f32 %v13370_v53, %v6653_v34 }
 0x3ac   :  { %v7113_v19 = vpop.f32.mrf.mxu1 }
 0x3ad   :  { %19945 = vst [vmem:[#allocation46_spill] sm:$0xff] %v17547_v26  ;;  %v17553_v28 = vadd.f32 %v7113_v19, %v6652_v32  ;;  %v19955_v19 = vld [vmem:[#allocation99_spill] sm:$0xff] }
 0x3ae   :  { %v13373_v50 = vpop.f32.mrf.mxu1  ;;  %v6656_v17 = vadd.f32 %v19955_v19, %v17258_v21  ;;  %v13802_v19 = vmov 1983009808  }
 0x3af   :  { %19948 = vst [vmem:[#allocation44_spill] sm:$0xff] %v17553_v28  ;;  %v17557_v46 = vadd.f32 %v13373_v50, %v6655_v25  ;;  %v19978_v28 = vld [vmem:[#allocation109_spill] sm:$0xff] }
 0x3b0   :  { %v7123_v53 = vpop.f32.mrf.mxu1 }
 0x3b1   :  { %19950 = vst [vmem:[#allocation160_spill] sm:$0xff] %v17557_v46  ;;  %v17563_v34 = vadd.f32 %v7123_v53, %v6654_v47  ;;  %v17579_v47 = vpop.f32.mrf.mxu0  ;;  %v19988_v46 = vld [vmem:[#allocation129_spill] sm:$0xff] }
 0x3b2   :  { %v13376_v61 = vpop.f32.mrf.mxu1  ;;  %19959 = vst [vmem:[#allocation163_spill] sm:$0xff] %v17579_v47 }
 0x3b3   :  { %19953 = vst [vmem:[#allocation224_spill] sm:$0xff] %v17563_v34  ;;  %v7429_v32 = vadd.f32 %v13376_v61, %v6657_v5  ;;  %v17585_v53 = vpop.f32.mrf.mxu0  ;;  %v19984_v34 = vld [vmem:[#allocation183_spill] sm:$0xff] }
 0x3b4   :  { %v7133_v50 = vpop.f32.mrf.mxu1  ;;  %19960 = vst [vmem:[#allocation164_spill] sm:$0xff] %v17585_v53  ;;  %v8459_v53 = vcombine.high %v8457_v8, %v8457_v8 }
 0x3b5   :  { %v17572_v31 = vadd.f32 %v17304_v39, %v7429_v32  ;;  %v7428_v15 = vadd.f32 %v7133_v50, %v6656_v17  ;;  %v17591_v39 = vpop.f32.mrf.mxu0  ;;  %v8461_v50 = vunpack.c.l.s4 %v13802_v19 }
 0x3b6   :  { %v17574_v25 = vpop.f32.mrf.mxu1  ;;  %19961 = vst [vmem:[#allocation91_spill] sm:$0xff] %v17591_v39 }
 0x3b7   :  { %19957 = vst [vmem:[#allocation162_spill] sm:$0xff] %v17572_v31  ;;  %v17577_v48 = vadd.f32 %v17314_v29, %v7428_v15  ;;  %v17597_v29 = vpop.f32.mrf.mxu0  ;;  %v8462_v47 = vunpack.c.0.s8 %v8461_v50  ;;  %v19987_v31 = vld [vmem:[#allocation55_spill] sm:$0xff] }
 0x3b8   :  { %v17581_v33 = vpop.f32.mrf.mxu1  ;;  %19962 = vst [vmem:[#allocation165_spill] sm:$0xff] %v17597_v29  ;;  %v5068_v29 = vadd.f32 %v19988_v46, %v19987_v31  ;;  %v19999_v46 = vld [vmem:[#allocation72_spill] sm:$0xff]  ;;  %v20000_v31 = vld [vmem:[#allocation195_spill] sm:$0xff] }
 0x3b9   :  { %19958 = vst [vmem:[#allocation47_spill] sm:$0xff] %v17577_v48  ;;  %v17606_v4 = vpop.f32.mrf.mxu0  ;;  %v8465_v51 = vsub.s32 %v8462_v47, %v19967_v58  ;;  %v19977_v58 = vld [vmem:[#allocation65_spill] sm:$0xff]  ;;  %v19982_v48 = vld [vmem:[#allocation79_spill] sm:$0xff]  ;;  %v5080_v6 = vadd.f32 %v20000_v31, %v19999_v46 }
 0x3ba   :  { %v17583_v61 = vpop.f32.mrf.mxu1  ;;  %19965 = vst [vmem:[#allocation167_spill] sm:$0xff] %v17606_v4  ;;  %v19985_v4 = vld [vmem:[#allocation116_spill] sm:$0xff]  ;;  %v20008_v31 = vld [vmem:[#allocation105_spill] sm:$0xff] }
 0x3bb   :  { %v17613_v9 = vrot.slane %v8459_v53, %v8465_v51  ;;  %v17615_v62 = vrot.slane %v8457_v8, %v8465_v51  ;;  %v17617_v19 = vpop.f32.mrf.mxu0  ;;  %v19976_v8 = vld [vmem:[#allocation51_spill] sm:$0xff] }
 0x3bc   :  { %v17587_v21 = vpop.f32.mrf.mxu1  ;;  %19971 = vst [vmem:[#allocation171_spill] sm:$0xff] %v17617_v19  ;;  %v5058_v19 = vadd.f32 %v19977_v58, %v19976_v8  ;;  %v19989_v58 = vld [vmem:[#allocation57_spill] sm:$0xff]  ;;  %v19990_v8 = vld [vmem:[#allocation187_spill] sm:$0xff] }
 0x3bd   :  { %19969 = vst [vmem:[#allocation169_spill] sm:$0xff] %v17613_v9  ;;  %19970 = vst [vmem:[#allocation170_spill] sm:$0xff] %v17615_v62  ;;  %v8475_v50 = vcombine.high %v17613_v9, %v17613_v9  ;;  %v8474_v16 = vcombine.high %v17615_v62, %v17615_v62  ;;  %v17627_v47 = vpop.f32.mrf.mxu0  ;;  %v19981_v62 = vld [vmem:[#allocation111_spill] sm:$0xff]  ;;  %v5070_v22 = vadd.f32 %v19990_v8, %v19989_v58  ;;  %v20001_v58 = vld [vmem:[#allocation100_spill] sm:$0xff] }
 0x3be   :  { %v17589_v11 = vpop.f32.mrf.mxu1  ;;  %19974 = vst [vmem:[#allocation174_spill] sm:$0xff] %v17627_v47  ;;  %v6659_v8 = vadd.f32 %v20001_v58, %v17263_v43  ;;  %v20006_v43 = vld [vmem:[#allocation103_spill] sm:$0xff]  ;;  %v17687_v58 = vadd.f32 %v17316_v59, %v5058_v19  ;;  %v20016_v59 = vld [vmem:[#allocation52_spill] sm:$0xff] }
 0x3bf   :  { %8614 = vmatprep.mubr.f32.mxu0 %v8475_v50  ;;  %8544 = vmatprep.mubr.f32.mxu1 %v8474_v16  ;;  %v17637_v9 = vpop.f32.mrf.mxu0  ;;  %v5062_v50 = vadd.f32 %v19982_v48, %v19981_v62  ;;  %v19983_v16 = vld [vmem:[#allocation114_spill] sm:$0xff]  ;;  %v19996_v62 = vld [vmem:[#allocation191_spill] sm:$0xff]  ;;  %v6663_v46 = vadd.f32 %v20006_v43, %v17287_v63  ;;  %v5840_v63 = vadd.f32 %v17366_v10, %v5068_v29  ;;  %v20021_v10 = vld [vmem:[#allocation113_spill] sm:$0xff] }
 0x3c0   :  { %v17593_v17 = vpop.f32.mrf.mxu1  ;;  %19980 = vst [vmem:[#allocation176_spill] sm:$0xff] %v17637_v9  ;;  %v5064_v47 = vadd.f32 %v19984_v34, %v19983_v16  ;;  %v5076_v48 = vadd.f32 %v19996_v62, %v19995_v60  ;;  %20009 = vst [vmem:[#allocation178_spill] sm:$0xff] %v17687_v58  ;;  %v20014_v43 = vld [vmem:[#allocation110_spill] sm:$0xff] }
 0x3c1   :  { %v20035_v58 = vld [vmem:[#allocation26_spill] sm:$0xff] }
 0x3c2   :  { %v17595_v5 = vpop.f32.mrf.mxu1 }
 0x3c4   :  { %v17599_v32 = vpop.f32.mrf.mxu1 }
 0x3c6   :  { %v17601_v15 = vpop.f32.mrf.mxu1 }
 0x3c7   :  { %19963 = vst [vmem:[#allocation166_spill] sm:$0xff] %v17601_v15 }
 0x3c8   :  { %v17608_v39 = vpop.f32.mrf.mxu1 }
 0x3c9   :  { %19966 = vst [vmem:[#allocation90_spill] sm:$0xff] %v17608_v39  ;;  %v19979_v39 = vld [vmem:[#allocation76_spill] sm:$0xff] }
 0x3ca   :  { %v17611_v55 = vpop.f32.mrf.mxu1  ;;  %v5060_v26 = vadd.f32 %v19979_v39, %v19978_v28  ;;  %v19991_v28 = vld [vmem:[#allocation119_spill] sm:$0xff]  ;;  %v19992_v39 = vld [vmem:[#allocation189_spill] sm:$0xff] }
 0x3cb   :  { %19968 = vst [vmem:[#allocation168_spill] sm:$0xff] %v17611_v55  ;;  %v5072_v9 = vadd.f32 %v19992_v39, %v19991_v28  ;;  %v19993_v55 = vld [vmem:[#allocation69_spill] sm:$0xff]  ;;  %v5834_v28 = vadd.f32 %v17336_v1, %v5062_v50  ;;  %v17667_v39 = vpop.f32.mrf.mxu0  ;;  %v20007_v1 = vld [vmem:[#allocation104_spill] sm:$0xff] }
 0x3cc   :  { %v17619_v2 = vpop.f32.mrf.mxu1  ;;  %v5832_v34 = vadd.f32 %v17326_v42, %v5060_v26  ;;  %20002 = vst [vmem:[#allocation177_spill] sm:$0xff] %v17667_v39  ;;  %v20005_v42 = vld [vmem:[#allocation50_spill] sm:$0xff]  ;;  %v6662_v50 = vadd.f32 %v20007_v1, %v17294_v3  ;;  %v5842_v3 = vadd.f32 %v17376_v45, %v5070_v22  ;;  %v20020_v1 = vld [vmem:[#allocation112_spill] sm:$0xff]  ;;  %v5848_v22 = vadd.f32 %v17401_v20, %v5076_v48  ;;  %v20031_v48 = vld [vmem:[#allocation117_spill] sm:$0xff] }
 0x3cd   :  { %19972 = vst [vmem:[#allocation172_spill] sm:$0xff] %v17619_v2  ;;  %v5066_v2 = vadd.f32 %v19986_v52, %v19985_v4  ;;  %v19997_v52 = vld [vmem:[#allocation68_spill] sm:$0xff]  ;;  %v17675_v26 = vadd.f32 %v20005_v42, %v17282_v30  ;;  %v20010_v30 = vld [vmem:[#allocation106_spill] sm:$0xff]  ;;  %v17714_v29 = vadd.f32 %v20021_v10, %v5834_v28 }
 0x3ce   :  { %v17625_v0 = vpop.f32.mrf.mxu1  ;;  %v19998_v4 = vld [vmem:[#allocation192_spill] sm:$0xff]  ;;  %v17703_v19 = vadd.f32 %v20016_v59, %v5832_v34 }
 0x3cf   :  { %19973 = vst [vmem:[#allocation173_spill] sm:$0xff] %v17625_v0  ;;  %v5078_v16 = vadd.f32 %v19998_v4, %v19997_v52  ;;  %v5836_v4 = vadd.f32 %v17346_v41, %v5064_v47  ;;  %v20013_v42 = vld [vmem:[#allocation20_spill] sm:$0xff]  ;;  %20022 = vst [vmem:[#allocation118_spill] sm:$0xff] %v17714_v29  ;;  %v20044_v29 = vld [vmem:[#allocation29_spill] sm:$0xff] }
 0x3d0   :  { %v17629_v53 = vpop.f32.mrf.mxu1  ;;  %20017 = vst [vmem:[#allocation61_spill] sm:$0xff] %v17703_v19  ;;  %v20030_v10 = vld [vmem:[#allocation56_spill] sm:$0xff] }
 0x3d1   :  { %19975 = vst [vmem:[#allocation175_spill] sm:$0xff] %v17629_v53  ;;  %v5074_v53 = vadd.f32 %v19994_v49, %v19993_v55  ;;  %v20003_v49 = vld [vmem:[#allocation101_spill] sm:$0xff]  ;;  %v20004_v55 = vld [vmem:[#allocation102_spill] sm:$0xff]  ;;  %v20036_v19 = vld [vmem:[#allocation120_spill] sm:$0xff] }
 0x3d2   :  { %v17631_v51 = vpop.f32.mrf.mxu1  ;;  %v6658_v60 = vadd.f32 %v20003_v49, %v17270_v13  ;;  %v6661_v62 = vadd.f32 %v20004_v55, %v17275_v57  ;;  %v6665_v13 = vadd.f32 %v20008_v31, %v17299_v7  ;;  %v5838_v57 = vadd.f32 %v17356_v35, %v5066_v2  ;;  %v20011_v55 = vld [vmem:[#allocation107_spill] sm:$0xff]  ;;  %v17707_v2 = vpop.f32.mrf.mxu0 }
 0x3d3   :  { %v6664_v49 = vadd.f32 %v20010_v30, %v17306_v24  ;;  %v17694_v41 = vadd.f32 %v20011_v55, %v17311_v37  ;;  %v17700_v7 = vadd.f32 %v20014_v43, %v20013_v42  ;;  %v5844_v35 = vadd.f32 %v17385_v14, %v5072_v9  ;;  %20018 = vst [vmem:[#allocation63_spill] sm:$0xff] %v17707_v2  ;;  %v20019_v37 = vld [vmem:[#allocation18_spill] sm:$0xff]  ;;  %v20024_v55 = vld [vmem:[#allocation53_spill] sm:$0xff]  ;;  %v20025_v42 = vld [vmem:[#allocation115_spill] sm:$0xff] }
 0x3d4   :  { %v17639_v15 = vpop.f32.mrf.mxu1  ;;  %v5846_v24 = vadd.f32 %v17393_v23, %v5074_v53  ;;  %v17711_v31 = vadd.f32 %v20020_v1, %v20019_v37  ;;  %v20023_v30 = vld [vmem:[#allocation22_spill] sm:$0xff]  ;;  %v17722_v14 = vadd.f32 %v20025_v42, %v5836_v4  ;;  %v20026_v23 = vld [vmem:[#allocation24_spill] sm:$0xff]  ;;  %v5850_v43 = vadd.f32 %v17409_v44, %v5078_v16  ;;  %v20029_v1 = vld [vmem:[#allocation21_spill] sm:$0xff] }
 0x3d5   :  { %20012 = vst [vmem:[#allocation179_spill] sm:$0xff] %v17694_v41  ;;  %20015 = vst [vmem:[#allocation180_spill] sm:$0xff] %v17700_v7  ;;  %v17719_v34 = vadd.f32 %v20024_v55, %v20023_v30  ;;  %v20027_v9 = vld [vmem:[#allocation54_spill] sm:$0xff]  ;;  %v7437_v59 = vadd.f32 %v17595_v5, %v6665_v13  ;;  %v6677_v39 = vadd.f32 %v20030_v10, %v20029_v1  ;;  %v20032_v30 = vld [vmem:[#allocation25_spill] sm:$0xff] }
 0x3d6   :  { %v17657_v0 = vpop.f32.mrf.mxu1  ;;  %v6675_v53 = vadd.f32 %v20027_v9, %v20026_v23  ;;  %v20028_v37 = vld [vmem:[#allocation58_spill] sm:$0xff]  ;;  %v6676_v2 = vadd.f32 %v20031_v48, %v5840_v63  ;;  %v20033_v55 = vld [vmem:[#allocation60_spill] sm:$0xff]  ;;  %v20034_v4 = vld [vmem:[#allocation59_spill] sm:$0xff]  ;;  %v6681_v23 = vadd.f32 %v20036_v19, %v20035_v58  ;;  %v17737_v9 = vpop.f32.mrf.mxu0  ;;  %v7436_v44 = vadd.f32 %v17599_v32, %v6664_v49 }
 0x3d7   :  { %v6674_v28 = vadd.f32 %v20028_v37, %v5838_v57  ;;  %v6679_v41 = vadd.f32 %v20033_v55, %v20032_v30  ;;  %v6678_v42 = vadd.f32 %v20034_v4, %v5842_v3  ;;  %v20037_v16 = vld [vmem:[#allocation62_spill] sm:$0xff]  ;;  %v20038_v57 = vld [vmem:[#allocation23_spill] sm:$0xff]  ;;  %v20039_v37 = vld [vmem:[#allocation64_spill] sm:$0xff]  ;;  %v17752_v32 = vadd.f32 %v17417_v27, %v5080_v6 }
 0x3d8   :  { %v17677_v52 = vpop.f32.mrf.mxu1  ;;  %v6680_v13 = vadd.f32 %v20037_v16, %v5844_v35  ;;  %v6683_v1 = vadd.f32 %v20039_v37, %v20038_v57  ;;  %v20040_v10 = vld [vmem:[#allocation121_spill] sm:$0xff]  ;;  %v20041_v7 = vld [vmem:[#allocation28_spill] sm:$0xff]  ;;  %v20042_v30 = vld [vmem:[#allocation67_spill] sm:$0xff]  ;;  %v7435_v49 = vadd.f32 %v17589_v11, %v6663_v46  ;;  %v17767_v27 = vadd.f32 %v17581_v33, %v6658_v60 }
 0x3d9   :  { %v6682_v63 = vadd.f32 %v20040_v10, %v5846_v24  ;;  %v6685_v55 = vadd.f32 %v20042_v30, %v20041_v7  ;;  %v20043_v3 = vld [vmem:[#allocation73_spill] sm:$0xff]  ;;  %v20045_v58 = vld [vmem:[#allocation70_spill] sm:$0xff]  ;;  %v20047_v37 = vld [vmem:[#allocation123_spill] sm:$0xff]  ;;  %v7434_v6 = vadd.f32 %v17593_v17, %v6662_v50  ;;  %v7432_v33 = vadd.f32 %v17587_v21, %v17675_v26 }
 0x3da   :  { %v13406_v47 = vpop.f32.mrf.mxu1  ;;  %v6684_v4 = vadd.f32 %v20043_v3, %v5848_v22  ;;  %v17749_v19 = vadd.f32 %v20045_v58, %v20044_v29  ;;  %v20046_v35 = vld [vmem:[#allocation145_spill] sm:$0xff]  ;;  %v17757_v24 = vadd.f32 %v20047_v37, %v5850_v43  ;;  %v20048_v22 = vld [vmem:[#allocation27_spill] sm:$0xff]  ;;  %v17764_v29 = vpop.f32.mrf.mxu0  ;;  %v20050_v11 = vld [vmem:[#allocation146_spill] sm:$0xff]  ;;  %v7447_v26 = vadd.f32 %v17657_v0, %v6675_v53 }
 0x3db   :  { %v8273_v16 = vadd.f32 %v20046_v35, %v7437_v59  ;;  %v20049_v10 = vld [vmem:[#allocation75_spill] sm:$0xff]  ;;  %v8272_v46 = vadd.f32 %v20050_v11, %v7436_v44  ;;  %v7449_v59 = vadd.f32 %v13406_v47, %v6677_v39  ;;  %v20051_v17 = vld [vmem:[#allocation144_spill] sm:$0xff]  ;;  %v7445_v11 = vadd.f32 %v17631_v51, %v17719_v34 }
 0x3dc   :  { %v7233_v45 = vpop.f32.mrf.mxu1  ;;  %v17762_v30 = vadd.f32 %v20049_v10, %v20048_v22  ;;  %v8271_v60 = vadd.f32 %v20051_v17, %v7435_v49  ;;  %v20061_v51 = vld [vmem:[#allocation87_spill] sm:$0xff] }
 0x3dd   :  { %v7448_v50 = vadd.f32 %v7233_v45, %v6676_v2 }
 0x3de   :  { %v13409_v20 = vpop.f32.mrf.mxu1 }
 0x3df   :  { %v7451_v48 = vadd.f32 %v13409_v20, %v6679_v41  ;;  %v7431_v41 = vadd.f32 %v17574_v25, %v6659_v8  ;;  %v17774_v25 = vld [vmem:[%s18690_s6] ss:$0 sm:$0xff]  ;;  %v7433_v8 = vadd.f32 %v17583_v61, %v6661_v62  ;;  %v17788_v61 = vpop.f32.mrf.mxu0  ;;  %v8284_v0 = vadd.f32 %v17501_v56, %v7448_v50 }
 0x3e0   :  { %v7243_v5 = vpop.f32.mrf.mxu1  ;;  %v8344_v39 = vadd.f32 %v17774_v25, %v8273_v16  ;;  %v8343_v21 = vadd.f32 %v17774_v25, %v8272_v46  ;;  %v8342_v35 = vadd.f32 %v17774_v25, %v8271_v60  ;;  %v8283_v56 = vadd.f32 %v17471_v36, %v7447_v26  ;;  %v20068_v26 = vld [vmem:[#allocation175_spill] sm:$0xff] }
 0x3e1   :  { %v7450_v7 = vadd.f32 %v7243_v5, %v6678_v42  ;;  %v8287_v42 = vadd.f32 %v17511_v40, %v7451_v48  ;;  %v20055_v48 = vld [vmem:[#allocation197_spill] sm:$0xff] }
 0x3e2   :  { %v13412_v57 = vpop.f32.mrf.mxu1  ;;  %v8269_v49 = vadd.f32 %v20055_v48, %v7433_v8  ;;  %v8408_v16 = vmax.f32 %v8344_v39, 0.0 }
 0x3e3   :  { %v7453_v20 = vadd.f32 %v13412_v57, %v6681_v23  ;;  %v8286_v44 = vadd.f32 %v17521_v54, %v7450_v7  ;;  %v7446_v57 = vadd.f32 %v17677_v52, %v6674_v28  ;;  %v17805_v7 = vpop.f32.mrf.mxu0 }
 0x3e4   :  { %v7253_v43 = vpop.f32.mrf.mxu1  ;;  %20057 = vst [vmem:[#allocation182_spill] sm:$0xff] %v17805_v7  ;;  %v8340_v8 = vadd.f32 %v17774_v25, %v8269_v49  ;;  %v20128_v7 = vld [vmem:[#allocation127_spill] sm:$0xff] }
 0x3e5   :  { %v8289_v23 = vadd.f32 %v17531_v12, %v7453_v20  ;;  %v7452_v5 = vadd.f32 %v7253_v43, %v6680_v13  ;;  %v20053_v12 = vld [vmem:[#allocation200_spill] sm:$0xff]  ;;  %v8285_v13 = vadd.f32 %v17491_v18, %v7449_v59  ;;  %v20058_v20 = vld [vmem:[#allocation143_spill] sm:$0xff]  ;;  %v20060_v59 = vld [vmem:[#allocation141_spill] sm:$0xff]  ;;  %v8282_v34 = vadd.f32 %v20061_v51, %v7446_v57  ;;  %v17824_v17 = vpop.f32.mrf.mxu0 }
 0x3e6   :  { %v13415_v47 = vpop.f32.mrf.mxu1  ;;  %v8270_v62 = vadd.f32 %v20053_v12, %v7434_v6  ;;  %v8268_v22 = vadd.f32 %v20058_v20, %v7432_v33  ;;  %v8407_v6 = vmax.f32 %v8343_v21, 0.0  ;;  %v8267_v43 = vadd.f32 %v20060_v59, %v7431_v41  ;;  %20062 = vst [vmem:[#allocation135_spill] sm:$0xff] %v17824_v17  ;;  %v20063_v41 = vld [vmem:[#allocation142_spill] sm:$0xff]  ;;  %v20081_v51 = vld [vmem:[#allocation209_spill] sm:$0xff] }
 0x3e7   :  { %v8288_v3 = vadd.f32 %v17541_v38, %v7452_v5  ;;  %v17785_v58 = vadd.f32 %v13415_v47, %v6683_v1  ;;  %v8360_v40 = vadd.f32 %v17774_v25, %v8289_v23  ;;  %v8358_v1 = vadd.f32 %v17774_v25, %v8287_v42  ;;  %v20067_v21 = vld [vmem:[#allocation118_spill] sm:$0xff]  ;;  %v20125_v17 = vld [vmem:[#allocation9_spill] sm:$0xff] }
 0x3e8   :  { %v7263_v2 = vpop.f32.mrf.mxu1  ;;  %v8341_v10 = vadd.f32 %v17774_v25, %v8270_v62  ;;  %v8356_v46 = vadd.f32 %v17774_v25, %v8285_v13  ;;  %v8406_v42 = vmax.f32 %v8342_v35, 0.0  ;;  %v7444_v23 = vadd.f32 %v17639_v15, %v17722_v14  ;;  %v20064_v15 = vld [vmem:[#allocation173_spill] sm:$0xff]  ;;  %v17844_v35 = vpop.f32.mrf.mxu0 }
 0x3e9   :  { %20052 = vst [vmem:[#allocation66_spill] sm:$0xff] %v17785_v58  ;;  %v17794_v45 = vadd.f32 %v7263_v2, %v6682_v63  ;;  %v8424_v54 = vmax.f32 %v8360_v40, 0.0  ;;  %v8359_v38 = vadd.f32 %v17774_v25, %v8288_v3  ;;  %v8357_v63 = vadd.f32 %v17774_v25, %v8286_v44  ;;  %v20065_v44 = vld [vmem:[#allocation32_spill] sm:$0xff]  ;;  %20071 = vst [vmem:[#allocation188_spill] sm:$0xff] %v17844_v35 }
 0x3ea   :  { %v13418_v37 = vpop.f32.mrf.mxu1  ;;  %v8355_v33 = vadd.f32 %v17774_v25, %v8284_v0  ;;  %v8266_v60 = vadd.f32 %v20063_v41, %v17767_v27  ;;  %v8339_v39 = vadd.f32 %v17774_v25, %v8268_v22  ;;  %v8405_v50 = vmax.f32 %v8341_v10, 0.0  ;;  %v20073_v0 = vld [vmem:[#allocation168_spill] sm:$0xff] }
 0x3eb   :  { %20054 = vst [vmem:[#allocation71_spill] sm:$0xff] %v17794_v45  ;;  %v17802_v53 = vadd.f32 %v13418_v37, %v6685_v55  ;;  %12457 = vmatprep.subr.mxu1 %v8424_v54  ;;  %v8423_v18 = vmax.f32 %v8359_v38, 0.0  ;;  %v8422_v55 = vmax.f32 %v8358_v1, 0.0  ;;  %v7443_v14 = vadd.f32 %v20064_v15, %v17711_v31  ;;  %v20069_v31 = vld [vmem:[#allocation74_spill] sm:$0xff]  ;;  %v20070_v38 = vld [vmem:[#allocation212_spill] sm:$0xff]  ;;  %v20123_v45 = vld [vmem:[#allocation77_spill] sm:$0xff] }
 0x3ec   :  { %v7273_v52 = vpop.f32.mrf.mxu1  ;;  %12458 = vmatpush3.msra.mxu1 %v8408_v16  ;;  %v8420_v40 = vmax.f32 %v8356_v46, 0.0  ;;  %v8354_v12 = vadd.f32 %v17774_v25, %v8283_v56  ;;  %v8338_v62 = vadd.f32 %v17774_v25, %v8267_v43  ;;  %v8404_v27 = vmax.f32 %v8340_v8, 0.0  ;;  %v20072_v37 = vld [vmem:[#allocation180_spill] sm:$0xff]  ;;  %v20077_v56 = vld [vmem:[#allocation19_spill] sm:$0xff]  ;;  %v20078_v46 = vld [vmem:[#allocation162_spill] sm:$0xff] }
 0x3ed   :  { %20056 = vst [vmem:[#allocation181_spill] sm:$0xff] %v17802_v53  ;;  %v17812_v28 = vadd.f32 %v7273_v52, %v6684_v4  ;;  %12459 = vmatprep.subr.mxu1 %v8423_v18  ;;  %v8421_v4 = vmax.f32 %v8357_v63, 0.0  ;;  %v7442_v13 = vadd.f32 %v20068_v26, %v20067_v21  ;;  %v6688_v54 = vadd.f32 %v20069_v31, %v17752_v32  ;;  %v20074_v63 = vld [vmem:[#allocation30_spill] sm:$0xff]  ;;  %v20075_v32 = vld [vmem:[#allocation165_spill] sm:$0xff]  ;;  %v20076_v52 = vld [vmem:[#allocation160_spill] sm:$0xff] }
 0x3ee   :  { %v13421_v5 = vpop.f32.mrf.mxu1  ;;  %12460 = vmatpush3.msra.mxu1 %v8407_v6  ;;  %v8280_v1 = vadd.f32 %v20070_v38, %v7444_v23  ;;  %v8419_v48 = vmax.f32 %v8355_v33, 0.0  ;;  %v8353_v49 = vadd.f32 %v17774_v25, %v8282_v34  ;;  %v8337_v16 = vadd.f32 %v17774_v25, %v8266_v60  ;;  %v20079_v8 = vld [vmem:[#allocation61_spill] sm:$0xff]  ;;  %v20086_v15 = vld [vmem:[#allocation194_spill] sm:$0xff]  ;;  %v20090_v21 = vld [vmem:[#allocation179_spill] sm:$0xff] }
 0x3ef   :  { %20059 = vst [vmem:[#allocation184_spill] sm:$0xff] %v17812_v28  ;;  %v17821_v36 = vadd.f32 %v13421_v5, %v17749_v19  ;;  %12461 = vmatprep.subr.mxu1 %v8422_v55  ;;  %v8281_v19 = vadd.f32 %v20065_v44, %v7445_v11  ;;  %v8403_v57 = vmax.f32 %v8339_v39, 0.0  ;;  %v7441_v18 = vadd.f32 %v20073_v0, %v20072_v37  ;;  %v17867_v39 = vpop.f32.mrf.mxu0  ;;  %v20091_v26 = vld [vmem:[#allocation166_spill] sm:$0xff]  ;;  %v20135_v53 = vld [vmem:[#allocation41_spill] sm:$0xff] }
 0x3f0   :  { %v7283_v47 = vpop.f32.mrf.mxu1  ;;  %12462 = vmatpush3.msra.mxu1 %v8406_v42  ;;  %v8279_v20 = vadd.f32 %v20074_v63, %v7443_v14  ;;  %v8418_v6 = vmax.f32 %v8354_v12, 0.0  ;;  %v8263_v55 = vadd.f32 %v20077_v56, %v20076_v52  ;;  %v8336_v59 = vadd.f32 %v17774_v25, %v20078_v46  ;;  %v20080_v42 = vld [vmem:[#allocation172_spill] sm:$0xff]  ;;  %20084 = vst [vmem:[#allocation10_spill] sm:$0xff] %v17867_v39  ;;  %v20095_v37 = vld [vmem:[#allocation90_spill] sm:$0xff]  ;;  %v20099_v46 = vld [vmem:[#allocation203_spill] sm:$0xff] }
 0x3f1   :  { %v17833_v3 = vadd.f32 %v7283_v47, %v17757_v24  ;;  %12463 = vmatprep.subr.mxu1 %v8421_v4  ;;  %v8352_v11 = vadd.f32 %v17774_v25, %v8281_v19  ;;  %v8402_v43 = vmax.f32 %v8338_v62, 0.0  ;;  %v7440_v23 = vadd.f32 %v20080_v42, %v20079_v8  ;;  %v20082_v4 = vld [vmem:[#allocation167_spill] sm:$0xff]  ;;  %v20089_v12 = vld [vmem:[#allocation108_spill] sm:$0xff]  ;;  %v20096_v63 = vld [vmem:[#allocation206_spill] sm:$0xff] }
 0x3f2   :  { %v13424_v2 = vpop.f32.mrf.mxu1  ;;  %12464 = vmatpush3.msra.mxu1 %v8405_v50  ;;  %v8278_v34 = vadd.f32 %v20081_v51, %v7442_v13  ;;  %v8417_v41 = vmax.f32 %v8353_v49, 0.0  ;;  %v8351_v60 = vadd.f32 %v17774_v25, %v8280_v1  ;;  %v20085_v50 = vld [vmem:[#allocation224_spill] sm:$0xff]  ;;  %v20087_v47 = vld [vmem:[#allocation47_spill] sm:$0xff]  ;;  %v8401_v19 = vmax.f32 %v8337_v16, 0.0  ;;  %v20093_v1 = vld [vmem:[#allocation46_spill] sm:$0xff] }
 0x3f3   :  { %20066 = vst [vmem:[#allocation186_spill] sm:$0xff] %v17833_v3  ;;  %v7461_v24 = vadd.f32 %v13424_v2, %v17762_v30  ;;  %12465 = vmatprep.subr.mxu1 %v8420_v40  ;;  %v8262_v14 = vadd.f32 %v20086_v15, %v20085_v50  ;;  %v8335_v44 = vadd.f32 %v17774_v25, %v20087_v47  ;;  %v20088_v40 = vld [vmem:[#allocation178_spill] sm:$0xff]  ;;  %v20092_v2 = vld [vmem:[#allocation148_spill] sm:$0xff]  ;;  %v8400_v16 = vmax.f32 %v8336_v59, 0.0  ;;  %v20100_v42 = vld [vmem:[#allocation45_spill] sm:$0xff] }
 0x3f4   :  { %v7293_v22 = vpop.f32.mrf.mxu1  ;;  %12466 = vmatpush3.msra.mxu1 %v8404_v27  ;;  %v6666_v62 = vadd.f32 %v20089_v12, %v20088_v40  ;;  %v7439_v13 = vadd.f32 %v20091_v26, %v20090_v21  ;;  %v8277_v31 = vadd.f32 %v20092_v2, %v7441_v18  ;;  %v8350_v38 = vadd.f32 %v17774_v25, %v8279_v20  ;;  %v20097_v20 = vld [vmem:[#allocation44_spill] sm:$0xff]  ;;  %v20132_v39 = vld [vmem:[#allocation130_spill] sm:$0xff] }
 0x3f5   :  { %v17851_v10 = vadd.f32 %v20075_v32, %v7461_v24  ;;  %v7460_v30 = vadd.f32 %v7293_v22, %v6688_v54  ;;  %12467 = vmatprep.subr.mxu1 %v8419_v48  ;;  %v8416_v54 = vmax.f32 %v8352_v11, 0.0  ;;  %v20094_v24 = vld [vmem:[#allocation14_spill] sm:$0xff]  ;;  %v8334_v49 = vadd.f32 %v17774_v25, %v8263_v55 }
 0x3f6   :  { %v17860_v5 = vpop.f32.mrf.mxu1  ;;  %12468 = vmatpush3.msra.mxu1 %v8403_v57  ;;  %v8261_v48 = vadd.f32 %v20094_v24, %v20093_v1  ;;  %v7438_v0 = vadd.f32 %v20095_v37, %v6666_v62  ;;  %v8276_v22 = vadd.f32 %v20096_v63, %v7440_v23  ;;  %v8415_v32 = vmax.f32 %v8351_v60, 0.0  ;;  %v20101_v23 = vld [vmem:[#allocation16_spill] sm:$0xff]  ;;  %v20102_v60 = vld [vmem:[#allocation147_spill] sm:$0xff] }
 0x3f7   :  { %v17864_v33 = vadd.f32 %v20082_v4, %v7460_v30  ;;  %12469 = vmatprep.subr.mxu1 %v8418_v6  ;;  %v8349_v18 = vadd.f32 %v17774_v25, %v8278_v34  ;;  %v17889_v30 = vpop.f32.mrf.mxu0  ;;  %v20098_v6 = vld [vmem:[#allocation140_spill] sm:$0xff]  ;;  %v8333_v52 = vadd.f32 %v17774_v25, %v8262_v14  ;;  %v8399_v56 = vmax.f32 %v8335_v44, 0.0  ;;  %v20104_v44 = vld [vmem:[#allocation221_spill] sm:$0xff] }
 0x3f8   :  { %v17875_v27 = vpop.f32.mrf.mxu1  ;;  %12470 = vmatpush3.msra.mxu1 %v8402_v43  ;;  %v8260_v11 = vadd.f32 %v20098_v6, %v20097_v20  ;;  %v8275_v59 = vadd.f32 %v20099_v46, %v7439_v13  ;;  %v8414_v43 = vmax.f32 %v8350_v38, 0.0  ;;  %v8348_v8 = vadd.f32 %v17774_v25, %v8277_v31 }
 0x3f9   :  { %20083 = vst [vmem:[#allocation7_spill] sm:$0xff] %v17864_v33  ;;  %12471 = vmatprep.subr.mxu1 %v8417_v41  ;;  %v8259_v51 = vadd.f32 %v20101_v23, %v20100_v42  ;;  %v8332_v34 = vadd.f32 %v17774_v25, %v8261_v48  ;;  %v8398_v4 = vmax.f32 %v8334_v49, 0.0  ;;  %v8274_v50 = vadd.f32 %v20102_v60, %v7438_v0  ;;  %v17905_v47 = vpop.f32.mrf.mxu0  ;;  %v20144_v33 = vld [vmem:[#allocation15_spill] sm:$0xff] }
 0x3fa   :  { %v17884_v57 = vpop.f32.mrf.mxu1  ;;  %12472 = vmatpush3.msra.mxu1 %v8401_v19  ;;  %v8413_v15 = vmax.f32 %v8349_v18, 0.0  ;;  %v8347_v14 = vadd.f32 %v17774_v25, %v8276_v22  ;;  %20103 = vst [vmem:[#allocation13_spill] sm:$0xff] %v17905_v47  ;;  %v20105_v19 = vld [vmem:[#allocation17_spill] sm:$0xff]  ;;  %v8331_v12 = vadd.f32 %v17774_v25, %v8260_v11  ;;  %v8397_v62 = vmax.f32 %v8333_v52, 0.0  ;;  %v20108_v11 = vld [vmem:[#allocation170_spill] sm:$0xff] }
 0x3fb   :  { %12473 = vmatprep.subr.mxu1 %v8416_v54  ;;  %v8258_v40 = vadd.f32 %v20105_v19, %v20104_v44  ;;  %v8412_v26 = vmax.f32 %v8348_v8, 0.0  ;;  %v8346_v13 = vadd.f32 %v17774_v25, %v8275_v59  ;;  %v8330_v2 = vadd.f32 %v17774_v25, %v8259_v51  ;;  %v17915_v24 = vpop.f32.mrf.mxu0  ;;  %v20113_v44 = vld [vmem:[#allocation126_spill] sm:$0xff]  ;;  %v20114_v19 = vld [vmem:[#allocation201_spill] sm:$0xff] }
 0x3fc   :  { %v17894_v55 = vpop.f32.mrf.mxu1  ;;  %12474 = vmatpush3.msra.mxu1 %v8400_v16  ;;  %v8396_v31 = vmax.f32 %v8332_v34, 0.0  ;;  %v8411_v38 = vmax.f32 %v8347_v14, 0.0  ;;  %v8345_v1 = vadd.f32 %v17774_v25, %v8274_v50  ;;  %v8395_v49 = vmax.f32 %v8331_v12, 0.0  ;;  %v20111_v50 = vld [vmem:[#allocation124_spill] sm:$0xff] }
 0x3fd   :  { %12475 = vmatprep.subr.mxu1 %v8415_v32  ;;  %v8329_v48 = vadd.f32 %v17774_v25, %v8258_v40  ;;  %v8410_v37 = vmax.f32 %v8346_v13, 0.0  ;;  %v8394_v0 = vmax.f32 %v8330_v2, 0.0  ;;  %v17920_v32 = vpop.f32.mrf.mxu0  ;;  %v20109_v52 = vmov 0.0   ;;  %v20116_v13 = vld [vmem:[#allocation150_spill] sm:$0xff] }
 0x3fe   :  { %v17901_v41 = vpop.f32.mrf.mxu1  ;;  %12476 = vmatpush3.msra.mxu1 %v8399_v56  ;;  %v8409_v22 = vmax.f32 %v8345_v1, 0.0  ;;  %v5084_v40 = vadd.f32 %v20114_v19, %v20113_v44  ;;  %v20118_v1 = vld [vmem:[#allocation131_spill] sm:$0xff]  ;;  %v20124_v19 = vld [vmem:[#allocation156_spill] sm:$0xff] }
 0x3ff   :  { %12477 = vmatprep.subr.mxu1 %v8414_v43  ;;  %v8393_v18 = vmax.f32 %v8329_v48, 0.0  ;;  %v17928_v56 = vpop.f32.mrf.mxu0 }
 0x400   :  { %v17910_v21 = vpop.f32.mrf.mxu1  ;;  %12478 = vmatpush3.msra.mxu1 %v8398_v4  ;;  %v5856_v2 = vadd.f32 %v20116_v13, %v5084_v40  ;;  %v20126_v40 = vld [vmem:[#allocation149_spill] sm:$0xff]  ;;  %v20127_v13 = vld [vmem:[#allocation78_spill] sm:$0xff] }
 0x401   :  { %12479 = vmatprep.subr.mxu1 %v8413_v15  ;;  %v17934_v43 = vpop.f32.mrf.mxu0  ;;  %v20112_v15 = vld [vmem:[#allocation198_spill] sm:$0xff]  ;;  %v6693_v58 = vadd.f32 %v20127_v13, %v20126_v40 }
 0x402   :  { %v13436_v54 = vpop.f32.mrf.mxu1  ;;  %12480 = vmatpush3.msra.mxu1 %v8397_v62  ;;  %v5082_v14 = vadd.f32 %v20112_v15, %v20111_v50  ;;  %v20115_v62 = vld [vmem:[#allocation33_spill] sm:$0xff] }
 0x403   :  { %12481 = vmatprep.subr.mxu1 %v8412_v26  ;;  %v13554_v23 = vpop.f32.mrf.mxu0  ;;  %v20122_v50 = vld [vmem:[#allocation125_spill] sm:$0xff] }
 0x404   :  { %v7333_v16 = vpop.f32.mrf.mxu1  ;;  %12482 = vmatpush3.msra.mxu1 %v8396_v31  ;;  %v5854_v26 = vadd.f32 %v20115_v62, %v5082_v14  ;;  %v6711_v14 = vadd.f32 %v20125_v17, %v20124_v19  ;;  %v20136_v17 = vld [vmem:[#allocation12_spill] sm:$0xff] }
 0x405   :  { %12483 = vmatprep.subr.mxu1 %v8411_v38  ;;  %v17942_v4 = vpop.f32.mrf.mxu0  ;;  %v20117_v38 = vld [vmem:[#allocation151_spill] sm:$0xff]  ;;  %v6713_v19 = vadd.f32 %v20136_v17, %v20135_v53 }
 0x406   :  { %v17918_v63 = vpop.f32.mrf.mxu1  ;;  %12484 = vmatpush3.msra.mxu1 %v8395_v49  ;;  %v6697_v48 = vadd.f32 %v20118_v1, %v20117_v38  ;;  %v6690_v44 = vadd.f32 %v20123_v45, %v5854_v26  ;;  %v6692_v38 = vadd.f32 %v20128_v7, %v5856_v2  ;;  %v20129_v1 = vld [vmem:[#allocation34_spill] sm:$0xff]  ;;  %v20134_v45 = vld [vmem:[#allocation11_spill] sm:$0xff]  ;;  %v20137_v7 = vld [vmem:[#allocation40_spill] sm:$0xff] }
 0x407   :  { %20106 = vst [vmem:[#allocation193_spill] sm:$0xff] %v17918_v63  ;;  %12485 = vmatprep.subr.mxu1 %v8410_v37  ;;  %v13557_v31 = vpop.f32.mrf.mxu0  ;;  %v20138_v2 = vld [vmem:[#allocation137_spill] sm:$0xff] }
 0x408   :  { %v17922_v20 = vpop.f32.mrf.mxu1  ;;  %12486 = vmatpush3.msra.mxu1 %v8394_v0  ;;  %v7469_v37 = vadd.f32 %v13436_v54, %v6697_v48  ;;  %v20119_v0 = vld [vmem:[#allocation152_spill] sm:$0xff]  ;;  %v6705_v13 = vadd.f32 %v20138_v2, %v20137_v7  ;;  %v20147_v7 = vld [vmem:[#allocation218_spill] sm:$0xff] }
 0x409   :  { %20107 = vst [vmem:[#allocation196_spill] sm:$0xff] %v17922_v20  ;;  %12487 = vmatprep.subr.mxu1 %v8409_v22  ;;  %v20120_v22 = vld [vmem:[#allocation80_spill] sm:$0xff]  ;;  %v8239_v62 = vpop.f32.mrf.mxu0 }
 0x40a   :  { %v17924_v6 = vpop.f32.mrf.mxu1  ;;  %12488 = vmatpush3.msra.mxu1 %v8393_v18  ;;  %v6696_v18 = vadd.f32 %v20120_v22, %v20119_v0  ;;  %v20130_v54 = vld [vmem:[#allocation128_spill] sm:$0xff]  ;;  %v20131_v22 = vld [vmem:[#allocation35_spill] sm:$0xff]  ;;  %v8305_v40 = vadd.f32 %v17764_v29, %v7469_v37 }
 0x40b   :  { %8545 = vmatmul.mubr.f32.vlgmr.msra.gmra.mxu1 %v20108_v11  ;;  %13561 = vmatprep.subr.mxu1 %v20109_v52  ;;  %v20121_v52 = vld [vmem:[#allocation31_spill] sm:$0xff]  ;;  %v6695_v48 = vadd.f32 %v20130_v54, %v20129_v1  ;;  %v6694_v20 = vadd.f32 %v20132_v39, %v20131_v22  ;;  %v20139_v1 = vld [vmem:[#allocation42_spill] sm:$0xff]  ;;  %v13560_v63 = vpop.f32.mrf.mxu0  ;;  %v20148_v2 = vld [vmem:[#allocation8_spill] sm:$0xff] }
 0x40c   :  { %v17930_v46 = vpop.f32.mrf.mxu1  ;;  %v6691_v15 = vadd.f32 %v20122_v50, %v20121_v52  ;;  %v7468_v28 = vadd.f32 %v7333_v16, %v6696_v18  ;;  %v20133_v50 = vld [vmem:[#allocation157_spill] sm:$0xff]  ;;  %v20140_v16 = vld [vmem:[#allocation138_spill] sm:$0xff]  ;;  %v20141_v39 = vld [vmem:[#allocation43_spill] sm:$0xff] }
 0x40d   :  { %20110 = vst [vmem:[#allocation199_spill] sm:$0xff] %v17930_v46  ;;  %v6710_v26 = vadd.f32 %v20134_v45, %v20133_v50  ;;  %v7467_v35 = vadd.f32 %v17901_v41, %v6695_v48  ;;  %v6704_v18 = vadd.f32 %v20140_v16, %v20139_v1  ;;  %v20143_v45 = vld [vmem:[#allocation158_spill] sm:$0xff]  ;;  %v7466_v41 = vadd.f32 %v17910_v21, %v6694_v20  ;;  %v20145_v37 = vld [vmem:[#allocation39_spill] sm:$0xff]  ;;  %v20151_v20 = vld [vmem:[#allocation85_spill] sm:$0xff] }
 0x40e   :  { %v17932_v59 = vpop.f32.mrf.mxu1  ;;  %v6712_v53 = vadd.f32 %v20144_v33, %v20143_v45  ;;  %v8304_v29 = vadd.f32 %v17788_v61, %v7468_v28  ;;  %v20146_v48 = vld [vmem:[#allocation139_spill] sm:$0xff]  ;;  %v6708_v1 = vadd.f32 %v20148_v2, %v20147_v7  ;;  %v8376_v33 = vadd.f32 %v17774_v25, %v8305_v40  ;;  %v8249_v28 = vpop.f32.mrf.mxu0 }
 0x40f   :  { %v6707_v17 = vadd.f32 %v20146_v48, %v20145_v37  ;;  %v20150_v21 = vld [vmem:[#allocation155_spill] sm:$0xff] }
 0x410   :  { %v17936_v8 = vpop.f32.mrf.mxu1  ;;  %v6706_v61 = vadd.f32 %v20151_v20, %v20150_v21 }
 0x412   :  { %v17938_v42 = vpop.f32.mrf.mxu1 }
 0x414   :  { %v17940_v51 = vpop.f32.mrf.mxu1 }
 0x415   :  { %v7476_v2 = vadd.f32 %v17940_v51, %v6704_v18 }
 0x416   :  { %v13451_v34 = vpop.f32.mrf.mxu1 }
 0x418   :  { %v17944_v60 = vpop.f32.mrf.mxu1 }
 0x41a   :  { %v13454_v12 = vpop.f32.mrf.mxu1 }
 0x41c   :  { %v7393_v49 = vpop.f32.mrf.mxu1 }
 0x41e   :  { %v13457_v11 = vpop.f32.mrf.mxu1 }
 0x41f   :  { %v7483_v52 = vadd.f32 %v13457_v11, %v6711_v14  ;;  %v20142_v11 = vld [vmem:[#allocation86_spill] sm:$0xff] }
 0x420   :  { %v7403_v0 = vpop.f32.mrf.mxu1  ;;  %v6709_v14 = vadd.f32 %v20142_v11, %v20141_v39 }
 0x421   :  { %v7482_v22 = vadd.f32 %v7403_v0, %v6710_v26  ;;  %v8319_v47 = vadd.f32 %v13557_v31, %v7483_v52  ;;  %v7465_v0 = vadd.f32 %v17884_v57, %v6693_v58  ;;  %v20149_v26 = vld [vmem:[#allocation63_spill] sm:$0xff]  ;;  %v8375_v31 = vadd.f32 %v17774_v25, %v8304_v29 }
 0x422   :  { %v13460_v54 = vpop.f32.mrf.mxu1  ;;  %v7481_v3 = vadd.f32 %v13454_v12, %v6709_v14  ;;  %v7464_v12 = vadd.f32 %v17894_v55, %v6692_v38  ;;  %v7479_v58 = vadd.f32 %v13451_v34, %v6707_v17  ;;  %v7463_v14 = vadd.f32 %v17860_v5, %v6691_v15  ;;  %v20153_v34 = vld [vmem:[#allocation177_spill] sm:$0xff] }
 0x423   :  { %v7485_v50 = vadd.f32 %v13460_v54, %v6713_v19  ;;  %v8303_v19 = vadd.f32 %v20149_v26, %v7467_v35  ;;  %v7480_v54 = vadd.f32 %v7393_v49, %v6708_v1  ;;  %v8318_v11 = vadd.f32 %v8239_v62, %v7482_v22  ;;  %v20152_v49 = vld [vmem:[#allocation176_spill] sm:$0xff]  ;;  %v20158_v26 = vld [vmem:[#allocation215_spill] sm:$0xff] }
 0x424   :  { %v7413_v16 = vpop.f32.mrf.mxu1  ;;  %v8317_v57 = vadd.f32 %v13554_v23, %v7481_v3  ;;  %v8390_v40 = vadd.f32 %v17774_v25, %v8319_v47  ;;  %v8301_v62 = vadd.f32 %v20152_v49, %v7465_v0  ;;  %v8440_v22 = vmax.f32 %v8376_v33, 0.0 }
 0x425   :  { %v8321_v46 = vadd.f32 %v13560_v63, %v7485_v50  ;;  %v7484_v39 = vadd.f32 %v7413_v16, %v6712_v53  ;;  %v8302_v63 = vadd.f32 %v17737_v9, %v7466_v41  ;;  %v7478_v55 = vadd.f32 %v17944_v60, %v6706_v61  ;;  %v20154_v41 = vld [vmem:[#allocation171_spill] sm:$0xff] }
 0x426   :  { %v8316_v9 = vadd.f32 %v17942_v4, %v7480_v54  ;;  %v8389_v3 = vadd.f32 %v17774_v25, %v8318_v11  ;;  %v7462_v23 = vadd.f32 %v17875_v27, %v6690_v44  ;;  %v8300_v50 = vadd.f32 %v20153_v34, %v7464_v12  ;;  %v20155_v27 = vld [vmem:[#allocation154_spill] sm:$0xff]  ;;  %v20156_v44 = vld [vmem:[#allocation81_spill] sm:$0xff] }
 0x427   :  { %v8392_v45 = vadd.f32 %v17774_v25, %v8321_v46  ;;  %v8320_v37 = vadd.f32 %v8249_v28, %v7484_v39  ;;  %v8374_v46 = vadd.f32 %v17774_v25, %v8303_v19  ;;  %v8373_v47 = vadd.f32 %v17774_v25, %v8302_v63  ;;  %v20159_v19 = vld [vmem:[#allocation136_spill] sm:$0xff]  ;;  %v20160_v28 = vld [vmem:[#allocation153_spill] sm:$0xff]  ;;  %v20161_v54 = vld [vmem:[#allocation82_spill] sm:$0xff] }
 0x428   :  { %v8439_v5 = vmax.f32 %v8375_v31, 0.0  ;;  %v7477_v15 = vadd.f32 %v17938_v42, %v6705_v13  ;;  %v8315_v53 = vadd.f32 %v17928_v56, %v7479_v58  ;;  %v8454_v60 = vmax.f32 %v8390_v40, 0.0  ;;  %v20157_v13 = vld [vmem:[#allocation174_spill] sm:$0xff]  ;;  %v20162_v31 = vld [vmem:[#allocation36_spill] sm:$0xff] }
 0x429   :  { %v8456_v35 = vmax.f32 %v8392_v45, 0.0  ;;  %v8391_v52 = vadd.f32 %v17774_v25, %v8320_v37  ;;  %v8388_v4 = vadd.f32 %v17774_v25, %v8317_v57  ;;  %v8299_v29 = vadd.f32 %v20154_v41, %v7463_v14  ;;  %v20163_v58 = vld [vmem:[#allocation134_spill] sm:$0xff] }
 0x42a   :  { %v8372_v48 = vadd.f32 %v17774_v25, %v8301_v62  ;;  %v8438_v17 = vmax.f32 %v8374_v46, 0.0  ;;  %v6703_v7 = vadd.f32 %v20156_v44, %v20155_v27  ;;  %v8314_v1 = vadd.f32 %v17934_v43, %v7478_v55  ;;  %v20165_v46 = vld [vmem:[#allocation37_spill] sm:$0xff]  ;;  %v20169_v34 = vld [vmem:[#allocation186_spill] sm:$0xff] }
 0x42b   :  { %v8455_v38 = vmax.f32 %v8391_v52, 0.0  ;;  %12492 = vmatprep.subr.mxu0 %v8456_v35  ;;  %v8453_v42 = vmax.f32 %v8389_v3, 0.0  ;;  %v8387_v56 = vadd.f32 %v17774_v25, %v8316_v9  ;;  %v8298_v16 = vadd.f32 %v20157_v13, %v7462_v23  ;;  %v20167_v9 = vld [vmem:[#allocation199_spill] sm:$0xff]  ;;  %v20176_v44 = vld [vmem:[#allocation181_spill] sm:$0xff] }
 0x42c   :  { %12493 = vmatpush3.msra.mxu0 %v8440_v22  ;;  %v8371_v39 = vadd.f32 %v17774_v25, %v8300_v50  ;;  %v8437_v0 = vmax.f32 %v8373_v47, 0.0  ;;  %v6702_v33 = vadd.f32 %v20159_v19, %v20158_v26  ;;  %v7475_v21 = vadd.f32 %v17932_v59, %v6703_v7  ;;  %v20166_v22 = vld [vmem:[#allocation132_spill] sm:$0xff]  ;;  %v20170_v50 = vld [vmem:[#allocation91_spill] sm:$0xff]  ;;  %v20177_v7 = vld [vmem:[#allocation161_spill] sm:$0xff] }
 0x42d   :  { %12494 = vmatprep.subr.mxu0 %v8455_v38  ;;  %v8313_v20 = vadd.f32 %v17915_v24, %v7477_v15  ;;  %v8452_v51 = vmax.f32 %v8388_v4, 0.0  ;;  %v8386_v43 = vadd.f32 %v17774_v25, %v8315_v53  ;;  %v8370_v18 = vadd.f32 %v17774_v25, %v8299_v29  ;;  %v20172_v15 = vld [vmem:[#allocation38_spill] sm:$0xff]  ;;  %v20173_v53 = vld [vmem:[#allocation133_spill] sm:$0xff]  ;;  %v20175_v29 = vld [vmem:[#allocation188_spill] sm:$0xff] }
 0x42e   :  { %12495 = vmatpush3.msra.mxu0 %v8439_v5  ;;  %v8436_v61 = vmax.f32 %v8372_v48, 0.0  ;;  %v6701_v11 = vadd.f32 %v20161_v54, %v20160_v28  ;;  %v7474_v45 = vadd.f32 %v17936_v8, %v6702_v33  ;;  %v8312_v37 = vadd.f32 %v17920_v32, %v7476_v2  ;;  %v20164_v32 = vld [vmem:[#allocation164_spill] sm:$0xff]  ;;  %v20174_v4 = vld [vmem:[#allocation193_spill] sm:$0xff]  ;;  %v20181_v33 = vld [vmem:[#allocation163_spill] sm:$0xff] }
 0x42f   :  { %12496 = vmatprep.subr.mxu0 %v8454_v60  ;;  %v8451_v12 = vmax.f32 %v8387_v56, 0.0  ;;  %v8385_v59 = vadd.f32 %v17774_v25, %v8314_v1  ;;  %v8369_v24 = vadd.f32 %v17774_v25, %v8298_v16  ;;  %v8435_v63 = vmax.f32 %v8371_v39, 0.0  ;;  %v20178_v56 = vld [vmem:[#allocation196_spill] sm:$0xff]  ;;  %v20179_v16 = vld [vmem:[#allocation10_spill] sm:$0xff] }
 0x430   :  { %12497 = vmatpush3.msra.mxu0 %v8438_v17  ;;  %v6700_v57 = vadd.f32 %v20163_v58, %v20162_v31  ;;  %v7473_v35 = vadd.f32 %v17924_v6, %v6701_v11  ;;  %v8311_v52 = vadd.f32 %v17889_v30, %v7475_v21  ;;  %v8450_v40 = vmax.f32 %v8386_v43, 0.0  ;;  %v20168_v6 = vld [vmem:[#allocation13_spill] sm:$0xff]  ;;  %v20180_v19 = vld [vmem:[#allocation184_spill] sm:$0xff]  ;;  %v20182_v43 = vld [vmem:[#allocation182_spill] sm:$0xff] }
 0x431   :  { %12498 = vmatprep.subr.mxu0 %v8453_v42  ;;  %v8384_v8 = vadd.f32 %v17774_v25, %v8313_v20  ;;  %v8295_v14 = vadd.f32 %v20164_v32, %v17821_v36  ;;  %v8368_v49 = vadd.f32 %v17774_v25, %v17851_v10  ;;  %v8434_v62 = vmax.f32 %v8370_v18, 0.0  ;;  %v20171_v36 = vld [vmem:[#allocation7_spill] sm:$0xff]  ;;  %v20183_v54 = vld [vmem:[#allocation66_spill] sm:$0xff] }
 0x432   :  { %12499 = vmatpush3.msra.mxu0 %v8437_v0  ;;  %v6699_v55 = vadd.f32 %v20166_v22, %v20165_v46  ;;  %v7472_v38 = vadd.f32 %v20167_v9, %v6700_v57  ;;  %v8310_v3 = vadd.f32 %v20168_v6, %v7474_v45  ;;  %v8449_v30 = vmax.f32 %v8385_v59, 0.0  ;;  %v20184_v11 = vld [vmem:[#allocation159_spill] sm:$0xff]  ;;  %v20187_v57 = vld [vmem:[#allocation88_spill] sm:$0xff] }
 0x433   :  { %12500 = vmatprep.subr.mxu0 %v8452_v51  ;;  %v8383_v23 = vadd.f32 %v17774_v25, %v8312_v37  ;;  %v8294_v47 = vadd.f32 %v20170_v50, %v20169_v34  ;;  %v8367_v5 = vadd.f32 %v17774_v25, %v20171_v36  ;;  %v8433_v10 = vmax.f32 %v8369_v24, 0.0  ;;  %v20185_v59 = vld [vmem:[#allocation135_spill] sm:$0xff] }
 0x434   :  { %12501 = vmatpush3.msra.mxu0 %v8436_v61  ;;  %v6698_v60 = vadd.f32 %v20173_v53, %v20172_v15  ;;  %v7471_v41 = vadd.f32 %v20174_v4, %v6699_v55  ;;  %v8309_v48 = vadd.f32 %v20175_v29, %v7473_v35  ;;  %v8448_v17 = vmax.f32 %v8384_v8, 0.0  ;;  %v20186_v58 = vld [vmem:[#allocation71_spill] sm:$0xff]  ;;  %v20191_v4 = vld [vmem:[#allocation6_spill] sm:$0xff] }
 0x435   :  { %12502 = vmatprep.subr.mxu0 %v8451_v12  ;;  %v8382_v27 = vadd.f32 %v17774_v25, %v8311_v52  ;;  %v8293_v2 = vadd.f32 %v20177_v7, %v20176_v44  ;;  %v8366_v1 = vadd.f32 %v17774_v25, %v8295_v14  ;;  %v8432_v42 = vmax.f32 %v8368_v49, 0.0  ;;  %v8706_v50 = vld [vmem:[%s20190_s1] sm:$0xff]  ;;  %v8623_v36 = vld [vmem:[%s18691_s7 + $0x18] sm:$0xff] }
 0x436   :  { %12503 = vmatpush3.msra.mxu0 %v8435_v63  ;;  %v7470_v13 = vadd.f32 %v20178_v56, %v6698_v60  ;;  %v8308_v39 = vadd.f32 %v20179_v16, %v7472_v38  ;;  %v8447_v0 = vmax.f32 %v8383_v23, 0.0  ;;  %v8381_v26 = vadd.f32 %v17774_v25, %v8310_v3  ;;  %v8708_v23 = vld [vmem:[%s18693_s9] sm:$0xff]  ;;  %13562 = vmatpush3.msra.mxu1 %v8623_v36 }
 0x437   :  { %12504 = vmatprep.subr.mxu0 %v8450_v40  ;;  %v8292_v21 = vadd.f32 %v20181_v33, %v20180_v19  ;;  %v8365_v20 = vadd.f32 %v17774_v25, %v8294_v47  ;;  %v8431_v51 = vmax.f32 %v8367_v5, 0.0  ;;  %v8307_v18 = vadd.f32 %v20182_v43, %v7471_v41  ;;  %v8707_v47 = vld [vmem:[%s20190_s1 + $0x8] sm:$0xff]  ;;  %v8622_v5 = vld [vmem:[%s18691_s7 + $0x10] sm:$0xff]  ;;  %v8620_v15 = vld [vmem:[%s18691_s7] sm:$0xff] }
 0x438   :  { %12505 = vmatpush3.msra.mxu0 %v8434_v62  ;;  %v8446_v61 = vmax.f32 %v8382_v27, 0.0  ;;  %v8380_v28 = vadd.f32 %v17774_v25, %v8309_v48  ;;  %v8291_v45 = vadd.f32 %v20184_v11, %v20183_v54  ;;  %v8364_v37 = vadd.f32 %v17774_v25, %v8293_v2  ;;  %v8710_v27 = vld [vmem:[%s18695_s11] sm:$0x3] }
 0x439   :  { %12506 = vmatprep.subr.mxu0 %v8449_v30  ;;  %v8430_v12 = vmax.f32 %v8366_v1, 0.0  ;;  %v8306_v24 = vadd.f32 %v20185_v59, %v7470_v13  ;;  %v8445_v63 = vmax.f32 %v8381_v26, 0.0  ;;  %v8379_v31 = vadd.f32 %v17774_v25, %v8308_v39  ;;  %v8709_v30 = vld [vmem:[%s18693_s9 + $0x8] sm:$0xff]  ;;  %v18153_v59 = vld [vmem:[%s18694_s10 + $0x20] sm:$0xff] }
 0x43a   :  { %12507 = vmatpush3.msra.mxu0 %v8433_v10  ;;  %v8290_v35 = vadd.f32 %v20187_v57, %v20186_v58  ;;  %v8363_v52 = vadd.f32 %v17774_v25, %v8292_v21  ;;  %v8429_v40 = vmax.f32 %v8365_v20, 0.0  ;;  %v8444_v8 = vmax.f32 %v8380_v28, 0.0  ;;  %v8621_v10 = vld [vmem:[%s18691_s7 + $0x8] sm:$0xff]  ;;  %s13804_s7 = smov 64  }
 0x43b   :  { %12508 = vmatprep.subr.mxu0 %v8448_v17  ;;  %v8378_v32 = vadd.f32 %v17774_v25, %v8307_v18  ;;  %v8362_v14 = vadd.f32 %v17774_v25, %v8291_v45  ;;  %v8428_v49 = vmax.f32 %v8364_v37, 0.0  ;;  %v8443_v62 = vmax.f32 %v8379_v31, 0.0  ;;  %v18137_v45 = vld [vmem:[%s18694_s10 + $0x38] sm:$0xff]  ;;  %v18142_v37 = vld [vmem:[%s18694_s10 + $0x30] sm:$0xff]  ;;  %v18174_v31 = vld [vmem:[%s18694_s10 + $0x8] sm:$0xff] }
 0x43c   :  { %12509 = vmatpush3.msra.mxu0 %v8432_v42  ;;  %v8377_v46 = vadd.f32 %v17774_v25, %v8306_v24  ;;  %v8361_v22 = vadd.f32 %v17774_v25, %v8290_v35  ;;  %v8427_v55 = vmax.f32 %v8363_v52, 0.0  ;;  %v20188_v25 = vld [vmem:[#allocation169_spill] sm:$0xff]  ;;  %v20189_v34 = vmov 0.0   ;;  %v18160_v24 = vld [vmem:[%s18694_s10 + $0x18] sm:$0xff]  ;;  %v18190_v52 = vld [vmem:[%s18694_s10] sm:$0xff] }
 0x43d   :  { %12510 = vmatprep.subr.mxu0 %v8447_v0  ;;  %v8442_v9 = vmax.f32 %v8378_v32, 0.0  ;;  %v8426_v38 = vmax.f32 %v8362_v14, 0.0  ;;  %13563 = vmatprep.subr.mxu1 %v20189_v34  ;;  %v8718_v41 = vsub.s32 1, %v20191_v4  ;;  %v8714_v7 = vsub.s32 0, %v20191_v4 }
 0x43e   :  { %12511 = vmatpush3.msra.mxu0 %v8431_v51  ;;  %v8441_v6 = vmax.f32 %v8377_v46, 0.0  ;;  %v8425_v3 = vmax.f32 %v8361_v22, 0.0  ;;  %13564 = vmatpush3.msra.mxu1 %v8622_v5 }
 0x43f   :  { %12512 = vmatprep.subr.mxu0 %v8446_v61  ;;  %13565 = vmatprep.subr.mxu1 %v20189_v34  ;;  %v8719_v2 = vrot.slane %v8710_v27, %v8718_v41  ;;  %v8715_v13 = vrot.slane %v8710_v27, %v8714_v7 }
 0x440   :  { %12513 = vmatpush3.msra.mxu0 %v8430_v12  ;;  %13566 = vmatpush3.msra.mxu1 %v8621_v10  ;;  %v18147_v12 = vld [vmem:[%s18694_s10 + $0x28] sm:$0xff] }
 0x441   :  { %12514 = vmatprep.subr.mxu0 %v8445_v63  ;;  %13567 = vmatprep.subr.mxu1 %v20189_v34  ;;  %v18167_v63 = vld [vmem:[%s18694_s10 + $0x10] sm:$0xff] }
 0x442   :  { %12515 = vmatpush3.msra.mxu0 %v8429_v40  ;;  %13568 = vmatpush3.msra.mxu1 %v8620_v15 }
 0x443   :  { %12516 = vmatprep.subr.mxu0 %v8444_v8  ;;  %13569 = vmatprep.mubr.msk.f32.mxu1 %vm13803_vm9, %v20189_v34 }
 0x444   :  { %12517 = vmatpush3.msra.mxu0 %v8428_v49  ;;  %8866 = vmatprep.subr.mxu1 %v18137_v45 }
 0x445   :  { %12518 = vmatprep.subr.mxu0 %v8443_v62 }
 0x446   :  { %12519 = vmatpush3.msra.mxu0 %v8427_v55 }
 0x447   :  { %12520 = vmatprep.subr.mxu0 %v8442_v9 }
 0x448   :  { %12521 = vmatpush3.msra.mxu0 %v8426_v38 }
 0x449   :  { %12522 = vmatprep.subr.mxu0 %v8441_v6 }
 0x44a   :  { %12523 = vmatpush3.msra.mxu0 %v8425_v3 }
 0x44b   :  { %8615 = vmatmul.mubr.f32.vlgmr.msra.gmra.mxu0 %v20188_v25  ;;  %8759 = vmatprep.subr.mxu0 %v8709_v30 }
 0x44c   :  { %8760 = vmatpush1.msra.mxu0 %v8708_v23  ;;  %8793 = vmatprep.mubr.f32.mxu0 %v20189_v34 }
 0x44d   :  { %8985 = vmatprep.subr.mxu0 %v18137_v45 }
 0x44f   :  { %11750 = vmatmul.mubr.msk.f32.vlgmr.msra.gmra.mxu0 %vm8722_vm7, %v8706_v50 }
 0x450   :  { %8799 = vmatprep.mubr.f32.mxu0 %v20189_v34  ;;  %8986 = vmatpush1.msra.mxu0 %v18142_v37 }
 0x451   :  { %8987 = vmatprep.subr.mxu0 %v18147_v12 }
 0x452   :  { %8988 = vmatpush1.msra.mxu0 %v18153_v59 }
 0x453   :  { %11751 = vmatmul.mubr.msk.f32.gmra.mxu0 %vm8722_vm7, %v8707_v47  ;;  %8989 = vmatprep.subr.mxu0 %v18160_v24 }
 0x454   :  { %9025 = vmatprep.mubr.f32.mxu0 %v20189_v34  ;;  %8990 = vmatpush1.msra.mxu0 %v18167_v63 }
 0x455   :  { %8991 = vmatprep.subr.mxu0 %v18174_v31 }
 0x456   :  { %8992 = vmatpush1.msra.mxu0 %v18190_v52 }
 0x457   :  { %9209 = vmatprep.subr.mxu0 %v18137_v45 }
 0x4cb   :  { %v12489_v53 = vpop.f32.mrf.mxu1 }
 0x4cd   :  { %v12490_v60 = vpop.f32.mrf.mxu1 }
 0x4ce   :  { %v12491_v48 = vadd.f32 %v12490_v60, %v12489_v53 }
 0x50b   :  { %v12524_v29 = vpop.f32.mrf.mxu0 }
 0x50d   :  { %v12525_v17 = vpop.f32.mrf.mxu0 }
 0x50e   :  { %v12526_v44 = vadd.f32 %v12525_v17, %v12524_v29 }
 0x50f   :  { %v8795_v1 = vpop.f32.mrf.mxu0 }
 0x510   :  { %v8617_v42 = vadd.f32 %v12526_v44, %v12491_v48  ;;  %v18128_v33 = vadd.f32 %v8795_v1, %v8715_v13 }
 0x511   :  { %v8797_v56 = vpop.f32.mrf.mxu0 }
 0x512   :  { %v18120_v16 = vadd.f32 %v8797_v56, %v8719_v2  ;;  %13570 = vmatmul.mubr.msk.f32.vlgmr.msra.gmra.mxu1 %vm8631_vm10, %v8617_v42 }
 0x513   :  { %v8801_v39 = vpop.f32.mrf.mxu0  ;;  %8906 = vmatprep.mubr.f32.mxu1 %v20189_v34  ;;  %8867 = vmatpush1.msra.mxu1 %v18142_v37 }
 0x514   :  { %v18124_v0 = vadd.f32 %v8801_v39, %v8715_v13  ;;  %8868 = vmatprep.subr.mxu1 %v18147_v12 }
 0x515   :  { %v8803_v26 = vpop.f32.mrf.mxu0  ;;  %8869 = vmatpush1.msra.mxu1 %v18153_v59 }
 0x516   :  { %v18126_v19 = vadd.f32 %v8803_v26, %v8719_v2  ;;  %8870 = vmatprep.subr.mxu1 %v18160_v24 }
 0x517   :  { %8871 = vmatpush1.msra.mxu1 %v18167_v63 }
 0x518   :  { %v8815_v21 = vrot.slane %v18126_v19, 4  ;;  %8872 = vmatprep.subr.mxu1 %v18174_v31 }
 0x519   :  { %8873 = vmatpush1.msra.mxu1 %v18190_v52 }
 0x51a   :  { %v8818_v20 = vsel %vm8817_vm11, %v18128_v33, %v8815_v21  ;;  %9094 = vmatprep.subr.mxu1 %v18137_v45 }
 0x51b   :  { %13631 = vtanh.f32 %v8818_v20  ;;  %v11752_v43 = vmul.f32 -1.442695, %v8818_v20 }
 0x51d   :  { %13633 = vpow2.f32 %v11752_v43 }
 0x528   :  { %v13632_v51 = vpop.eup %13631 }
 0x529   :  { %8827 = vrot.lane.b32.xlu0 %v13632_v51, %s13804_s7 }
 0x52a   :  { %v13634_v18 = vpop.eup %13633 }
 0x52b   :  { %v8822_v61 = vadd.f32 1.0, %v13634_v18 }
 0x52d   :  { %13635 = vrcp.f32 %v8822_v61 }
 0x53a   :  { %v13636_v28 = vpop.eup %13635 }
 0x59b   :  { %v8828_v54 = vpop.permute.xlu0 %8827 }
 0x59c   :  { %v8830_v11 = vmul.f32 %v13636_v28, %v8828_v54 }
 0x59e   :  { %13637 = vtanh.f32 %v8830_v11 }
 0x5ab   :  { %v13638_v58 = vpop.eup %13637 }
 0x5ac   :  { %8833 = vrot.lane.b32.xlu0 %v13638_v58, %s13805_s28 }
 0x5b0   :  { %8936 = vrot.lane.b32.xlu0 %v8830_v11, %s13806_s29 }
 0x5d2   :  { %v18185_v57 = vpop.f32.mrf.mxu1 }
 0x5d4   :  { %v13571_v35 = vpop.f32.mrf.mxu1 }
 0x61e   :  { %v8834_v40 = vpop.permute.xlu0 %8833 }
 0x61f   :  { %v18196_v8 = vmul.f32 %v13636_v28, %v8834_v40 }
 0x621   :  { %8838 = vrot.lane.b32.xlu1 %v18196_v8, %s13806_s29 }
 0x622   :  { %v8937_v5 = vpop.permute.xlu0 %8936 }
 0x693   :  { %v8839_v32 = vpop.permute.xlu1 %8838 }
 0x694   :  { %11753 = vmatmul.mubr.msk.f32.vlgmr.msra.gmra.mxu1 %vm8631_vm10, %v8839_v32 }
 0x695   :  { %9095 = vmatpush1.msra.mxu1 %v18142_v37  ;;  %9134 = vmatprep.mubr.f32.mxu1 %v20189_v34 }
 0x696   :  { %9096 = vmatprep.subr.mxu1 %v18147_v12 }
 0x697   :  { %9097 = vmatpush1.msra.mxu1 %v18153_v59 }
 0x698   :  { %9098 = vmatprep.subr.mxu1 %v18160_v24 }
 0x699   :  { %9099 = vmatpush1.msra.mxu1 %v18167_v63 }
 0x69a   :  { %9100 = vmatprep.subr.mxu1 %v18174_v31 }
 0x69b   :  { %9101 = vmatpush1.msra.mxu1 %v18190_v52 }
 0x69c   :  { %9318 = vmatprep.subr.mxu1 %v18137_v45 }
 0x754   :  { %v8908_v14 = vpop.f32.mrf.mxu1 }
 0x755   :  { %v8914_v49 = vrot.slane %v8908_v14, 6 }
 0x756   :  { %v8910_v62 = vpop.f32.mrf.mxu1 }
 0x757   :  { %v8916_v46 = vadd.f32 %v8914_v49, %v18128_v33  ;;  %v8918_v22 = vrot.slane %v8910_v62, 6 }
 0x759   :  { %v8920_v55 = vadd.f32 %v8918_v22, %v18126_v19  ;;  %v8922_v9 = vrot.slane %v8916_v46, 2 }
 0x75b   :  { %v8925_v38 = vrot.slane %v8920_v55, 2 }
 0x75d   :  { %v8927_v6 = vsel %vm8817_vm11, %v8922_v9, %v8925_v38 }
 0x75e   :  { %13639 = vtanh.f32 %v8927_v6  ;;  %v11754_v30 = vmul.f32 -1.442695, %v8927_v6 }
 0x760   :  { %13641 = vpow2.f32 %v11754_v30 }
 0x76b   :  { %v13640_v3 = vpop.eup %13639 }
 0x76c   :  { %8941 = vrot.lane.b32.xlu1 %v13640_v3, %s13804_s7 }
 0x76d   :  { %v13642_v23 = vpop.eup %13641 }
 0x76e   :  { %v8931_v25 = vadd.f32 1.0, %v13642_v23 }
 0x770   :  { %13643 = vrcp.f32 %v8931_v25 }
 0x77d   :  { %v13644_v50 = vpop.eup %13643 }
 0x77e   :  { %v8939_v10 = vmul.f32 %v13644_v50, %v8937_v5 }
 0x7de   :  { %v8942_v47 = vpop.permute.xlu1 %8941 }
 0x7df   :  { %v8944_v36 = vmul.f32 %v13644_v50, %v8942_v47 }
 0x7e1   :  { %8946 = vrot.lane.b32.xlu1 %v8944_v36, %s13806_s29 }
 0x853   :  { %v8947_v15 = vpop.permute.xlu1 %8946 }
 0x854   :  { %v8949_v53 = vadd.f32 %v8947_v15, %v8939_v10 }
 0x856   :  { %13645 = vtanh.f32 %v8949_v53 }
 0x863   :  { %v13646_v60 = vpop.eup %13645 }
 0x864   :  { %8952 = vrot.lane.b32.xlu0 %v13646_v60, %s13804_s7 }
 0x8d6   :  { %v8953_v29 = vpop.permute.xlu0 %8952 }
 0x8d7   :  { %v18216_v48 = vmul.f32 %v13644_v50, %v8953_v29 }
 0x8d9   :  { %8957 = vrot.lane.b32.xlu1 %v18216_v48, %s13806_s29 }
 0x94b   :  { %v8958_v17 = vpop.permute.xlu1 %8957 }
 0x94c   :  { %11755 = vmatmul.mubr.msk.f32.vlgmr.msra.gmra.mxu0 %vm8631_vm10, %v8958_v17 }
 0x94d   :  { %9210 = vmatpush1.msra.mxu0 %v18142_v37  ;;  %9249 = vmatprep.mubr.f32.mxu0 %v20189_v34 }
 0x94e   :  { %9211 = vmatprep.subr.mxu0 %v18147_v12 }
 0x94f   :  { %9212 = vmatpush1.msra.mxu0 %v18153_v59 }
 0x950   :  { %9213 = vmatprep.subr.mxu0 %v18160_v24 }
 0x951   :  { %9214 = vmatpush1.msra.mxu0 %v18167_v63 }
 0x952   :  { %9215 = vmatprep.subr.mxu0 %v18174_v31 }
 0x953   :  { %9216 = vmatpush1.msra.mxu0 %v18190_v52 }
 0x954   :  { %9433 = vmatprep.subr.mxu0 %v18137_v45 }
 0xa0c   :  { %v9027_v27 = vpop.f32.mrf.mxu0 }
 0xa0d   :  { %v9033_v44 = vrot.slane %v9027_v27, 4 }
 0xa0e   :  { %v9029_v2 = vpop.f32.mrf.mxu0 }
 0xa0f   :  { %v9035_v1 = vadd.f32 %v9033_v44, %v18128_v33  ;;  %v9036_v56 = vadd.f32 %v9029_v2, %v18126_v19 }
 0xa11   :  { %v9038_v42 = vrot.slane %v9035_v1, 4 }
 0xa13   :  { %v9040_v13 = vsel %vm8817_vm11, %v9038_v42, %v9036_v56 }
 0xa14   :  { %13647 = vtanh.f32 %v9040_v13  ;;  %v11756_v26 = vmul.f32 -1.442695, %v9040_v13 }
 0xa16   :  { %13649 = vpow2.f32 %v11756_v26 }
 0xa21   :  { %v13648_v39 = vpop.eup %13647 }
 0xa22   :  { %9050 = vrot.lane.b32.xlu0 %v13648_v39, %s13804_s7 }
 0xa23   :  { %v13650_v21 = vpop.eup %13649 }
 0xa24   :  { %v9044_v20 = vadd.f32 1.0, %v13650_v21 }
 0xa26   :  { %13651 = vrcp.f32 %v9044_v20 }
 0xa33   :  { %v13652_v51 = vpop.eup %13651 }
 0xa34   :  { %v9048_v61 = vmul.f32 %v13652_v51, %v8949_v53 }
 0xa94   :  { %v9051_v43 = vpop.permute.xlu0 %9050 }
 0xa95   :  { %v9053_v18 = vmul.f32 %v13652_v51, %v9051_v43 }
 0xa97   :  { %9055 = vrot.lane.b32.xlu1 %v9053_v18, %s13806_s29 }
 0xb09   :  { %v9056_v28 = vpop.permute.xlu1 %9055 }
 0xb0a   :  { %v9058_v54 = vadd.f32 %v9056_v28, %v9048_v61 }
 0xb0c   :  { %13653 = vtanh.f32 %v9058_v54 }
 0xb19   :  { %v13654_v11 = vpop.eup %13653 }
 0xb1a   :  { %9061 = vrot.lane.b32.xlu0 %v13654_v11, %s13804_s7 }
 0xb8c   :  { %v9062_v58 = vpop.permute.xlu0 %9061 }
 0xb8d   :  { %v18236_v35 = vmul.f32 %v13652_v51, %v9062_v58 }
 0xb8f   :  { %9066 = vrot.lane.b32.xlu1 %v18236_v35, %s13806_s29 }
 0xc01   :  { %v9067_v40 = vpop.permute.xlu1 %9066 }
 0xc02   :  { %11757 = vmatmul.mubr.msk.f32.vlgmr.msra.gmra.mxu1 %vm8631_vm10, %v9067_v40 }
 0xc03   :  { %9319 = vmatpush1.msra.mxu1 %v18142_v37  ;;  %9358 = vmatprep.mubr.f32.mxu1 %v20189_v34 }
 0xc04   :  { %9320 = vmatprep.subr.mxu1 %v18147_v12 }
 0xc05   :  { %9321 = vmatpush1.msra.mxu1 %v18153_v59 }
 0xc06   :  { %9322 = vmatprep.subr.mxu1 %v18160_v24 }
 0xc07   :  { %9323 = vmatpush1.msra.mxu1 %v18167_v63 }
 0xc08   :  { %9324 = vmatprep.subr.mxu1 %v18174_v31 }
 0xc09   :  { %9325 = vmatpush1.msra.mxu1 %v18190_v52 }
 0xc0a   :  { %9542 = vmatprep.subr.mxu1 %v18137_v45 }
 0xcc2   :  { %v9136_v32 = vpop.f32.mrf.mxu1 }
 0xcc3   :  { %v9142_v14 = vrot.slane %v9136_v32, 2 }
 0xcc4   :  { %v9138_v49 = vpop.f32.mrf.mxu1 }
 0xcc5   :  { %v9144_v62 = vadd.f32 %v9142_v14, %v18128_v33  ;;  %v9146_v46 = vrot.slane %v9138_v49, 2 }
 0xcc7   :  { %v9148_v22 = vadd.f32 %v9146_v46, %v18126_v19  ;;  %v9150_v55 = vrot.slane %v9144_v62, 6 }
 0xcc9   :  { %v9153_v9 = vrot.slane %v9148_v22, 6 }
 0xccb   :  { %v9155_v38 = vsel %vm8817_vm11, %v9150_v55, %v9153_v9 }
 0xccc   :  { %13655 = vtanh.f32 %v9155_v38  ;;  %v11758_v3 = vmul.f32 -1.442695, %v9155_v38 }
 0xcce   :  { %13657 = vpow2.f32 %v11758_v3 }
 0xcd9   :  { %v13656_v6 = vpop.eup %13655 }
 0xcda   :  { %9165 = vrot.lane.b32.xlu0 %v13656_v6, %s13804_s7 }
 0xcdb   :  { %v13658_v30 = vpop.eup %13657 }
 0xcdc   :  { %v9159_v45 = vadd.f32 1.0, %v13658_v30 }
 0xcde   :  { %13659 = vrcp.f32 %v9159_v45 }
 0xceb   :  { %v13660_v23 = vpop.eup %13659 }
 0xcec   :  { %v9163_v33 = vmul.f32 %v13660_v23, %v9058_v54 }
 0xd4c   :  { %v9166_v25 = vpop.permute.xlu0 %9165 }
 0xd4d   :  { %v9168_v50 = vmul.f32 %v13660_v23, %v9166_v25 }
 0xd4f   :  { %9170 = vrot.lane.b32.xlu1 %v9168_v50, %s13806_s29 }
 0xdc1   :  { %v9171_v19 = vpop.permute.xlu1 %9170 }
 0xdc2   :  { %v9173_v47 = vadd.f32 %v9171_v19, %v9163_v33 }
 0xdc4   :  { %13661 = vtanh.f32 %v9173_v47 }
 0xdd1   :  { %v13662_v36 = vpop.eup %13661 }
 0xdd2   :  { %9176 = vrot.lane.b32.xlu0 %v13662_v36, %s13804_s7 }
 0xe44   :  { %v9177_v5 = vpop.permute.xlu0 %9176 }
 0xe45   :  { %v18256_v10 = vmul.f32 %v13660_v23, %v9177_v5 }
 0xe47   :  { %9181 = vrot.lane.b32.xlu1 %v18256_v10, %s13806_s29 }
 0xeb9   :  { %v9182_v15 = vpop.permute.xlu1 %9181 }
 0xeba   :  { %11759 = vmatmul.mubr.msk.f32.vlgmr.msra.gmra.mxu0 %vm8631_vm10, %v9182_v15 }
 0xebb   :  { %9434 = vmatpush1.msra.mxu0 %v18142_v37  ;;  %9473 = vmatprep.mubr.f32.mxu0 %v20189_v34 }
 0xebc   :  { %9435 = vmatprep.subr.mxu0 %v18147_v12 }
 0xebd   :  { %9436 = vmatpush1.msra.mxu0 %v18153_v59 }
 0xebe   :  { %9437 = vmatprep.subr.mxu0 %v18160_v24 }
 0xebf   :  { %9438 = vmatpush1.msra.mxu0 %v18167_v63 }
 0xec0   :  { %9439 = vmatprep.subr.mxu0 %v18174_v31 }
 0xec1   :  { %9440 = vmatpush1.msra.mxu0 %v18190_v52 }
 0xf7a   :  { %v9251_v53 = vpop.f32.mrf.mxu0 }
 0xf7b   :  { %v9256_v27 = vadd.f32 %v9251_v53, %v18124_v0 }
 0xf7c   :  { %v9253_v60 = vpop.f32.mrf.mxu0 }
 0xf7d   :  { %v9258_v29 = vrot.slane %v9253_v60, 4 }
 0xf7f   :  { %v9260_v17 = vadd.f32 %v9258_v29, %v18120_v16 }
 0xf81   :  { %v9262_v44 = vrot.slane %v9260_v17, 4 }
 0xf83   :  { %v9264_v2 = vsel %vm8817_vm11, %v9256_v27, %v9262_v44 }
 0xf84   :  { %13663 = vtanh.f32 %v9264_v2  ;;  %v11760_v42 = vmul.f32 -1.442695, %v9264_v2 }
 0xf86   :  { %13665 = vpow2.f32 %v11760_v42 }
 0xf91   :  { %v13664_v1 = vpop.eup %13663 }
 0xf92   :  { %9274 = vrot.lane.b32.xlu0 %v13664_v1, %s13804_s7 }
 0xf93   :  { %v13666_v56 = vpop.eup %13665 }
 0xf94   :  { %v9268_v13 = vadd.f32 1.0, %v13666_v56 }
 0xf96   :  { %13667 = vrcp.f32 %v9268_v13 }
 0xfa3   :  { %v13668_v39 = vpop.eup %13667 }
 0xfa4   :  { %v9272_v20 = vmul.f32 %v13668_v39, %v9173_v47 }
0x1004   :  { %v9275_v26 = vpop.permute.xlu0 %9274 }
0x1005   :  { %v9277_v21 = vmul.f32 %v13668_v39, %v9275_v26 }
0x1007   :  { %9279 = vrot.lane.b32.xlu1 %v9277_v21, %s13806_s29 }
0x1079   :  { %v9280_v51 = vpop.permute.xlu1 %9279 }
0x107a   :  { %v9282_v43 = vadd.f32 %v9280_v51, %v9272_v20 }
0x107c   :  { %13669 = vtanh.f32 %v9282_v43 }
0x1089   :  { %v13670_v18 = vpop.eup %13669 }
0x108a   :  { %9285 = vrot.lane.b32.xlu0 %v13670_v18, %s13804_s7 }
0x10fc   :  { %v9286_v61 = vpop.permute.xlu0 %9285 }
0x10fd   :  { %v18275_v28 = vmul.f32 %v13668_v39, %v9286_v61 }
0x10ff   :  { %9290 = vrot.lane.b32.xlu1 %v18275_v28, %s13806_s29 }
0x1171   :  { %v9291_v54 = vpop.permute.xlu1 %9290 }
0x1172   :  { %11761 = vmatmul.mubr.msk.f32.vlgmr.msra.gmra.mxu1 %vm8631_vm10, %v9291_v54 }
0x1173   :  { %9543 = vmatpush1.msra.mxu1 %v18142_v37  ;;  %9582 = vmatprep.mubr.f32.mxu1 %v20189_v34 }
0x1174   :  { %9544 = vmatprep.subr.mxu1 %v18147_v12 }
0x1175   :  { %9545 = vmatpush1.msra.mxu1 %v18153_v59 }
0x1176   :  { %9546 = vmatprep.subr.mxu1 %v18160_v24 }
0x1177   :  { %9547 = vmatpush1.msra.mxu1 %v18167_v63 }
0x1178   :  { %9548 = vmatprep.subr.mxu1 %v18174_v31 }
0x1179   :  { %9549 = vmatpush1.msra.mxu1 %v18190_v52 }
0x1232   :  { %v9360_v11 = vpop.f32.mrf.mxu1 }
0x1233   :  { %v9366_v58 = vrot.slane %v9360_v11, 6 }
0x1234   :  { %v9362_v40 = vpop.f32.mrf.mxu1 }
0x1235   :  { %v9368_v32 = vadd.f32 %v9366_v58, %v18124_v0  ;;  %v9370_v37 = vrot.slane %v9362_v40, 6 }
0x1237   :  { %v9372_v14 = vadd.f32 %v9370_v37, %v18120_v16  ;;  %v9374_v49 = vrot.slane %v9368_v32, 2 }
0x1239   :  { %v9377_v12 = vrot.slane %v9372_v14, 2 }
0x123b   :  { %v9379_v59 = vsel %vm8817_vm11, %v9374_v49, %v9377_v12 }
0x123c   :  { %13671 = vtanh.f32 %v9379_v59  ;;  %v11762_v63 = vmul.f32 -1.442695, %v9379_v59  ;;  %v9663_v59 = vld [vmem:[%s18696_s12 + $0x28] sm:$0xff] }
0x123e   :  { %13673 = vpow2.f32 %v11762_v63 }
0x1249   :  { %v13672_v24 = vpop.eup %13671 }
0x124a   :  { %9389 = vrot.lane.b32.xlu0 %v13672_v24, %s13804_s7  ;;  %v9662_v24 = vld [vmem:[%s18696_s12 + $0x20] sm:$0xff] }
0x124b   :  { %v13674_v31 = vpop.eup %13673 }
0x124c   :  { %v9383_v52 = vadd.f32 1.0, %v13674_v31 }
0x124e   :  { %13675 = vrcp.f32 %v9383_v52 }
0x125b   :  { %v13676_v62 = vpop.eup %13675 }
0x125c   :  { %v9387_v55 = vmul.f32 %v13676_v62, %v9282_v43 }
0x12bc   :  { %v9390_v46 = vpop.permute.xlu0 %9389 }
0x12bd   :  { %v9392_v22 = vmul.f32 %v13676_v62, %v9390_v46  ;;  %v9660_v46 = vld [vmem:[%s18696_s12 + $0x10] sm:$0xff] }
0x12bf   :  { %9394 = vrot.lane.b32.xlu1 %v9392_v22, %s13806_s29  ;;  %v9659_v22 = vld [vmem:[%s18696_s12 + $0x8] sm:$0xff] }
0x1331   :  { %v9395_v9 = vpop.permute.xlu1 %9394 }
0x1332   :  { %v9397_v38 = vadd.f32 %v9395_v9, %v9387_v55  ;;  %v9658_v55 = vld [vmem:[%s18696_s12] sm:$0xff]  ;;  %v9628_v9 = vrot.slane %v18216_v48, 6 }
0x1333   :  { %v9670_v48 = vld [vmem:[%s18696_s12 + $0x60] sm:$0xff] }
0x1334   :  { %13677 = vtanh.f32 %v9397_v38 }
0x1341   :  { %v13678_v6 = vpop.eup %13677 }
0x1342   :  { %9400 = vrot.lane.b32.xlu0 %v13678_v6, %s13804_s7  ;;  %v9673_v6 = vld [vmem:[%s18696_s12 + $0x78] sm:$0xff] }
0x1343   :  { %9708 = vmatprep.subr.mxu0 %v9673_v6  ;;  %v18428_v6 = vld [vmem:[%s18697_s13 + $0x30] sm:$0xff] }
0x13b4   :  { %v9401_v3 = vpop.permute.xlu0 %9400 }
0x13b5   :  { %v18294_v30 = vmul.f32 %v13676_v62, %v9401_v3  ;;  %v9661_v62 = vld [vmem:[%s18696_s12 + $0x18] sm:$0xff]  ;;  %v9672_v3 = vld [vmem:[%s18696_s12 + $0x70] sm:$0xff] }
0x13b7   :  { %9405 = vrot.lane.b32.xlu1 %v18294_v30, %s13806_s29 }
0x1429   :  { %v9406_v45 = vpop.permute.xlu1 %9405 }
0x142a   :  { %11763 = vmatmul.mubr.msk.f32.vlgmr.msra.gmra.mxu0 %vm8631_vm10, %v9406_v45  ;;  %v9671_v45 = vld [vmem:[%s18696_s12 + $0x68] sm:$0xff] }
0x142b   :  { %9748 = vmatprep.mubr.f32.mxu0 %v20189_v34  ;;  %9709 = vmatpush1.msra.mxu0 %v9672_v3  ;;  %v18433_v3 = vld [vmem:[%s18697_s13 + $0x28] sm:$0xff] }
0x142c   :  { %9710 = vmatprep.subr.mxu0 %v9671_v45  ;;  %v18439_v45 = vld [vmem:[%s18697_s13 + $0x20] sm:$0xff] }
0x142d   :  { %9711 = vmatpush1.msra.mxu0 %v9670_v48  ;;  %v18460_v48 = vld [vmem:[%s18697_s13 + $0x8] sm:$0xff] }
0x14ea   :  { %v9475_v23 = vpop.f32.mrf.mxu0 }
0x14eb   :  { %v9481_v25 = vrot.slane %v9475_v23, 4 }
0x14ec   :  { %v9477_v50 = vpop.f32.mrf.mxu0 }
0x14ed   :  { %v9483_v33 = vadd.f32 %v9481_v25, %v18124_v0  ;;  %v9484_v47 = vadd.f32 %v9477_v50, %v18120_v16  ;;  %v9632_v25 = vrot.slane %v18256_v10, 2  ;;  %v9669_v50 = vld [vmem:[%s18696_s12 + $0x58] sm:$0xff]  ;;  %v9668_v10 = vld [vmem:[%s18696_s12 + $0x50] sm:$0xff] }
0x14ee   :  { %9712 = vmatprep.subr.mxu0 %v9669_v50  ;;  %v18467_v50 = vld [vmem:[%s18697_s13] sm:$0xff] }
0x14ef   :  { %v9486_v19 = vrot.slane %v9483_v33, 4  ;;  %v9641_v33 = vsel %vm8817_vm11, %v18196_v8, %v9628_v9  ;;  %9713 = vmatpush1.msra.mxu0 %v9668_v10 }
0x14f1   :  { %v9488_v36 = vsel %vm8817_vm11, %v9486_v19, %v9484_v47 }
0x14f2   :  { %13679 = vtanh.f32 %v9488_v36  ;;  %v11764_v15 = vmul.f32 -1.442695, %v9488_v36  ;;  %v9667_v36 = vld [vmem:[%s18696_s12 + $0x48] sm:$0xff] }
0x14f3   :  { %9714 = vmatprep.subr.mxu0 %v9667_v36 }
0x14f4   :  { %13681 = vpow2.f32 %v11764_v15  ;;  %v9634_v15 = vrot.slane %v18294_v30, 6 }
0x14ff   :  { %v13680_v5 = vpop.eup %13679 }
0x1500   :  { %9498 = vrot.lane.b32.xlu0 %v13680_v5, %s13804_s7  ;;  %v9666_v5 = vld [vmem:[%s18696_s12 + $0x40] sm:$0xff] }
0x1501   :  { %v13682_v53 = vpop.eup %13681  ;;  %9715 = vmatpush1.msra.mxu0 %v9666_v5 }
0x1502   :  { %v9492_v60 = vadd.f32 1.0, %v13682_v53 }
0x1504   :  { %13683 = vrcp.f32 %v9492_v60 }
0x1511   :  { %v13684_v29 = vpop.eup %13683 }
0x1512   :  { %v9496_v44 = vmul.f32 %v13684_v29, %v9397_v38  ;;  %v9630_v38 = vrot.slane %v18236_v35, 4 }
0x1514   :  { %v9642_v19 = vsel %vm20192_vm13, %v9641_v33, %v9630_v38  ;;  %v18423_v38 = vld [vmem:[%s18697_s13 + $0x38] sm:$0xff] }
0x1515   :  { %v9644_v47 = vsel %vm9643_vm12, %v9642_v19, %v9632_v25  ;;  %9923 = vmatprep.subr.mxu0 %v18423_v38 }
0x1572   :  { %v9499_v17 = vpop.permute.xlu0 %9498 }
0x1573   :  { %v9501_v27 = vmul.f32 %v13684_v29, %v9499_v17 }
0x1575   :  { %9503 = vrot.lane.b32.xlu1 %v9501_v27, %s13806_s29  ;;  %v9645_v27 = vsel %vm8817_vm11, %v18275_v28, %v9634_v15 }
0x15e7   :  { %v9504_v2 = vpop.permute.xlu1 %9503 }
0x15e8   :  { %v9506_v1 = vadd.f32 %v9504_v2, %v9496_v44 }
0x15ea   :  { %13685 = vtanh.f32 %v9506_v1 }
0x15f7   :  { %v13686_v42 = vpop.eup %13685 }
0x15f8   :  { %9509 = vrot.lane.b32.xlu0 %v13686_v42, %s13804_s7 }
0x166a   :  { %v9510_v56 = vpop.permute.xlu0 %9509 }
0x166b   :  { %v18306_v13 = vmul.f32 %v13684_v29, %v9510_v56  ;;  %v9655_v56 = vsel %vm8817_vm11, %v9632_v25, %v18236_v35  ;;  %v18453_v25 = vld [vmem:[%s18697_s13 + $0x10] sm:$0xff] }
0x166d   :  { %9514 = vrot.lane.b32.xlu1 %v18306_v13, %s13806_s29  ;;  %v9636_v53 = vrot.slane %v18306_v13, 4 }
0x166f   :  { %v9646_v2 = vsel %vm20193_vm14, %v9645_v27, %v9636_v53 }
0x16df   :  { %v9515_v39 = vpop.permute.xlu1 %9514 }
0x16e0   :  { %11765 = vmatmul.mubr.msk.f32.vlgmr.msra.gmra.mxu1 %vm8631_vm10, %v9515_v39 }
0x16e1   :  { %9835 = vmatprep.mubr.f32.mxu1 %v20189_v34 }
0x17a0   :  { %v9584_v26 = vpop.f32.mrf.mxu1 }
0x17a1   :  { %v9590_v21 = vrot.slane %v9584_v26, 2 }
0x17a2   :  { %v9586_v20 = vpop.f32.mrf.mxu1 }
0x17a3   :  { %v9592_v51 = vadd.f32 %v9590_v21, %v18124_v0  ;;  %v9594_v43 = vrot.slane %v9586_v20, 2  ;;  %v9664_v0 = vld [vmem:[%s18696_s12 + $0x30] sm:$0xff] }
0x17a5   :  { %v9596_v18 = vadd.f32 %v9594_v43, %v18120_v16  ;;  %v9598_v61 = vrot.slane %v9592_v51, 6  ;;  %v9665_v16 = vld [vmem:[%s18696_s12 + $0x38] sm:$0xff] }
0x17a6   :  { %9795 = vmatprep.subr.mxu1 %v9665_v16 }
0x17a7   :  { %v9601_v54 = vrot.slane %v9596_v18, 6  ;;  %9796 = vmatpush1.msra.mxu1 %v9664_v0 }
0x17a8   :  { %9797 = vmatprep.subr.mxu1 %v9663_v59 }
0x17a9   :  { %v9603_v11 = vsel %vm8817_vm11, %v9598_v61, %v9601_v54  ;;  %9798 = vmatpush1.msra.mxu1 %v9662_v24  ;;  %v9848_v61 = vld [vmem:[%s18698_s14] sm:$0x3] }
0x17aa   :  { %13687 = vtanh.f32 %v9603_v11  ;;  %v11766_v40 = vmul.f32 -1.442695, %v9603_v11  ;;  %9799 = vmatprep.subr.mxu1 %v9661_v62  ;;  %v9857_v54 = vrot.slane %v9848_v61, %v8718_v41 }
0x17ab   :  { %9800 = vmatpush1.msra.mxu1 %v9660_v46 }
0x17ac   :  { %13689 = vpow2.f32 %v11766_v40  ;;  %9801 = vmatprep.subr.mxu1 %v9659_v22 }
0x17ad   :  { %9802 = vmatpush1.msra.mxu1 %v9658_v55 }
0x17ae   :  { %10042 = vmatprep.subr.mxu1 %v18423_v38 }
0x17b7   :  { %v13688_v58 = vpop.eup %13687 }
0x17b8   :  { %9613 = vrot.lane.b32.xlu0 %v13688_v58, %s13804_s7 }
0x17b9   :  { %v13690_v32 = vpop.eup %13689 }
0x17ba   :  { %v9607_v37 = vadd.f32 1.0, %v13690_v32 }
0x17bc   :  { %13691 = vrcp.f32 %v9607_v37  ;;  %v9853_v37 = vrot.slane %v9848_v61, %v8714_v7 }
0x17c9   :  { %v13692_v14 = vpop.eup %13691 }
0x17ca   :  { %v9611_v63 = vmul.f32 %v13692_v14, %v9506_v1  ;;  %v9648_v1 = vrot.slane %v18275_v28, 4  ;;  %v9656_v28 = vsel %vm20195_vm1, %v9655_v56, %v9628_v9 }
0x182a   :  { %v9614_v49 = vpop.permute.xlu0 %9613 }
0x182b   :  { %v9616_v12 = vmul.f32 %v13692_v14, %v9614_v49 }
0x182d   :  { %9618 = vrot.lane.b32.xlu1 %v9616_v12, %s13806_s29 }
0x189f   :  { %v9619_v31 = vpop.permute.xlu1 %9618 }
0x18a0   :  { %v9621_v52 = vadd.f32 %v9619_v31, %v9611_v63 }
0x18a2   :  { %13693 = vtanh.f32 %v9621_v52 }
0x18af   :  { %v13694_v23 = vpop.eup %13693 }
0x18b0   :  { %9624 = vrot.lane.b32.xlu0 %v13694_v23, %s13804_s7  ;;  %v18446_v23 = vld [vmem:[%s18697_s13 + $0x18] sm:$0xff] }
0x18b4   :  { %9763 = vrot.lane.b32.xlu0 %v9644_v47, %s13806_s29 }
0x1922   :  { %v9625_v60 = vpop.permute.xlu0 %9624 }
0x1923   :  { %v9627_v29 = vmul.f32 %v13692_v14, %v9625_v60 }
0x1925   :  { %v9639_v17 = vrot.slane %v9627_v29, 2 }
0x1926   :  { %v9764_v44 = vpop.permute.xlu0 %9763 }
0x1927   :  { %v9652_v42 = vsel %vm8817_vm11, %v9639_v17, %v18306_v13  ;;  %11769 = vmatmul.mubr.msk.f32.vlgmr.msra.gmra.mxu1 %vm8631_vm10, %v9764_v44  ;;  %v9647_v30 = vsel %vm9643_vm12, %v9646_v2, %v9639_v17  ;;  %v9650_v13 = vrot.slane %v18196_v8, 4 }
0x1928   :  { %9765 = vrot.lane.b32.xlu0 %v9647_v30, %s13806_s29  ;;  %v9653_v39 = vsel %vm20194_vm15, %v9652_v42, %v9634_v15  ;;  %9841 = vmatprep.mubr.f32.mxu1 %v20189_v34 }
0x1929   :  { %v9654_v26 = vsel %vm9643_vm12, %v9653_v39, %v9648_v1  ;;  %v9657_v21 = vsel %vm9643_vm12, %v9656_v28, %v9650_v13  ;;  %10043 = vmatpush1.msra.mxu1 %v18428_v6 }
0x192a   :  { %9676 = vrot.lane.b32.xlu1 %v9654_v26, %s13806_s29  ;;  %10044 = vmatprep.subr.mxu1 %v18433_v3 }
0x192b   :  { %10045 = vmatpush1.msra.mxu1 %v18439_v45 }
0x192c   :  { %10046 = vmatprep.subr.mxu1 %v18446_v23 }
0x192d   :  { %10047 = vmatpush1.msra.mxu1 %v18453_v25 }
0x192e   :  { %9678 = vrot.lane.b32.xlu1 %v9657_v21, %s13806_s29  ;;  %10048 = vmatprep.subr.mxu1 %v18460_v48 }
0x192f   :  { %10049 = vmatpush1.msra.mxu1 %v18467_v50 }
0x1930   :  { %10266 = vmatprep.subr.mxu1 %v18423_v38 }
0x199a   :  { %v9766_v20 = vpop.permute.xlu0 %9765 }
0x199b   :  { %11770 = vmatmul.mubr.msk.f32.gmra.mxu1 %vm8631_vm10, %v9766_v20 }
0x199c   :  { %v9677_v35 = vpop.permute.xlu1 %9676  ;;  %10082 = vmatprep.mubr.f32.mxu1 %v20189_v34 }
0x199d   :  { %11767 = vmatmul.mubr.msk.f32.vlgmr.msra.gmra.mxu0 %vm8631_vm10, %v9677_v35 }
0x199e   :  { %9754 = vmatprep.mubr.f32.mxu0 %v20189_v34  ;;  %9924 = vmatpush1.msra.mxu0 %v18428_v6 }
0x199f   :  { %9925 = vmatprep.subr.mxu0 %v18433_v3 }
0x19a0   :  { %v9679_v51 = vpop.permute.xlu1 %9678  ;;  %9926 = vmatpush1.msra.mxu0 %v18439_v45 }
0x19a1   :  { %11768 = vmatmul.mubr.msk.f32.gmra.mxu0 %vm8631_vm10, %v9679_v51  ;;  %9927 = vmatprep.subr.mxu0 %v18446_v23 }
0x19a2   :  { %9963 = vmatprep.mubr.f32.mxu0 %v20189_v34  ;;  %9928 = vmatpush1.msra.mxu0 %v18453_v25 }
0x19a3   :  { %9929 = vmatprep.subr.mxu0 %v18460_v48 }
0x19a4   :  { %9930 = vmatpush1.msra.mxu0 %v18467_v50 }
0x19a5   :  { %10151 = vmatprep.subr.mxu0 %v18423_v38 }
0x19e7   :  { %v9837_v8 = vpop.f32.mrf.mxu1 }
0x19e9   :  { %v9839_v43 = vpop.f32.mrf.mxu1 }
0x1a5b   :  { %v9843_v11 = vpop.f32.mrf.mxu1 }
0x1a5d   :  { %v9750_v18 = vpop.f32.mrf.mxu0  ;;  %v9845_v12 = vpop.f32.mrf.mxu1 }
0x1a5e   :  { %v9838_v0 = vadd.f32 %v9837_v8, %v9750_v18 }
0x1a5f   :  { %v9752_v58 = vpop.f32.mrf.mxu0 }
0x1a60   :  { %v9840_v40 = vadd.f32 %v9839_v43, %v9752_v58  ;;  %v18414_v31 = vadd.f32 %v9853_v37, %v9838_v0 }
0x1a61   :  { %v9756_v32 = vpop.f32.mrf.mxu0 }
0x1a62   :  { %v18408_v14 = vadd.f32 %v9857_v54, %v9840_v40  ;;  %v9844_v49 = vadd.f32 %v9843_v11, %v9756_v32 }
0x1a63   :  { %v9758_v16 = vpop.f32.mrf.mxu0 }
0x1a64   :  { %v18410_v59 = vadd.f32 %v9853_v37, %v9844_v49  ;;  %v9846_v24 = vadd.f32 %v9845_v12, %v9758_v16 }
0x1a66   :  { %v18412_v63 = vadd.f32 %v9857_v54, %v9846_v24 }
0x1a68   :  { %v9873_v41 = vrot.slane %v18412_v63, 4 }
0x1a6a   :  { %v9875_v52 = vsel %vm8817_vm11, %v18414_v31, %v9873_v41 }
0x1a6b   :  { %13695 = vtanh.f32 %v9875_v52  ;;  %v11771_v7 = vmul.f32 -1.442695, %v9875_v52 }
0x1a6d   :  { %13697 = vpow2.f32 %v11771_v7 }
0x1a78   :  { %v13696_v4 = vpop.eup %13695 }
0x1a79   :  { %9884 = vrot.lane.b32.xlu1 %v13696_v4, %s13804_s7 }
0x1a7a   :  { %v13698_v62 = vpop.eup %13697 }
0x1a7b   :  { %v9879_v46 = vadd.f32 1.0, %v13698_v62 }
0x1a7d   :  { %13699 = vrcp.f32 %v9879_v46 }
0x1a8a   :  { %v13700_v22 = vpop.eup %13699 }
0x1aeb   :  { %v9885_v55 = vpop.permute.xlu1 %9884 }
0x1aec   :  { %v9887_v9 = vmul.f32 %v13700_v22, %v9885_v55 }
0x1aee   :  { %13701 = vtanh.f32 %v9887_v9 }
0x1afb   :  { %v13702_v33 = vpop.eup %13701 }
0x1afc   :  { %9890 = vrot.lane.b32.xlu0 %v13702_v33, %s13805_s28 }
0x1b6e   :  { %v9891_v10 = vpop.permute.xlu0 %9890 }
0x1b6f   :  { %v9893_v19 = vmul.f32 %v13700_v22, %v9891_v10 }
0x1b71   :  { %9895 = vrot.lane.b32.xlu1 %v9893_v19, %s13806_s29 }
0x1b75   :  { %9993 = vrot.lane.b32.xlu1 %v9887_v9, %s13806_s29 }
0x1be3   :  { %v9896_v47 = vpop.permute.xlu1 %9895 }
0x1be4   :  { %11772 = vmatmul.mubr.msk.f32.vlgmr.msra.gmra.mxu0 %vm8631_vm10, %v9896_v47 }
0x1be5   :  { %10152 = vmatpush1.msra.mxu0 %v18428_v6  ;;  %10191 = vmatprep.mubr.f32.mxu0 %v20189_v34 }
0x1be6   :  { %10153 = vmatprep.subr.mxu0 %v18433_v3 }
0x1be7   :  { %10154 = vmatpush1.msra.mxu0 %v18439_v45  ;;  %v9994_v28 = vpop.permute.xlu1 %9993 }
0x1be8   :  { %10155 = vmatprep.subr.mxu0 %v18446_v23 }
0x1be9   :  { %10156 = vmatpush1.msra.mxu0 %v18453_v25 }
0x1bea   :  { %10157 = vmatprep.subr.mxu0 %v18460_v48 }
0x1beb   :  { %10158 = vmatpush1.msra.mxu0 %v18467_v50 }
0x1bec   :  { %10375 = vmatprep.subr.mxu0 %v18423_v38 }
0x1ca4   :  { %v9965_v36 = vpop.f32.mrf.mxu0 }
0x1ca5   :  { %v9971_v5 = vrot.slane %v9965_v36, 6 }
0x1ca6   :  { %v9967_v15 = vpop.f32.mrf.mxu0 }
0x1ca7   :  { %v9973_v53 = vadd.f32 %v9971_v5, %v18414_v31  ;;  %v9975_v60 = vrot.slane %v9967_v15, 6 }
0x1ca9   :  { %v9977_v29 = vadd.f32 %v9975_v60, %v18412_v63  ;;  %v9979_v17 = vrot.slane %v9973_v53, 2 }
0x1cab   :  { %v9982_v27 = vrot.slane %v9977_v29, 2 }
0x1cad   :  { %v9984_v44 = vsel %vm8817_vm11, %v9979_v17, %v9982_v27 }
0x1cae   :  { %13703 = vtanh.f32 %v9984_v44  ;;  %v11773_v1 = vmul.f32 -1.442695, %v9984_v44 }
0x1cb0   :  { %13705 = vpow2.f32 %v11773_v1 }
0x1cbb   :  { %v13704_v2 = vpop.eup %13703 }
0x1cbc   :  { %9998 = vrot.lane.b32.xlu0 %v13704_v2, %s13804_s7 }
0x1cbd   :  { %v13706_v42 = vpop.eup %13705 }
0x1cbe   :  { %v9988_v30 = vadd.f32 1.0, %v13706_v42 }
0x1cc0   :  { %13707 = vrcp.f32 %v9988_v30 }
0x1ccd   :  { %v13708_v56 = vpop.eup %13707 }
0x1cce   :  { %v9996_v13 = vmul.f32 %v13708_v56, %v9994_v28 }
0x1d2e   :  { %v9999_v39 = vpop.permute.xlu0 %9998 }
0x1d2f   :  { %v10001_v26 = vmul.f32 %v13708_v56, %v9999_v39 }
0x1d31   :  { %10003 = vrot.lane.b32.xlu0 %v10001_v26, %s13806_s29 }
0x1da3   :  { %v10004_v21 = vpop.permute.xlu0 %10003 }
0x1da4   :  { %v10006_v20 = vadd.f32 %v10004_v21, %v9996_v13 }
0x1da6   :  { %13709 = vtanh.f32 %v10006_v20 }
0x1db3   :  { %v13710_v35 = vpop.eup %13709 }
0x1db4   :  { %10009 = vrot.lane.b32.xlu1 %v13710_v35, %s13804_s7 }
0x1e26   :  { %v10010_v51 = vpop.permute.xlu1 %10009 }
0x1e27   :  { %v10012_v8 = vmul.f32 %v13708_v56, %v10010_v51 }
0x1e29   :  { %10014 = vrot.lane.b32.xlu0 %v10012_v8, %s13806_s29 }
0x1e9b   :  { %v10015_v43 = vpop.permute.xlu0 %10014 }
0x1e9c   :  { %11774 = vmatmul.mubr.msk.f32.vlgmr.msra.gmra.mxu1 %vm8631_vm10, %v10015_v43 }
0x1e9d   :  { %10267 = vmatpush1.msra.mxu1 %v18428_v6  ;;  %10306 = vmatprep.mubr.f32.mxu1 %v20189_v34 }
0x1e9e   :  { %10268 = vmatprep.subr.mxu1 %v18433_v3 }
0x1e9f   :  { %10269 = vmatpush1.msra.mxu1 %v18439_v45 }
0x1ea0   :  { %10270 = vmatprep.subr.mxu1 %v18446_v23 }
0x1ea1   :  { %10271 = vmatpush1.msra.mxu1 %v18453_v25 }
0x1ea2   :  { %10272 = vmatprep.subr.mxu1 %v18460_v48 }
0x1ea3   :  { %10273 = vmatpush1.msra.mxu1 %v18467_v50 }
0x1ea4   :  { %10490 = vmatprep.subr.mxu1 %v18423_v38 }
0x1f5c   :  { %v10084_v18 = vpop.f32.mrf.mxu1 }
0x1f5d   :  { %v10090_v61 = vrot.slane %v10084_v18, 4 }
0x1f5e   :  { %v10086_v54 = vpop.f32.mrf.mxu1 }
0x1f5f   :  { %v10092_v11 = vadd.f32 %v10090_v61, %v18414_v31  ;;  %v10093_v40 = vadd.f32 %v10086_v54, %v18412_v63 }
0x1f61   :  { %v10095_v58 = vrot.slane %v10092_v11, 4 }
0x1f63   :  { %v10097_v32 = vsel %vm8817_vm11, %v10095_v58, %v10093_v40 }
0x1f64   :  { %13711 = vtanh.f32 %v10097_v32  ;;  %v11775_v49 = vmul.f32 -1.442695, %v10097_v32 }
0x1f66   :  { %13713 = vpow2.f32 %v11775_v49 }
0x1f71   :  { %v13712_v37 = vpop.eup %13711 }
0x1f72   :  { %10107 = vrot.lane.b32.xlu1 %v13712_v37, %s13804_s7 }
0x1f73   :  { %v13714_v12 = vpop.eup %13713 }
0x1f74   :  { %v10101_v16 = vadd.f32 1.0, %v13714_v12 }
0x1f76   :  { %13715 = vrcp.f32 %v10101_v16 }
0x1f83   :  { %v13716_v0 = vpop.eup %13715 }
0x1f84   :  { %v10105_v52 = vmul.f32 %v13716_v0, %v10006_v20 }
0x1fe4   :  { %v10108_v24 = vpop.permute.xlu1 %10107 }
0x1fe5   :  { %v10110_v41 = vmul.f32 %v13716_v0, %v10108_v24 }
0x1fe7   :  { %10112 = vrot.lane.b32.xlu0 %v10110_v41, %s13806_s29 }
0x2059   :  { %v10113_v4 = vpop.permute.xlu0 %10112 }
0x205a   :  { %v10115_v7 = vadd.f32 %v10113_v4, %v10105_v52 }
0x205c   :  { %13717 = vtanh.f32 %v10115_v7 }
0x2069   :  { %v13718_v62 = vpop.eup %13717 }
0x206a   :  { %10118 = vrot.lane.b32.xlu1 %v13718_v62, %s13804_s7 }
0x20dc   :  { %v10119_v46 = vpop.permute.xlu1 %10118 }
0x20dd   :  { %v10121_v22 = vmul.f32 %v13716_v0, %v10119_v46 }
0x20df   :  { %10123 = vrot.lane.b32.xlu0 %v10121_v22, %s13806_s29 }
0x2151   :  { %v10124_v55 = vpop.permute.xlu0 %10123 }
0x2152   :  { %11776 = vmatmul.mubr.msk.f32.vlgmr.msra.gmra.mxu0 %vm8631_vm10, %v10124_v55 }
0x2153   :  { %10376 = vmatpush1.msra.mxu0 %v18428_v6  ;;  %10415 = vmatprep.mubr.f32.mxu0 %v20189_v34 }
0x2154   :  { %10377 = vmatprep.subr.mxu0 %v18433_v3 }
0x2155   :  { %10378 = vmatpush1.msra.mxu0 %v18439_v45 }
0x2156   :  { %10379 = vmatprep.subr.mxu0 %v18446_v23 }
0x2157   :  { %10380 = vmatpush1.msra.mxu0 %v18453_v25 }
0x2158   :  { %10381 = vmatprep.subr.mxu0 %v18460_v48 }
0x2159   :  { %10382 = vmatpush1.msra.mxu0 %v18467_v50 }
0x215a   :  { %10599 = vmatprep.subr.mxu0 %v18423_v38 }
0x2212   :  { %v10193_v9 = vpop.f32.mrf.mxu0 }
0x2213   :  { %v10199_v33 = vrot.slane %v10193_v9, 2 }
0x2214   :  { %v10195_v10 = vpop.f32.mrf.mxu0 }
0x2215   :  { %v10201_v19 = vadd.f32 %v10199_v33, %v18414_v31  ;;  %v10203_v47 = vrot.slane %v10195_v10, 2 }
0x2217   :  { %v10205_v36 = vadd.f32 %v10203_v47, %v18412_v63  ;;  %v10207_v5 = vrot.slane %v10201_v19, 6 }
0x2219   :  { %v10210_v15 = vrot.slane %v10205_v36, 6 }
0x221b   :  { %v10212_v53 = vsel %vm8817_vm11, %v10207_v5, %v10210_v15 }
0x221c   :  { %13719 = vtanh.f32 %v10212_v53  ;;  %v11777_v29 = vmul.f32 -1.442695, %v10212_v53 }
0x221e   :  { %13721 = vpow2.f32 %v11777_v29 }
0x2229   :  { %v13720_v60 = vpop.eup %13719 }
0x222a   :  { %10222 = vrot.lane.b32.xlu1 %v13720_v60, %s13804_s7 }
0x222b   :  { %v13722_v17 = vpop.eup %13721 }
0x222c   :  { %v10216_v38 = vadd.f32 1.0, %v13722_v17 }
0x222e   :  { %13723 = vrcp.f32 %v10216_v38 }
0x223b   :  { %v13724_v27 = vpop.eup %13723 }
0x223c   :  { %v10220_v31 = vmul.f32 %v13724_v27, %v10115_v7 }
0x229c   :  { %v10223_v44 = vpop.permute.xlu1 %10222 }
0x229d   :  { %v10225_v2 = vmul.f32 %v13724_v27, %v10223_v44 }
0x229f   :  { %10227 = vrot.lane.b32.xlu0 %v10225_v2, %s13806_s29 }
0x2311   :  { %v10228_v63 = vpop.permute.xlu0 %10227 }
0x2312   :  { %v10230_v1 = vadd.f32 %v10228_v63, %v10220_v31 }
0x2314   :  { %13725 = vtanh.f32 %v10230_v1 }
0x2321   :  { %v13726_v42 = vpop.eup %13725 }
0x2322   :  { %10233 = vrot.lane.b32.xlu1 %v13726_v42, %s13804_s7 }
0x2394   :  { %v10234_v30 = vpop.permute.xlu1 %10233 }
0x2395   :  { %v10236_v56 = vmul.f32 %v13724_v27, %v10234_v30 }
0x2397   :  { %10238 = vrot.lane.b32.xlu0 %v10236_v56, %s13806_s29 }
0x2409   :  { %v10239_v39 = vpop.permute.xlu0 %10238 }
0x240a   :  { %11778 = vmatmul.mubr.msk.f32.vlgmr.msra.gmra.mxu1 %vm8631_vm10, %v10239_v39 }
0x240b   :  { %10491 = vmatpush1.msra.mxu1 %v18428_v6  ;;  %10530 = vmatprep.mubr.f32.mxu1 %v20189_v34 }
0x240c   :  { %10492 = vmatprep.subr.mxu1 %v18433_v3 }
0x240d   :  { %10493 = vmatpush1.msra.mxu1 %v18439_v45 }
0x240e   :  { %10494 = vmatprep.subr.mxu1 %v18446_v23 }
0x240f   :  { %10495 = vmatpush1.msra.mxu1 %v18453_v25 }
0x2410   :  { %10496 = vmatprep.subr.mxu1 %v18460_v48 }
0x2411   :  { %10497 = vmatpush1.msra.mxu1 %v18467_v50 }
0x2412   :  { %13572 = vmatprep.subr.mxu1 %v20189_v34 }
0x24ca   :  { %v10308_v26 = vpop.f32.mrf.mxu1 }
0x24cb   :  { %v10313_v20 = vadd.f32 %v10308_v26, %v18410_v59 }
0x24cc   :  { %v10310_v28 = vpop.f32.mrf.mxu1 }
0x24cd   :  { %v10315_v13 = vrot.slane %v10310_v28, 4 }
0x24cf   :  { %v10317_v21 = vadd.f32 %v10315_v13, %v18408_v14 }
0x24d1   :  { %v10319_v35 = vrot.slane %v10317_v21, 4 }
0x24d3   :  { %v10321_v51 = vsel %vm8817_vm11, %v10313_v20, %v10319_v35 }
0x24d4   :  { %13727 = vtanh.f32 %v10321_v51  ;;  %v11779_v43 = vmul.f32 -1.442695, %v10321_v51 }
0x24d6   :  { %13729 = vpow2.f32 %v11779_v43 }
0x24e1   :  { %v13728_v8 = vpop.eup %13727 }
0x24e2   :  { %10331 = vrot.lane.b32.xlu1 %v13728_v8, %s13804_s7 }
0x24e3   :  { %v13730_v18 = vpop.eup %13729 }
0x24e4   :  { %v10325_v61 = vadd.f32 1.0, %v13730_v18 }
0x24e6   :  { %13731 = vrcp.f32 %v10325_v61 }
0x24f3   :  { %v13732_v54 = vpop.eup %13731 }
0x24f4   :  { %v10329_v40 = vmul.f32 %v13732_v54, %v10230_v1 }
0x2554   :  { %v10332_v11 = vpop.permute.xlu1 %10331 }
0x2555   :  { %v10334_v58 = vmul.f32 %v13732_v54, %v10332_v11 }
0x2557   :  { %10336 = vrot.lane.b32.xlu0 %v10334_v58, %s13806_s29 }
0x25c9   :  { %v10337_v32 = vpop.permute.xlu0 %10336 }
0x25ca   :  { %v10339_v37 = vadd.f32 %v10337_v32, %v10329_v40 }
0x25cc   :  { %13733 = vtanh.f32 %v10339_v37 }
0x25d9   :  { %v13734_v49 = vpop.eup %13733 }
0x25da   :  { %10342 = vrot.lane.b32.xlu1 %v13734_v49, %s13804_s7 }
0x264c   :  { %v10343_v12 = vpop.permute.xlu1 %10342 }
0x264d   :  { %v10345_v16 = vmul.f32 %v13732_v54, %v10343_v12 }
0x264f   :  { %10347 = vrot.lane.b32.xlu0 %v10345_v16, %s13806_s29 }
0x26c1   :  { %v10348_v0 = vpop.permute.xlu0 %10347 }
0x26c2   :  { %11780 = vmatmul.mubr.msk.f32.vlgmr.msra.gmra.mxu0 %vm8631_vm10, %v10348_v0 }
0x26c3   :  { %10600 = vmatpush1.msra.mxu0 %v18428_v6  ;;  %10639 = vmatprep.mubr.f32.mxu0 %v20189_v34 }
0x26c4   :  { %10601 = vmatprep.subr.mxu0 %v18433_v3 }
0x26c5   :  { %10602 = vmatpush1.msra.mxu0 %v18439_v45 }
0x26c6   :  { %10603 = vmatprep.subr.mxu0 %v18446_v23 }
0x26c7   :  { %10604 = vmatpush1.msra.mxu0 %v18453_v25 }
0x26c8   :  { %10605 = vmatprep.subr.mxu0 %v18460_v48 }
0x26c9   :  { %10606 = vmatpush1.msra.mxu0 %v18467_v50 }
0x26ca   :  { %13583 = vmatprep.subr.mxu0 %v20189_v34 }
0x2782   :  { %v10417_v24 = vpop.f32.mrf.mxu0 }
0x2783   :  { %v10423_v41 = vrot.slane %v10417_v24, 6 }
0x2784   :  { %v10419_v52 = vpop.f32.mrf.mxu0 }
0x2785   :  { %v10425_v6 = vadd.f32 %v10423_v41, %v18410_v59  ;;  %v10427_v4 = vrot.slane %v10419_v52, 6  ;;  %v10688_v41 = vld [vmem:[%s18699_s15 + $0x18] sm:$0xff]  ;;  %v10687_v52 = vld [vmem:[%s18699_s15 + $0x10] sm:$0xff] }
0x2787   :  { %v10429_v3 = vadd.f32 %v10427_v4, %v18408_v14  ;;  %v10431_v7 = vrot.slane %v10425_v6, 2  ;;  %v10692_v6 = vld [vmem:[%s18699_s15 + $0x38] sm:$0xff]  ;;  %v10691_v4 = vld [vmem:[%s18699_s15 + $0x30] sm:$0xff] }
0x2789   :  { %v10434_v45 = vrot.slane %v10429_v3, 2  ;;  %v10686_v3 = vld [vmem:[%s18699_s15 + $0x8] sm:$0xff] }
0x278b   :  { %v10436_v23 = vsel %vm8817_vm11, %v10431_v7, %v10434_v45  ;;  %v10690_v7 = vld [vmem:[%s18699_s15 + $0x28] sm:$0xff]  ;;  %v10685_v45 = vld [vmem:[%s18699_s15] sm:$0xff] }
0x278c   :  { %13735 = vtanh.f32 %v10436_v23  ;;  %v11781_v48 = vmul.f32 -1.442695, %v10436_v23 }
0x278e   :  { %13737 = vpow2.f32 %v11781_v48 }
0x2799   :  { %v13736_v25 = vpop.eup %13735 }
0x279a   :  { %10446 = vrot.lane.b32.xlu1 %v13736_v25, %s13804_s7  ;;  %v10689_v25 = vld [vmem:[%s18699_s15 + $0x20] sm:$0xff] }
0x279b   :  { %v13738_v50 = vpop.eup %13737 }
0x279c   :  { %v10440_v62 = vadd.f32 1.0, %v13738_v50 }
0x279e   :  { %13739 = vrcp.f32 %v10440_v62 }
0x27ab   :  { %v13740_v46 = vpop.eup %13739 }
0x27ac   :  { %v10444_v9 = vmul.f32 %v13740_v46, %v10339_v37 }
0x280c   :  { %v10447_v22 = vpop.permute.xlu1 %10446 }
0x280d   :  { %v10449_v55 = vmul.f32 %v13740_v46, %v10447_v22  ;;  %v11748_v22 = vld [vmem:[%s18692_s8] ss:$0 sm:$0xff] }
0x280f   :  { %10451 = vrot.lane.b32.xlu0 %v10449_v55, %s13806_s29 }
0x2881   :  { %v10452_v33 = vpop.permute.xlu0 %10451 }
0x2882   :  { %v10454_v10 = vadd.f32 %v10452_v33, %v10444_v9  ;;  %v10854_v9 = vld [vmem:[%s18701_s17 + $0x10] sm:$0xff] }
0x2884   :  { %13741 = vtanh.f32 %v10454_v10 }
0x2891   :  { %v13742_v19 = vpop.eup %13741 }
0x2892   :  { %10457 = vrot.lane.b32.xlu1 %v13742_v19, %s13804_s7  ;;  %v10853_v19 = vld [vmem:[%s18701_s17 + $0x8] sm:$0xff] }
0x2904   :  { %v10458_v47 = vpop.permute.xlu1 %10457 }
0x2905   :  { %v10460_v36 = vmul.f32 %v13740_v46, %v10458_v47  ;;  %v10855_v46 = vld [vmem:[%s18701_s17 + $0x18] sm:$0xff]  ;;  %v10852_v47 = vld [vmem:[%s18701_s17] sm:$0xff] }
0x2907   :  { %10462 = vrot.lane.b32.xlu0 %v10460_v36, %s13806_s29  ;;  %v10859_v36 = vld [vmem:[%s18701_s17 + $0x38] sm:$0xff] }
0x2979   :  { %v10463_v5 = vpop.permute.xlu0 %10462 }
0x297a   :  { %11782 = vmatmul.mubr.msk.f32.vlgmr.msra.gmra.mxu1 %vm8631_vm10, %v10463_v5  ;;  %v10858_v5 = vld [vmem:[%s18701_s17 + $0x30] sm:$0xff] }
0x297b   :  { %13580 = vmatprep.mubr.msk.f32.mxu1 %vm13803_vm9, %v20189_v34  ;;  %13573 = vmatpush3.msra.mxu1 %v10692_v6 }
0x297c   :  { %13574 = vmatprep.subr.mxu1 %v20189_v34 }
0x297d   :  { %13575 = vmatpush3.msra.mxu1 %v10691_v4 }
0x297e   :  { %13576 = vmatprep.subr.mxu1 %v20189_v34 }
0x297f   :  { %13577 = vmatpush3.msra.mxu1 %v10690_v7 }
0x2980   :  { %13578 = vmatprep.subr.mxu1 %v20189_v34 }
0x2981   :  { %13579 = vmatpush3.msra.mxu1 %v10689_v25 }
0x2982   :  { %13594 = vmatprep.subr.mxu1 %v20189_v34 }
0x2a3a   :  { %v10532_v15 = vpop.f32.mrf.mxu1 }
0x2a3b   :  { %v10538_v53 = vrot.slane %v10532_v15, 4  ;;  %v10857_v15 = vld [vmem:[%s18701_s17 + $0x28] sm:$0xff] }
0x2a3c   :  { %v10534_v60 = vpop.f32.mrf.mxu1 }
0x2a3d   :  { %v10540_v29 = vadd.f32 %v10538_v53, %v18410_v59  ;;  %v10541_v38 = vadd.f32 %v10534_v60, %v18408_v14  ;;  %v10856_v53 = vld [vmem:[%s18701_s17 + $0x20] sm:$0xff] }
0x2a3f   :  { %v10543_v17 = vrot.slane %v10540_v29, 4 }
0x2a41   :  { %v10545_v27 = vsel %vm8817_vm11, %v10543_v17, %v10541_v38  ;;  %v11788_v17 = vld [vmem:[%s18700_s16] ss:$0 sm:$0xff] }
0x2a42   :  { %13743 = vtanh.f32 %v10545_v27  ;;  %v11783_v2 = vmul.f32 -1.442695, %v10545_v27 }
0x2a44   :  { %13745 = vpow2.f32 %v11783_v2 }
0x2a4f   :  { %v13744_v44 = vpop.eup %13743 }
0x2a50   :  { %10555 = vrot.lane.b32.xlu1 %v13744_v44, %s13804_s7 }
0x2a51   :  { %v13746_v31 = vpop.eup %13745 }
0x2a52   :  { %v10549_v63 = vadd.f32 1.0, %v13746_v31 }
0x2a54   :  { %13747 = vrcp.f32 %v10549_v63 }
0x2a61   :  { %v13748_v1 = vpop.eup %13747 }
0x2a62   :  { %v10553_v56 = vmul.f32 %v13748_v1, %v10454_v10  ;;  %v8702_v10 = vadd.f32 %v11748_v22, %v18185_v57 }
0x2a64   :  { %v8705_v57 = vmax.f32 %v8702_v10, 0.0 }
0x2ac2   :  { %v10556_v42 = vpop.permute.xlu1 %10555 }
0x2ac3   :  { %v10558_v30 = vmul.f32 %v13748_v1, %v10556_v42  ;;  %v11016_v42 = vld [vmem:[%s18703_s19 + $0x8] sm:$0xff] }
0x2ac5   :  { %10560 = vrot.lane.b32.xlu0 %v10558_v30, %s13806_s29  ;;  %v11015_v30 = vld [vmem:[%s18703_s19] sm:$0xff]  ;;  %s13807_s19 = smov [#allocation3]  }
0x2ac6   :  { %s11105_s25 = sshll.u32 %s13807_s19, 4  ;;  %s11106_s25 = int_to_ptr.vmem [resolvable:$true] %s11105_s25 }
0x2ac7   :  { %s13779_s27 = scalar_lea.vmem %s11106_s25, 32  ;;  %p13784_p1 = scmp.lt.s32.totalorder %s11106_s25, %s11106_s25 }
0x2ac8   :  { %p13780_p0 = scmp.ne.s32.totalorder %s11106_s25, %s13779_s27  ;;  %p13785_p2 = scmp.lt.s32.totalorder %s13779_s27, %s13779_s27 }
0x2aca   :  { %p13786_p3 = por %p13785_p2, %p13784_p1 }
0x2acc   :  { %p13787_p4 = pnand %p13786_p3, %p13780_p0 }
0x2b37   :  { %v10561_v39 = vpop.permute.xlu0 %10560 }
0x2b38   :  { %v10563_v26 = vadd.f32 %v10561_v39, %v10553_v56  ;;  %v11791_v39 = vld [vmem:[%s18702_s18] ss:$0 sm:$0xff] }
0x2b3a   :  { %13749 = vtanh.f32 %v10563_v26 }
0x2b47   :  { %v13750_v28 = vpop.eup %13749 }
0x2b48   :  { %10566 = vrot.lane.b32.xlu1 %v13750_v28, %s13804_s7 }
0x2bba   :  { %v10567_v13 = vpop.permute.xlu1 %10566 }
0x2bbb   :  { %v10569_v21 = vmul.f32 %v13748_v1, %v10567_v13 }
0x2bbd   :  { %10571 = vrot.lane.b32.xlu0 %v10569_v21, %s13806_s29 }
0x2c2f   :  { %v10572_v20 = vpop.permute.xlu0 %10571 }
0x2c30   :  { %11784 = vmatmul.mubr.msk.f32.vlgmr.msra.gmra.mxu0 %vm8631_vm10, %v10572_v20  ;;  %v11792_v20 = vld [vmem:[%s18704_s20] ss:$0 sm:$0xff] }
0x2c31   :  { %13591 = vmatprep.mubr.msk.f32.mxu0 %vm13803_vm9, %v20189_v34  ;;  %13584 = vmatpush3.msra.mxu0 %v10688_v41 }
0x2c32   :  { %13585 = vmatprep.subr.mxu0 %v20189_v34 }
0x2c33   :  { %13586 = vmatpush3.msra.mxu0 %v10687_v52 }
0x2c34   :  { %13587 = vmatprep.subr.mxu0 %v20189_v34 }
0x2c35   :  { %13588 = vmatpush3.msra.mxu0 %v10686_v3 }
0x2c36   :  { %13589 = vmatprep.subr.mxu0 %v20189_v34 }
0x2c37   :  { %13590 = vmatpush3.msra.mxu0 %v10685_v45 }
0x2c38   :  { %13605 = vmatprep.subr.mxu0 %v20189_v34 }
0x2cf0   :  { %v10641_v35 = vpop.f32.mrf.mxu0 }
0x2cf1   :  { %v10647_v51 = vrot.slane %v10641_v35, 2 }
0x2cf2   :  { %v10643_v8 = vpop.f32.mrf.mxu0 }
0x2cf3   :  { %v10649_v43 = vadd.f32 %v10647_v51, %v18410_v59  ;;  %v10651_v18 = vrot.slane %v10643_v8, 2 }
0x2cf5   :  { %v10653_v61 = vadd.f32 %v10651_v18, %v18408_v14  ;;  %v10655_v54 = vrot.slane %v10649_v43, 6 }
0x2cf7   :  { %v10658_v11 = vrot.slane %v10653_v61, 6 }
0x2cf9   :  { %v10660_v58 = vsel %vm8817_vm11, %v10655_v54, %v10658_v11 }
0x2cfa   :  { %13751 = vtanh.f32 %v10660_v58  ;;  %v11785_v32 = vmul.f32 -1.442695, %v10660_v58 }
0x2cfc   :  { %13753 = vpow2.f32 %v11785_v32 }
0x2d07   :  { %v13752_v40 = vpop.eup %13751 }
0x2d08   :  { %10670 = vrot.lane.b32.xlu1 %v13752_v40, %s13804_s7 }
0x2d09   :  { %v13754_v37 = vpop.eup %13753 }
0x2d0a   :  { %v10664_v49 = vadd.f32 1.0, %v13754_v37 }
0x2d0c   :  { %13755 = vrcp.f32 %v10664_v49 }
0x2d19   :  { %v13756_v12 = vpop.eup %13755 }
0x2d1a   :  { %v10668_v59 = vmul.f32 %v13756_v12, %v10563_v26 }
0x2d7a   :  { %v10671_v16 = vpop.permute.xlu1 %10670 }
0x2d7b   :  { %v10673_v0 = vmul.f32 %v13756_v12, %v10671_v16 }
0x2d7d   :  { %10675 = vrot.lane.b32.xlu0 %v10673_v0, %s13806_s29 }
0x2def   :  { %v10676_v14 = vpop.permute.xlu0 %10675 }
0x2df0   :  { %v10678_v24 = vadd.f32 %v10676_v14, %v10668_v59 }
0x2df2   :  { %13757 = vtanh.f32 %v10678_v24 }
0x2dff   :  { %v13758_v23 = vpop.eup %13757 }
0x2e00   :  { %10681 = vrot.lane.b32.xlu1 %v13758_v23, %s13804_s7 }
0x2e72   :  { %v10682_v48 = vpop.permute.xlu1 %10681 }
0x2e73   :  { %v10684_v50 = vmul.f32 %v13756_v12, %v10682_v48 }
0x2e75   :  { %v10694_v62 = vrot.slane %v10684_v50, 2  ;;  %10769 = vrot.lane.b32.xlu1 %v10684_v50, %s13806_s29 }
0x2e77   :  { %10695 = vrot.lane.b32.xlu0 %v10694_v62, %s13806_s29 }
0x2ee7   :  { %v10770_v55 = vpop.permute.xlu1 %10769 }
0x2ee8   :  { %13592 = vmatmul.mubr.msk.f32.vlgmr.msra.gmra.mxu0 %vm8631_vm10, %v10770_v55 }
0x2ee9   :  { %13606 = vmatpush3.msra.mxu0 %v10855_v46  ;;  %v10696_v33 = vpop.permute.xlu0 %10695  ;;  %13613 = vmatprep.mubr.msk.f32.mxu0 %vm13803_vm9, %v20189_v34 }
0x2eea   :  { %13607 = vmatprep.subr.mxu0 %v20189_v34  ;;  %13581 = vmatmul.mubr.msk.f32.vlgmr.msra.gmra.mxu1 %vm8631_vm10, %v10696_v33 }
0x2eeb   :  { %13608 = vmatpush3.msra.mxu0 %v10854_v9  ;;  %13602 = vmatprep.mubr.msk.f32.mxu1 %vm13803_vm9, %v20189_v34 }
0x2eec   :  { %13609 = vmatprep.subr.mxu0 %v20189_v34  ;;  %13595 = vmatpush3.msra.mxu1 %v10859_v36 }
0x2eed   :  { %13610 = vmatpush3.msra.mxu0 %v10853_v19  ;;  %13596 = vmatprep.subr.mxu1 %v20189_v34 }
0x2eee   :  { %13611 = vmatprep.subr.mxu0 %v20189_v34  ;;  %13597 = vmatpush3.msra.mxu1 %v10858_v5 }
0x2eef   :  { %13612 = vmatpush3.msra.mxu0 %v10852_v47  ;;  %13598 = vmatprep.subr.mxu1 %v20189_v34 }
0x2ef0   :  { %13614 = vmatmul.mubr.msk.f32.vlgmr.msra.gmra.mxu0 %vm8631_vm10, %v8705_v57  ;;  %13599 = vmatpush3.msra.mxu1 %v10857_v15 }
0x2ef1   :  { %13600 = vmatprep.subr.mxu1 %v20189_v34 }
0x2ef2   :  { %13601 = vmatpush3.msra.mxu1 %v10856_v53 }
0x2ef3   :  { %13616 = vmatprep.subr.mxu1 %v20189_v34 }
0x2fa8   :  { %v10839_v60 = vpop.f32.mrf.mxu0 }
0x2faa   :  { %v10765_v29 = vpop.f32.mrf.mxu1  ;;  %v13593_v38 = vpop.f32.mrf.mxu0 }
0x2fab   :  { %v10840_v27 = vadd.f32 %v10839_v60, %v10765_v29 }
0x2fac   :  { %v13582_v44 = vpop.f32.mrf.mxu1 }
0x2fad   :  { %v10850_v2 = vadd.f32 %v11788_v17, %v10840_v27 }
0x2faf   :  { %v10851_v31 = vmax.f32 %v10850_v2, 0.0 }
0x2fb0   :  { %v11002_v63 = vpop.f32.mrf.mxu0 }
0x2fb1   :  { %13603 = vmatmul.mubr.msk.f32.vlgmr.msra.gmra.mxu1 %vm8631_vm10, %v10851_v31 }
0x2fb2   :  { %v13615_v1 = vpop.f32.mrf.mxu0  ;;  %13620 = vmatprep.mubr.msk.f32.mxu1 %vm13803_vm9, %v20189_v34  ;;  %13617 = vmatpush3.msra.mxu1 %v11016_v42 }
0x2fb3   :  { %13618 = vmatprep.subr.mxu1 %v20189_v34 }
0x2fb4   :  { %13619 = vmatpush3.msra.mxu1 %v11015_v30 }
0x3071   :  { %v10929_v56 = vpop.f32.mrf.mxu1 }
0x3072   :  { %v11003_v26 = vadd.f32 %v11002_v63, %v10929_v56 }
0x3073   :  { %v13604_v28 = vpop.f32.mrf.mxu1 }
0x3074   :  { %v11013_v13 = vadd.f32 %v11791_v39, %v11003_v26 }
0x3076   :  { %v11014_v21 = vmax.f32 %v11013_v13, 0.0 }
0x3078   :  { %13621 = vmatmul.mubr.msk.f32.vlgmr.msra.gmra.mxu1 %vm791_vm2, %v11014_v21 }
0x3138   :  { %v11093_v35 = vpop.f32.mrf.mxu1 }
0x3139   :  { %v11094_v34 = vadd.f32 %v11792_v20, %v11093_v35 }
0x313a   :  { %v13622_v51 = vpop.f32.mrf.mxu1 }
0x313b   :  { %11098 = vst.msk [vmem:[#allocation3] sm:$0x3] %vm11097_vm0, %v11094_v34 }
0x313c   :  { %13790 = shalt.err (!%p13787_p4)
}
0x313d   :  { %11108 = dma.vmem_to_hbm [thread:$0]  %s11106_s25, 32, %s18705_s21, [#allocation4]  }
0x313e   :  { %13799 = dma.done.wait [#allocation4], 32  }
0x313f   :  { %13800 = vsyncadd [#allocation4], 4294967264 }
0x3140   :  { %11112 = vsyncpa [#allocation4], 1 }

</bundles_post_ra>
